<compile_context>
chip_gen: v7x
topology: tpu7x:2x2x1
jax: 0.10.0
libtpu: 0.0.40
codegen_flags: <defaults>
</compile_context>

<pallas_src>
import functools

import jax
import jax.numpy as jnp
from jax.experimental import pallas as pl
from jax.experimental.pallas import tpu as pltpu


# ---------------------------------------------------------------------------
# Generation-aware VMEM budgets (v5e/v6e: 128 MiB physical, v7x: 64 MiB)
# ---------------------------------------------------------------------------
def _vmem_capacity_bytes():
    try:
        cap = int(getattr(pltpu.get_tpu_info(), "vmem_capacity_bytes", 0))
        if 16 * 2**20 <= cap <= 1024 * 2**20:
            return cap
    except Exception:
        pass
    return 64 * 2**20          # conservative fallback (v7x per-TensorCore)


_VMEM_CAP = _vmem_capacity_bytes()
# Scoped VMEM limit handed to every pallas_call: ~75% of physical, capped.
_VMEM_LIMIT = max(32 * 2**20, min(_VMEM_CAP * 3 // 4, 96 * 2**20))
# Budget for all double-buffered blocks of one kernel when picking tiles.
_BLOCK_BUDGET = _VMEM_LIMIT * 2 // 3
# Budget for one (2, 2, K, TN) bf16 weight block (grid-invariant per cout tile
# after the grid reorder; 8 MiB on v5e/v6e, 4 MiB on v7x).
_WEIGHT_BUDGET = min(_VMEM_CAP // 16, 8 * 2**20)


# ---------------------------------------------------------------------------
# Pallas kernel: (TB batch x TR output rows) x one Cout tile per grid step
# ---------------------------------------------------------------------------
def _conv_tile_kernel(a_ref, h_ref, w_ref, b_ref, o_ref, *, apply_relu):
    """
    a_ref: (TB, TR, Ws, K)   s2d rows [i*TR, (i+1)*TR)          (bf16)
    h_ref: (TB, 1,  Ws, K)   s2d halo row (i+1)*TR              (bf16)
    w_ref: (2, 2, K, TN)     tap-group weights                  (bf16)
    b_ref: (1, TN)           bias                               (f32)
    o_ref: (TB, TR, Wo, TN)  output rows                        (bf16 / f32)
    """
    tb, tr, wo, tn = o_ref.shape
    k = a_ref.shape[3]
    # Tile rows + one halo row: (TB, TR+1, Ws, K).  One VMEM copy, amortised
    # over TR output rows (replaces the old 2x re-fetch of every s2d row).
    rows = jnp.concatenate([a_ref[...], h_ref[...]], axis=1)
    m = tb * tr * wo
    acc = jnp.zeros((m, tn), jnp.float32)
    for di in (0, 1):
        for dj in (0, 1):
            lhs = rows[:, di:di + tr, dj:dj + wo, :].reshape(m, k)
            acc = acc + jnp.dot(lhs, w_ref[di, dj],
                                preferred_element_type=jnp.float32)
    acc = acc + b_ref[...]                       # (1, TN) broadcast, f32
    if apply_relu:
        acc = jnp.maximum(acc, 0.2 * acc)        # LeakyReLU(0.2): mul + max
    o_ref[...] = acc.reshape(tb, tr, wo, tn).astype(o_ref.dtype)


# ---------------------------------------------------------------------------
# Tile selection
# ---------------------------------------------------------------------------
def _pick_cout_tile(cout, k):
    # Prefer the full Cout when the whole (2,2,K,Cout) bf16 weight block fits
    # the budget (then n_ct == 1: the s2d input is streamed from HBM exactly
    # once and the weight block index is grid-invariant).
    if 4 * k * cout * 2 <= _WEIGHT_BUDGET:
        return cout
    for t in (512, 256, 128):
        if cout % t == 0 and 4 * k * t * 2 <= _WEIGHT_BUDGET:
            return t
    return 128 if cout % 128 == 0 else cout


def _divisors(x):
    return [d for d in range(1, x + 1) if x % d == 0]


def _pick_spatial_tiles(n, ho, wo, k, tn, out_itemsize, target_m=256):
    """Pick (TB, TR) so M = TB*TR*Wo is MXU-native-ish, under the VMEM budget."""
    ws = wo + 1

    def fits(tb, tr):
        a_blk = tb * tr * ws * k * 2
        halo = tb * ws * k * 2
        o_blk = tb * tr * wo * tn * out_itemsize
        w_blk = 4 * k * tn * 2 + tn * 4
        return 2 * (a_blk + halo + o_blk + w_blk) <= _BLOCK_BUDGET

    tr = 1
    for d in _divisors(ho):
        if d * wo <= target_m and fits(1, d):
            tr = d
    tb = 1
    if tr == ho:   # whole image per step: amortise the tail layers over batch
        for d in _divisors(n):
            if d * tr * wo <= target_m and fits(d, tr):
                tb = d
    return tb, tr


# ---------------------------------------------------------------------------
# Conv2d(kernel=4, stride=2, padding=1) on a space-to-depth view
# ---------------------------------------------------------------------------
def _conv4s2p1(x_nhwc, w2, bias, *, apply_relu, out_dtype):
    n, h, w, cin = x_nhwc.shape
    if h % 2 or w % 2:
        # TODO(synk): odd H/W (e.g. 321x321 seg maps) would need an extra
        # asymmetric pad before the space-to-depth relayout; the test inputs
        # are /32 like the module expects for 5 stride-2 convs.
        raise ValueError("spatial dims must be even")
    cout = w2.shape[-1]
    ho, wo = h // 2, w // 2
    hs, ws = ho + 1, wo + 1
    k = 4 * cin

    # pad=1 + space-to-depth: one ~1x relayout, replaces the 4x im2col blow-up.
    # TODO(synk): on v5e this extra activation round trip could be removed by
    # writing layer i's output directly in layer i+1's (hs, ws, 4*Cin) layout.
    xp = jnp.pad(x_nhwc, ((0, 0), (1, 1), (1, 1), (0, 0)))
    xs = xp.reshape(n, hs, 2, ws, 2, cin).transpose(0, 1, 3, 2, 4, 5)
    xs = xs.reshape(n, hs, ws, k)

    tn = _pick_cout_tile(cout, k)
    n_ct = cout // tn
    out_itemsize = jnp.dtype(out_dtype).itemsize
    tb, tr = _pick_spatial_tiles(n, ho, wo, k, tn, out_itemsize)
    n_bt, n_rt = n // tb, ho // tr

    out_bytes = n * ho * wo * cout * out_itemsize
    cost = pl.CostEstimate(
        flops=2 * n * ho * wo * cout * 4 * k,
        transcendentals=0,
        bytes_accessed=n_ct * n * hs * ws * k * 2
        + 4 * k * cout * 2 + cout * 4 + out_bytes,
    )

    kernel = functools.partial(_conv_tile_kernel, apply_relu=apply_relu)
    out = pl.pallas_call(
        kernel,
        out_shape=jax.ShapeDtypeStruct((n, ho, wo, cout), out_dtype),
        # cout tiles OUTERMOST (weight block DMA'd n_ct times total), rows
        # innermost; every axis writes disjoint output blocks -> all parallel
        # (keeps at least one shardable axis for v7x's 2 TensorCores).
        grid=(n_ct, n_bt, n_rt),
        in_specs=[
            pl.BlockSpec((tb, tr, ws, k), lambda j, b, i: (b, i, 0, 0)),
            # 1-row halo block: block size 1 along rows -> block index is the
            # element row (i+1)*TR (in bounds: hs = ho + 1).
            pl.BlockSpec((tb, 1, ws, k), lambda j, b, i: (b, (i + 1) * tr, 0, 0)),
            pl.BlockSpec((2, 2, k, tn), lambda j, b, i: (0, 0, 0, j)),
            pl.BlockSpec((1, tn), lambda j, b, i: (0, j)),
        ],
        out_specs=pl.BlockSpec((tb, tr, wo, tn), lambda j, b, i: (b, i, 0, j)),
        compiler_params=pltpu.CompilerParams(
            dimension_semantics=("parallel", "parallel", "parallel"),
            vmem_limit_bytes=_VMEM_LIMIT,
        ),
        cost_estimate=cost,
    )(xs, xs, w2, bias)
    return out


# ---------------------------------------------------------------------------
# Parameters
# ---------------------------------------------------------------------------
def init_fc_discriminator_params(key, num_classes, ndf):
    dims = [
        (num_classes, ndf),
        (ndf, ndf * 2),
        (ndf * 2, ndf * 4),
        (ndf * 4, ndf * 8),
        (ndf * 8, 1),
    ]
    params = []
    for i, (cin, cout) in enumerate(dims):
        kw, kb = jax.random.split(jax.random.fold_in(key, i))
        bound = 1.0 / (cin * 16) ** 0.5
        w = jax.random.uniform(kw, (cout, cin, 4, 4), jnp.float32, -bound, bound)
        b = jax.random.uniform(kb, (cout,), jnp.float32, -bound, bound)
        params.append((w, b))
    return params


def prepare_params(params):
    """Hoisted (once-per-model) weight/bias relayout for the Pallas kernels.

    W (Cout, Cin, 4, 4) -> W2 (2, 2, 4*Cin', Cout') bf16 with
    W2[di, dj, (2*pi + pj)*Cin' + c, o] = W[o, c, 2*di + pi, 2*dj + pj],
    matching the space-to-depth channel order.  Every layer's Cout is
    zero-padded up to a multiple of 128 so output stores stay lane-dense
    (unmasked vst); the NEXT layer's Cin is zero-padded to match, so the
    padded channels contribute exactly 0 and numerics are unchanged.  The
    classifier's single real channel is sliced back in the forward pass.
    """
    layers = []
    prev_extra = 0
    for (w, b) in params:
        cout, cin = w.shape[0], w.shape[1]
        if prev_extra:   # match the previous layer's lane-padded Cout
            w = jnp.concatenate(
                [w, jnp.zeros((cout, prev_extra, 4, 4), w.dtype)], axis=1)
            cin += prev_extra
        cout_pad = -(-cout // 128) * 128
        extra = cout_pad - cout
        if extra:
            w = jnp.concatenate([w, jnp.zeros((extra, cin, 4, 4), w.dtype)], axis=0)
            b = jnp.concatenate([b, jnp.zeros((extra,), b.dtype)], axis=0)
        prev_extra = extra
        w2 = w.transpose(2, 3, 1, 0)                  # (4,4,Cin,Cout) [ki,kj,c,o]
        w2 = w2.reshape(2, 2, 2, 2, cin, cout_pad)    # [di, pi, dj, pj, c, o]
        w2 = w2.transpose(0, 2, 1, 3, 4, 5)           # [di, dj, pi, pj, c, o]
        w2 = w2.reshape(2, 2, 4 * cin, cout_pad).astype(jnp.bfloat16)
        layers.append((w2, b.reshape(1, cout_pad).astype(jnp.float32)))
    return layers


# ---------------------------------------------------------------------------
# FCDiscriminator forward
# ---------------------------------------------------------------------------
def fc_discriminator_forward(layers, x_nchw):
    """x_nchw: (N, num_classes, H, W) f32 -> (N, 1, H/32, W/32) f32 (PyTorch-like)."""
    x = jnp.transpose(x_nchw, (0, 2, 3, 1)).astype(jnp.bfloat16)   # NHWC, bf16
    n_layers = len(layers)
    for idx, (w2, b) in enumerate(layers):
        last = idx == n_layers - 1
        x = _conv4s2p1(x, w2, b, apply_relu=not last,
                       out_dtype=jnp.float32 if last else jnp.bfloat16)
    # classifier is Conv2d(..., out_channels=1); its Cout was zero-padded to
    # 128 at prep time for a lane-dense store -- take the single real channel.
    x = x[..., :1]
    return jnp.transpose(x, (0, 3, 1, 2))                          # NHWC -> NCHW


def _reference_forward(params, x_nchw):
    """Pure-JAX reference with matching bf16 quantization points."""
    q = lambda t: t.astype(jnp.bfloat16).astype(jnp.float32)
    x = q(x_nchw)
    for i, (w, b) in enumerate(params):
        x = jax.lax.conv_general_dilated(
            x, q(w), window_strides=(2, 2), padding=((1, 1), (1, 1)),
            dimension_numbers=("NCHW", "OIHW", "NCHW"),
            precision=jax.lax.Precision.HIGHEST,
        ) + b.reshape(1, -1, 1, 1)
        if i < len(params) - 1:
            x = jnp.where(x >= 0.0, x, 0.2 * x)
            x = q(x)
    return x


if __name__ == "__main__":
    num_classes = 4
    ndf = 8                   # small ndf for the synthetic test (module default 64)
    N, H, W = 2, 32, 32       # five stride-2 convs need spatial >= 32

    key = jax.random.PRNGKey(0)
    pkey, xkey = jax.random.split(key)
    params = init_fc_discriminator_params(pkey, num_classes, ndf)
    x = jax.random.normal(xkey, (N, num_classes, H, W), jnp.float32)

    layers = prepare_params(params)          # hoisted out of the forward pass
    fwd = jax.jit(fc_discriminator_forward)
    out = jax.block_until_ready(fwd(layers, x))

    ref = _reference_forward(params, x)
    assert out.shape == (N, 1, H // 32, W // 32), out.shape
    assert jnp.allclose(out, ref, atol=1e-2, rtol=1e-2), (
        float(jnp.max(jnp.abs(out - ref))))
    print("KERNEL_OK")
</pallas_src>

<mosaic_0001>
module attributes {stable_mosaic.version = 11 : i64} {
  func.func @_conv_tile_kernel(%arg0: i32, %arg1: i32, %arg2: i32, %arg3: memref<1x16x17x16xbf16, #tpu.memory_space<vmem>>, %arg4: memref<1x1x17x16xbf16, #tpu.memory_space<vmem>>, %arg5: memref<2x2x16x128xbf16, #tpu.memory_space<vmem>>, %arg6: memref<1x128xf32, #tpu.memory_space<vmem>>, %arg7: memref<1x16x16x128xbf16, #tpu.memory_space<vmem>>) attributes {dimension_semantics = [#tpu.dimension_semantics<parallel>, #tpu.dimension_semantics<parallel>, #tpu.dimension_semantics<parallel>], iteration_bounds = array<i64: 1, 2, 1>, scalar_prefetch = 0 : i64, scratch_operands = 0 : i64, tpu.core_type = #tpu.core_type<tc>, window_params = [{transform_indices = @transform_0, window_bounds = array<i64: 1, 16, 17, 16>}, {transform_indices = @transform_1, window_bounds = array<i64: 1, 1, 17, 16>}, {transform_indices = @transform_2, window_bounds = array<i64: 2, 2, 16, 128>}, {transform_indices = @transform_3, window_bounds = array<i64: 1, 128>}, {transform_indices = @transform_4, window_bounds = array<i64: 1, 16, 16, 128>}]} {
    %c0 = arith.constant 0 : index
    %c0_0 = arith.constant 0 : index
    %c0_1 = arith.constant 0 : index
    %c0_2 = arith.constant 0 : index
    %0 = vector.load %arg3[%c0, %c0_0, %c0_1, %c0_2] : memref<1x16x17x16xbf16, #tpu.memory_space<vmem>>, vector<1x16x17x16xbf16>
    %c0_3 = arith.constant 0 : index
    %c0_4 = arith.constant 0 : index
    %c0_5 = arith.constant 0 : index
    %c0_6 = arith.constant 0 : index
    %1 = vector.load %arg4[%c0_3, %c0_4, %c0_5, %c0_6] : memref<1x1x17x16xbf16, #tpu.memory_space<vmem>>, vector<1x1x17x16xbf16>
    %2 = tpu.concatenate %0, %1 in 1 : vector<1x16x17x16xbf16>, vector<1x1x17x16xbf16> -> vector<1x17x17x16xbf16>
    %cst = arith.constant 0.000000e+00 : f32
    %3 = vector.broadcast %cst : f32 to vector<256x128xf32>
    %4 = vector.extract_strided_slice %2 {offsets = [0, 0, 0, 0], sizes = [1, 16, 16, 16], strides = [1, 1, 1, 1]} : vector<1x17x17x16xbf16> to vector<1x16x16x16xbf16>
    %5 = vector.shape_cast %4 : vector<1x16x16x16xbf16> to vector<256x16xbf16>
    %c0_7 = arith.constant 0 : index
    %c0_8 = arith.constant 0 : index
    %c0_9 = arith.constant 0 : index
    %c0_10 = arith.constant 0 : index
    %6 = vector.load %arg5[%c0_7, %c0_8, %c0_9, %c0_10] : memref<2x2x16x128xbf16, #tpu.memory_space<vmem>>, vector<1x1x16x128xbf16>
    %7 = vector.shape_cast %6 : vector<1x1x16x128xbf16> to vector<16x128xbf16>
    %cst_11 = arith.constant dense<0.000000e+00> : vector<256x128xf32>
    %8 = tpu.matmul %5, %7, %cst_11 {dimension_numbers = #tpu.dot_dimension_numbers<[1], [0], [0], [1], [0, 0, 1, 1], [], []>} : vector<256x16xbf16>, vector<16x128xbf16>, vector<256x128xf32> -> vector<256x128xf32>
    %9 = arith.addf %3, %8 : vector<256x128xf32>
    %10 = vector.extract_strided_slice %2 {offsets = [0, 0, 1, 0], sizes = [1, 16, 16, 16], strides = [1, 1, 1, 1]} : vector<1x17x17x16xbf16> to vector<1x16x16x16xbf16>
    %11 = vector.shape_cast %10 : vector<1x16x16x16xbf16> to vector<256x16xbf16>
    %c0_12 = arith.constant 0 : index
    %c1 = arith.constant 1 : index
    %c0_13 = arith.constant 0 : index
    %c0_14 = arith.constant 0 : index
    %12 = vector.load %arg5[%c0_12, %c1, %c0_13, %c0_14] : memref<2x2x16x128xbf16, #tpu.memory_space<vmem>>, vector<1x1x16x128xbf16>
    %13 = vector.shape_cast %12 : vector<1x1x16x128xbf16> to vector<16x128xbf16>
    %cst_15 = arith.constant dense<0.000000e+00> : vector<256x128xf32>
    %14 = tpu.matmul %11, %13, %cst_15 {dimension_numbers = #tpu.dot_dimension_numbers<[1], [0], [0], [1], [0, 0, 1, 1], [], []>} : vector<256x16xbf16>, vector<16x128xbf16>, vector<256x128xf32> -> vector<256x128xf32>
    %15 = arith.addf %9, %14 : vector<256x128xf32>
    %16 = vector.extract_strided_slice %2 {offsets = [0, 1, 0, 0], sizes = [1, 16, 16, 16], strides = [1, 1, 1, 1]} : vector<1x17x17x16xbf16> to vector<1x16x16x16xbf16>
    %17 = vector.shape_cast %16 : vector<1x16x16x16xbf16> to vector<256x16xbf16>
    %c1_16 = arith.constant 1 : index
    %c0_17 = arith.constant 0 : index
    %c0_18 = arith.constant 0 : index
    %c0_19 = arith.constant 0 : index
    %18 = vector.load %arg5[%c1_16, %c0_17, %c0_18, %c0_19] : memref<2x2x16x128xbf16, #tpu.memory_space<vmem>>, vector<1x1x16x128xbf16>
    %19 = vector.shape_cast %18 : vector<1x1x16x128xbf16> to vector<16x128xbf16>
    %cst_20 = arith.constant dense<0.000000e+00> : vector<256x128xf32>
    %20 = tpu.matmul %17, %19, %cst_20 {dimension_numbers = #tpu.dot_dimension_numbers<[1], [0], [0], [1], [0, 0, 1, 1], [], []>} : vector<256x16xbf16>, vector<16x128xbf16>, vector<256x128xf32> -> vector<256x128xf32>
    %21 = arith.addf %15, %20 : vector<256x128xf32>
    %22 = vector.extract_strided_slice %2 {offsets = [0, 1, 1, 0], sizes = [1, 16, 16, 16], strides = [1, 1, 1, 1]} : vector<1x17x17x16xbf16> to vector<1x16x16x16xbf16>
    %23 = vector.shape_cast %22 : vector<1x16x16x16xbf16> to vector<256x16xbf16>
    %c1_21 = arith.constant 1 : index
    %c1_22 = arith.constant 1 : index
    %c0_23 = arith.constant 0 : index
    %c0_24 = arith.constant 0 : index
    %24 = vector.load %arg5[%c1_21, %c1_22, %c0_23, %c0_24] : memref<2x2x16x128xbf16, #tpu.memory_space<vmem>>, vector<1x1x16x128xbf16>
    %25 = vector.shape_cast %24 : vector<1x1x16x128xbf16> to vector<16x128xbf16>
    %cst_25 = arith.constant dense<0.000000e+00> : vector<256x128xf32>
    %26 = tpu.matmul %23, %25, %cst_25 {dimension_numbers = #tpu.dot_dimension_numbers<[1], [0], [0], [1], [0, 0, 1, 1], [], []>} : vector<256x16xbf16>, vector<16x128xbf16>, vector<256x128xf32> -> vector<256x128xf32>
    %27 = arith.addf %21, %26 : vector<256x128xf32>
    %c0_26 = arith.constant 0 : index
    %c0_27 = arith.constant 0 : index
    %28 = vector.load %arg6[%c0_26, %c0_27] : memref<1x128xf32, #tpu.memory_space<vmem>>, vector<1x128xf32>
    %29 = vector.broadcast %28 : vector<1x128xf32> to vector<256x128xf32>
    %30 = arith.addf %27, %29 : vector<256x128xf32>
    %cst_28 = arith.constant 2.000000e-01 : f32
    %31 = vector.broadcast %cst_28 : f32 to vector<256x128xf32>
    %32 = arith.mulf %31, %30 : vector<256x128xf32>
    %33 = arith.maximumf %30, %32 : vector<256x128xf32>
    %34 = vector.shape_cast %33 : vector<256x128xf32> to vector<1x16x16x128xf32>
    %35 = arith.truncf %34 : vector<1x16x16x128xf32> to vector<1x16x16x128xbf16>
    %c0_29 = arith.constant 0 : index
    %c0_30 = arith.constant 0 : index
    %c0_31 = arith.constant 0 : index
    %c0_32 = arith.constant 0 : index
    %36 = vector.load %arg7[%c0_29, %c0_30, %c0_31, %c0_32] : memref<1x16x16x128xbf16, #tpu.memory_space<vmem>>, vector<1x16x16x128xbf16>
    tpu.vector_store %arg7[%c0_29, %c0_30, %c0_31, %c0_32], %35 {strides = array<i32>} : memref<1x16x16x128xbf16, #tpu.memory_space<vmem>>, vector<1x16x16x128xbf16>,
    return
  }
  func.func @transform_0(%arg0: i32, %arg1: i32, %arg2: i32) -> (i32, i32, i32, i32) {
    %c0_i32 = arith.constant 0 : i32
    %c0_i32_0 = arith.constant 0 : i32
    %c0_i32_1 = arith.constant 0 : i32
    return %arg1, %arg2, %c0_i32, %c0_i32_0 : i32, i32, i32, i32
  }
  func.func @transform_1(%arg0: i32, %arg1: i32, %arg2: i32) -> (i32, i32, i32, i32) {
    %c1_i32 = arith.constant 1 : i32
    %0 = arith.addi %arg2, %c1_i32 : i32
    %c16_i32 = arith.constant 16 : i32
    %1 = arith.muli %0, %c16_i32 : i32
    %c0_i32 = arith.constant 0 : i32
    %c0_i32_0 = arith.constant 0 : i32
    %c0_i32_1 = arith.constant 0 : i32
    return %arg1, %1, %c0_i32, %c0_i32_0 : i32, i32, i32, i32
  }
  func.func @transform_2(%arg0: i32, %arg1: i32, %arg2: i32) -> (i32, i32, i32, i32) {
    %c0_i32 = arith.constant 0 : i32
    %c0_i32_0 = arith.constant 0 : i32
    %c0_i32_1 = arith.constant 0 : i32
    %c0_i32_2 = arith.constant 0 : i32
    return %c0_i32, %c0_i32_0, %c0_i32_1, %arg0 : i32, i32, i32, i32
  }
  func.func @transform_3(%arg0: i32, %arg1: i32, %arg2: i32) -> (i32, i32) {
    %c0_i32 = arith.constant 0 : i32
    %c0_i32_0 = arith.constant 0 : i32
    return %c0_i32, %arg0 : i32, i32
  }
  func.func @transform_4(%arg0: i32, %arg1: i32, %arg2: i32) -> (i32, i32, i32, i32) {
    %c0_i32 = arith.constant 0 : i32
    %c0_i32_0 = arith.constant 0 : i32
    return %arg1, %arg2, %c0_i32, %arg0 : i32, i32, i32, i32
  }
}

module attributes {stable_mosaic.version = 11 : i64} {
  func.func @_conv_tile_kernel(%arg0: i32, %arg1: i32, %arg2: i32, %arg3: memref<2x8x9x512xbf16, #tpu.memory_space<vmem>>, %arg4: memref<2x1x9x512xbf16, #tpu.memory_space<vmem>>, %arg5: memref<2x2x512x128xbf16, #tpu.memory_space<vmem>>, %arg6: memref<1x128xf32, #tpu.memory_space<vmem>>, %arg7: memref<2x8x8x128xbf16, #tpu.memory_space<vmem>>) attributes {dimension_semantics = [#tpu.dimension_semantics<parallel>, #tpu.dimension_semantics<parallel>, #tpu.dimension_semantics<parallel>], iteration_bounds = array<i64: 1, 1, 1>, scalar_prefetch = 0 : i64, scratch_operands = 0 : i64, tpu.core_type = #tpu.core_type<tc>, window_params = [{transform_indices = @transform_0, window_bounds = array<i64: 2, 8, 9, 512>}, {transform_indices = @transform_1, window_bounds = array<i64: 2, 1, 9, 512>}, {transform_indices = @transform_2, window_bounds = array<i64: 2, 2, 512, 128>}, {transform_indices = @transform_3, window_bounds = array<i64: 1, 128>}, {transform_indices = @transform_4, window_bounds = array<i64: 2, 8, 8, 128>}]} {
    %c0 = arith.constant 0 : index
    %c0_0 = arith.constant 0 : index
    %c0_1 = arith.constant 0 : index
    %c0_2 = arith.constant 0 : index
    %0 = vector.load %arg3[%c0, %c0_0, %c0_1, %c0_2] : memref<2x8x9x512xbf16, #tpu.memory_space<vmem>>, vector<2x8x9x512xbf16>
    %c0_3 = arith.constant 0 : index
    %c0_4 = arith.constant 0 : index
    %c0_5 = arith.constant 0 : index
    %c0_6 = arith.constant 0 : index
    %1 = vector.load %arg4[%c0_3, %c0_4, %c0_5, %c0_6] : memref<2x1x9x512xbf16, #tpu.memory_space<vmem>>, vector<2x1x9x512xbf16>
    %2 = tpu.concatenate %0, %1 in 1 : vector<2x8x9x512xbf16>, vector<2x1x9x512xbf16> -> vector<2x9x9x512xbf16>
    %cst = arith.constant 0.000000e+00 : f32
    %3 = vector.broadcast %cst : f32 to vector<128x128xf32>
    %4 = vector.extract_strided_slice %2 {offsets = [0, 0, 0, 0], sizes = [2, 8, 8, 512], strides = [1, 1, 1, 1]} : vector<2x9x9x512xbf16> to vector<2x8x8x512xbf16>
    %5 = vector.shape_cast %4 : vector<2x8x8x512xbf16> to vector<128x512xbf16>
    %c0_7 = arith.constant 0 : index
    %c0_8 = arith.constant 0 : index
    %c0_9 = arith.constant 0 : index
    %c0_10 = arith.constant 0 : index
    %6 = vector.load %arg5[%c0_7, %c0_8, %c0_9, %c0_10] : memref<2x2x512x128xbf16, #tpu.memory_space<vmem>>, vector<1x1x512x128xbf16>
    %7 = vector.shape_cast %6 : vector<1x1x512x128xbf16> to vector<512x128xbf16>
    %cst_11 = arith.constant dense<0.000000e+00> : vector<128x128xf32>
    %8 = tpu.matmul %5, %7, %cst_11 {dimension_numbers = #tpu.dot_dimension_numbers<[1], [0], [0], [1], [0, 0, 1, 1], [], []>} : vector<128x512xbf16>, vector<512x128xbf16>, vector<128x128xf32> -> vector<128x128xf32>
    %9 = arith.addf %3, %8 : vector<128x128xf32>
    %10 = vector.extract_strided_slice %2 {offsets = [0, 0, 1, 0], sizes = [2, 8, 8, 512], strides = [1, 1, 1, 1]} : vector<2x9x9x512xbf16> to vector<2x8x8x512xbf16>
    %11 = vector.shape_cast %10 : vector<2x8x8x512xbf16> to vector<128x512xbf16>
    %c0_12 = arith.constant 0 : index
    %c1 = arith.constant 1 : index
    %c0_13 = arith.constant 0 : index
    %c0_14 = arith.constant 0 : index
    %12 = vector.load %arg5[%c0_12, %c1, %c0_13, %c0_14] : memref<2x2x512x128xbf16, #tpu.memory_space<vmem>>, vector<1x1x512x128xbf16>
    %13 = vector.shape_cast %12 : vector<1x1x512x128xbf16> to vector<512x128xbf16>
    %cst_15 = arith.constant dense<0.000000e+00> : vector<128x128xf32>
    %14 = tpu.matmul %11, %13, %cst_15 {dimension_numbers = #tpu.dot_dimension_numbers<[1], [0], [0], [1], [0, 0, 1, 1], [], []>} : vector<128x512xbf16>, vector<512x128xbf16>, vector<128x128xf32> -> vector<128x128xf32>
    %15 = arith.addf %9, %14 : vector<128x128xf32>
    %16 = vector.extract_strided_slice %2 {offsets = [0, 1, 0, 0], sizes = [2, 8, 8, 512], strides = [1, 1, 1, 1]} : vector<2x9x9x512xbf16> to vector<2x8x8x512xbf16>
    %17 = vector.shape_cast %16 : vector<2x8x8x512xbf16> to vector<128x512xbf16>
    %c1_16 = arith.constant 1 : index
    %c0_17 = arith.constant 0 : index
    %c0_18 = arith.constant 0 : index
    %c0_19 = arith.constant 0 : index
    %18 = vector.load %arg5[%c1_16, %c0_17, %c0_18, %c0_19] : memref<2x2x512x128xbf16, #tpu.memory_space<vmem>>, vector<1x1x512x128xbf16>
    %19 = vector.shape_cast %18 : vector<1x1x512x128xbf16> to vector<512x128xbf16>
    %cst_20 = arith.constant dense<0.000000e+00> : vector<128x128xf32>
    %20 = tpu.matmul %17, %19, %cst_20 {dimension_numbers = #tpu.dot_dimension_numbers<[1], [0], [0], [1], [0, 0, 1, 1], [], []>} : vector<128x512xbf16>, vector<512x128xbf16>, vector<128x128xf32> -> vector<128x128xf32>
    %21 = arith.addf %15, %20 : vector<128x128xf32>
    %22 = vector.extract_strided_slice %2 {offsets = [0, 1, 1, 0], sizes = [2, 8, 8, 512], strides = [1, 1, 1, 1]} : vector<2x9x9x512xbf16> to vector<2x8x8x512xbf16>
    %23 = vector.shape_cast %22 : vector<2x8x8x512xbf16> to vector<128x512xbf16>
    %c1_21 = arith.constant 1 : index
    %c1_22 = arith.constant 1 : index
    %c0_23 = arith.constant 0 : index
    %c0_24 = arith.constant 0 : index
    %24 = vector.load %arg5[%c1_21, %c1_22, %c0_23, %c0_24] : memref<2x2x512x128xbf16, #tpu.memory_space<vmem>>, vector<1x1x512x128xbf16>
    %25 = vector.shape_cast %24 : vector<1x1x512x128xbf16> to vector<512x128xbf16>
    %cst_25 = arith.constant dense<0.000000e+00> : vector<128x128xf32>
    %26 = tpu.matmul %23, %25, %cst_25 {dimension_numbers = #tpu.dot_dimension_numbers<[1], [0], [0], [1], [0, 0, 1, 1], [], []>} : vector<128x512xbf16>, vector<512x128xbf16>, vector<128x128xf32> -> vector<128x128xf32>
    %27 = arith.addf %21, %26 : vector<128x128xf32>
    %c0_26 = arith.constant 0 : index
    %c0_27 = arith.constant 0 : index
    %28 = vector.load %arg6[%c0_26, %c0_27] : memref<1x128xf32, #tpu.memory_space<vmem>>, vector<1x128xf32>
    %29 = vector.broadcast %28 : vector<1x128xf32> to vector<128x128xf32>
    %30 = arith.addf %27, %29 : vector<128x128xf32>
    %cst_28 = arith.constant 2.000000e-01 : f32
    %31 = vector.broadcast %cst_28 : f32 to vector<128x128xf32>
    %32 = arith.mulf %31, %30 : vector<128x128xf32>
    %33 = arith.maximumf %30, %32 : vector<128x128xf32>
    %34 = vector.shape_cast %33 : vector<128x128xf32> to vector<2x8x8x128xf32>
    %35 = arith.truncf %34 : vector<2x8x8x128xf32> to vector<2x8x8x128xbf16>
    %c0_29 = arith.constant 0 : index
    %c0_30 = arith.constant 0 : index
    %c0_31 = arith.constant 0 : index
    %c0_32 = arith.constant 0 : index
    %36 = vector.load %arg7[%c0_29, %c0_30, %c0_31, %c0_32] : memref<2x8x8x128xbf16, #tpu.memory_space<vmem>>, vector<2x8x8x128xbf16>
    tpu.vector_store %arg7[%c0_29, %c0_30, %c0_31, %c0_32], %35 {strides = array<i32>} : memref<2x8x8x128xbf16, #tpu.memory_space<vmem>>, vector<2x8x8x128xbf16>,
    return
  }
  func.func @transform_0(%arg0: i32, %arg1: i32, %arg2: i32) -> (i32, i32, i32, i32) {
    %c0_i32 = arith.constant 0 : i32
    %c0_i32_0 = arith.constant 0 : i32
    %c0_i32_1 = arith.constant 0 : i32
    return %arg1, %arg2, %c0_i32, %c0_i32_0 : i32, i32, i32, i32
  }
  func.func @transform_1(%arg0: i32, %arg1: i32, %arg2: i32) -> (i32, i32, i32, i32) {
    %c1_i32 = arith.constant 1 : i32
    %0 = arith.addi %arg2, %c1_i32 : i32
    %c8_i32 = arith.constant 8 : i32
    %1 = arith.muli %0, %c8_i32 : i32
    %c0_i32 = arith.constant 0 : i32
    %c0_i32_0 = arith.constant 0 : i32
    %c0_i32_1 = arith.constant 0 : i32
    return %arg1, %1, %c0_i32, %c0_i32_0 : i32, i32, i32, i32
  }
  func.func @transform_2(%arg0: i32, %arg1: i32, %arg2: i32) -> (i32, i32, i32, i32) {
    %c0_i32 = arith.constant 0 : i32
    %c0_i32_0 = arith.constant 0 : i32
    %c0_i32_1 = arith.constant 0 : i32
    %c0_i32_2 = arith.constant 0 : i32
    return %c0_i32, %c0_i32_0, %c0_i32_1, %arg0 : i32, i32, i32, i32
  }
  func.func @transform_3(%arg0: i32, %arg1: i32, %arg2: i32) -> (i32, i32) {
    %c0_i32 = arith.constant 0 : i32
    %c0_i32_0 = arith.constant 0 : i32
    return %c0_i32, %arg0 : i32, i32
  }
  func.func @transform_4(%arg0: i32, %arg1: i32, %arg2: i32) -> (i32, i32, i32, i32) {
    %c0_i32 = arith.constant 0 : i32
    %c0_i32_0 = arith.constant 0 : i32
    return %arg1, %arg2, %c0_i32, %arg0 : i32, i32, i32, i32
  }
}

module attributes {stable_mosaic.version = 11 : i64} {
  func.func @_conv_tile_kernel(%arg0: i32, %arg1: i32, %arg2: i32, %arg3: memref<2x4x5x512xbf16, #tpu.memory_space<vmem>>, %arg4: memref<2x1x5x512xbf16, #tpu.memory_space<vmem>>, %arg5: memref<2x2x512x128xbf16, #tpu.memory_space<vmem>>, %arg6: memref<1x128xf32, #tpu.memory_space<vmem>>, %arg7: memref<2x4x4x128xbf16, #tpu.memory_space<vmem>>) attributes {dimension_semantics = [#tpu.dimension_semantics<parallel>, #tpu.dimension_semantics<parallel>, #tpu.dimension_semantics<parallel>], iteration_bounds = array<i64: 1, 1, 1>, scalar_prefetch = 0 : i64, scratch_operands = 0 : i64, tpu.core_type = #tpu.core_type<tc>, window_params = [{transform_indices = @transform_0, window_bounds = array<i64: 2, 4, 5, 512>}, {transform_indices = @transform_1, window_bounds = array<i64: 2, 1, 5, 512>}, {transform_indices = @transform_2, window_bounds = array<i64: 2, 2, 512, 128>}, {transform_indices = @transform_3, window_bounds = array<i64: 1, 128>}, {transform_indices = @transform_4, window_bounds = array<i64: 2, 4, 4, 128>}]} {
    %c0 = arith.constant 0 : index
    %c0_0 = arith.constant 0 : index
    %c0_1 = arith.constant 0 : index
    %c0_2 = arith.constant 0 : index
    %0 = vector.load %arg3[%c0, %c0_0, %c0_1, %c0_2] : memref<2x4x5x512xbf16, #tpu.memory_space<vmem>>, vector<2x4x5x512xbf16>
    %c0_3 = arith.constant 0 : index
    %c0_4 = arith.constant 0 : index
    %c0_5 = arith.constant 0 : index
    %c0_6 = arith.constant 0 : index
    %1 = vector.load %arg4[%c0_3, %c0_4, %c0_5, %c0_6] : memref<2x1x5x512xbf16, #tpu.memory_space<vmem>>, vector<2x1x5x512xbf16>
    %2 = tpu.concatenate %0, %1 in 1 : vector<2x4x5x512xbf16>, vector<2x1x5x512xbf16> -> vector<2x5x5x512xbf16>
    %cst = arith.constant 0.000000e+00 : f32
    %3 = vector.broadcast %cst : f32 to vector<32x128xf32>
    %4 = vector.extract_strided_slice %2 {offsets = [0, 0, 0, 0], sizes = [2, 4, 4, 512], strides = [1, 1, 1, 1]} : vector<2x5x5x512xbf16> to vector<2x4x4x512xbf16>
    %5 = vector.shape_cast %4 : vector<2x4x4x512xbf16> to vector<32x512xbf16>
    %c0_7 = arith.constant 0 : index
    %c0_8 = arith.constant 0 : index
    %c0_9 = arith.constant 0 : index
    %c0_10 = arith.constant 0 : index
    %6 = vector.load %arg5[%c0_7, %c0_8, %c0_9, %c0_10] : memref<2x2x512x128xbf16, #tpu.memory_space<vmem>>, vector<1x1x512x128xbf16>
    %7 = vector.shape_cast %6 : vector<1x1x512x128xbf16> to vector<512x128xbf16>
    %cst_11 = arith.constant dense<0.000000e+00> : vector<32x128xf32>
    %8 = tpu.matmul %5, %7, %cst_11 {dimension_numbers = #tpu.dot_dimension_numbers<[1], [0], [0], [1], [0, 0, 1, 1], [], []>} : vector<32x512xbf16>, vector<512x128xbf16>, vector<32x128xf32> -> vector<32x128xf32>
    %9 = arith.addf %3, %8 : vector<32x128xf32>
    %10 = vector.extract_strided_slice %2 {offsets = [0, 0, 1, 0], sizes = [2, 4, 4, 512], strides = [1, 1, 1, 1]} : vector<2x5x5x512xbf16> to vector<2x4x4x512xbf16>
    %11 = vector.shape_cast %10 : vector<2x4x4x512xbf16> to vector<32x512xbf16>
    %c0_12 = arith.constant 0 : index
    %c1 = arith.constant 1 : index
    %c0_13 = arith.constant 0 : index
    %c0_14 = arith.constant 0 : index
    %12 = vector.load %arg5[%c0_12, %c1, %c0_13, %c0_14] : memref<2x2x512x128xbf16, #tpu.memory_space<vmem>>, vector<1x1x512x128xbf16>
    %13 = vector.shape_cast %12 : vector<1x1x512x128xbf16> to vector<512x128xbf16>
    %cst_15 = arith.constant dense<0.000000e+00> : vector<32x128xf32>
    %14 = tpu.matmul %11, %13, %cst_15 {dimension_numbers = #tpu.dot_dimension_numbers<[1], [0], [0], [1], [0, 0, 1, 1], [], []>} : vector<32x512xbf16>, vector<512x128xbf16>, vector<32x128xf32> -> vector<32x128xf32>
    %15 = arith.addf %9, %14 : vector<32x128xf32>
    %16 = vector.extract_strided_slice %2 {offsets = [0, 1, 0, 0], sizes = [2, 4, 4, 512], strides = [1, 1, 1, 1]} : vector<2x5x5x512xbf16> to vector<2x4x4x512xbf16>
    %17 = vector.shape_cast %16 : vector<2x4x4x512xbf16> to vector<32x512xbf16>
    %c1_16 = arith.constant 1 : index
    %c0_17 = arith.constant 0 : index
    %c0_18 = arith.constant 0 : index
    %c0_19 = arith.constant 0 : index
    %18 = vector.load %arg5[%c1_16, %c0_17, %c0_18, %c0_19] : memref<2x2x512x128xbf16, #tpu.memory_space<vmem>>, vector<1x1x512x128xbf16>
    %19 = vector.shape_cast %18 : vector<1x1x512x128xbf16> to vector<512x128xbf16>
    %cst_20 = arith.constant dense<0.000000e+00> : vector<32x128xf32>
    %20 = tpu.matmul %17, %19, %cst_20 {dimension_numbers = #tpu.dot_dimension_numbers<[1], [0], [0], [1], [0, 0, 1, 1], [], []>} : vector<32x512xbf16>, vector<512x128xbf16>, vector<32x128xf32> -> vector<32x128xf32>
    %21 = arith.addf %15, %20 : vector<32x128xf32>
    %22 = vector.extract_strided_slice %2 {offsets = [0, 1, 1, 0], sizes = [2, 4, 4, 512], strides = [1, 1, 1, 1]} : vector<2x5x5x512xbf16> to vector<2x4x4x512xbf16>
    %23 = vector.shape_cast %22 : vector<2x4x4x512xbf16> to vector<32x512xbf16>
    %c1_21 = arith.constant 1 : index
    %c1_22 = arith.constant 1 : index
    %c0_23 = arith.constant 0 : index
    %c0_24 = arith.constant 0 : index
    %24 = vector.load %arg5[%c1_21, %c1_22, %c0_23, %c0_24] : memref<2x2x512x128xbf16, #tpu.memory_space<vmem>>, vector<1x1x512x128xbf16>
    %25 = vector.shape_cast %24 : vector<1x1x512x128xbf16> to vector<512x128xbf16>
    %cst_25 = arith.constant dense<0.000000e+00> : vector<32x128xf32>
    %26 = tpu.matmul %23, %25, %cst_25 {dimension_numbers = #tpu.dot_dimension_numbers<[1], [0], [0], [1], [0, 0, 1, 1], [], []>} : vector<32x512xbf16>, vector<512x128xbf16>, vector<32x128xf32> -> vector<32x128xf32>
    %27 = arith.addf %21, %26 : vector<32x128xf32>
    %c0_26 = arith.constant 0 : index
    %c0_27 = arith.constant 0 : index
    %28 = vector.load %arg6[%c0_26, %c0_27] : memref<1x128xf32, #tpu.memory_space<vmem>>, vector<1x128xf32>
    %29 = vector.broadcast %28 : vector<1x128xf32> to vector<32x128xf32>
    %30 = arith.addf %27, %29 : vector<32x128xf32>
    %cst_28 = arith.constant 2.000000e-01 : f32
    %31 = vector.broadcast %cst_28 : f32 to vector<32x128xf32>
    %32 = arith.mulf %31, %30 : vector<32x128xf32>
    %33 = arith.maximumf %30, %32 : vector<32x128xf32>
    %34 = vector.shape_cast %33 : vector<32x128xf32> to vector<2x4x4x128xf32>
    %35 = arith.truncf %34 : vector<2x4x4x128xf32> to vector<2x4x4x128xbf16>
    %c0_29 = arith.constant 0 : index
    %c0_30 = arith.constant 0 : index
    %c0_31 = arith.constant 0 : index
    %c0_32 = arith.constant 0 : index
    %36 = vector.load %arg7[%c0_29, %c0_30, %c0_31, %c0_32] : memref<2x4x4x128xbf16, #tpu.memory_space<vmem>>, vector<2x4x4x128xbf16>
    tpu.vector_store %arg7[%c0_29, %c0_30, %c0_31, %c0_32], %35 {strides = array<i32>} : memref<2x4x4x128xbf16, #tpu.memory_space<vmem>>, vector<2x4x4x128xbf16>,
    return
  }
  func.func @transform_0(%arg0: i32, %arg1: i32, %arg2: i32) -> (i32, i32, i32, i32) {
    %c0_i32 = arith.constant 0 : i32
    %c0_i32_0 = arith.constant 0 : i32
    %c0_i32_1 = arith.constant 0 : i32
    return %arg1, %arg2, %c0_i32, %c0_i32_0 : i32, i32, i32, i32
  }
  func.func @transform_1(%arg0: i32, %arg1: i32, %arg2: i32) -> (i32, i32, i32, i32) {
    %c1_i32 = arith.constant 1 : i32
    %0 = arith.addi %arg2, %c1_i32 : i32
    %c4_i32 = arith.constant 4 : i32
    %1 = arith.muli %0, %c4_i32 : i32
    %c0_i32 = arith.constant 0 : i32
    %c0_i32_0 = arith.constant 0 : i32
    %c0_i32_1 = arith.constant 0 : i32
    return %arg1, %1, %c0_i32, %c0_i32_0 : i32, i32, i32, i32
  }
  func.func @transform_2(%arg0: i32, %arg1: i32, %arg2: i32) -> (i32, i32, i32, i32) {
    %c0_i32 = arith.constant 0 : i32
    %c0_i32_0 = arith.constant 0 : i32
    %c0_i32_1 = arith.constant 0 : i32
    %c0_i32_2 = arith.constant 0 : i32
    return %c0_i32, %c0_i32_0, %c0_i32_1, %arg0 : i32, i32, i32, i32
  }
  func.func @transform_3(%arg0: i32, %arg1: i32, %arg2: i32) -> (i32, i32) {
    %c0_i32 = arith.constant 0 : i32
    %c0_i32_0 = arith.constant 0 : i32
    return %c0_i32, %arg0 : i32, i32
  }
  func.func @transform_4(%arg0: i32, %arg1: i32, %arg2: i32) -> (i32, i32, i32, i32) {
    %c0_i32 = arith.constant 0 : i32
    %c0_i32_0 = arith.constant 0 : i32
    return %arg1, %arg2, %c0_i32, %arg0 : i32, i32, i32, i32
  }
}

module attributes {stable_mosaic.version = 11 : i64} {
  func.func @_conv_tile_kernel(%arg0: i32, %arg1: i32, %arg2: i32, %arg3: memref<2x2x3x512xbf16, #tpu.memory_space<vmem>>, %arg4: memref<2x1x3x512xbf16, #tpu.memory_space<vmem>>, %arg5: memref<2x2x512x128xbf16, #tpu.memory_space<vmem>>, %arg6: memref<1x128xf32, #tpu.memory_space<vmem>>, %arg7: memref<2x2x2x128xbf16, #tpu.memory_space<vmem>>) attributes {dimension_semantics = [#tpu.dimension_semantics<parallel>, #tpu.dimension_semantics<parallel>, #tpu.dimension_semantics<parallel>], iteration_bounds = array<i64: 1, 1, 1>, scalar_prefetch = 0 : i64, scratch_operands = 0 : i64, tpu.core_type = #tpu.core_type<tc>, window_params = [{transform_indices = @transform_0, window_bounds = array<i64: 2, 2, 3, 512>}, {transform_indices = @transform_1, window_bounds = array<i64: 2, 1, 3, 512>}, {transform_indices = @transform_2, window_bounds = array<i64: 2, 2, 512, 128>}, {transform_indices = @transform_3, window_bounds = array<i64: 1, 128>}, {transform_indices = @transform_4, window_bounds = array<i64: 2, 2, 2, 128>}]} {
    %c0 = arith.constant 0 : index
    %c0_0 = arith.constant 0 : index
    %c0_1 = arith.constant 0 : index
    %c0_2 = arith.constant 0 : index
    %0 = vector.load %arg3[%c0, %c0_0, %c0_1, %c0_2] : memref<2x2x3x512xbf16, #tpu.memory_space<vmem>>, vector<2x2x3x512xbf16>
    %c0_3 = arith.constant 0 : index
    %c0_4 = arith.constant 0 : index
    %c0_5 = arith.constant 0 : index
    %c0_6 = arith.constant 0 : index
    %1 = vector.load %arg4[%c0_3, %c0_4, %c0_5, %c0_6] : memref<2x1x3x512xbf16, #tpu.memory_space<vmem>>, vector<2x1x3x512xbf16>
    %2 = tpu.concatenate %0, %1 in 1 : vector<2x2x3x512xbf16>, vector<2x1x3x512xbf16> -> vector<2x3x3x512xbf16>
    %cst = arith.constant 0.000000e+00 : f32
    %3 = vector.broadcast %cst : f32 to vector<8x128xf32>
    %4 = vector.extract_strided_slice %2 {offsets = [0, 0, 0, 0], sizes = [2, 2, 2, 512], strides = [1, 1, 1, 1]} : vector<2x3x3x512xbf16> to vector<2x2x2x512xbf16>
    %5 = vector.shape_cast %4 : vector<2x2x2x512xbf16> to vector<8x512xbf16>
    %c0_7 = arith.constant 0 : index
    %c0_8 = arith.constant 0 : index
    %c0_9 = arith.constant 0 : index
    %c0_10 = arith.constant 0 : index
    %6 = vector.load %arg5[%c0_7, %c0_8, %c0_9, %c0_10] : memref<2x2x512x128xbf16, #tpu.memory_space<vmem>>, vector<1x1x512x128xbf16>
    %7 = vector.shape_cast %6 : vector<1x1x512x128xbf16> to vector<512x128xbf16>
    %cst_11 = arith.constant dense<0.000000e+00> : vector<8x128xf32>
    %8 = tpu.matmul %5, %7, %cst_11 {dimension_numbers = #tpu.dot_dimension_numbers<[1], [0], [0], [1], [0, 0, 1, 1], [], []>} : vector<8x512xbf16>, vector<512x128xbf16>, vector<8x128xf32> -> vector<8x128xf32>
    %9 = arith.addf %3, %8 : vector<8x128xf32>
    %10 = vector.extract_strided_slice %2 {offsets = [0, 0, 1, 0], sizes = [2, 2, 2, 512], strides = [1, 1, 1, 1]} : vector<2x3x3x512xbf16> to vector<2x2x2x512xbf16>
    %11 = vector.shape_cast %10 : vector<2x2x2x512xbf16> to vector<8x512xbf16>
    %c0_12 = arith.constant 0 : index
    %c1 = arith.constant 1 : index
    %c0_13 = arith.constant 0 : index
    %c0_14 = arith.constant 0 : index
    %12 = vector.load %arg5[%c0_12, %c1, %c0_13, %c0_14] : memref<2x2x512x128xbf16, #tpu.memory_space<vmem>>, vector<1x1x512x128xbf16>
    %13 = vector.shape_cast %12 : vector<1x1x512x128xbf16> to vector<512x128xbf16>
    %cst_15 = arith.constant dense<0.000000e+00> : vector<8x128xf32>
    %14 = tpu.matmul %11, %13, %cst_15 {dimension_numbers = #tpu.dot_dimension_numbers<[1], [0], [0], [1], [0, 0, 1, 1], [], []>} : vector<8x512xbf16>, vector<512x128xbf16>, vector<8x128xf32> -> vector<8x128xf32>
    %15 = arith.addf %9, %14 : vector<8x128xf32>
    %16 = vector.extract_strided_slice %2 {offsets = [0, 1, 0, 0], sizes = [2, 2, 2, 512], strides = [1, 1, 1, 1]} : vector<2x3x3x512xbf16> to vector<2x2x2x512xbf16>
    %17 = vector.shape_cast %16 : vector<2x2x2x512xbf16> to vector<8x512xbf16>
    %c1_16 = arith.constant 1 : index
    %c0_17 = arith.constant 0 : index
    %c0_18 = arith.constant 0 : index
    %c0_19 = arith.constant 0 : index
    %18 = vector.load %arg5[%c1_16, %c0_17, %c0_18, %c0_19] : memref<2x2x512x128xbf16, #tpu.memory_space<vmem>>, vector<1x1x512x128xbf16>
    %19 = vector.shape_cast %18 : vector<1x1x512x128xbf16> to vector<512x128xbf16>
    %cst_20 = arith.constant dense<0.000000e+00> : vector<8x128xf32>
    %20 = tpu.matmul %17, %19, %cst_20 {dimension_numbers = #tpu.dot_dimension_numbers<[1], [0], [0], [1], [0, 0, 1, 1], [], []>} : vector<8x512xbf16>, vector<512x128xbf16>, vector<8x128xf32> -> vector<8x128xf32>
    %21 = arith.addf %15, %20 : vector<8x128xf32>
    %22 = vector.extract_strided_slice %2 {offsets = [0, 1, 1, 0], sizes = [2, 2, 2, 512], strides = [1, 1, 1, 1]} : vector<2x3x3x512xbf16> to vector<2x2x2x512xbf16>
    %23 = vector.shape_cast %22 : vector<2x2x2x512xbf16> to vector<8x512xbf16>
    %c1_21 = arith.constant 1 : index
    %c1_22 = arith.constant 1 : index
    %c0_23 = arith.constant 0 : index
    %c0_24 = arith.constant 0 : index
    %24 = vector.load %arg5[%c1_21, %c1_22, %c0_23, %c0_24] : memref<2x2x512x128xbf16, #tpu.memory_space<vmem>>, vector<1x1x512x128xbf16>
    %25 = vector.shape_cast %24 : vector<1x1x512x128xbf16> to vector<512x128xbf16>
    %cst_25 = arith.constant dense<0.000000e+00> : vector<8x128xf32>
    %26 = tpu.matmul %23, %25, %cst_25 {dimension_numbers = #tpu.dot_dimension_numbers<[1], [0], [0], [1], [0, 0, 1, 1], [], []>} : vector<8x512xbf16>, vector<512x128xbf16>, vector<8x128xf32> -> vector<8x128xf32>
    %27 = arith.addf %21, %26 : vector<8x128xf32>
    %c0_26 = arith.constant 0 : index
    %c0_27 = arith.constant 0 : index
    %28 = vector.load %arg6[%c0_26, %c0_27] : memref<1x128xf32, #tpu.memory_space<vmem>>, vector<1x128xf32>
    %29 = vector.broadcast %28 : vector<1x128xf32> to vector<8x128xf32>
    %30 = arith.addf %27, %29 : vector<8x128xf32>
    %cst_28 = arith.constant 2.000000e-01 : f32
    %31 = vector.broadcast %cst_28 : f32 to vector<8x128xf32>
    %32 = arith.mulf %31, %30 : vector<8x128xf32>
    %33 = arith.maximumf %30, %32 : vector<8x128xf32>
    %34 = vector.shape_cast %33 : vector<8x128xf32> to vector<2x2x2x128xf32>
    %35 = arith.truncf %34 : vector<2x2x2x128xf32> to vector<2x2x2x128xbf16>
    %c0_29 = arith.constant 0 : index
    %c0_30 = arith.constant 0 : index
    %c0_31 = arith.constant 0 : index
    %c0_32 = arith.constant 0 : index
    %36 = vector.load %arg7[%c0_29, %c0_30, %c0_31, %c0_32] : memref<2x2x2x128xbf16, #tpu.memory_space<vmem>>, vector<2x2x2x128xbf16>
    tpu.vector_store %arg7[%c0_29, %c0_30, %c0_31, %c0_32], %35 {strides = array<i32>} : memref<2x2x2x128xbf16, #tpu.memory_space<vmem>>, vector<2x2x2x128xbf16>,
    return
  }
  func.func @transform_0(%arg0: i32, %arg1: i32, %arg2: i32) -> (i32, i32, i32, i32) {
    %c0_i32 = arith.constant 0 : i32
    %c0_i32_0 = arith.constant 0 : i32
    %c0_i32_1 = arith.constant 0 : i32
    return %arg1, %arg2, %c0_i32, %c0_i32_0 : i32, i32, i32, i32
  }
  func.func @transform_1(%arg0: i32, %arg1: i32, %arg2: i32) -> (i32, i32, i32, i32) {
    %c1_i32 = arith.constant 1 : i32
    %0 = arith.addi %arg2, %c1_i32 : i32
    %c2_i32 = arith.constant 2 : i32
    %1 = arith.muli %0, %c2_i32 : i32
    %c0_i32 = arith.constant 0 : i32
    %c0_i32_0 = arith.constant 0 : i32
    %c0_i32_1 = arith.constant 0 : i32
    return %arg1, %1, %c0_i32, %c0_i32_0 : i32, i32, i32, i32
  }
  func.func @transform_2(%arg0: i32, %arg1: i32, %arg2: i32) -> (i32, i32, i32, i32) {
    %c0_i32 = arith.constant 0 : i32
    %c0_i32_0 = arith.constant 0 : i32
    %c0_i32_1 = arith.constant 0 : i32
    %c0_i32_2 = arith.constant 0 : i32
    return %c0_i32, %c0_i32_0, %c0_i32_1, %arg0 : i32, i32, i32, i32
  }
  func.func @transform_3(%arg0: i32, %arg1: i32, %arg2: i32) -> (i32, i32) {
    %c0_i32 = arith.constant 0 : i32
    %c0_i32_0 = arith.constant 0 : i32
    return %c0_i32, %arg0 : i32, i32
  }
  func.func @transform_4(%arg0: i32, %arg1: i32, %arg2: i32) -> (i32, i32, i32, i32) {
    %c0_i32 = arith.constant 0 : i32
    %c0_i32_0 = arith.constant 0 : i32
    return %arg1, %arg2, %c0_i32, %arg0 : i32, i32, i32, i32
  }
}

module attributes {stable_mosaic.version = 11 : i64} {
  func.func @_conv_tile_kernel(%arg0: i32, %arg1: i32, %arg2: i32, %arg3: memref<2x1x2x512xbf16, #tpu.memory_space<vmem>>, %arg4: memref<2x1x2x512xbf16, #tpu.memory_space<vmem>>, %arg5: memref<2x2x512x128xbf16, #tpu.memory_space<vmem>>, %arg6: memref<1x128xf32, #tpu.memory_space<vmem>>, %arg7: memref<2x1x1x128xf32, #tpu.memory_space<vmem>>) attributes {dimension_semantics = [#tpu.dimension_semantics<parallel>, #tpu.dimension_semantics<parallel>, #tpu.dimension_semantics<parallel>], iteration_bounds = array<i64: 1, 1, 1>, scalar_prefetch = 0 : i64, scratch_operands = 0 : i64, tpu.core_type = #tpu.core_type<tc>, window_params = [{transform_indices = @transform_0, window_bounds = array<i64: 2, 1, 2, 512>}, {transform_indices = @transform_1, window_bounds = array<i64: 2, 1, 2, 512>}, {transform_indices = @transform_2, window_bounds = array<i64: 2, 2, 512, 128>}, {transform_indices = @transform_3, window_bounds = array<i64: 1, 128>}, {transform_indices = @transform_4, window_bounds = array<i64: 2, 1, 1, 128>}]} {
    %c0 = arith.constant 0 : index
    %c0_0 = arith.constant 0 : index
    %c0_1 = arith.constant 0 : index
    %c0_2 = arith.constant 0 : index
    %0 = vector.load %arg3[%c0, %c0_0, %c0_1, %c0_2] : memref<2x1x2x512xbf16, #tpu.memory_space<vmem>>, vector<2x1x2x512xbf16>
    %c0_3 = arith.constant 0 : index
    %c0_4 = arith.constant 0 : index
    %c0_5 = arith.constant 0 : index
    %c0_6 = arith.constant 0 : index
    %1 = vector.load %arg4[%c0_3, %c0_4, %c0_5, %c0_6] : memref<2x1x2x512xbf16, #tpu.memory_space<vmem>>, vector<2x1x2x512xbf16>
    %2 = tpu.concatenate %0, %1 in 1 : vector<2x1x2x512xbf16>, vector<2x1x2x512xbf16> -> vector<2x2x2x512xbf16>
    %cst = arith.constant 0.000000e+00 : f32
    %3 = vector.broadcast %cst : f32 to vector<2x128xf32>
    %4 = vector.extract_strided_slice %2 {offsets = [0, 0, 0, 0], sizes = [2, 1, 1, 512], strides = [1, 1, 1, 1]} : vector<2x2x2x512xbf16> to vector<2x1x1x512xbf16>
    %5 = vector.shape_cast %4 : vector<2x1x1x512xbf16> to vector<2x512xbf16>
    %c0_7 = arith.constant 0 : index
    %c0_8 = arith.constant 0 : index
    %c0_9 = arith.constant 0 : index
    %c0_10 = arith.constant 0 : index
    %6 = vector.load %arg5[%c0_7, %c0_8, %c0_9, %c0_10] : memref<2x2x512x128xbf16, #tpu.memory_space<vmem>>, vector<1x1x512x128xbf16>
    %7 = vector.shape_cast %6 : vector<1x1x512x128xbf16> to vector<512x128xbf16>
    %cst_11 = arith.constant dense<0.000000e+00> : vector<2x128xf32>
    %8 = tpu.matmul %5, %7, %cst_11 {dimension_numbers = #tpu.dot_dimension_numbers<[1], [0], [0], [1], [0, 0, 1, 1], [], []>} : vector<2x512xbf16>, vector<512x128xbf16>, vector<2x128xf32> -> vector<2x128xf32>
    %9 = arith.addf %3, %8 : vector<2x128xf32>
    %10 = vector.extract_strided_slice %2 {offsets = [0, 0, 1, 0], sizes = [2, 1, 1, 512], strides = [1, 1, 1, 1]} : vector<2x2x2x512xbf16> to vector<2x1x1x512xbf16>
    %11 = vector.shape_cast %10 : vector<2x1x1x512xbf16> to vector<2x512xbf16>
    %c0_12 = arith.constant 0 : index
    %c1 = arith.constant 1 : index
    %c0_13 = arith.constant 0 : index
    %c0_14 = arith.constant 0 : index
    %12 = vector.load %arg5[%c0_12, %c1, %c0_13, %c0_14] : memref<2x2x512x128xbf16, #tpu.memory_space<vmem>>, vector<1x1x512x128xbf16>
    %13 = vector.shape_cast %12 : vector<1x1x512x128xbf16> to vector<512x128xbf16>
    %cst_15 = arith.constant dense<0.000000e+00> : vector<2x128xf32>
    %14 = tpu.matmul %11, %13, %cst_15 {dimension_numbers = #tpu.dot_dimension_numbers<[1], [0], [0], [1], [0, 0, 1, 1], [], []>} : vector<2x512xbf16>, vector<512x128xbf16>, vector<2x128xf32> -> vector<2x128xf32>
    %15 = arith.addf %9, %14 : vector<2x128xf32>
    %16 = vector.extract_strided_slice %2 {offsets = [0, 1, 0, 0], sizes = [2, 1, 1, 512], strides = [1, 1, 1, 1]} : vector<2x2x2x512xbf16> to vector<2x1x1x512xbf16>
    %17 = vector.shape_cast %16 : vector<2x1x1x512xbf16> to vector<2x512xbf16>
    %c1_16 = arith.constant 1 : index
    %c0_17 = arith.constant 0 : index
    %c0_18 = arith.constant 0 : index
    %c0_19 = arith.constant 0 : index
    %18 = vector.load %arg5[%c1_16, %c0_17, %c0_18, %c0_19] : memref<2x2x512x128xbf16, #tpu.memory_space<vmem>>, vector<1x1x512x128xbf16>
    %19 = vector.shape_cast %18 : vector<1x1x512x128xbf16> to vector<512x128xbf16>
    %cst_20 = arith.constant dense<0.000000e+00> : vector<2x128xf32>
    %20 = tpu.matmul %17, %19, %cst_20 {dimension_numbers = #tpu.dot_dimension_numbers<[1], [0], [0], [1], [0, 0, 1, 1], [], []>} : vector<2x512xbf16>, vector<512x128xbf16>, vector<2x128xf32> -> vector<2x128xf32>
    %21 = arith.addf %15, %20 : vector<2x128xf32>
    %22 = vector.extract_strided_slice %2 {offsets = [0, 1, 1, 0], sizes = [2, 1, 1, 512], strides = [1, 1, 1, 1]} : vector<2x2x2x512xbf16> to vector<2x1x1x512xbf16>
    %23 = vector.shape_cast %22 : vector<2x1x1x512xbf16> to vector<2x512xbf16>
    %c1_21 = arith.constant 1 : index
    %c1_22 = arith.constant 1 : index
    %c0_23 = arith.constant 0 : index
    %c0_24 = arith.constant 0 : index
    %24 = vector.load %arg5[%c1_21, %c1_22, %c0_23, %c0_24] : memref<2x2x512x128xbf16, #tpu.memory_space<vmem>>, vector<1x1x512x128xbf16>
    %25 = vector.shape_cast %24 : vector<1x1x512x128xbf16> to vector<512x128xbf16>
    %cst_25 = arith.constant dense<0.000000e+00> : vector<2x128xf32>
    %26 = tpu.matmul %23, %25, %cst_25 {dimension_numbers = #tpu.dot_dimension_numbers<[1], [0], [0], [1], [0, 0, 1, 1], [], []>} : vector<2x512xbf16>, vector<512x128xbf16>, vector<2x128xf32> -> vector<2x128xf32>
    %27 = arith.addf %21, %26 : vector<2x128xf32>
    %c0_26 = arith.constant 0 : index
    %c0_27 = arith.constant 0 : index
    %28 = vector.load %arg6[%c0_26, %c0_27] : memref<1x128xf32, #tpu.memory_space<vmem>>, vector<1x128xf32>
    %29 = vector.broadcast %28 : vector<1x128xf32> to vector<2x128xf32>
    %30 = arith.addf %27, %29 : vector<2x128xf32>
    %31 = vector.shape_cast %30 : vector<2x128xf32> to vector<2x1x1x128xf32>
    %c0_28 = arith.constant 0 : index
    %c0_29 = arith.constant 0 : index
    %c0_30 = arith.constant 0 : index
    %c0_31 = arith.constant 0 : index
    %32 = vector.load %arg7[%c0_28, %c0_29, %c0_30, %c0_31] : memref<2x1x1x128xf32, #tpu.memory_space<vmem>>, vector<2x1x1x128xf32>
    tpu.vector_store %arg7[%c0_28, %c0_29, %c0_30, %c0_31], %31 {strides = array<i32>} : memref<2x1x1x128xf32, #tpu.memory_space<vmem>>, vector<2x1x1x128xf32>,
    return
  }
  func.func @transform_0(%arg0: i32, %arg1: i32, %arg2: i32) -> (i32, i32, i32, i32) {
    %c0_i32 = arith.constant 0 : i32
    %c0_i32_0 = arith.constant 0 : i32
    %c0_i32_1 = arith.constant 0 : i32
    return %arg1, %arg2, %c0_i32, %c0_i32_0 : i32, i32, i32, i32
  }
  func.func @transform_1(%arg0: i32, %arg1: i32, %arg2: i32) -> (i32, i32, i32, i32) {
    %c1_i32 = arith.constant 1 : i32
    %0 = arith.addi %arg2, %c1_i32 : i32
    %c1_i32_0 = arith.constant 1 : i32
    %1 = arith.muli %0, %c1_i32_0 : i32
    %c0_i32 = arith.constant 0 : i32
    %c0_i32_1 = arith.constant 0 : i32
    %c0_i32_2 = arith.constant 0 : i32
    return %arg1, %1, %c0_i32, %c0_i32_1 : i32, i32, i32, i32
  }
  func.func @transform_2(%arg0: i32, %arg1: i32, %arg2: i32) -> (i32, i32, i32, i32) {
    %c0_i32 = arith.constant 0 : i32
    %c0_i32_0 = arith.constant 0 : i32
    %c0_i32_1 = arith.constant 0 : i32
    %c0_i32_2 = arith.constant 0 : i32
    return %c0_i32, %c0_i32_0, %c0_i32_1, %arg0 : i32, i32, i32, i32
  }
  func.func @transform_3(%arg0: i32, %arg1: i32, %arg2: i32) -> (i32, i32) {
    %c0_i32 = arith.constant 0 : i32
    %c0_i32_0 = arith.constant 0 : i32
    return %c0_i32, %arg0 : i32, i32
  }
  func.func @transform_4(%arg0: i32, %arg1: i32, %arg2: i32) -> (i32, i32, i32, i32) {
    %c0_i32 = arith.constant 0 : i32
    %c0_i32_0 = arith.constant 0 : i32
    return %arg1, %arg2, %c0_i32, %arg0 : i32, i32, i32, i32
  }
}

</mosaic_0001>

<bundles_post_ra>
// kernel: fc_discriminator_forward.5
= control target key start
LH: loop header
LB: loop body
LE: loop exit
PB: predicated region body
PF: predicated region fallthrough
CT: control target
= control target key end

     0   :  { %s2907_s15 = smov 0   ;;  %s2909_s16 = smov 0   ;;  %s3451_s0 = inlined_call_operand.vmem [shape: bf16[2,17,17,16], index: 0, kind: input, shape index: {}, may-alias: {0,1}]   ;;  %s3452_s1 = inlined_call_operand.vmem [shape: bf16[2,17,17,16], index: 1, kind: input, shape index: {}, may-alias: {0,1}]   ;;  %s3453_s2 = inlined_call_operand.vmem [shape: bf16[2,2,16,128], index: 2, kind: input, shape index: {}]   ;;  %s3454_s3 = inlined_call_operand.vmem [shape: f32[1,128], index: 3, kind: input, shape index: {}]   ;;  %s3455_s4 = inlined_call_operand.vmem [shape: bf16[2,16,16,128], index: 4, kind: output, shape index: {}]  }
   0x1   :  { %s2911_s17 = smov 0  }
   0x2 LB: > { %s29_s18 = sadd.s32 1, %s2876_s16  ;;  %p2232_p0 = scmp.ge.s32.totalorder %s2880_s17, 1  ;;  %s2880_s17 = sphi %s2911_s17, %s14_s17   ;;  %s2876_s16 = sphi %s2909_s16, %s3459_s16   ;;  %s2872_s15 = sphi %s2907_s15, %s3458_s15  }
   0x3   : > { %p31_p1 = scmp.ge.s32.totalorder %s29_s18, 2  ;;  %p244_p2 = scmp.lt.s32.totalorder %s2880_s17, 3 }
   0x5   : > { %s3461_s18 = smov (%p31_p1, %s29_s18), 0  ;;  %p245_p3 = pnand %p2232_p0, %p244_p2 }
   0x6   : > { %v2837_v0 = vld [vmem:[%s3453_s2 + $0x10] sm:$0xff] (!%p245_p3)   ;;  %p312_p4 = scmp.lt.s32.totalorder (!%p245_p3), %s2872_s15, 1  ;;  %v2840_v1 = vld [vmem:[%s3453_s2 + $0x8] sm:$0xff] (!%p245_p3)   ;;  %v2936_v2 = vld [vmem:[%s3453_s2] sm:$0xff] (!%p245_p3)   ;;  %vm859_vm0 = vcmask (!%p245_p3), 130048  }
   0x7   : > { %248 = sbr.rel (%p245_p3) target bundleno = 389 (0x185), region = 36  ;;  %2646 = vmatprep.subr.bf16.mxu0 (!%p245_p3), %v2837_v0  ;;  %2578 = vmatprep.subr.bf16.mxu1 (!%p245_p3), %v2840_v1  ;;  %v2844_v3 = vld [vmem:[%s3453_s2 + $0x18] sm:$0xff] (!%p245_p3)   ;;  %vm415_vm1 = vsmask.f32 (!%p245_p3), 3328  ;;  %vm416_vm2 = vsmask.f32 (!%p245_p3), 7440 }
   0x8   : > { %2647 = vmatpush3.bf16.msra.mxu0 (!%p245_p3), %v2837_v0  ;;  %2579 = vmatpush3.bf16.msra.mxu1 (!%p245_p3), %v2840_v1  ;;  %vm3001_vm3 = vmor (!%p245_p3), %vm415_vm1, %vm416_vm2 }
   0x9   : > { %2612 = vmatprep.subr.bf16.mxu1 (!%p245_p3), %v2936_v2  ;;  %2680 = vmatprep.subr.bf16.mxu0 (!%p245_p3), %v2844_v3 }
   0xe   : > { %s3463_s15 = smov (!%p312_p4, %s2872_s15), 1 }
   0xf   : > { %s2810_s25 = smul.u32 204, %s3463_s15  ;;  %s2382_s11 = sshll.u32 %s3463_s15, 7 }
  0x10   : > { %s3396_s14 = scalar_lea.vmem %s3455_s4, %s2382_s11 }
  0x11   : > { %s2948_s30 = scalar_lea.vmem %s3451_s0, %s2810_s25  ;;  %s2381_s5 = sadd.s32 192, %s2810_s25 }
  0x12   : > { %v365_v4 = vld [vmem:[%s2948_s30 + $0xc] sm:$0xf]  ;;  %v366_v5 = vld [vmem:[%s2948_s30 + $0x10] sm:$0xf]  ;;  %v368_v6 = vld [vmem:[%s2948_s30 + $0x18] sm:$0xf]  ;;  %s3241_s8 = scalar_lea.vmem %s3452_s1, %s2381_s5 }
  0x13   : > { %v443_v7 = vshrl.u32 %v365_v4, 16  ;;  %v446_v8 = vshll.u32 %v365_v4, 16  ;;  %v452_v9 = vshll.u32 %v366_v5, 16  ;;  %v456_v10 = vshrl.u32 %v366_v5, 16  ;;  %v369_v11 = vld [vmem:[%s2948_s30 + $0x1c] sm:$0xf] }
  0x14   : > { %v2954_v12 = vcombine.low %v365_v4, %v366_v5  ;;  %v467_v13 = vshrl.u32 %v368_v6, 16  ;;  %v470_v14 = vshll.u32 %v368_v6, 16  ;;  %v476_v15 = vshll.u32 %v369_v11, 16  ;;  %v371_v20 = vld [vmem:[%s2948_s30 + $0x24] sm:$0xf] }
  0x15   : > { %v445_v16 = vrot.slane %v443_v7, 4  ;;  %v448_v17 = vrot.slane %v446_v8, 5  ;;  %v2956_v18 = vrot.slane %v452_v9, 5  ;;  %v458_v19 = vrot.slane %v456_v10, 4  ;;  %v372_v21 = vld [vmem:[%s2948_s30 + $0x28] sm:$0xf] }
  0x16   : > { %2648 = vmatprep.mubr.msk.bf16.mxu0 %vm859_vm0, %v2954_v12  ;;  %v2962_v22 = vrot.slane %v467_v13, 4  ;;  %v2964_v23 = vcombine.low %v368_v6, %v369_v11  ;;  %v2967_v24 = vld [vmem:[%s2948_s30] sm:$0xf]  ;;  %v2969_v26 = vrot.slane %v470_v14, 5  ;;  %v480_v27 = vshrl.u32 %v369_v11, 16 }
  0x17   : > { %v449_v25 = vor.u32 %v448_v17, %v445_v16  ;;  %v2972_v28 = vld [vmem:[%s2948_s30 + $0x4] sm:$0xf]  ;;  %v364_v29 = vld [vmem:[%s2948_s30 + $0x8] sm:$0x1]  ;;  %v459_v30 = vor.u32 %v458_v19, %v2956_v18  ;;  %v2976_v31 = vrot.slane %v476_v15, 5  ;;  %v491_v32 = vshrl.u32 %v371_v20, 16 }
  0x18   : > { %2649 = vmatmul.mubr.msk.bf16.vlgmr.msra.gmra.mrb[0].mxu0 %vm859_vm0, %v2964_v23  ;;  %v2980_v33 = vcombine.low %v371_v20, %v372_v21  ;;  %v494_v34 = vshll.u32 %v371_v20, 16  ;;  %v500_v35 = vshll.u32 %v372_v21, 16  ;;  %v504_v36 = vshrl.u32 %v372_v21, 16  ;;  %v374_v42 = vld [vmem:[%s2948_s30 + $0x30] sm:$0xf] }
  0x19   : > { %v419_v37 = vshrl.u32 %v2967_v24, 16  ;;  %2681 = vmatpush3.bf16.msra.mxu0 %v2844_v3  ;;  %v422_v38 = vshll.u32 %v2967_v24, 16  ;;  %v428_v39 = vshll.u32 %v2972_v28, 16  ;;  %v432_v40 = vshrl.u32 %v2972_v28, 16  ;;  %v375_v46 = vld [vmem:[%s2948_s30 + $0x34] sm:$0xf] }
  0x1a   : > { %2652 = vmatprep.mubr.msk.bf16.mxu0 %vm859_vm0, %v2980_v33  ;;  %v438_v41 = vshll.u32 %v364_v29, 16  ;;  %v450_v43 = vrot.slane %v449_v25, 4  ;;  %v482_v44 = vrot.slane %v480_v27, 4  ;;  %v515_v47 = vshrl.u32 %v374_v42, 16  ;;  %v367_v52 = vld [vmem:[%s2948_s30 + $0x14] sm:$0x1] }
  0x1b   : > { %v421_v45 = vrot.slane %v419_v37, 4  ;;  %v460_v48 = vrot.slane %v459_v30, 4  ;;  %v424_v49 = vrot.slane %v422_v38, 5  ;;  %v430_v50 = vrot.slane %v428_v39, 5  ;;  %v377_v62 = vld [vmem:[%s2948_s30 + $0x3c] sm:$0xf] }
  0x1c   : > { %v434_v51 = vrot.slane %v432_v40, 4  ;;  %v2991_v53 = vrot.slane %v491_v32, 4  ;;  %v2993_v54 = vrot.slane %v494_v34, 5  ;;  %v2995_v55 = vrot.slane %v500_v35, 5  ;;  %v378_v63 = vld [vmem:[%s2948_s30 + $0x40] sm:$0xf] }
  0x1d   : > { %v2997_v56 = vrot.slane %v504_v36, 4  ;;  %v425_v58 = vor.u32 %v424_v49, %v421_v45  ;;  %v440_v60 = vrot.slane %v438_v41, 5  ;;  %v3005_v61 = vcombine.low %v374_v42, %v375_v46  ;;  %v370_v14 = vld [vmem:[%s2948_s30 + $0x20] sm:$0x1]  ;;  %v380_v27 = vld [vmem:[%s2948_s30 + $0x48] sm:$0xf] }
  0x1e   : > { %v435_v59 = vor.u32 %v434_v51, %v430_v50  ;;  %v3009_v0 = vrot.slane %v515_v47, 4  ;;  %v518_v1 = vshll.u32 %v374_v42, 16  ;;  %v524_v3 = vshll.u32 %v375_v46, 16  ;;  %v381_v29 = vld [vmem:[%s2948_s30 + $0x4c] sm:$0xf] }
  0x1f   : > { %v462_v4 = vshll.u32 %v367_v52, 16  ;;  %v426_v5 = vrot.slane %v425_v58, 4  ;;  %v528_v7 = vshrl.u32 %v375_v46, 16  ;;  %v455_v8 = vsel %vm3001_vm3, %v450_v43, %v2956_v18  ;;  %v373_v40 = vld [vmem:[%s2948_s30 + $0x2c] sm:$0x1] }
  0x20   : > { %v436_v6 = vrot.slane %v435_v59, 4  ;;  %2653 = vmatmul.mubr.msk.bf16.gmra.mrb[4].mxu0 %vm859_vm0, %v3005_v61  ;;  %v539_v10 = vshrl.u32 %v377_v62, 16  ;;  %v542_v11 = vshll.u32 %v377_v62, 16  ;;  %v3016_v13 = vcombine.low %v377_v62, %v378_v63  ;;  %v383_v47 = vld [vmem:[%s2948_s30 + $0x54] sm:$0xf] }
  0x21   : > { %v464_v9 = vrot.slane %v462_v4, 5  ;;  %v431_v15 = vsel %vm3001_vm3, %v426_v5, %v430_v50  ;;  %v548_v17 = vshll.u32 %v378_v63, 16  ;;  %v552_v19 = vshrl.u32 %v378_v63, 16  ;;  %v384_v51 = vld [vmem:[%s2948_s30 + $0x58] sm:$0xf] }
  0x22   : > { %v441_v16 = vsel %vm3001_vm3, %v436_v6, %v440_v60  ;;  %2656 = vmatprep.mubr.msk.bf16.mxu0 %vm859_vm0, %v3016_v13  ;;  %v473_v21 = vor.u32 %v2969_v26, %v2962_v22  ;;  %v483_v25 = vor.u32 %v482_v44, %v2976_v31  ;;  %v520_v30 = vrot.slane %v518_v1, 5  ;;  %v376_v63 = vld [vmem:[%s2948_s30 + $0x38] sm:$0x1] }
  0x23   : > { %v2239_v20 = vcombine.low %v431_v15, %v441_v16  ;;  %v465_v18 = vsel %vm3001_vm3, %v460_v48, %v464_v9  ;;  %v3032_v32 = vrot.slane %v524_v3, 5  ;;  %v486_v35 = vshll.u32 %v370_v14, 16  ;;  %v386_v9 = vld [vmem:[%s2948_s30 + $0x60] sm:$0xf] }
  0x24   : > { %v3034_v34 = vcombine.low %v455_v8, %v465_v18  ;;  %v530_v36 = vrot.slane %v528_v7, 4  ;;  %v3037_v37 = vrot.slane %v539_v10, 4  ;;  %v474_v38 = vrot.slane %v473_v21, 4  ;;  %v387_v10 = vld [vmem:[%s2948_s30 + $0x64] sm:$0xf] }
  0x25   : > { %2580 = vmatprep.mubr.msk.bf16.mxu1 %vm859_vm0, %v2239_v20  ;;  %v484_v39 = vrot.slane %v483_v25, 4  ;;  %v3042_v22 = vrot.slane %v542_v11, 5  ;;  %v488_v26 = vrot.slane %v486_v35, 5  ;;  %v563_v41 = vshrl.u32 %v380_v27, 16 }
  0x26   : > { %2581 = vmatmul.mubr.msk.bf16.vlgmr.msra.gmra.mrb[0].mxu1 %vm859_vm0, %v3034_v34  ;;  %v3044_v42 = vcombine.low %v380_v27, %v381_v29  ;;  %v3047_v43 = vrot.slane %v548_v17, 5  ;;  %v554_v44 = vrot.slane %v552_v19, 4  ;;  %v479_v45 = vsel %vm3001_vm3, %v474_v38, %v2976_v31  ;;  %v389_v38 = vld [vmem:[%s2948_s30 + $0x6c] sm:$0xf] }
  0x27   : > { %2613 = vmatpush3.bf16.msra.mxu1 %v2936_v2  ;;  %v497_v46 = vor.u32 %v2993_v54, %v2991_v53  ;;  %v489_v48 = vsel %vm3001_vm3, %v484_v39, %v488_v26  ;;  %v566_v49 = vshll.u32 %v380_v27, 16  ;;  %v507_v2 = vor.u32 %v2997_v56, %v2995_v55 }
  0x28   : > { %2657 = vmatmul.mubr.msk.bf16.gmra.mrb[8].mxu0 %vm859_vm0, %v3044_v42  ;;  %v510_v50 = vshll.u32 %v373_v40, 16  ;;  %v3062_v52 = vcombine.low %v479_v45, %v489_v48  ;;  %v572_v31 = vshll.u32 %v381_v29, 16  ;;  %v576_v58 = vshrl.u32 %v381_v29, 16  ;;  %v390_v45 = vld [vmem:[%s2948_s30 + $0x70] sm:$0xf] }
  0x29   : > { %v498_v53 = vrot.slane %v497_v46, 4  ;;  %v3064_v54 = vrot.slane %v563_v41, 4  ;;  %v508_v59 = vrot.slane %v507_v2, 4  ;;  %v587_v62 = vshrl.u32 %v383_v47, 16 }
  0x2a   : > { %v512_v60 = vrot.slane %v510_v50, 5  ;;  %2584 = vmatprep.mubr.msk.bf16.mxu1 %vm859_vm0, %v3062_v52  ;;  %v590_v1 = vshll.u32 %v383_v47, 16  ;;  %v596_v3 = vshll.u32 %v384_v51, 16  ;;  %v3072_v4 = vcombine.low %v383_v47, %v384_v51  ;;  %v382_v50 = vld [vmem:[%s2948_s30 + $0x50] sm:$0x1] }
  0x2b   : > { %v503_v56 = vsel %vm3001_vm3, %v498_v53, %v2995_v55  ;;  %v600_v6 = vshrl.u32 %v384_v51, 16  ;;  %v521_v7 = vor.u32 %v520_v30, %v3009_v0  ;;  %v531_v8 = vor.u32 %v530_v36, %v3032_v32  ;;  %v379_v0 = vld [vmem:[%s2948_s30 + $0x44] sm:$0x1] }
  0x2c   : > { %v513_v5 = vsel %vm3001_vm3, %v508_v59, %v512_v60  ;;  %v568_v11 = vrot.slane %v566_v49, 5  ;;  %v3080_v14 = vrot.slane %v572_v31, 5  ;;  %2660 = vmatprep.mubr.msk.bf16.mxu0 %vm859_vm0, %v3072_v4  ;;  %v534_v55 = vshll.u32 %v376_v63, 16  ;;  %v392_v63 = vld [vmem:[%s2948_s30 + $0x78] sm:$0xf] }
  0x2d   : > { %v3082_v15 = vcombine.low %v503_v56, %v513_v5  ;;  %v578_v16 = vrot.slane %v576_v58, 4  ;;  %v3086_v17 = vrot.slane %v587_v62, 4  ;;  %v522_v19 = vrot.slane %v521_v7, 4  ;;  %v393_v56 = vld [vmem:[%s2948_s30 + $0x7c] sm:$0xf] }
  0x2e   : > { %v532_v20 = vrot.slane %v531_v8, 4  ;;  %v3091_v18 = vrot.slane %v590_v1, 5  ;;  %v536_v21 = vrot.slane %v534_v55, 5  ;;  %v611_v25 = vshrl.u32 %v386_v9, 16 }
  0x2f   : > { %2585 = vmatmul.mubr.msk.bf16.gmra.mrb[4].mxu1 %vm859_vm0, %v3082_v15  ;;  %v3093_v27 = vcombine.low %v386_v9, %v387_v10  ;;  %v3095_v29 = vrot.slane %v596_v3, 5  ;;  %v602_v30 = vrot.slane %v600_v6, 4  ;;  %v527_v35 = vsel %vm3001_vm3, %v522_v19, %v3032_v32 }
  0x30   : > { %v545_v36 = vor.u32 %v3042_v22, %v3037_v37  ;;  %v537_v39 = vsel %vm3001_vm3, %v532_v20, %v536_v21  ;;  %v614_v40 = vshll.u32 %v386_v9, 16  ;;  %v555_v26 = vor.u32 %v554_v44, %v3047_v43 }
  0x31   : > { %2661 = vmatmul.mubr.msk.bf16.gmra.mrb[12].mxu0 %vm859_vm0, %v3093_v27  ;;  %v558_v41 = vshll.u32 %v379_v0, 16  ;;  %v3109_v46 = vcombine.low %v527_v35, %v537_v39  ;;  %v620_v47 = vshll.u32 %v387_v10, 16  ;;  %v624_v32 = vshrl.u32 %v387_v10, 16 }
  0x32   : > { %v546_v48 = vrot.slane %v545_v36, 4  ;;  %v3111_v37 = vrot.slane %v611_v25, 4  ;;  %v556_v22 = vrot.slane %v555_v26, 4  ;;  %v635_v2 = vshrl.u32 %v389_v38, 16  ;;  %v395_v25 = vld [vmem:[%s2948_s30 + $0x84] sm:$0xf] }
  0x33   : > { %v560_v49 = vrot.slane %v558_v41, 5  ;;  %2588 = vmatprep.mubr.msk.bf16.mxu1 %vm859_vm0, %v3109_v46  ;;  %v638_v51 = vshll.u32 %v389_v38, 16  ;;  %v644_v31 = vshll.u32 %v390_v45, 16  ;;  %v3119_v58 = vcombine.low %v389_v38, %v390_v45 }
  0x34   : > { %v551_v44 = vsel %vm3001_vm3, %v546_v48, %v3047_v43  ;;  %v648_v59 = vshrl.u32 %v390_v45, 16  ;;  %v569_v60 = vor.u32 %v568_v11, %v3064_v54  ;;  %v579_v62 = vor.u32 %v578_v16, %v3080_v14  ;;  %v385_v54 = vld [vmem:[%s2948_s30 + $0x5c] sm:$0x1]  ;;  %v388_v48 = vld [vmem:[%s2948_s30 + $0x68] sm:$0x1] }
  0x35   : > { %v561_v53 = vsel %vm3001_vm3, %v556_v22, %v560_v49  ;;  %v616_v1 = vrot.slane %v614_v40, 5  ;;  %v3127_v3 = vrot.slane %v620_v47, 5  ;;  %2664 = vmatprep.mubr.msk.bf16.mxu0 %vm859_vm0, %v3119_v58  ;;  %v582_v43 = vshll.u32 %v382_v50, 16  ;;  %v396_v40 = vld [vmem:[%s2948_s30 + $0x88] sm:$0xf] }
  0x36   : > { %v3129_v5 = vcombine.low %v551_v44, %v561_v53  ;;  %v626_v6 = vrot.slane %v624_v32, 4  ;;  %v3133_v7 = vrot.slane %v635_v2, 4  ;;  %v570_v8 = vrot.slane %v569_v60, 4  ;;  %v398_v53 = vld [vmem:[%s2948_s30 + $0x90] sm:$0xf] }
  0x37   : > { %v580_v9 = vrot.slane %v579_v62, 4  ;;  %v3138_v10 = vrot.slane %v638_v51, 5  ;;  %v584_v11 = vrot.slane %v582_v43, 5  ;;  %v659_v55 = vshrl.u32 %v392_v63, 16 }
  0x38   : > { %2589 = vmatmul.mubr.msk.bf16.gmra.mrb[8].mxu1 %vm859_vm0, %v3129_v5  ;;  %v3140_v16 = vcombine.low %v392_v63, %v393_v56  ;;  %v3142_v19 = vrot.slane %v644_v31, 5  ;;  %v650_v20 = vrot.slane %v648_v59, 4  ;;  %v575_v0 = vsel %vm3001_vm3, %v570_v8, %v3080_v14  ;;  %v399_v59 = vld [vmem:[%s2948_s30 + $0x94] sm:$0xf] }
  0x39   : > { %v593_v21 = vor.u32 %v3091_v18, %v3086_v17  ;;  %v585_v35 = vsel %vm3001_vm3, %v580_v9, %v584_v11  ;;  %v662_v36 = vshll.u32 %v392_v63, 16  ;;  %v603_v38 = vor.u32 %v602_v30, %v3095_v29 }
  0x3a   : > { %2665 = vmatmul.mubr.msk.bf16.gmra.mrb[16].mxu0 %vm859_vm0, %v3140_v16  ;;  %v606_v39 = vshll.u32 %v385_v54, 16  ;;  %v3156_v26 = vcombine.low %v575_v0, %v585_v35  ;;  %v668_v41 = vshll.u32 %v393_v56, 16  ;;  %v672_v14 = vshrl.u32 %v393_v56, 16  ;;  %v401_v35 = vld [vmem:[%s2948_s30 + $0x9c] sm:$0xf] }
  0x3b   : > { %v594_v45 = vrot.slane %v593_v21, 4  ;;  %v3158_v17 = vrot.slane %v659_v55, 4  ;;  %v604_v18 = vrot.slane %v603_v38, 4  ;;  %v683_v32 = vshrl.u32 %v395_v25, 16 }
  0x3c   : > { %v608_v47 = vrot.slane %v606_v39, 5  ;;  %2592 = vmatprep.mubr.msk.bf16.mxu1 %vm859_vm0, %v3156_v26  ;;  %v686_v22 = vshll.u32 %v395_v25, 16  ;;  %v692_v49 = vshll.u32 %v396_v40, 16  ;;  %v3166_v2 = vcombine.low %v395_v25, %v396_v40 }
  0x3d   : > { %v599_v30 = vsel %vm3001_vm3, %v594_v45, %v3095_v29  ;;  %v696_v44 = vshrl.u32 %v396_v40, 16  ;;  %v617_v51 = vor.u32 %v616_v1, %v3111_v37  ;;  %v627_v31 = vor.u32 %v626_v6, %v3127_v3  ;;  %v391_v37 = vld [vmem:[%s2948_s30 + $0x74] sm:$0x1] }
  0x3e   : > { %v609_v50 = vsel %vm3001_vm3, %v604_v18, %v608_v47  ;;  %v664_v60 = vrot.slane %v662_v36, 5  ;;  %v3174_v62 = vrot.slane %v668_v41, 5  ;;  %2668 = vmatprep.mubr.msk.bf16.mxu0 %vm859_vm0, %v3166_v2  ;;  %v630_v29 = vshll.u32 %v388_v48, 16  ;;  %v402_v41 = vld [vmem:[%s2948_s30 + $0xa0] sm:$0xf] }
  0x3f   : > { %v3176_v63 = vcombine.low %v599_v30, %v609_v50  ;;  %v674_v56 = vrot.slane %v672_v14, 4  ;;  %v3180_v43 = vrot.slane %v683_v32, 4  ;;  %v618_v8 = vrot.slane %v617_v51, 4  ;;  %v394_v48 = vld [vmem:[%s2948_s30 + $0x80] sm:$0x1] }
  0x40   : > { %v628_v9 = vrot.slane %v627_v31, 4  ;;  %v3185_v1 = vrot.slane %v686_v22, 5  ;;  %v632_v6 = vrot.slane %v630_v29, 5  ;;  %v707_v54 = vshrl.u32 %v398_v53, 16 }
  0x41   : > { %2593 = vmatmul.mubr.msk.bf16.gmra.mrb[12].mxu1 %vm859_vm0, %v3176_v63  ;;  %v3187_v11 = vcombine.low %v398_v53, %v399_v59  ;;  %v3189_v55 = vrot.slane %v692_v49, 5  ;;  %v3191_v0 = vrot.slane %v696_v44, 4  ;;  %v623_v21 = vsel %vm3001_vm3, %v618_v8, %v3127_v3 }
  0x42   : > { %v641_v25 = vor.u32 %v3138_v10, %v3133_v7  ;;  %v633_v36 = vsel %vm3001_vm3, %v628_v9, %v632_v6  ;;  %v710_v38 = vshll.u32 %v398_v53, 16  ;;  %v651_v39 = vor.u32 %v650_v20, %v3142_v19  ;;  %v404_v53 = vld [vmem:[%s2948_s30 + $0xa8] sm:$0xf] }
  0x43   : > { %2669 = vmatmul.mubr.msk.bf16.gmra.mrb[20].mxu0 %vm859_vm0, %v3187_v11  ;;  %v654_v40 = vshll.u32 %v391_v37, 16  ;;  %v3205_v14 = vcombine.low %v623_v21, %v633_v36  ;;  %v716_v45 = vshll.u32 %v399_v59, 16  ;;  %v720_v3 = vshrl.u32 %v399_v59, 16  ;;  %v405_v59 = vld [vmem:[%s2948_s30 + $0xac] sm:$0xf] }
  0x44   : > { %v642_v18 = vrot.slane %v641_v25, 4  ;;  %v3207_v7 = vrot.slane %v707_v54, 4  ;;  %v652_v10 = vrot.slane %v651_v39, 4  ;;  %v731_v32 = vshrl.u32 %v401_v35, 16 }
  0x45   : > { %v656_v47 = vrot.slane %v654_v40, 5  ;;  %2596 = vmatprep.mubr.msk.bf16.mxu1 %vm859_vm0, %v3205_v14  ;;  %v734_v30 = vshll.u32 %v401_v35, 16  ;;  %v740_v22 = vshll.u32 %v402_v41, 16  ;;  %v3215_v49 = vcombine.low %v401_v35, %v402_v41 }
  0x46   : > { %v647_v20 = vsel %vm3001_vm3, %v642_v18, %v3142_v19  ;;  %v744_v44 = vshrl.u32 %v402_v41, 16  ;;  %v665_v51 = vor.u32 %v664_v60, %v3158_v17  ;;  %v675_v31 = vor.u32 %v674_v56, %v3174_v62  ;;  %v397_v56 = vld [vmem:[%s2948_s30 + $0x8c] sm:$0x1]  ;;  %v407_v41 = vld [vmem:[%s2948_s30 + $0xb4] sm:$0xf] }
  0x47   : > { %v657_v50 = vsel %vm3001_vm3, %v652_v10, %v656_v47  ;;  %v712_v29 = vrot.slane %v710_v38, 5  ;;  %v3225_v8 = vrot.slane %v716_v45, 5  ;;  %2672 = vmatprep.mubr.msk.bf16.mxu0 %vm859_vm0, %v3215_v49  ;;  %v678_v9 = vshll.u32 %v394_v48, 16  ;;  %v408_v47 = vld [vmem:[%s2948_s30 + $0xb8] sm:$0xf] }
  0x48   : > { %v3227_v19 = vcombine.low %v647_v20, %v657_v50  ;;  %v722_v37 = vrot.slane %v720_v3, 4  ;;  %v3231_v6 = vrot.slane %v731_v32, 4  ;;  %v666_v17 = vrot.slane %v665_v51, 4  ;;  %v400_v32 = vld [vmem:[%s2948_s30 + $0x98] sm:$0x1] }
  0x49   : > { %v676_v60 = vrot.slane %v675_v31, 4  ;;  %v736_v54 = vrot.slane %v734_v30, 5  ;;  %v680_v21 = vrot.slane %v678_v9, 5  ;;  %v755_v25 = vshrl.u32 %v404_v53, 16  ;;  %v3265_v51 = vld [vmem:[%s3241_s8 + $0x4] sm:$0xf] }
  0x4a   : > { %2597 = vmatmul.mubr.msk.bf16.gmra.mrb[16].mxu1 %vm859_vm0, %v3227_v19  ;;  %v3236_v35 = vcombine.low %v404_v53, %v405_v59  ;;  %v3243_v36 = vrot.slane %v740_v22, 5  ;;  %v746_v38 = vrot.slane %v744_v44, 4  ;;  %v671_v39 = vsel %vm3001_vm3, %v666_v17, %v3174_v62 }
  0x4b   : > { %v689_v40 = vor.u32 %v3185_v1, %v3180_v43  ;;  %v681_v45 = vsel %vm3001_vm3, %v676_v60, %v680_v21  ;;  %v758_v3 = vshll.u32 %v404_v53, 16  ;;  %v699_v18 = vor.u32 %v3191_v0, %v3189_v55  ;;  %v3262_v1 = vld [vmem:[%s3241_s8] sm:$0xf] }
  0x4c   : > { %2673 = vmatmul.mubr.msk.bf16.gmra.mrb[24].mxu0 %vm859_vm0, %v3236_v35  ;;  %v702_v10 = vshll.u32 %v397_v56, 16  ;;  %v3259_v48 = vcombine.low %v671_v39, %v681_v45  ;;  %v764_v62 = vshll.u32 %v405_v59, 16  ;;  %v768_v20 = vshrl.u32 %v405_v59, 16 }
  0x4d   : > { %v690_v43 = vrot.slane %v689_v40, 4  ;;  %v757_v30 = vrot.slane %v755_v25, 4  ;;  %v700_v22 = vrot.slane %v699_v18, 4  ;;  %v779_v44 = vshrl.u32 %v407_v41, 16 }
  0x4e   : > { %v704_v50 = vrot.slane %v702_v10, 5  ;;  %2600 = vmatprep.mubr.msk.bf16.mxu1 %vm859_vm0, %v3259_v48  ;;  %v782_v31 = vshll.u32 %v407_v41, 16  ;;  %v788_v53 = vshll.u32 %v408_v47, 16  ;;  %v3272_v59 = vcombine.low %v407_v41, %v408_v47  ;;  %v403_v10 = vld [vmem:[%s2948_s30 + $0xa4] sm:$0x1] }
  0x4f   : > { %v695_v0 = vsel %vm3001_vm3, %v690_v43, %v3189_v55  ;;  %v792_v17 = vshrl.u32 %v408_v47, 16  ;;  %v713_v60 = vor.u32 %v712_v29, %v3207_v7  ;;  %v723_v56 = vor.u32 %v722_v37, %v3225_v8 }
  0x50   : > { %v705_v9 = vsel %vm3001_vm3, %v700_v22, %v704_v50  ;;  %v760_v21 = vrot.slane %v758_v3, 5  ;;  %2676 = vmatprep.mubr.msk.bf16.mxu0 %vm859_vm0, %v3272_v59  ;;  %v726_v55 = vshll.u32 %v400_v32, 16  ;;  %v2307_v39 = vcombine.low %v3262_v1, %v3265_v51 }
  0x51   : > { %v3278_v25 = vcombine.low %v695_v0, %v705_v9  ;;  %v766_v40 = vrot.slane %v764_v62, 5  ;;  %v770_v41 = vrot.slane %v768_v20, 4  ;;  %v714_v45 = vrot.slane %v713_v60, 4  ;;  %v406_v20 = vld [vmem:[%s2948_s30 + $0xb0] sm:$0x1] }
  0x52   : > { %v724_v18 = vrot.slane %v723_v56, 4  ;;  %v781_v7 = vrot.slane %v779_v44, 4  ;;  %v784_v29 = vrot.slane %v782_v31, 5  ;;  %v728_v37 = vrot.slane %v726_v55, 5 }
  0x53   : > { %2601 = vmatmul.mubr.msk.bf16.gmra.mrb[20].mxu1 %vm859_vm0, %v3278_v25  ;;  %v737_v3 = vor.u32 %v736_v54, %v3231_v6  ;;  %v790_v47 = vrot.slane %v788_v53, 5  ;;  %v794_v32 = vrot.slane %v792_v17, 4  ;;  %v719_v43 = vsel %vm3001_vm3, %v714_v45, %v3225_v8  ;;  %v409_v6 = vld [vmem:[%s2948_s30 + $0xbc] sm:$0x1] }
  0x54   : > { %2677 = vmatmul.mubr.msk.bf16.gmra.mrb[28].mxu0 %vm859_vm0, %v2307_v39  ;;  %v747_v62 = vor.u32 %v746_v38, %v3243_v36  ;;  %v729_v22 = vsel %vm3001_vm3, %v724_v18, %v728_v37  ;;  %v750_v44 = vshll.u32 %v403_v10, 16  ;;  %v761_v31 = vor.u32 %v760_v21, %v757_v30 }
  0x55   : > { %v738_v50 = vrot.slane %v737_v3, 4  ;;  %2682 = vmatprep.mubr.msk.bf16.mxu0 %vm859_vm0, %v3034_v34  ;;  %v2251_v54 = vcombine.low %v719_v43, %v729_v22  ;;  %v771_v53 = vor.u32 %v770_v41, %v766_v40  ;;  %v774_v38 = vshll.u32 %v406_v20, 16 }
  0x56   : > { %v748_v0 = vrot.slane %v747_v62, 4  ;;  %v752_v9 = vrot.slane %v750_v44, 5  ;;  %v785_v17 = vor.u32 %v784_v29, %v781_v7  ;;  %v762_v60 = vrot.slane %v761_v31, 4 }
  0x57   : > { %v743_v8 = vsel %vm3001_vm3, %v738_v50, %v3243_v36  ;;  %2604 = vmatprep.mubr.msk.bf16.mxu1 %vm859_vm0, %v2251_v54  ;;  %v772_v56 = vrot.slane %v771_v53, 4  ;;  %v795_v55 = vor.u32 %v794_v32, %v790_v47  ;;  %v798_v39 = vshll.u32 %v409_v6, 16 }
  0x58   : > { %v753_v34 = vsel %vm3001_vm3, %v748_v0, %v752_v9  ;;  %v776_v45 = vrot.slane %v774_v38, 5  ;;  %v786_v18 = vrot.slane %v785_v17, 4  ;;  %v2272_v30 = vcombine.low %v2967_v24, %v2972_v28 }
  0x59   : > { %v2252_v21 = vcombine.low %v743_v8, %v753_v34  ;;  %v767_v36 = vsel %vm3001_vm3, %v762_v60, %v766_v40  ;;  %v796_v41 = vrot.slane %v795_v55, 4  ;;  %v800_v10 = vrot.slane %v798_v39, 5 }
  0x5a   : > { %v777_v7 = vsel %vm3001_vm3, %v772_v56, %v776_v45  ;;  %v791_v37 = vsel %vm3001_vm3, %v786_v18, %v790_v47 }
  0x5b   : > { %2605 = vmatmul.mubr.msk.bf16.gmra.mrb[24].mxu1 %vm859_vm0, %v2252_v21  ;;  %v2253_v29 = vcombine.low %v767_v36, %v777_v7  ;;  %v801_v24 = vsel %vm3001_vm3, %v796_v41, %v800_v10 }
  0x5c   : > { %2683 = vmatmul.mubr.msk.bf16.vlgmr.msra.gmra.mrb[0].mxu0 %vm859_vm0, %v3062_v52  ;;  %v2254_v28 = vcombine.low %v791_v37, %v801_v24  ;;  %v1588_v52 = vshrl.u32 %v3265_v51, 16 }
  0x5d   : > { %2686 = vmatprep.mubr.msk.bf16.mxu0 %vm859_vm0, %v3082_v15  ;;  %2608 = vmatprep.mubr.msk.bf16.mxu1 %vm859_vm0, %v2253_v29 }
  0x63   : > { %2609 = vmatmul.mubr.msk.bf16.gmra.mrb[28].mxu1 %vm859_vm0, %v2254_v28 }
  0x64   : > { %2687 = vmatmul.mubr.msk.bf16.gmra.mrb[4].mxu0 %vm859_vm0, %v3109_v46  ;;  %2614 = vmatprep.mubr.msk.bf16.mxu1 %vm859_vm0, %v2272_v30  ;;  %v1590_v46 = vrot.slane %v1588_v52, 4 }
  0x65   : > { %2690 = vmatprep.mubr.msk.bf16.mxu0 %vm859_vm0, %v3129_v5  ;;  %v412_v5 = vld [vmem:[%s3241_s8 + $0x8] sm:$0x1] }
  0x6b   : > { %2615 = vmatmul.mubr.msk.bf16.vlgmr.msra.gmra.mrb[0].mxu1 %vm859_vm0, %v2954_v12  ;;  %v1575_v12 = vshrl.u32 %v3262_v1, 16 }
  0x6c   : > { %2691 = vmatmul.mubr.msk.bf16.gmra.mrb[8].mxu0 %vm859_vm0, %v3156_v26  ;;  %2618 = vmatprep.mubr.msk.bf16.mxu1 %vm859_vm0, %v2964_v23  ;;  %v1578_v23 = vshll.u32 %v3262_v1, 16 }
  0x6d   : > { %2694 = vmatprep.mubr.msk.bf16.mxu0 %vm859_vm0, %v3176_v63  ;;  %v1594_v63 = vshll.u32 %v412_v5, 16 }
  0x6e   : > { %v1580_v15 = vrot.slane %v1578_v23, 5 }
  0x73   : > { %2619 = vmatmul.mubr.msk.bf16.gmra.mrb[4].mxu1 %vm859_vm0, %v2980_v33  ;;  %v1584_v33 = vshll.u32 %v3265_v51, 16 }
  0x74   : > { %2695 = vmatmul.mubr.msk.bf16.gmra.mrb[12].mxu0 %vm859_vm0, %v3205_v14  ;;  %2622 = vmatprep.mubr.msk.bf16.mxu1 %vm859_vm0, %v3005_v61  ;;  %v1577_v61 = vrot.slane %v1575_v12, 4 }
  0x75   : > { %2698 = vmatprep.mubr.msk.bf16.mxu0 %vm859_vm0, %v3227_v19 }
  0x76   : > { %v1581_v26 = vor.u32 %v1580_v15, %v1577_v61 }
  0x78   : > { %v1582_v14 = vrot.slane %v1581_v26, 4 }
  0x7b   : > { %2623 = vmatmul.mubr.msk.bf16.gmra.mrb[8].mxu1 %vm859_vm0, %v3016_v13  ;;  %v1586_v13 = vrot.slane %v1584_v33, 5 }
  0x7c   : > { %2699 = vmatmul.mubr.msk.bf16.gmra.mrb[16].mxu0 %vm859_vm0, %v3259_v48  ;;  %2626 = vmatprep.mubr.msk.bf16.mxu1 %vm859_vm0, %v3044_v42  ;;  %v1596_v48 = vrot.slane %v1594_v63, 5 }
  0x7d   : > { %2702 = vmatprep.mubr.msk.bf16.mxu0 %vm859_vm0, %v3278_v25  ;;  %v1591_v42 = vor.u32 %v1590_v46, %v1586_v13 }
  0x7f   : > { %v1592_v19 = vrot.slane %v1591_v42, 4 }
  0x83   : > { %2627 = vmatmul.mubr.msk.bf16.gmra.mrb[12].mxu1 %vm859_vm0, %v3072_v4  ;;  %v1587_v4 = vsel %vm3001_vm3, %v1582_v14, %v1586_v13 }
  0x84   : > { %2703 = vmatmul.mubr.msk.bf16.gmra.mrb[20].mxu0 %vm859_vm0, %v2251_v54  ;;  %2630 = vmatprep.mubr.msk.bf16.mxu1 %vm859_vm0, %v3093_v27  ;;  %v1597_v27 = vsel %vm3001_vm3, %v1592_v19, %v1596_v48 }
  0x85   : > { %2706 = vmatprep.mubr.msk.bf16.mxu0 %vm859_vm0, %v2252_v21  ;;  %v2327_v1 = vcombine.low %v1587_v4, %v1597_v27 }
  0x8b   : > { %2631 = vmatmul.mubr.msk.bf16.gmra.mrb[16].mxu1 %vm859_vm0, %v3119_v58 }
  0x8c   : > { %2707 = vmatmul.mubr.msk.bf16.gmra.mrb[24].mxu0 %vm859_vm0, %v2253_v29  ;;  %2634 = vmatprep.mubr.msk.bf16.mxu1 %vm859_vm0, %v3140_v16 }
  0x8d   : > { %2710 = vmatprep.mubr.msk.bf16.mxu0 %vm859_vm0, %v2254_v28 }
  0x93   : > { %2635 = vmatmul.mubr.msk.bf16.gmra.mrb[20].mxu1 %vm859_vm0, %v3166_v2 }
  0x94   : > { %2711 = vmatmul.mubr.msk.bf16.gmra.mrb[28].mxu0 %vm859_vm0, %v2327_v1  ;;  %2638 = vmatprep.mubr.msk.bf16.mxu1 %vm859_vm0, %v3187_v11  ;;  %v3386_v11 = vld [vmem:[%s3454_s3] ss:$0 sm:$0xff] }
  0x9b   : > { %2639 = vmatmul.mubr.msk.bf16.gmra.mrb[24].mxu1 %vm859_vm0, %v3215_v49 }
  0x9c   : > { %2642 = vmatprep.mubr.msk.bf16.mxu1 %vm859_vm0, %v3236_v35 }
  0xa3   : > { %2643 = vmatmul.mubr.msk.bf16.gmra.mrb[28].mxu1 %vm859_vm0, %v3272_v59 }
 0x12f   : > { %v2684_v57 = vpop.f32.mrb[0].mxu0 }
 0x130   : > { %v1647_v58 = vpop.f32.mrb[1].mxu0 }
 0x131   : > { %v2685_v16 = vpop.f32.mrb[2].mxu0 }
 0x132   : > { %v1650_v51 = vpop.f32.mrb[3].mxu0 }
 0x137   : > { %v2688_v25 = vpop.f32.mrb[4].mxu0 }
 0x138   : > { %v1663_v2 = vpop.f32.mrb[5].mxu0 }
 0x139   : > { %v2689_v40 = vpop.f32.mrb[6].mxu0 }
 0x13a   : > { %v1666_v3 = vpop.f32.mrb[7].mxu0 }
 0x13e   : > { %v2616_v47 = vpop.f32.mrb[0].mxu1 }
 0x13f   : > { %v2692_v49 = vpop.f32.mrb[8].mxu0  ;;  %v2714_v32 = vadd.f32 %v2684_v57, %v2616_v47  ;;  %v1237_v35 = vpop.f32.mrb[1].mxu1 }
 0x140   : > { %v1679_v43 = vpop.f32.mrb[9].mxu0  ;;  %v2715_v59 = vadd.f32 %v1647_v58, %v1237_v35  ;;  %v2617_v62 = vpop.f32.mrb[2].mxu1 }
 0x141   : > { %v2693_v20 = vpop.f32.mrb[10].mxu0  ;;  %v1815_v22 = vadd.f32 %v2714_v32, %v3386_v11  ;;  %v2716_v50 = vadd.f32 %v2685_v16, %v2617_v62  ;;  %v1240_v44 = vpop.f32.mrb[3].mxu1 }
 0x142   : > { %v1682_v6 = vpop.f32.mrb[11].mxu0  ;;  %v1813_v54 = vadd.f32 %v2715_v59, %v3386_v11  ;;  %v2717_v0 = vadd.f32 %v1650_v51, %v1240_v44 }
 0x143   : > { %v1847_v31 = vmul.f32 0.2, %v1815_v22  ;;  %v1816_v53 = vadd.f32 %v2716_v50, %v3386_v11 }
 0x144   : > { %v1845_v8 = vmul.f32 0.2, %v1813_v54  ;;  %v1814_v9 = vadd.f32 %v2717_v0, %v3386_v11 }
 0x145   : > { %v1848_v38 = vmul.f32 0.2, %v1816_v53  ;;  %v1879_v55 = vmax.f32 %v1815_v22, %v1847_v31 }
 0x146   : > { %v1846_v17 = vmul.f32 0.2, %v1814_v9  ;;  %v2620_v60 = vpop.f32.mrb[4].mxu1  ;;  %v1877_v30 = vmax.f32 %v1813_v54, %v1845_v8 }
 0x147   : > { %v2696_v56 = vpop.f32.mrb[12].mxu0  ;;  %v1880_v39 = vmax.f32 %v1816_v53, %v1848_v38  ;;  %v2718_v34 = vadd.f32 %v2688_v25, %v2620_v60  ;;  %v1253_v45 = vpop.f32.mrb[5].mxu1 }
 0x148   : > { %v1695_v18 = vpop.f32.mrb[13].mxu0  ;;  %v1878_v21 = vmax.f32 %v1814_v9, %v1846_v17  ;;  %v2719_v36 = vadd.f32 %v1663_v2, %v1253_v45  ;;  %v2621_v41 = vpop.f32.mrb[6].mxu1 }
 0x149   : > { %v2697_v10 = vpop.f32.mrb[14].mxu0  ;;  %v2423_v7 = vpack.c.bf16 %v1880_v39, %v1879_v55  ;;  %v1819_v29 = vadd.f32 %v2718_v34, %v3386_v11  ;;  %v2720_v37 = vadd.f32 %v2689_v40, %v2621_v41  ;;  %v1256_v24 = vpop.f32.mrb[7].mxu1 }
 0x14a   : > { %v1698_v28 = vpop.f32.mrb[15].mxu0  ;;  %v2418_v12 = vpack.c.bf16 %v1878_v21, %v1877_v30  ;;  %v1817_v23 = vadd.f32 %v2719_v36, %v3386_v11  ;;  %v2721_v33 = vadd.f32 %v1666_v3, %v1256_v24 }
 0x14b   : > { %2495 = vst [vmem:[%s3396_s14 + $0x8] sm:$0xff] %v2423_v7   ;;  %v1851_v52 = vmul.f32 0.2, %v1819_v29  ;;  %v1820_v61 = vadd.f32 %v2720_v37, %v3386_v11 }
 0x14c   : > { %2419 = vst [vmem:[%s3396_s14] sm:$0xff] %v2418_v12   ;;  %v1849_v15 = vmul.f32 0.2, %v1817_v23  ;;  %v1818_v13 = vadd.f32 %v2721_v33, %v3386_v11 }
 0x14d   : > { %v1852_v46 = vmul.f32 0.2, %v1820_v61  ;;  %v1883_v63 = vmax.f32 %v1819_v29, %v1851_v52 }
 0x14e   : > { %v1850_v5 = vmul.f32 0.2, %v1818_v13  ;;  %v2624_v26 = vpop.f32.mrb[8].mxu1  ;;  %v1881_v27 = vmax.f32 %v1817_v23, %v1849_v15 }
 0x14f   : > { %v2700_v42 = vpop.f32.mrb[16].mxu0  ;;  %v1884_v14 = vmax.f32 %v1820_v61, %v1852_v46  ;;  %v2722_v19 = vadd.f32 %v2692_v49, %v2624_v26  ;;  %v1269_v48 = vpop.f32.mrb[9].mxu1 }
 0x150   : > { %v1711_v4 = vpop.f32.mrb[17].mxu0  ;;  %v1882_v1 = vmax.f32 %v1818_v13, %v1850_v5  ;;  %v2723_v57 = vadd.f32 %v1679_v43, %v1269_v48  ;;  %v2625_v58 = vpop.f32.mrb[10].mxu1 }
 0x151   : > { %v2701_v16 = vpop.f32.mrb[18].mxu0  ;;  %v2433_v51 = vpack.c.bf16 %v1884_v14, %v1883_v63  ;;  %v1823_v25 = vadd.f32 %v2722_v19, %v3386_v11  ;;  %v2724_v2 = vadd.f32 %v2693_v20, %v2625_v58  ;;  %v1272_v40 = vpop.f32.mrb[11].mxu1 }
 0x152   : > { %v1714_v3 = vpop.f32.mrb[19].mxu0  ;;  %v2428_v47 = vpack.c.bf16 %v1882_v1, %v1881_v27  ;;  %v1821_v32 = vadd.f32 %v2723_v57, %v3386_v11  ;;  %v2725_v35 = vadd.f32 %v1682_v6, %v1272_v40 }
 0x153   : > { %2497 = vst [vmem:[%s3396_s14 + $0x18] sm:$0xff] %v2433_v51   ;;  %v1855_v49 = vmul.f32 0.2, %v1823_v25  ;;  %v1824_v59 = vadd.f32 %v2724_v2, %v3386_v11 }
 0x154   : > { %2496 = vst [vmem:[%s3396_s14 + $0x10] sm:$0xff] %v2428_v47   ;;  %v1853_v62 = vmul.f32 0.2, %v1821_v32  ;;  %v1822_v43 = vadd.f32 %v2725_v35, %v3386_v11 }
 0x155   : > { %v1856_v22 = vmul.f32 0.2, %v1824_v59  ;;  %v1887_v0 = vmax.f32 %v1823_v25, %v1855_v49 }
 0x156   : > { %v1854_v50 = vmul.f32 0.2, %v1822_v43  ;;  %v2628_v44 = vpop.f32.mrb[12].mxu1  ;;  %v1885_v9 = vmax.f32 %v1821_v32, %v1853_v62 }
 0x157   : > { %v2704_v54 = vpop.f32.mrb[20].mxu0  ;;  %v1888_v20 = vmax.f32 %v1824_v59, %v1856_v22  ;;  %v2726_v31 = vadd.f32 %v2696_v56, %v2628_v44  ;;  %v1285_v53 = vpop.f32.mrb[13].mxu1 }
 0x158   : > { %v1727_v8 = vpop.f32.mrb[21].mxu0  ;;  %v1886_v6 = vmax.f32 %v1822_v43, %v1854_v50  ;;  %v2727_v38 = vadd.f32 %v1695_v18, %v1285_v53  ;;  %v2629_v17 = vpop.f32.mrb[14].mxu1 }
 0x159   : > { %v2705_v60 = vpop.f32.mrb[22].mxu0  ;;  %v2443_v55 = vpack.c.bf16 %v1888_v20, %v1887_v0  ;;  %v1827_v39 = vadd.f32 %v2726_v31, %v3386_v11  ;;  %v2728_v34 = vadd.f32 %v2697_v10, %v2629_v17  ;;  %v1288_v45 = vpop.f32.mrb[15].mxu1 }
 0x15a   : > { %v1730_v30 = vpop.f32.mrb[23].mxu0  ;;  %v2438_v21 = vpack.c.bf16 %v1886_v6, %v1885_v9  ;;  %v1825_v36 = vadd.f32 %v2727_v38, %v3386_v11  ;;  %v2729_v41 = vadd.f32 %v1698_v28, %v1288_v45 }
 0x15b   : > { %2499 = vst [vmem:[%s3396_s14 + $0x28] sm:$0xff] %v2443_v55   ;;  %v1859_v56 = vmul.f32 0.2, %v1827_v39  ;;  %v1828_v7 = vadd.f32 %v2728_v34, %v3386_v11 }
 0x15c   : > { %2498 = vst [vmem:[%s3396_s14 + $0x20] sm:$0xff] %v2438_v21   ;;  %v1857_v29 = vmul.f32 0.2, %v1825_v36  ;;  %v1826_v18 = vadd.f32 %v2729_v41, %v3386_v11 }
 0x15d   : > { %v1860_v37 = vmul.f32 0.2, %v1828_v7  ;;  %v1891_v33 = vmax.f32 %v1827_v39, %v1859_v56 }
 0x15e   : > { %v1858_v24 = vmul.f32 0.2, %v1826_v18  ;;  %v2632_v12 = vpop.f32.mrb[16].mxu1  ;;  %v1889_v13 = vmax.f32 %v1825_v36, %v1857_v29 }
 0x15f   : > { %v2708_v23 = vpop.f32.mrb[24].mxu0  ;;  %v1892_v10 = vmax.f32 %v1828_v7, %v1860_v37  ;;  %v2730_v52 = vadd.f32 %v2700_v42, %v2632_v12  ;;  %v1301_v61 = vpop.f32.mrb[17].mxu1 }
 0x160   : > { %v1743_v15 = vpop.f32.mrb[25].mxu0  ;;  %v1890_v28 = vmax.f32 %v1826_v18, %v1858_v24  ;;  %v2731_v46 = vadd.f32 %v1711_v4, %v1301_v61  ;;  %v2633_v5 = vpop.f32.mrb[18].mxu1 }
 0x161   : > { %v2709_v26 = vpop.f32.mrb[26].mxu0  ;;  %v2453_v63 = vpack.c.bf16 %v1892_v10, %v1891_v33  ;;  %v1831_v14 = vadd.f32 %v2730_v52, %v3386_v11  ;;  %v2732_v19 = vadd.f32 %v2701_v16, %v2633_v5  ;;  %v1304_v48 = vpop.f32.mrb[19].mxu1 }
 0x162   : > { %v1746_v27 = vpop.f32.mrb[27].mxu0  ;;  %v2448_v1 = vpack.c.bf16 %v1890_v28, %v1889_v13  ;;  %v1829_v57 = vadd.f32 %v2731_v46, %v3386_v11  ;;  %v2733_v58 = vadd.f32 %v1714_v3, %v1304_v48 }
 0x163   : > { %2501 = vst [vmem:[%s3396_s14 + $0x38] sm:$0xff] %v2453_v63   ;;  %v1863_v42 = vmul.f32 0.2, %v1831_v14  ;;  %v1832_v51 = vadd.f32 %v2732_v19, %v3386_v11 }
 0x164   : > { %2500 = vst [vmem:[%s3396_s14 + $0x30] sm:$0xff] %v2448_v1   ;;  %v1861_v25 = vmul.f32 0.2, %v1829_v57  ;;  %v1830_v4 = vadd.f32 %v2733_v58, %v3386_v11 }
 0x165   : > { %v1864_v2 = vmul.f32 0.2, %v1832_v51  ;;  %v1895_v35 = vmax.f32 %v1831_v14, %v1863_v42 }
 0x166   : > { %v1862_v40 = vmul.f32 0.2, %v1830_v4  ;;  %v2636_v47 = vpop.f32.mrb[20].mxu1  ;;  %v1893_v43 = vmax.f32 %v1829_v57, %v1861_v25 }
 0x167   : > { %v2712_v32 = vpop.f32.mrb[28].mxu0  ;;  %v1896_v16 = vmax.f32 %v1832_v51, %v1864_v2  ;;  %v2734_v49 = vadd.f32 %v2704_v54, %v2636_v47  ;;  %v1317_v59 = vpop.f32.mrb[21].mxu1 }
 0x168   : > { %v1759_v62 = vpop.f32.mrb[29].mxu0  ;;  %v1894_v3 = vmax.f32 %v1830_v4, %v1862_v40  ;;  %v2735_v22 = vadd.f32 %v1727_v8, %v1317_v59  ;;  %v2637_v50 = vpop.f32.mrb[22].mxu1 }
 0x169   : > { %v2713_v44 = vpop.f32.mrb[30].mxu0  ;;  %v2463_v0 = vpack.c.bf16 %v1896_v16, %v1895_v35  ;;  %v1835_v20 = vadd.f32 %v2734_v49, %v3386_v11  ;;  %v2736_v31 = vadd.f32 %v2705_v60, %v2637_v50  ;;  %v1320_v53 = vpop.f32.mrb[23].mxu1 }
 0x16a   : > { %v1762_v9 = vpop.f32.mrb[31].mxu0  ;;  %v2458_v6 = vpack.c.bf16 %v1894_v3, %v1893_v43  ;;  %v1833_v38 = vadd.f32 %v2735_v22, %v3386_v11  ;;  %v2737_v17 = vadd.f32 %v1730_v30, %v1320_v53 }
 0x16b   : > { %2503 = vst [vmem:[%s3396_s14 + $0x48] sm:$0xff] %v2463_v0   ;;  %v1867_v54 = vmul.f32 0.2, %v1835_v20  ;;  %v1836_v55 = vadd.f32 %v2736_v31, %v3386_v11 }
 0x16c   : > { %2502 = vst [vmem:[%s3396_s14 + $0x40] sm:$0xff] %v2458_v6   ;;  %v1865_v39 = vmul.f32 0.2, %v1833_v38  ;;  %v1834_v8 = vadd.f32 %v2737_v17, %v3386_v11 }
 0x16d   : > { %v1868_v34 = vmul.f32 0.2, %v1836_v55  ;;  %v1899_v36 = vmax.f32 %v1835_v20, %v1867_v54 }
 0x16e   : > { %v1866_v45 = vmul.f32 0.2, %v1834_v8  ;;  %v2640_v21 = vpop.f32.mrb[24].mxu1  ;;  %v1897_v7 = vmax.f32 %v1833_v38, %v1865_v39 }
 0x16f   : > { %v1900_v60 = vmax.f32 %v1836_v55, %v1868_v34  ;;  %v2738_v41 = vadd.f32 %v2708_v23, %v2640_v21  ;;  %v1333_v56 = vpop.f32.mrb[25].mxu1 }
 0x170   : > { %v1898_v29 = vmax.f32 %v1834_v8, %v1866_v45  ;;  %v2739_v30 = vadd.f32 %v1743_v15, %v1333_v56  ;;  %v2641_v18 = vpop.f32.mrb[26].mxu1 }
 0x171   : > { %v2473_v37 = vpack.c.bf16 %v1900_v60, %v1899_v36  ;;  %v1839_v24 = vadd.f32 %v2738_v41, %v3386_v11  ;;  %v2740_v12 = vadd.f32 %v2709_v26, %v2641_v18  ;;  %v1336_v33 = vpop.f32.mrb[27].mxu1 }
 0x172   : > { %v2468_v10 = vpack.c.bf16 %v1898_v29, %v1897_v7  ;;  %v1837_v52 = vadd.f32 %v2739_v30, %v3386_v11  ;;  %v2741_v61 = vadd.f32 %v1746_v27, %v1336_v33 }
 0x173   : > { %2505 = vst [vmem:[%s3396_s14 + $0x58] sm:$0xff] %v2473_v37   ;;  %v1871_v13 = vmul.f32 0.2, %v1839_v24  ;;  %v1840_v28 = vadd.f32 %v2740_v12, %v3386_v11 }
 0x174   : > { %2504 = vst [vmem:[%s3396_s14 + $0x50] sm:$0xff] %v2468_v10   ;;  %v1869_v23 = vmul.f32 0.2, %v1837_v52  ;;  %v1838_v46 = vadd.f32 %v2741_v61, %v3386_v11 }
 0x175   : > { %v1872_v5 = vmul.f32 0.2, %v1840_v28  ;;  %v1903_v14 = vmax.f32 %v1839_v24, %v1871_v13 }
 0x176   : > { %v1870_v15 = vmul.f32 0.2, %v1838_v46  ;;  %v2644_v63 = vpop.f32.mrb[28].mxu1  ;;  %v1901_v1 = vmax.f32 %v1837_v52, %v1869_v23 }
 0x177   : > { %v1904_v19 = vmax.f32 %v1840_v28, %v1872_v5  ;;  %v2742_v26 = vadd.f32 %v2712_v32, %v2644_v63  ;;  %v1349_v48 = vpop.f32.mrb[29].mxu1 }
 0x178   : > { %v1902_v57 = vmax.f32 %v1838_v46, %v1870_v15  ;;  %v2743_v27 = vadd.f32 %v1759_v62, %v1349_v48  ;;  %v2645_v58 = vpop.f32.mrb[30].mxu1 }
 0x179   : > { %v2483_v42 = vpack.c.bf16 %v1904_v19, %v1903_v14  ;;  %v1843_v51 = vadd.f32 %v2742_v26, %v3386_v11  ;;  %v2744_v25 = vadd.f32 %v2713_v44, %v2645_v58  ;;  %v1352_v4 = vpop.f32.mrb[31].mxu1 }
 0x17a   : > { %v2478_v2 = vpack.c.bf16 %v1902_v57, %v1901_v1  ;;  %v1841_v40 = vadd.f32 %v2743_v27, %v3386_v11  ;;  %v2745_v47 = vadd.f32 %v1762_v9, %v1352_v4 }
 0x17b   : > { %2507 = vst [vmem:[%s3396_s14 + $0x68] sm:$0xff] %v2483_v42   ;;  %v1875_v35 = vmul.f32 0.2, %v1843_v51  ;;  %v1844_v32 = vadd.f32 %v2744_v25, %v3386_v11 }
 0x17c   : > { %2506 = vst [vmem:[%s3396_s14 + $0x60] sm:$0xff] %v2478_v2   ;;  %v1873_v16 = vmul.f32 0.2, %v1841_v40  ;;  %v1842_v49 = vadd.f32 %v2745_v47, %v3386_v11 }
 0x17d   : > { %v1876_v59 = vmul.f32 0.2, %v1844_v32  ;;  %v1907_v43 = vmax.f32 %v1843_v51, %v1875_v35 }
 0x17e   : > { %v1874_v62 = vmul.f32 0.2, %v1842_v49  ;;  %v1905_v22 = vmax.f32 %v1841_v40, %v1873_v16 }
 0x17f   : > { %v1908_v3 = vmax.f32 %v1844_v32, %v1876_v59 }
 0x180   : > { %v1906_v50 = vmax.f32 %v1842_v49, %v1874_v62 }
 0x181   : > { %v2493_v44 = vpack.c.bf16 %v1908_v3, %v1907_v43 }
 0x182   : > { %v2488_v0 = vpack.c.bf16 %v1906_v50, %v1905_v22 }
 0x183   : > { %2509 = vst [vmem:[%s3396_s14 + $0x78] sm:$0xff] %v2493_v44  }
 0x184   : > { %2508 = vst [vmem:[%s3396_s14 + $0x70] sm:$0xff] %v2488_v0  }
 0x185 PF: > { %s14_s17 = sadd.s32 1, %s2880_s17   ;;  %s3458_s15 = smov %s2876_s16 }
 0x186   : > { %p11_p5 = scmp.ge.s32.totalorder %s14_s17, 4   ;;  %s3459_s16 = smov %s3461_s18 }
 0x188   :  { %13 = sbr.rel (!%p11_p5) target bundleno = 2 (0x2), region = 78 }

// kernel: fc_discriminator_forward.6
= control target key start
LH: loop header
LB: loop body
LE: loop exit
PB: predicated region body
PF: predicated region fallthrough
CT: control target
= control target key end

     0   :  { %vm339_vm0 = vsmask.f32 3328  ;;  %vm340_vm1 = vsmask.f32 7440  ;;  %s5680_s0 = inlined_call_operand.vmem [shape: bf16[2,9,9,512], index: 0, kind: input, shape index: {}, may-alias: {0,1}]   ;;  %s5681_s1 = inlined_call_operand.vmem [shape: bf16[2,9,9,512], index: 1, kind: input, shape index: {}, may-alias: {0,1}]   ;;  %s5682_s2 = inlined_call_operand.vmem [shape: bf16[2,2,512,128], index: 2, kind: input, shape index: {}]   ;;  %s5683_s3 = inlined_call_operand.vmem [shape: f32[1,128], index: 3, kind: input, shape index: {}]   ;;  %s5684_s4 = inlined_call_operand.vmem [shape: bf16[2,8,8,128], index: 4, kind: output, shape index: {}]  }
   0x1   :  { %v4169_v0 = vld [vmem:[%s5682_s2 + $0x140] sm:$0xff]   ;;  %v4173_v4 = vld [vmem:[%s5682_s2 + $0x148] sm:$0xff]   ;;  %v4177_v8 = vld [vmem:[%s5682_s2 + $0x150] sm:$0xff]  }
   0x2   :  { %v4170_v1 = vld [vmem:[%s5682_s2 + $0x1c0] sm:$0xff]   ;;  %3657 = vmatprep.subr.bf16.mxu0 %v4169_v0  ;;  %v4174_v5 = vld [vmem:[%s5682_s2 + $0x1c8] sm:$0xff]   ;;  %v4178_v9 = vld [vmem:[%s5682_s2 + $0x1d0] sm:$0xff]  }
   0x3   :  { %v4171_v2 = vld [vmem:[%s5682_s2 + $0x100] sm:$0xff]   ;;  %3721 = vmatprep.subr.bf16.mxu1 %v4170_v1  ;;  %v4175_v6 = vld [vmem:[%s5682_s2 + $0x108] sm:$0xff]   ;;  %v4179_v10 = vld [vmem:[%s5682_s2 + $0x110] sm:$0xff]  }
   0x4   :  { %v4172_v3 = vld [vmem:[%s5682_s2 + $0x180] sm:$0xff]   ;;  %3658 = vmatpush3.bf16.msra.mxu0 %v4171_v2  ;;  %v4176_v7 = vld [vmem:[%s5682_s2 + $0x188] sm:$0xff]   ;;  %v4180_v11 = vld [vmem:[%s5682_s2 + $0x190] sm:$0xff]  }
   0x5   :  { %3722 = vmatpush3.bf16.msra.mxu1 %v4172_v3  ;;  %3659 = vmatprep.subr.bf16.mxu0 %v4173_v4  ;;  %v4181_v12 = vld [vmem:[%s5682_s2 + $0x158] sm:$0xff]   ;;  %v4185_v16 = vld [vmem:[%s5682_s2 + $0x160] sm:$0xff]   ;;  %v4189_v20 = vld [vmem:[%s5682_s2 + $0x168] sm:$0xff]  }
   0x6   :  { %3723 = vmatprep.subr.bf16.mxu1 %v4174_v5  ;;  %v4182_v13 = vld [vmem:[%s5682_s2 + $0x1d8] sm:$0xff]   ;;  %v4186_v17 = vld [vmem:[%s5682_s2 + $0x1e0] sm:$0xff]   ;;  %v4190_v21 = vld [vmem:[%s5682_s2 + $0x1e8] sm:$0xff]  }
   0x7   :  { %v4183_v14 = vld [vmem:[%s5682_s2 + $0x118] sm:$0xff]   ;;  %v4187_v18 = vld [vmem:[%s5682_s2 + $0x120] sm:$0xff]   ;;  %v4191_v22 = vld [vmem:[%s5682_s2 + $0x128] sm:$0xff]  }
   0x8   :  { %3660 = vmatpush3.bf16.msra.mxu0 %v4175_v6  ;;  %v4184_v15 = vld [vmem:[%s5682_s2 + $0x198] sm:$0xff]   ;;  %v4188_v19 = vld [vmem:[%s5682_s2 + $0x1a0] sm:$0xff]   ;;  %v4192_v23 = vld [vmem:[%s5682_s2 + $0x1a8] sm:$0xff]  }
   0x9   :  { %3724 = vmatpush3.bf16.msra.mxu1 %v4176_v7  ;;  %3661 = vmatprep.subr.bf16.mxu0 %v4177_v8  ;;  %v4193_v24 = vld [vmem:[%s5682_s2 + $0x170] sm:$0xff]   ;;  %v4197_v28 = vld [vmem:[%s5682_s2 + $0x178] sm:$0xff]   ;;  %v23_v32 = vld [vmem:[%s5680_s0] sm:$0xff] }
   0xa   :  { %3725 = vmatprep.subr.bf16.mxu1 %v4178_v9  ;;  %v4194_v25 = vld [vmem:[%s5682_s2 + $0x1f0] sm:$0xff]   ;;  %v4198_v29 = vld [vmem:[%s5682_s2 + $0x1f8] sm:$0xff]   ;;  %v31_v34 = vld [vmem:[%s5680_s0 + $0x20] sm:$0xff]  ;;  %24 = vst [vmem:[#allocation2] sm:$0xff] %v23_v32  ;;  %v343_v38 = vshrl.u32 %v23_v32, 16  ;;  %v346_v39 = vshll.u32 %v23_v32, 16 }
   0xb   :  { %v4195_v26 = vld [vmem:[%s5682_s2 + $0x130] sm:$0xff]   ;;  %v4199_v30 = vld [vmem:[%s5682_s2 + $0x138] sm:$0xff]   ;;  %32 = vst [vmem:[#allocation2 + $0x20] sm:$0xff] %v31_v34  ;;  %v39_v36 = vld [vmem:[%s5680_s0 + $0x40] sm:$0xff]  ;;  %v371_v40 = vshrl.u32 %v31_v34, 16  ;;  %v374_v41 = vshll.u32 %v31_v34, 16 }
   0xc   :  { %3662 = vmatpush3.bf16.msra.mxu0 %v4179_v10  ;;  %v4196_v27 = vld [vmem:[%s5682_s2 + $0x1b0] sm:$0xff]   ;;  %v4200_v31 = vld [vmem:[%s5682_s2 + $0x1b8] sm:$0xff]   ;;  %40 = vst [vmem:[#allocation2 + $0x40] sm:$0xff] %v39_v36  ;;  %v399_v42 = vshrl.u32 %v39_v36, 16  ;;  %v25_v43 = vld [vmem:[%s5680_s0 + $0x8] sm:$0xff]  ;;  %v345_v45 = vrot.slane %v343_v38, 4 }
   0xd   :  { %3726 = vmatpush3.bf16.msra.mxu1 %v4180_v11  ;;  %3663 = vmatprep.subr.bf16.mxu0 %v4181_v12  ;;  %v27_v33 = vld [vmem:[%s5680_s0 + $0x10] sm:$0xff]  ;;  %v29_v44 = vld [vmem:[%s5680_s0 + $0x18] sm:$0xff]  ;;  %v402_v46 = vshll.u32 %v39_v36, 16  ;;  %26 = vst [vmem:[#allocation2 + $0x8] sm:$0xff] %v25_v43  ;;  %v33_v47 = vld [vmem:[%s5680_s0 + $0x28] sm:$0xff]  ;;  %v357_v50 = vshrl.u32 %v25_v43, 16 }
   0xe   :  { %3727 = vmatprep.subr.bf16.mxu1 %v4182_v13  ;;  %28 = vst [vmem:[#allocation2 + $0x10] sm:$0xff] %v27_v33  ;;  %v35_v35 = vld [vmem:[%s5680_s0 + $0x30] sm:$0xff]  ;;  %30 = vst [vmem:[#allocation2 + $0x18] sm:$0xff] %v29_v44  ;;  %v37_v48 = vld [vmem:[%s5680_s0 + $0x38] sm:$0xff]  ;;  %v348_v51 = vrot.slane %v346_v39, 5  ;;  %v373_v52 = vrot.slane %v371_v40, 4 }
   0xf   :  { %v43_v37 = vld [vmem:[%s5680_s0 + $0x50] sm:$0xff]  ;;  %36 = vst [vmem:[#allocation2 + $0x30] sm:$0xff] %v35_v35  ;;  %v41_v49 = vld [vmem:[%s5680_s0 + $0x48] sm:$0xff]  ;;  %v376_v53 = vrot.slane %v374_v41, 5  ;;  %v401_v54 = vrot.slane %v399_v42, 4  ;;  %34 = vst [vmem:[#allocation2 + $0x28] sm:$0xff] %v33_v47 }
  0x10   :  { %3664 = vmatpush3.bf16.msra.mxu0 %v4183_v14  ;;  %44 = vst [vmem:[#allocation2 + $0x50] sm:$0xff] %v43_v37  ;;  %38 = vst [vmem:[#allocation2 + $0x38] sm:$0xff] %v37_v48  ;;  %v45_v55 = vld [vmem:[%s5680_s0 + $0x58] sm:$0xff]  ;;  %v4201_v56 = vld [vmem:[%s5682_s2 + $0x40] sm:$0xff]   ;;  %v404_v57 = vrot.slane %v402_v46, 5  ;;  %v359_v58 = vrot.slane %v357_v50, 4  ;;  %v349_v61 = vor.u32 %v348_v51, %v345_v45 }
  0x11   :  { %3728 = vmatpush3.bf16.msra.mxu1 %v4184_v15  ;;  %3665 = vmatprep.subr.bf16.mxu0 %v4185_v16  ;;  %42 = vst [vmem:[#allocation2 + $0x48] sm:$0xff] %v41_v49  ;;  %46 = vst [vmem:[#allocation2 + $0x58] sm:$0xff] %v45_v55  ;;  %v360_v59 = vshll.u32 %v25_v43, 16  ;;  %v385_v60 = vshrl.u32 %v33_v47, 16  ;;  %v377_v62 = vor.u32 %v376_v53, %v373_v52  ;;  %v388_v63 = vshll.u32 %v33_v47, 16  ;;  %v4202_v4 = vld [vmem:[%s5682_s2 + $0xc0] sm:$0xff]  }
  0x12   :  { %3729 = vmatprep.subr.bf16.mxu1 %v4186_v17  ;;  %v413_v0 = vshrl.u32 %v41_v49, 16  ;;  %v416_v3 = vshll.u32 %v41_v49, 16  ;;  %v350_v6 = vrot.slane %v349_v61, 4  ;;  %v405_v7 = vor.u32 %v404_v57, %v401_v54  ;;  %vm4478_vm2 = vmor %vm339_vm0, %vm340_vm1  ;;  %v4203_v34 = vld [vmem:[%s5682_s2] sm:$0xff]   ;;  %v51_v43 = vld [vmem:[%s5680_s0 + $0x70] sm:$0xff] }
  0x13   :  { %v362_v1 = vrot.slane %v360_v59, 5  ;;  %v387_v2 = vrot.slane %v385_v60, 4  ;;  %v390_v8 = vrot.slane %v388_v63, 5  ;;  %v378_v15 = vrot.slane %v377_v62, 4  ;;  %v47_v37 = vld [vmem:[%s5680_s0 + $0x60] sm:$0xff]  ;;  %v49_v44 = vld [vmem:[%s5680_s0 + $0x68] sm:$0xff] }
  0x14   :  { %3666 = vmatpush3.bf16.msra.mxu0 %v4187_v18  ;;  %v415_v13 = vrot.slane %v413_v0, 4  ;;  %v4204_v42 = vld [vmem:[%s5682_s2 + $0x80] sm:$0xff]   ;;  %48 = vst [vmem:[#allocation2 + $0x60] sm:$0xff] %v47_v37  ;;  %v53_v45 = vld [vmem:[%s5680_s0 + $0x78] sm:$0xff]  ;;  %52 = vst [vmem:[#allocation2 + $0x70] sm:$0xff] %v51_v43  ;;  %v427_v49 = vshrl.u32 %v47_v37, 16 }
  0x15   :  { %3730 = vmatpush3.bf16.msra.mxu1 %v4188_v19  ;;  %3667 = vmatprep.subr.bf16.mxu0 %v4189_v20  ;;  %v205_v5 = vld [vmem:[#allocation2 + $0x10] sm:$0x11]  ;;  %v363_v12 = vor.u32 %v362_v1, %v359_v58  ;;  %v206_v17 = vld [vmem:[#allocation2 + $0x18] sm:$0x11]  ;;  %v391_v18 = vor.u32 %v390_v8, %v387_v2  ;;  %v418_v19 = vrot.slane %v416_v3, 5  ;;  %50 = vst [vmem:[#allocation2 + $0x68] sm:$0xff] %v49_v44 }
  0x16   :  { %3731 = vmatprep.subr.bf16.mxu1 %v4190_v21  ;;  %v209_v9 = vld [vmem:[#allocation2 + $0x30] sm:$0x11]  ;;  %v352_v11 = vshll.u32 %v205_v5, 16  ;;  %54 = vst [vmem:[#allocation2 + $0x78] sm:$0xff] %v53_v45  ;;  %v4205_v50 = vld [vmem:[%s5682_s2 + $0x48] sm:$0xff]   ;;  %v430_v53 = vshll.u32 %v47_v37, 16 }
  0x17   :  { %v213_v10 = vld [vmem:[#allocation2 + $0x50] sm:$0x11]  ;;  %v380_v16 = vshll.u32 %v209_v9, 16  ;;  %v419_v32 = vor.u32 %v418_v19, %v415_v13  ;;  %v441_v54 = vshrl.u32 %v49_v44, 16  ;;  %v429_v55 = vrot.slane %v427_v49, 4  ;;  %v4206_v57 = vld [vmem:[%s5682_s2 + $0xc8] sm:$0xff]  }
  0x18   :  { %3668 = vmatpush3.bf16.msra.mxu0 %v4191_v22  ;;  %v354_v20 = vrot.slane %v352_v11, 5  ;;  %v408_v21 = vshll.u32 %v213_v10, 16  ;;  %v210_v22 = vld [vmem:[#allocation2 + $0x38] sm:$0x11]  ;;  %v4207_v58 = vld [vmem:[%s5682_s2 + $0x8] sm:$0xff]   ;;  %v432_v59 = vrot.slane %v430_v53, 5 }
  0x19   :  { %3732 = vmatpush3.bf16.msra.mxu1 %v4192_v23  ;;  %3669 = vmatprep.subr.bf16.mxu0 %v4193_v24  ;;  %v364_v23 = vrot.slane %v363_v12, 4  ;;  %v366_v24 = vshll.u32 %v206_v17, 16  ;;  %v420_v47 = vrot.slane %v419_v32, 4  ;;  %v443_v60 = vrot.slane %v441_v54, 4  ;;  %v4208_v62 = vld [vmem:[%s5682_s2 + $0x88] sm:$0xff]   ;;  %v55_v0 = vld [vmem:[%s5680_s0 + $0x80] sm:$0xff] }
  0x1a   :  { %3733 = vmatprep.subr.bf16.mxu1 %v4194_v25  ;;  %v382_v25 = vrot.slane %v380_v16, 5  ;;  %v410_v38 = vrot.slane %v408_v21, 5  ;;  %v433_v63 = vor.u32 %v432_v59, %v429_v55  ;;  %v59_v1 = vld [vmem:[%s5680_s0 + $0x90] sm:$0xff]  ;;  %v63_v2 = vld [vmem:[%s5680_s0 + $0xa0] sm:$0xff]  ;;  %56 = vst [vmem:[#allocation2 + $0x80] sm:$0xff] %v55_v0  ;;  %v455_v5 = vshrl.u32 %v55_v0, 16 }
  0x1b   :  { %60 = vst [vmem:[#allocation2 + $0x90] sm:$0xff] %v59_v1  ;;  %64 = vst [vmem:[#allocation2 + $0xa0] sm:$0xff] %v63_v2  ;;  %v57_v8 = vld [vmem:[%s5680_s0 + $0x88] sm:$0xff]  ;;  %v61_v9 = vld [vmem:[%s5680_s0 + $0x98] sm:$0xff]  ;;  %v486_v16 = vshll.u32 %v63_v2, 16 }
  0x1c   :  { %3670 = vmatpush3.bf16.msra.mxu0 %v4195_v26  ;;  %v4482_v26 = vrot.slane %v405_v7, 4  ;;  %v4491_v35 = vsel %vm4478_vm2, %v378_v15, %v382_v25  ;;  %v483_v7 = vshrl.u32 %v63_v2, 16  ;;  %v217_v12 = vld [vmem:[#allocation2 + $0x70] sm:$0x11]  ;;  %v434_v13 = vrot.slane %v433_v63, 4  ;;  %58 = vst [vmem:[#allocation2 + $0x88] sm:$0xff] %v57_v8 }
  0x1d   :  { %3734 = vmatpush3.bf16.msra.mxu1 %v4196_v27  ;;  %3671 = vmatprep.subr.bf16.mxu0 %v4197_v28  ;;  %v214_v27 = vld [vmem:[#allocation2 + $0x58] sm:$0x11]  ;;  %v392_v28 = vrot.slane %v391_v18, 4  ;;  %62 = vst [vmem:[#allocation2 + $0x98] sm:$0xff] %v61_v9  ;;  %v436_v17 = vshll.u32 %v217_v12, 16  ;;  %v65_v21 = vld [vmem:[%s5680_s0 + $0xa8] sm:$0xff] }
  0x1e   :  { %3735 = vmatprep.subr.bf16.mxu1 %v4198_v29  ;;  %v394_v29 = vshll.u32 %v210_v22, 16  ;;  %v422_v33 = vshll.u32 %v214_v27, 16  ;;  %v4551_v10 = vsel %vm4478_vm2, %v4482_v26, %v410_v38  ;;  %v218_v15 = vld [vmem:[#allocation2 + $0x78] sm:$0x11]  ;;  %v488_v25 = vrot.slane %v486_v16, 5  ;;  %66 = vst [vmem:[#allocation2 + $0xa8] sm:$0xff] %v65_v21 }
  0x1f   :  { %v450_v19 = vshll.u32 %v218_v15, 16  ;;  %v69_v22 = vld [vmem:[%s5680_s0 + $0xb8] sm:$0xff]  ;;  %v469_v26 = vshrl.u32 %v57_v8, 16  ;;  %v438_v27 = vrot.slane %v436_v17, 5  ;;  %v4210_v37 = vld [vmem:[%s5682_s2 + $0xd0] sm:$0xff]   ;;  %v73_v9 = vld [vmem:[%s5680_s0 + $0xc8] sm:$0xff] }
  0x20   :  { %3672 = vmatpush3.bf16.msra.mxu0 %v4199_v30  ;;  %v355_v30 = vsel %vm4478_vm2, %v350_v6, %v354_v20  ;;  %v396_v36 = vrot.slane %v394_v29, 5  ;;  %v424_v48 = vrot.slane %v422_v33, 5  ;;  %v458_v6 = vshll.u32 %v55_v0, 16  ;;  %70 = vst [vmem:[#allocation2 + $0xb8] sm:$0xff] %v69_v22  ;;  %v4212_v54 = vld [vmem:[%s5682_s2 + $0x90] sm:$0xff]   ;;  %v77_v12 = vld [vmem:[%s5680_s0 + $0xd8] sm:$0xff] }
  0x21   :  { %3736 = vmatpush3.bf16.msra.mxu1 %v4200_v31  ;;  %3785 = vmatprep.subr.bf16.mxu0 %v4201_v56  ;;  %v368_v31 = vrot.slane %v366_v24, 5  ;;  %v3225_v39 = vcombine.low %v355_v30, %v4491_v35  ;;  %v3226_v40 = vcombine.high %v355_v30, %v4491_v35  ;;  %v444_v56 = vshll.u32 %v49_v44, 16  ;;  %v75_v2 = vld [vmem:[%s5680_s0 + $0xd0] sm:$0xff]  ;;  %74 = vst [vmem:[#allocation2 + $0xc8] sm:$0xff] %v73_v9 }
  0x22   :  { %3849 = vmatprep.subr.bf16.mxu1 %v4202_v4  ;;  %v4514_v46 = vsel %vm4478_vm2, %v392_v28, %v396_v36  ;;  %v67_v4 = vld [vmem:[%s5680_s0 + $0xb0] sm:$0xff]  ;;  %v4555_v11 = vsel %vm4478_vm2, %v420_v47, %v424_v48  ;;  %v457_v20 = vrot.slane %v455_v5, 4  ;;  %v485_v24 = vrot.slane %v483_v7, 4  ;;  %76 = vst [vmem:[#allocation2 + $0xd0] sm:$0xff] %v75_v2  ;;  %78 = vst [vmem:[#allocation2 + $0xd8] sm:$0xff] %v77_v12  ;;  %v93_v12 = vld [vmem:[%s5680_s0 + $0x138] sm:$0xff] }
  0x23   :  { %v369_v41 = vsel %vm4478_vm2, %v364_v23, %v368_v31  ;;  %1207 = vmatprep.mubr.bf16.mxu0 %v3226_v40  ;;  %v446_v61 = vrot.slane %v444_v56, 5  ;;  %68 = vst [vmem:[#allocation2 + $0xb0] sm:$0xff] %v67_v4  ;;  %v460_v23 = vrot.slane %v458_v6, 5  ;;  %v452_v28 = vrot.slane %v450_v19, 5  ;;  %v4209_v36 = vld [vmem:[%s5682_s2 + $0x50] sm:$0xff]   ;;  %v85_v19 = vld [vmem:[%s5680_s0 + $0xf8] sm:$0xff] }
  0x24   :  { %v3227_v51 = vcombine.low %v369_v41, %v4514_v46  ;;  %v3228_v52 = vcombine.high %v369_v41, %v4514_v46  ;;  %1208 = vmatmul.mubr.bf16.vlgmr.msra.gmra.mrb[0].mxu0 %v3225_v39  ;;  %v472_v29 = vshll.u32 %v57_v8, 16  ;;  %v497_v30 = vshrl.u32 %v65_v21, 16  ;;  %v221_v47 = vld [vmem:[#allocation2 + $0x90] sm:$0x11]  ;;  %v222_v56 = vld [vmem:[#allocation2 + $0x98] sm:$0x11] }
  0x25   :  { %3786 = vmatpush3.bf16.msra.mxu0 %v4203_v34  ;;  %v447_v3 = vor.u32 %v446_v61, %v443_v60  ;;  %v461_v31 = vor.u32 %v460_v23, %v457_v20  ;;  %v489_v32 = vor.u32 %v488_v25, %v485_v24  ;;  %v471_v33 = vrot.slane %v469_v26, 4  ;;  %v4211_v48 = vld [vmem:[%s5682_s2 + $0x10] sm:$0xff]   ;;  %v4213_v20 = vld [vmem:[%s5682_s2 + $0x58] sm:$0xff]   ;;  %86 = vst [vmem:[#allocation2 + $0xf8] sm:$0xff] %v85_v19 }
  0x26   :  { %1304 = vmatprep.mubr.bf16.mxu1 %v3228_v52  ;;  %3787 = vmatprep.subr.bf16.mxu0 %v4205_v50  ;;  %v500_v34 = vshll.u32 %v65_v21, 16  ;;  %v4571_v38 = vsel %vm4478_vm2, %v434_v13, %v438_v27  ;;  %v474_v40 = vrot.slane %v472_v29, 5  ;;  %v499_v41 = vrot.slane %v497_v30, 4  ;;  %v83_v6 = vld [vmem:[%s5680_s0 + $0xf0] sm:$0xff]  ;;  %v4214_v25 = vld [vmem:[%s5682_s2 + $0xd8] sm:$0xff]   ;;  %94 = vst [vmem:[#allocation2 + $0x118] sm:$0xff] %v93_v12 }
  0x27   :  { %1305 = vmatmul.mubr.bf16.vlgmr.msra.gmra.mrb[0].mxu1 %v3227_v51  ;;  %v448_v18 = vrot.slane %v447_v3, 4  ;;  %v3229_v44 = vcombine.low %v4551_v10, %v4571_v38  ;;  %v462_v50 = vrot.slane %v461_v31, 4  ;;  %v464_v51 = vshll.u32 %v221_v47, 16  ;;  %v226_v59 = vld [vmem:[#allocation2 + $0xb8] sm:$0x11]  ;;  %v79_v3 = vld [vmem:[%s5680_s0 + $0xe0] sm:$0xff] }
  0x28   :  { %3850 = vmatpush3.bf16.msra.mxu1 %v4204_v42  ;;  %v3230_v42 = vcombine.high %v4551_v10, %v4571_v38  ;;  %v490_v52 = vrot.slane %v489_v32, 4  ;;  %v475_v53 = vor.u32 %v474_v40, %v471_v33  ;;  %v478_v61 = vshll.u32 %v222_v56, 16  ;;  %80 = vst [vmem:[#allocation2 + $0xe0] sm:$0xff] %v79_v3  ;;  %84 = vst [vmem:[#allocation2 + $0xf0] sm:$0xff] %v83_v6  ;;  %v4215_v30 = vld [vmem:[%s5682_s2 + $0x18] sm:$0xff]   ;;  %v91_v56 = vld [vmem:[%s5680_s0 + $0x130] sm:$0xff] }
  0x29   :  { %3851 = vmatprep.subr.bf16.mxu1 %v4206_v57  ;;  %3788 = vmatpush3.bf16.msra.mxu0 %v4207_v58  ;;  %v4575_v39 = vsel %vm4478_vm2, %v448_v18, %v452_v28  ;;  %v502_v57 = vrot.slane %v500_v34, 5  ;;  %v466_v58 = vrot.slane %v464_v51, 5  ;;  %v506_v1 = vshll.u32 %v226_v59, 16  ;;  %v81_v18 = vld [vmem:[%s5680_s0 + $0xe8] sm:$0xff]  ;;  %v4654_v51 = vld [vmem:[%s5680_s0 + $0x120] sm:$0xff]  ;;  %92 = vst [vmem:[#allocation2 + $0x110] sm:$0xff] %v91_v56 }
  0x2a   :  { %v3232_v43 = vcombine.high %v4555_v11, %v4575_v39  ;;  %v3231_v45 = vcombine.low %v4555_v11, %v4575_v39  ;;  %3789 = vmatprep.subr.bf16.mxu0 %v4209_v36  ;;  %v225_v49 = vld [vmem:[#allocation2 + $0xb0] sm:$0x11]  ;;  %1215 = vmatprep.mubr.bf16.mxu0 %v3230_v42  ;;  %v476_v60 = vrot.slane %v475_v53, 4  ;;  %v480_v5 = vrot.slane %v478_v61, 5  ;;  %82 = vst [vmem:[#allocation2 + $0xe8] sm:$0xff] %v81_v18  ;;  %v4216_v42 = vld [vmem:[%s5682_s2 + $0x98] sm:$0xff]  }
  0x2b   :  { %v492_v55 = vshll.u32 %v225_v49, 16  ;;  %v503_v0 = vor.u32 %v502_v57, %v499_v41  ;;  %v4602_v4 = vsel %vm4478_vm2, %v462_v50, %v466_v58  ;;  %v508_v16 = vrot.slane %v506_v1, 5  ;;  %v99_v2 = vld [vmem:[%s5680_s0 + $0x150] sm:$0xff] }
  0x2c   :  { %3852 = vmatpush3.bf16.msra.mxu1 %v4208_v62  ;;  %1312 = vmatprep.mubr.bf16.mxu1 %v3232_v43  ;;  %v71_v62 = vld [vmem:[%s5680_s0 + $0xc0] sm:$0xff]  ;;  %v539_v17 = vshrl.u32 %v79_v3, 16  ;;  %v4630_v22 = vsel %vm4478_vm2, %v476_v60, %v480_v5  ;;  %v542_v29 = vshll.u32 %v79_v3, 16  ;;  %v525_v33 = vshrl.u32 %v73_v9, 16  ;;  %v234_v59 = vld [vmem:[#allocation2 + $0xf8] sm:$0x11] }
  0x2d   :  { %3853 = vmatprep.subr.bf16.mxu1 %v4210_v37  ;;  %1216 = vmatmul.mubr.bf16.gmra.mrb[4].mxu0 %v3229_v44  ;;  %v494_v63 = vrot.slane %v492_v55, 5  ;;  %72 = vst [vmem:[#allocation2 + $0xc0] sm:$0xff] %v71_v62  ;;  %v511_v7 = vshrl.u32 %v71_v62, 16  ;;  %v514_v8 = vshll.u32 %v71_v62, 16  ;;  %v504_v15 = vrot.slane %v503_v0, 4  ;;  %v4662_v62 = vld [vmem:[%s5680_s0 + $0x140] sm:$0xff] }
  0x2e   :  { %3790 = vmatpush3.bf16.msra.mxu0 %v4211_v48  ;;  %v541_v28 = vrot.slane %v539_v17, 4  ;;  %v528_v34 = vshll.u32 %v73_v9, 16  ;;  %v544_v37 = vrot.slane %v542_v29, 5  ;;  %v553_v40 = vshrl.u32 %v81_v18, 16  ;;  %v4671_v5 = vld [vmem:[%s5680_s0 + $0x128] sm:$0xff]  ;;  %100 = vst [vmem:[#allocation2 + $0x130] sm:$0xff] %v99_v2 }
  0x2f   :  { %1313 = vmatmul.mubr.bf16.gmra.mrb[4].mxu1 %v3231_v45  ;;  %v4615_v13 = vsel %vm4478_vm2, %v490_v52, %v494_v63  ;;  %v513_v24 = vrot.slane %v511_v7, 4  ;;  %v4639_v26 = vsel %vm4478_vm2, %v504_v15, %v508_v16  ;;  %v516_v27 = vrot.slane %v514_v8, 5  ;;  %3791 = vmatprep.subr.bf16.mxu0 %v4213_v20  ;;  %v229_v45 = vld [vmem:[#allocation2 + $0xd0] sm:$0x11]  ;;  %v4680_v15 = vld [vmem:[%s5680_s0 + $0x148] sm:$0xff]  ;;  %v101_v20 = vld [vmem:[%s5680_s0 + $0x158] sm:$0xff] }
  0x30   :  { %3854 = vmatpush3.bf16.msra.mxu1 %v4212_v54  ;;  %v3234_v21 = vcombine.high %v4602_v4, %v4615_v13  ;;  %v3233_v23 = vcombine.low %v4602_v4, %v4615_v13  ;;  %v3236_v31 = vcombine.high %v4630_v22, %v4639_v26  ;;  %v3235_v32 = vcombine.low %v4630_v22, %v4639_v26  ;;  %v233_v52 = vld [vmem:[#allocation2 + $0xf0] sm:$0x11]  ;;  %v230_v54 = vld [vmem:[#allocation2 + $0xd8] sm:$0x11] }
  0x31   :  { %3855 = vmatprep.subr.bf16.mxu1 %v4214_v25  ;;  %v517_v36 = vor.u32 %v516_v27, %v513_v24  ;;  %v556_v41 = vshll.u32 %v81_v18, 16  ;;  %v527_v43 = vrot.slane %v525_v33, 4  ;;  %v530_v44 = vrot.slane %v528_v34, 5  ;;  %102 = vst [vmem:[#allocation2 + $0x138] sm:$0xff] %v101_v20  ;;  %v4217_v27 = vld [vmem:[%s5682_s2 + $0x60] sm:$0xff]  }
  0x32   :  { %1223 = vmatprep.mubr.bf16.mxu0 %v3234_v21  ;;  %3792 = vmatpush3.bf16.msra.mxu0 %v4215_v30  ;;  %v545_v48 = vor.u32 %v544_v37, %v541_v28  ;;  %v555_v49 = vrot.slane %v553_v40, 4  ;;  %v520_v53 = vshll.u32 %v229_v45, 16  ;;  %v548_v58 = vshll.u32 %v233_v52, 16  ;;  %v4218_v28 = vld [vmem:[%s5682_s2 + $0xe0] sm:$0xff]   ;;  %v4244_v52 = vld [vmem:[%s5682_s2 + $0x290] sm:$0xff]  }
  0x33   :  { %1320 = vmatprep.mubr.bf16.mxu1 %v3236_v31  ;;  %v518_v47 = vrot.slane %v517_v36, 4  ;;  %v558_v50 = vrot.slane %v556_v41, 5  ;;  %v531_v55 = vor.u32 %v530_v44, %v527_v43  ;;  %v534_v60 = vshll.u32 %v230_v54, 16  ;;  %v4219_v33 = vld [vmem:[%s5682_s2 + $0x20] sm:$0xff]   ;;  %3793 = vmatprep.subr.bf16.mxu0 %v4217_v27 }
  0x34   :  { %3856 = vmatpush3.bf16.msra.mxu1 %v4216_v42  ;;  %v546_v57 = vrot.slane %v545_v48, 4  ;;  %v522_v63 = vrot.slane %v520_v53, 5  ;;  %v562_v1 = vshll.u32 %v234_v59, 16  ;;  %v567_v3 = vshrl.u32 %v4654_v51, 16  ;;  %v4220_v41 = vld [vmem:[%s5682_s2 + $0xa0] sm:$0xff]  }
  0x35   :  { %1224 = vmatmul.mubr.bf16.gmra.mrb[8].mxu0 %v3233_v23  ;;  %v559_v61 = vor.u32 %v558_v50, %v555_v49  ;;  %v532_v0 = vrot.slane %v531_v55, 4  ;;  %v550_v6 = vrot.slane %v548_v58, 5  ;;  %v536_v7 = vrot.slane %v534_v60, 5  ;;  %3857 = vmatprep.subr.bf16.mxu1 %v4218_v28  ;;  %v237_v42 = vld [vmem:[#allocation2 + $0x110] sm:$0x11] }
  0x36   :  { %v570_v9 = vshll.u32 %v4654_v51, 16  ;;  %v4684_v16 = vsel %vm4478_vm2, %v518_v47, %v522_v63  ;;  %v564_v17 = vrot.slane %v562_v1, 5  ;;  %v569_v18 = vrot.slane %v567_v3, 4  ;;  %3794 = vmatpush3.bf16.msra.mxu0 %v4219_v33  ;;  %v241_v53 = vld [vmem:[#allocation2 + $0x130] sm:$0x11]  ;;  %v4732_v63 = vld [vmem:[%s5680_s0 + $0x160] sm:$0xff] }
  0x37   :  { %1321 = vmatmul.mubr.bf16.gmra.mrb[8].mxu1 %v3235_v32  ;;  %v560_v8 = vrot.slane %v559_v61, 4  ;;  %v595_v19 = vshrl.u32 %v4662_v62, 16  ;;  %v4692_v21 = vsel %vm4478_vm2, %v546_v57, %v550_v6  ;;  %v4696_v23 = vsel %vm4478_vm2, %v532_v0, %v536_v7  ;;  %v238_v61 = vld [vmem:[#allocation2 + $0x118] sm:$0x11]  ;;  %v107_v7 = vld [vmem:[%s5680_s0 + $0x170] sm:$0xff] }
  0x38   :  { %v572_v24 = vrot.slane %v570_v9, 5  ;;  %v598_v25 = vshll.u32 %v4662_v62, 16  ;;  %v3238_v29 = vcombine.high %v4684_v16, %v4692_v21  ;;  %v3237_v31 = vcombine.low %v4684_v16, %v4692_v21  ;;  %3858 = vmatpush3.bf16.msra.mxu1 %v4220_v41  ;;  %v242_v1 = vld [vmem:[#allocation2 + $0x138] sm:$0x11]  ;;  %108 = vst [vmem:[#allocation2 + $0x150] sm:$0xff] %v107_v7  ;;  %v4221_v41 = vld [vmem:[%s5682_s2 + $0x68] sm:$0xff]  }
  0x39   :  { %v4709_v30 = vsel %vm4478_vm2, %v560_v8, %v564_v17  ;;  %v597_v32 = vrot.slane %v595_v19, 4  ;;  %v581_v43 = vshrl.u32 %v4671_v5, 16  ;;  %v584_v44 = vshll.u32 %v4671_v5, 16  ;;  %v4742_v8 = vld [vmem:[%s5680_s0 + $0x180] sm:$0xff]  ;;  %v115_v19 = vld [vmem:[%s5680_s0 + $0x190] sm:$0xff]  ;;  %v117_v33 = vld [vmem:[%s5680_s0 + $0x198] sm:$0xff]  ;;  %3795 = vmatprep.subr.bf16.mxu0 %v4221_v41 }
  0x3a   :  { %v3240_v34 = vcombine.high %v4696_v23, %v4709_v30  ;;  %v3239_v36 = vcombine.low %v4696_v23, %v4709_v30  ;;  %v573_v37 = vor.u32 %v572_v24, %v569_v18  ;;  %v600_v40 = vrot.slane %v598_v25, 5  ;;  %1231 = vmatprep.mubr.bf16.mxu0 %v3238_v29  ;;  %v4754_v24 = vld [vmem:[%s5680_s0 + $0x168] sm:$0xff]  ;;  %v109_v25 = vld [vmem:[%s5680_s0 + $0x178] sm:$0xff]  ;;  %116 = vst [vmem:[#allocation2 + $0x170] sm:$0xff] %v115_v19 }
  0x3b   :  { %v609_v45 = vshrl.u32 %v4680_v15, 16  ;;  %v612_v47 = vshll.u32 %v4680_v15, 16  ;;  %v576_v49 = vshll.u32 %v237_v42, 16  ;;  %v583_v54 = vrot.slane %v581_v43, 4  ;;  %110 = vst [vmem:[#allocation2 + $0x158] sm:$0xff] %v109_v25  ;;  %118 = vst [vmem:[#allocation2 + $0x178] sm:$0xff] %v117_v33 }
  0x3c   :  { %1328 = vmatprep.mubr.bf16.mxu1 %v3240_v34  ;;  %v574_v48 = vrot.slane %v573_v37, 4  ;;  %v601_v50 = vor.u32 %v600_v40, %v597_v32  ;;  %v586_v55 = vrot.slane %v584_v44, 5  ;;  %v604_v60 = vshll.u32 %v241_v53, 16  ;;  %v4762_v32 = vld [vmem:[%s5680_s0 + $0x188] sm:$0xff] }
  0x3d   :  { %1232 = vmatmul.mubr.bf16.gmra.mrb[12].mxu0 %v3237_v31  ;;  %v611_v56 = vrot.slane %v609_v45, 4  ;;  %v614_v57 = vrot.slane %v612_v47, 5  ;;  %v578_v58 = vrot.slane %v576_v49, 5  ;;  %v590_v3 = vshll.u32 %v238_v61, 16  ;;  %v4222_v47 = vld [vmem:[%s5682_s2 + $0xe8] sm:$0xff]  }
  0x3e   :  { %v602_v59 = vrot.slane %v601_v50, 4  ;;  %v587_v2 = vor.u32 %v586_v55, %v583_v54  ;;  %v623_v9 = vshrl.u32 %v4732_v63, 16  ;;  %v606_v17 = vrot.slane %v604_v60, 5  ;;  %3859 = vmatprep.subr.bf16.mxu1 %v4222_v47 }
  0x3f   :  { %1329 = vmatmul.mubr.bf16.gmra.mrb[12].mxu1 %v3239_v36  ;;  %v615_v6 = vor.u32 %v614_v57, %v611_v56  ;;  %v579_v12 = vsel %vm4478_vm2, %v574_v48, %v578_v58  ;;  %v618_v18 = vshll.u32 %v242_v1, 16  ;;  %v626_v20 = vshll.u32 %v4732_v63, 16  ;;  %v4223_v58 = vld [vmem:[%s5682_s2 + $0x28] sm:$0xff]  }
  0x40   :  { %v588_v27 = vrot.slane %v587_v2, 4  ;;  %v592_v28 = vrot.slane %v590_v3, 5  ;;  %v625_v31 = vrot.slane %v623_v9, 4  ;;  %v4769_v34 = vsel %vm4478_vm2, %v602_v59, %v606_v17  ;;  %v4224_v59 = vld [vmem:[%s5682_s2 + $0xa8] sm:$0xff]   ;;  %v245_v3 = vld [vmem:[#allocation2 + $0x150] sm:$0x11]  ;;  %3796 = vmatpush3.bf16.msra.mxu0 %v4223_v58 }
  0x41   :  { %v616_v29 = vrot.slane %v615_v6, 4  ;;  %v620_v36 = vrot.slane %v618_v18, 5  ;;  %v628_v37 = vrot.slane %v626_v20, 5  ;;  %v651_v40 = vshrl.u32 %v4742_v8, 16  ;;  %v4802_v9 = vld [vmem:[%s5680_s0 + $0x1a0] sm:$0xff]  ;;  %3860 = vmatpush3.bf16.msra.mxu1 %v4224_v59 }
  0x42   :  { %v3242_v42 = vcombine.high %v579_v12, %v4769_v34  ;;  %v593_v43 = vsel %vm4478_vm2, %v588_v27, %v592_v28  ;;  %v3241_v44 = vcombine.low %v579_v12, %v4769_v34  ;;  %v654_v45 = vshll.u32 %v4742_v8, 16  ;;  %v249_v18 = vld [vmem:[#allocation2 + $0x170] sm:$0x11]  ;;  %v246_v20 = vld [vmem:[#allocation2 + $0x158] sm:$0x11] }
  0x43   :  { %v4785_v48 = vsel %vm4478_vm2, %v616_v29, %v620_v36  ;;  %v629_v49 = vor.u32 %v628_v37, %v625_v31  ;;  %v653_v50 = vrot.slane %v651_v40, 4  ;;  %v637_v53 = vshrl.u32 %v4754_v24, 16  ;;  %v250_v33 = vld [vmem:[#allocation2 + $0x178] sm:$0x11]  ;;  %v123_v40 = vld [vmem:[%s5680_s0 + $0x1b0] sm:$0xff] }
  0x44   :  { %1239 = vmatprep.mubr.bf16.mxu0 %v3242_v42  ;;  %v3244_v54 = vcombine.high %v593_v43, %v4785_v48  ;;  %v3243_v55 = vcombine.low %v593_v43, %v4785_v48  ;;  %v656_v56 = vrot.slane %v654_v45, 5  ;;  %v640_v57 = vshll.u32 %v4754_v24, 16  ;;  %124 = vst [vmem:[#allocation2 + $0x190] sm:$0xff] %v123_v40  ;;  %v131_v45 = vld [vmem:[%s5680_s0 + $0x1d0] sm:$0xff] }
  0x45   :  { %1240 = vmatmul.mubr.bf16.gmra.mrb[16].mxu0 %v3241_v44  ;;  %v630_v60 = vrot.slane %v629_v49, 4  ;;  %v639_v61 = vrot.slane %v637_v53, 4  ;;  %v665_v1 = vshrl.u32 %v4762_v32, 16  ;;  %v668_v2 = vshll.u32 %v4762_v32, 16  ;;  %v4818_v44 = vld [vmem:[%s5680_s0 + $0x1c0] sm:$0xff]  ;;  %132 = vst [vmem:[#allocation2 + $0x1b0] sm:$0xff] %v131_v45 }
  0x46   :  { %1336 = vmatprep.mubr.bf16.mxu1 %v3244_v54  ;;  %v657_v6 = vor.u32 %v656_v56, %v653_v50  ;;  %v642_v7 = vrot.slane %v640_v57, 5  ;;  %v632_v19 = vshll.u32 %v245_v3, 16  ;;  %v660_v31 = vshll.u32 %v249_v18, 16  ;;  %v125_v56 = vld [vmem:[%s5680_s0 + $0x1b8] sm:$0xff]  ;;  %v4225_v18 = vld [vmem:[%s5682_s2 + $0x70] sm:$0xff]  }
  0x47   :  { %1337 = vmatmul.mubr.bf16.gmra.mrb[16].mxu1 %v3243_v55  ;;  %v667_v25 = vrot.slane %v665_v1, 4  ;;  %v646_v37 = vshll.u32 %v246_v20, 16  ;;  %v670_v42 = vrot.slane %v668_v2, 5  ;;  %v674_v43 = vshll.u32 %v250_v33, 16  ;;  %v4828_v55 = vld [vmem:[%s5680_s0 + $0x1a8] sm:$0xff]  ;;  %126 = vst [vmem:[#allocation2 + $0x198] sm:$0xff] %v125_v56  ;;  %3797 = vmatprep.subr.bf16.mxu0 %v4225_v18 }
  0x48   :  { %v658_v29 = vrot.slane %v657_v6, 4  ;;  %v643_v36 = vor.u32 %v642_v7, %v639_v61  ;;  %v634_v41 = vrot.slane %v632_v19, 5  ;;  %v679_v47 = vshrl.u32 %v4802_v9, 16  ;;  %v4840_v1 = vld [vmem:[%s5680_s0 + $0x1c8] sm:$0xff]  ;;  %v133_v2 = vld [vmem:[%s5680_s0 + $0x1d8] sm:$0xff]  ;;  %v4226_v19 = vld [vmem:[%s5682_s2 + $0xf0] sm:$0xff]  }
  0x49   :  { %v662_v49 = vrot.slane %v660_v31, 5  ;;  %v648_v53 = vrot.slane %v646_v37, 5  ;;  %v682_v54 = vshll.u32 %v4802_v9, 16  ;;  %v671_v58 = vor.u32 %v670_v42, %v667_v25  ;;  %134 = vst [vmem:[#allocation2 + $0x1b8] sm:$0xff] %v133_v2  ;;  %3861 = vmatprep.subr.bf16.mxu1 %v4226_v19  ;;  %v4886_v18 = vld [vmem:[%s5680_s0 + $0x1e0] sm:$0xff] }
  0x4a   :  { %v644_v50 = vrot.slane %v643_v36, 4  ;;  %v4835_v57 = vsel %vm4478_vm2, %v630_v60, %v634_v41  ;;  %v676_v59 = vrot.slane %v674_v43, 5  ;;  %v681_v61 = vrot.slane %v679_v47, 4  ;;  %v4227_v41 = vld [vmem:[%s5682_s2 + $0x30] sm:$0xff]  }
  0x4b   :  { %v4847_v3 = vsel %vm4478_vm2, %v658_v29, %v662_v49  ;;  %v684_v6 = vrot.slane %v682_v54, 5  ;;  %v707_v7 = vshrl.u32 %v4818_v44, 16  ;;  %v672_v25 = vrot.slane %v671_v58, 4  ;;  %v4228_v49 = vld [vmem:[%s5682_s2 + $0xb0] sm:$0xff]   ;;  %3798 = vmatpush3.bf16.msra.mxu0 %v4227_v41 }
  0x4c   :  { %v4851_v60 = vsel %vm4478_vm2, %v644_v50, %v648_v53  ;;  %v3246_v20 = vcombine.high %v4835_v57, %v4847_v3  ;;  %v3245_v29 = vcombine.low %v4835_v57, %v4847_v3  ;;  %v710_v31 = vshll.u32 %v4818_v44, 16  ;;  %v253_v54 = vld [vmem:[#allocation2 + $0x190] sm:$0x11]  ;;  %3862 = vmatpush3.bf16.msra.mxu1 %v4228_v49 }
  0x4d   :  { %v685_v33 = vor.u32 %v684_v6, %v681_v61  ;;  %v709_v36 = vrot.slane %v707_v7, 4  ;;  %v693_v37 = vshrl.u32 %v4828_v55, 16  ;;  %v696_v40 = vshll.u32 %v4828_v55, 16 }
  0x4e   :  { %1247 = vmatprep.mubr.bf16.mxu0 %v3246_v20  ;;  %v4872_v42 = vsel %vm4478_vm2, %v672_v25, %v676_v59  ;;  %v712_v43 = vrot.slane %v710_v31, 5  ;;  %v721_v45 = vshrl.u32 %v4840_v1, 16  ;;  %v724_v47 = vshll.u32 %v4840_v1, 16  ;;  %v257_v59 = vld [vmem:[#allocation2 + $0x1b0] sm:$0x11] }
  0x4f   :  { %v3248_v50 = vcombine.high %v4851_v60, %v4872_v42  ;;  %1248 = vmatmul.mubr.bf16.gmra.mrb[20].mxu0 %v3245_v29  ;;  %v3247_v53 = vcombine.low %v4851_v60, %v4872_v42  ;;  %v686_v56 = vrot.slane %v685_v33, 4  ;;  %v695_v58 = vrot.slane %v693_v37, 4  ;;  %v254_v20 = vld [vmem:[#allocation2 + $0x198] sm:$0x11] }
  0x50   :  { %v688_v61 = vshll.u32 %v253_v54, 16  ;;  %v713_v2 = vor.u32 %v712_v43, %v709_v36  ;;  %v698_v6 = vrot.slane %v696_v40, 5  ;;  %v723_v7 = vrot.slane %v721_v45, 4  ;;  %v258_v37 = vld [vmem:[#allocation2 + $0x1b8] sm:$0x11]  ;;  %v139_v43 = vld [vmem:[%s5680_s0 + $0x1f0] sm:$0xff] }
  0x51   :  { %1344 = vmatprep.mubr.bf16.mxu1 %v3248_v50  ;;  %v716_v19 = vshll.u32 %v257_v59, 16  ;;  %v726_v25 = vrot.slane %v724_v47, 5  ;;  %v702_v41 = vshll.u32 %v254_v20, 16  ;;  %v730_v50 = vshll.u32 %v258_v37, 16  ;;  %140 = vst [vmem:[#allocation2 + $0x1d0] sm:$0xff] %v139_v43  ;;  %v4898_v47 = vld [vmem:[%s5680_s0 + $0x200] sm:$0xff] }
  0x52   :  { %1345 = vmatmul.mubr.bf16.gmra.mrb[20].mxu1 %v3247_v53  ;;  %v690_v33 = vrot.slane %v688_v61, 5  ;;  %v714_v36 = vrot.slane %v713_v2, 4  ;;  %v699_v40 = vor.u32 %v698_v6, %v695_v58  ;;  %v147_v53 = vld [vmem:[%s5680_s0 + $0x210] sm:$0xff]  ;;  %v735_v54 = vshrl.u32 %v4886_v18, 16  ;;  %v4907_v58 = vld [vmem:[%s5680_s0 + $0x1e8] sm:$0xff]  ;;  %v149_v20 = vld [vmem:[%s5680_s0 + $0x218] sm:$0xff] }
  0x53   :  { %v718_v45 = vrot.slane %v716_v19, 5  ;;  %v727_v49 = vor.u32 %v726_v25, %v723_v7  ;;  %v704_v2 = vrot.slane %v702_v41, 5  ;;  %148 = vst [vmem:[#allocation2 + $0x1f0] sm:$0xff] %v147_v53  ;;  %v738_v6 = vshll.u32 %v4886_v18, 16  ;;  %v141_v7 = vld [vmem:[%s5680_s0 + $0x1f8] sm:$0xff]  ;;  %v4920_v19 = vld [vmem:[%s5680_s0 + $0x208] sm:$0xff] }
  0x54   :  { %v4911_v59 = vsel %vm4478_vm2, %v686_v56, %v690_v33  ;;  %v700_v61 = vrot.slane %v699_v40, 4  ;;  %v732_v33 = vrot.slane %v730_v50, 5  ;;  %v737_v37 = vrot.slane %v735_v54, 4  ;;  %142 = vst [vmem:[#allocation2 + $0x1d8] sm:$0xff] %v141_v7  ;;  %150 = vst [vmem:[#allocation2 + $0x1f8] sm:$0xff] %v149_v20  ;;  %v4229_v40 = vld [vmem:[%s5682_s2 + $0x78] sm:$0xff]  }
  0x55   :  { %v4927_v56 = vsel %vm4478_vm2, %v714_v36, %v718_v45  ;;  %v728_v25 = vrot.slane %v727_v49, 4  ;;  %v740_v45 = vrot.slane %v738_v6, 5  ;;  %v4230_v49 = vld [vmem:[%s5682_s2 + $0xf8] sm:$0xff]   ;;  %v763_v53 = vshrl.u32 %v4898_v47, 16  ;;  %3799 = vmatprep.subr.bf16.mxu0 %v4229_v40 }
  0x56   :  { %5699 = vst [vmem:[#allocation4_spill] sm:$0xff] %v4927_v56  ;;  %v3250_v41 = vcombine.high %v4911_v59, %v4927_v56  ;;  %v4936_v43 = vsel %vm4478_vm2, %v700_v61, %v704_v2  ;;  %v3249_v36 = vcombine.low %v4911_v59, %v4927_v56  ;;  %v766_v54 = vshll.u32 %v4898_v47, 16  ;;  %v4231_v61 = vld [vmem:[%s5682_s2 + $0x38] sm:$0xff]   ;;  %3863 = vmatprep.subr.bf16.mxu1 %v4230_v49 }
  0x57   :  { %v4945_v50 = vsel %vm4478_vm2, %v728_v25, %v732_v33  ;;  %v749_v7 = vshrl.u32 %v4907_v58, 16  ;;  %v741_v20 = vor.u32 %v740_v45, %v737_v37  ;;  %v752_v25 = vshll.u32 %v4907_v58, 16  ;;  %v4232_v33 = vld [vmem:[%s5682_s2 + $0xb8] sm:$0xff]   ;;  %3800 = vmatpush3.bf16.msra.mxu0 %v4231_v61  ;;  %v4233_v37 = vld [vmem:[%s5682_s2 + $0x240] sm:$0xff]  }
  0x58   :  { %5700 = vst [vmem:[#allocation5_spill] sm:$0xff] %v4945_v50  ;;  %1255 = vmatprep.mubr.bf16.mxu0 %v3250_v41  ;;  %v3252_v2 = vcombine.high %v4936_v43, %v4945_v50  ;;  %v3251_v6 = vcombine.low %v4936_v43, %v4945_v50  ;;  %v765_v40 = vrot.slane %v763_v53, 4  ;;  %v768_v31 = vrot.slane %v766_v54, 5  ;;  %v261_v28 = vld [vmem:[#allocation2 + $0x1d0] sm:$0x11]  ;;  %3864 = vmatpush3.bf16.msra.mxu1 %v4232_v33 }
  0x59   :  { %1256 = vmatmul.mubr.bf16.gmra.mrb[24].mxu0 %v3249_v36  ;;  %v751_v29 = vrot.slane %v749_v7, 4  ;;  %v777_v41 = vshrl.u32 %v4920_v19, 16  ;;  %v742_v17 = vrot.slane %v741_v20, 4  ;;  %v754_v27 = vrot.slane %v752_v25, 5  ;;  %3913 = vmatprep.subr.bf16.mxu0 %v4233_v37  ;;  %v4249_v7 = vld [vmem:[%s5682_s2 + $0x260] sm:$0xff]  }
  0x5a   :  { %1352 = vmatprep.mubr.bf16.mxu1 %v3252_v2  ;;  %v780_v12 = vshll.u32 %v4920_v19, 16  ;;  %v265_v36 = vld [vmem:[#allocation2 + $0x1f0] sm:$0x11]  ;;  %v744_v49 = vshll.u32 %v261_v28, 16  ;;  %v769_v53 = vor.u32 %v768_v31, %v765_v40 }
  0x5b   :  { %1353 = vmatmul.mubr.bf16.gmra.mrb[24].mxu1 %v3251_v6  ;;  %v779_v54 = vrot.slane %v777_v41, 4  ;;  %v772_v2 = vshll.u32 %v265_v36, 16  ;;  %v262_v20 = vld [vmem:[#allocation2 + $0x1d8] sm:$0x11]  ;;  %v755_v0 = vor.u32 %v754_v27, %v751_v29  ;;  %v4234_v29 = vld [vmem:[%s5682_s2 + $0x2c0] sm:$0xff]  }
  0x5c   :  { %v266_v25 = vld [vmem:[#allocation2 + $0x1f8] sm:$0x11]  ;;  %v782_v61 = vrot.slane %v780_v12, 5  ;;  %v746_v50 = vrot.slane %v744_v49, 5  ;;  %v770_v45 = vrot.slane %v769_v53, 4  ;;  %v758_v6 = vshll.u32 %v262_v20, 16  ;;  %3977 = vmatprep.subr.bf16.mxu1 %v4234_v29 }
  0x5d   :  { %v786_v56 = vshll.u32 %v266_v25, 16  ;;  %v774_v28 = vrot.slane %v772_v2, 5  ;;  %v756_v31 = vrot.slane %v755_v0, 4  ;;  %v4299_v20 = vld [vmem:[#allocation2 + $0x8] sm:$0xff]  ;;  %v5035_v29 = vld [vmem:[#allocation2 + $0x40] sm:$0xff] }
  0x5e   :  { %v783_v40 = vor.u32 %v782_v61, %v779_v54  ;;  %v4976_v36 = vsel %vm4478_vm2, %v742_v17, %v746_v50  ;;  %v760_v12 = vrot.slane %v758_v6, 5  ;;  %v4993_v50 = vld [vmem:[#allocation2 + $0x20] sm:$0xff]  ;;  %v5004_v25 = vld [vmem:[#allocation2 + $0x28] sm:$0xff] }
  0x5f   :  { %5701 = vst [vmem:[#allocation6_spill] sm:$0xff] %v4976_v36  ;;  %v788_v27 = vrot.slane %v786_v56, 5  ;;  %v4983_v33 = vsel %vm4478_vm2, %v770_v45, %v774_v28  ;;  %v4297_v56 = vld [vmem:[#allocation2] sm:$0xff]  ;;  %v3292_v61 = vcombine.high %v4299_v20, %v5004_v25  ;;  %v5087_v6 = vld [vmem:[#allocation2 + $0xa8] sm:$0xff] }
  0x60   :  { %5702 = vst [vmem:[#allocation7_spill] sm:$0xff] %v4983_v33  ;;  %v784_v37 = vrot.slane %v783_v40, 4  ;;  %v3254_v0 = vcombine.high %v4976_v36, %v4983_v33  ;;  %v4989_v49 = vsel %vm4478_vm2, %v756_v31, %v760_v12  ;;  %v3253_v17 = vcombine.low %v4976_v36, %v4983_v33  ;;  %v4239_v12 = vld [vmem:[%s5682_s2 + $0x208] sm:$0xff]   ;;  %v4241_v31 = vld [vmem:[%s5682_s2 + $0x250] sm:$0xff]  }
  0x61   :  { %5703 = vst [vmem:[#allocation8_spill] sm:$0xff] %v4989_v49  ;;  %v3290_v53 = vcombine.high %v4297_v56, %v4993_v50  ;;  %v5127_v33 = vld [vmem:[#allocation2 + $0xe8] sm:$0xff] }
  0x62   :  { %v4998_v45 = vsel %vm4478_vm2, %v784_v37, %v788_v27  ;;  %1263 = vmatprep.mubr.bf16.mxu0 %v3254_v0  ;;  %v5037_v37 = vld [vmem:[#allocation2 + $0x60] sm:$0xff]  ;;  %v5050_v27 = vld [vmem:[#allocation2 + $0x68] sm:$0xff] }
  0x63   :  { %5704 = vst [vmem:[#allocation9_spill] sm:$0xff] %v4998_v45  ;;  %v3256_v54 = vcombine.high %v4989_v49, %v4998_v45  ;;  %v3255_v2 = vcombine.low %v4989_v49, %v4998_v45  ;;  %1264 = vmatmul.mubr.bf16.gmra.mrb[28].mxu0 %v3253_v17  ;;  %v3294_v0 = vcombine.high %v5035_v29, %v5037_v37  ;;  %v5125_v45 = vld [vmem:[#allocation2 + $0xc8] sm:$0xff] }
  0x64   :  { %1753 = vmatprep.mubr.bf16.mxu0 %v3290_v53  ;;  %v3289_v53 = vcombine.low %v4297_v56, %v4993_v50  ;;  %v3291_v17 = vcombine.low %v4299_v20, %v5004_v25  ;;  %v4237_v56 = vld [vmem:[%s5682_s2 + $0x248] sm:$0xff]   ;;  %v3304_v49 = vcombine.high %v5125_v45, %v5127_v33 }
  0x65   :  { %1360 = vmatprep.mubr.bf16.mxu1 %v3256_v54  ;;  %v5048_v54 = vld [vmem:[#allocation2 + $0x48] sm:$0xff] }
  0x66   :  { %1361 = vmatmul.mubr.bf16.gmra.mrb[28].mxu1 %v3255_v2  ;;  %v4236_v2 = vld [vmem:[%s5682_s2 + $0x280] sm:$0xff]   ;;  %v3296_v40 = vcombine.high %v5048_v54, %v5050_v27  ;;  %v4238_v20 = vld [vmem:[%s5682_s2 + $0x2c8] sm:$0xff]   ;;  %v3295_v28 = vcombine.low %v5048_v54, %v5050_v27 }
  0x67   :  { %1850 = vmatprep.mubr.bf16.mxu1 %v3292_v61  ;;  %v4235_v61 = vld [vmem:[%s5682_s2 + $0x200] sm:$0xff]   ;;  %v4255_v36 = vld [vmem:[%s5682_s2 + $0x228] sm:$0xff]  }
  0x6b   :  { %1754 = vmatmul.mubr.bf16.vlgmr.msra.gmra.mrb[32].mxu0 %v3289_v53  ;;  %v4240_v53 = vld [vmem:[%s5682_s2 + $0x288] sm:$0xff]  }
  0x6c   :  { %3914 = vmatpush3.bf16.msra.mxu0 %v4235_v61  ;;  %1761 = vmatprep.mubr.bf16.mxu0 %v3294_v0  ;;  %v3293_v61 = vcombine.low %v5035_v29, %v5037_v37  ;;  %v4242_v0 = vld [vmem:[%s5682_s2 + $0x2d0] sm:$0xff]  }
  0x6d   :  { %3915 = vmatprep.subr.bf16.mxu0 %v4237_v56  ;;  %v5073_v56 = vld [vmem:[#allocation2 + $0xa0] sm:$0xff] }
  0x6e   :  { %1851 = vmatmul.mubr.bf16.vlgmr.msra.gmra.mrb[32].mxu1 %v3291_v17  ;;  %v5071_v17 = vld [vmem:[#allocation2 + $0x80] sm:$0xff] }
  0x6f   :  { %3978 = vmatpush3.bf16.msra.mxu1 %v4236_v2  ;;  %1858 = vmatprep.mubr.bf16.mxu1 %v3296_v40  ;;  %v3298_v40 = vcombine.high %v5071_v17, %v5073_v56  ;;  %v4243_v2 = vld [vmem:[%s5682_s2 + $0x210] sm:$0xff]  }
  0x70   :  { %3979 = vmatprep.subr.bf16.mxu1 %v4238_v20  ;;  %3916 = vmatpush3.bf16.msra.mxu0 %v4239_v12  ;;  %v4245_v20 = vld [vmem:[%s5682_s2 + $0x258] sm:$0xff]   ;;  %v5085_v12 = vld [vmem:[#allocation2 + $0x88] sm:$0xff] }
  0x71   :  { %3917 = vmatprep.subr.bf16.mxu0 %v4241_v31  ;;  %v3300_v41 = vcombine.high %v5085_v12, %v5087_v6  ;;  %v4246_v31 = vld [vmem:[%s5682_s2 + $0x2d8] sm:$0xff]  }
  0x73   :  { %3980 = vmatpush3.bf16.msra.mxu1 %v4240_v53  ;;  %1762 = vmatmul.mubr.bf16.gmra.mrb[36].mxu0 %v3293_v61  ;;  %v4247_v53 = vld [vmem:[%s5682_s2 + $0x218] sm:$0xff]  }
  0x74   :  { %3981 = vmatprep.subr.bf16.mxu1 %v4242_v0  ;;  %1769 = vmatprep.mubr.bf16.mxu0 %v3298_v40  ;;  %v4248_v61 = vld [vmem:[%s5682_s2 + $0x298] sm:$0xff]   ;;  %v3297_v0 = vcombine.low %v5071_v17, %v5073_v56  ;;  %v4250_v40 = vld [vmem:[%s5682_s2 + $0x2e0] sm:$0xff]  }
  0x75   :  { %3918 = vmatpush3.bf16.msra.mxu0 %v4243_v2  ;;  %v5113_v2 = vld [vmem:[#allocation2 + $0xe0] sm:$0xff] }
  0x76   :  { %1859 = vmatmul.mubr.bf16.gmra.mrb[36].mxu1 %v3295_v28  ;;  %3919 = vmatprep.subr.bf16.mxu0 %v4245_v20  ;;  %v5111_v28 = vld [vmem:[#allocation2 + $0xc0] sm:$0xff]  ;;  %v3299_v20 = vcombine.low %v5085_v12, %v5087_v6 }
  0x77   :  { %1866 = vmatprep.mubr.bf16.mxu1 %v3300_v41  ;;  %3982 = vmatpush3.bf16.msra.mxu1 %v4244_v52  ;;  %v3302_v41 = vcombine.high %v5111_v28, %v5113_v2  ;;  %v4251_v52 = vld [vmem:[%s5682_s2 + $0x220] sm:$0xff]  }
  0x78   :  { %3983 = vmatprep.subr.bf16.mxu1 %v4246_v31  ;;  %v4253_v31 = vld [vmem:[%s5682_s2 + $0x268] sm:$0xff]  }
  0x79   :  { %3920 = vmatpush3.bf16.msra.mxu0 %v4247_v53  ;;  %v4252_v53 = vld [vmem:[%s5682_s2 + $0x2a0] sm:$0xff]  }
  0x7a   :  { %3921 = vmatprep.subr.bf16.mxu0 %v4249_v7  ;;  %v4254_v7 = vld [vmem:[%s5682_s2 + $0x2e8] sm:$0xff]  }
  0x7b   :  { %3984 = vmatpush3.bf16.msra.mxu1 %v4248_v61  ;;  %1770 = vmatmul.mubr.bf16.gmra.mrb[40].mxu0 %v3297_v0  ;;  %v4257_v61 = vld [vmem:[%s5682_s2 + $0x270] sm:$0xff]   ;;  %v4256_v0 = vld [vmem:[%s5682_s2 + $0x2a8] sm:$0xff]  }
  0x7c   :  { %3985 = vmatprep.subr.bf16.mxu1 %v4250_v40  ;;  %1777 = vmatprep.mubr.bf16.mxu0 %v3302_v41  ;;  %v3301_v40 = vcombine.low %v5111_v28, %v5113_v2  ;;  %v4258_v41 = vld [vmem:[%s5682_s2 + $0x2f0] sm:$0xff]  }
  0x7d   :  { %3922 = vmatpush3.bf16.msra.mxu0 %v4251_v52  ;;  %v4259_v52 = vld [vmem:[%s5682_s2 + $0x230] sm:$0xff]  }
  0x7e   :  { %1867 = vmatmul.mubr.bf16.gmra.mrb[40].mxu1 %v3299_v20  ;;  %3923 = vmatprep.subr.bf16.mxu0 %v4253_v31  ;;  %v4261_v20 = vld [vmem:[%s5682_s2 + $0x278] sm:$0xff]   ;;  %v4260_v31 = vld [vmem:[%s5682_s2 + $0x2b0] sm:$0xff]  }
  0x7f   :  { %1874 = vmatprep.mubr.bf16.mxu1 %v3304_v49  ;;  %3986 = vmatpush3.bf16.msra.mxu1 %v4252_v53  ;;  %v3303_v49 = vcombine.low %v5125_v45, %v5127_v33  ;;  %v5705_v53 = vcombine.high %v4654_v51, %v4662_v62 }
  0x80   :  { %3987 = vmatprep.subr.bf16.mxu1 %v4254_v7  ;;  %v4263_v7 = vld [vmem:[%s5682_s2 + $0x238] sm:$0xff]  }
  0x81   :  { %3924 = vmatpush3.bf16.msra.mxu0 %v4255_v36  ;;  %v4262_v36 = vld [vmem:[%s5682_s2 + $0x2f8] sm:$0xff]  }
  0x82   :  { %3925 = vmatprep.subr.bf16.mxu0 %v4257_v61  ;;  %v4265_v61 = vld [vmem:[%s5682_s2 + $0x340] sm:$0xff]  }
  0x83   :  { %3988 = vmatpush3.bf16.msra.mxu1 %v4256_v0  ;;  %1778 = vmatmul.mubr.bf16.gmra.mrb[44].mxu0 %v3301_v40  ;;  %v5706_v0 = vcombine.high %v4671_v5, %v4680_v15  ;;  %v4264_v40 = vld [vmem:[%s5682_s2 + $0x2b8] sm:$0xff]  }
  0x84   :  { %3989 = vmatprep.subr.bf16.mxu1 %v4258_v41  ;;  %1785 = vmatprep.mubr.bf16.mxu0 %v5705_v53  ;;  %v4266_v41 = vld [vmem:[%s5682_s2 + $0x3c0] sm:$0xff]   ;;  %v5710_v53 = vcombine.high %v4754_v24, %v4762_v32 }
  0x85   :  { %3926 = vmatpush3.bf16.msra.mxu0 %v4259_v52  ;;  %v5186_v52 = vld [vmem:[%s5681_s1 + $0x100] sm:$0xff] }
  0x86   :  { %1875 = vmatmul.mubr.bf16.gmra.mrb[44].mxu1 %v3303_v49  ;;  %3927 = vmatprep.subr.bf16.mxu0 %v4261_v20  ;;  %v5191_v49 = vld [vmem:[%s5681_s1 + $0x108] sm:$0xff]  ;;  %v5707_v20 = vcombine.low %v4654_v51, %v4662_v62  ;;  %v5712_v51 = vcombine.high %v4802_v9, %v4818_v44 }
  0x87   :  { %1882 = vmatprep.mubr.bf16.mxu1 %v5706_v0  ;;  %3990 = vmatpush3.bf16.msra.mxu1 %v4260_v31  ;;  %v5708_v31 = vcombine.high %v4732_v63, %v4742_v8  ;;  %v3318_v0 = vcombine.high %v4886_v18, %v4898_v47 }
  0x88   :  { %3991 = vmatprep.subr.bf16.mxu1 %v4262_v36  ;;  %v5709_v36 = vcombine.low %v4671_v5, %v4680_v15  ;;  %v5714_v5 = vcombine.high %v4828_v55, %v4840_v1 }
  0x89   :  { %3928 = vmatpush3.bf16.msra.mxu0 %v4263_v7  ;;  %v5711_v7 = vcombine.low %v4732_v63, %v4742_v8 }
  0x8a   :  { %4041 = vmatprep.subr.bf16.mxu0 %v4265_v61  ;;  %v5713_v61 = vcombine.low %v4754_v24, %v4762_v32 }
  0x8b   :  { %3992 = vmatpush3.bf16.msra.mxu1 %v4264_v40  ;;  %1786 = vmatmul.mubr.bf16.gmra.mrb[48].mxu0 %v5707_v20  ;;  %v5222_v40 = vld [vmem:[%s5681_s1 + $0x220] sm:$0xff]  ;;  %v5229_v20 = vld [vmem:[%s5681_s1 + $0x228] sm:$0xff] }
  0x8c   :  { %4105 = vmatprep.subr.bf16.mxu1 %v4266_v41  ;;  %1793 = vmatprep.mubr.bf16.mxu0 %v5708_v31  ;;  %v3320_v41 = vcombine.high %v4907_v58, %v4920_v19  ;;  %v5715_v31 = vcombine.low %v4802_v9, %v4818_v44 }
  0x8e   :  { %1883 = vmatmul.mubr.bf16.gmra.mrb[48].mxu1 %v5709_v36  ;;  %v5716_v36 = vcombine.low %v4828_v55, %v4840_v1 }
  0x8f   :  { %1890 = vmatprep.mubr.bf16.mxu1 %v5710_v53  ;;  %v3155_v53 = vld [vmem:[%s5681_s1 + $0x110] sm:$0xff] }
  0x90   :  { %178 = vst [vmem:[#allocation3 + $0x10] sm:$0xff] %v3155_v53  ;;  %v4267_v53 = vld [vmem:[%s5682_s2 + $0x300] sm:$0xff]  }
  0x93   :  { %1794 = vmatmul.mubr.bf16.gmra.mrb[52].mxu0 %v5711_v7  ;;  %v3317_v7 = vcombine.low %v4886_v18, %v4898_v47 }
  0x94   :  { %1801 = vmatprep.mubr.bf16.mxu0 %v5712_v51  ;;  %v3156_v51 = vld [vmem:[%s5681_s1 + $0x118] sm:$0xff] }
  0x95   :  { %180 = vst [vmem:[#allocation3 + $0x18] sm:$0xff] %v3156_v51  ;;  %v3422_v51 = vcombine.high %v5037_v37, %v5071_v17 }
  0x96   :  { %1891 = vmatmul.mubr.bf16.gmra.mrb[52].mxu1 %v5713_v61  ;;  %v3159_v61 = vld [vmem:[%s5681_s1 + $0x230] sm:$0xff] }
  0x97   :  { %1898 = vmatprep.mubr.bf16.mxu1 %v5714_v5  ;;  %v3160_v5 = vld [vmem:[%s5681_s1 + $0x238] sm:$0xff]  ;;  %186 = vst [vmem:[#allocation3 + $0x30] sm:$0xff] %v3159_v61  ;;  %v3419_v61 = vcombine.low %v5004_v25, %v5048_v54 }
  0x98   :  { %188 = vst [vmem:[#allocation3 + $0x38] sm:$0xff] %v3160_v5  ;;  %v4268_v5 = vld [vmem:[%s5682_s2 + $0x380] sm:$0xff]  }
  0x9b   :  { %1802 = vmatmul.mubr.bf16.gmra.mrb[56].mxu0 %v5715_v31  ;;  %v3420_v31 = vcombine.high %v5004_v25, %v5048_v54  ;;  %v4271_v25 = vld [vmem:[%s5682_s2 + $0x308] sm:$0xff]   ;;  %v4273_v54 = vld [vmem:[%s5682_s2 + $0x350] sm:$0xff]  }
  0x9c   :  { %1809 = vmatprep.mubr.bf16.mxu0 %v3318_v0  ;;  %v3418_v0 = vcombine.high %v4993_v50, %v5035_v29 }
  0x9e   :  { %1899 = vmatmul.mubr.bf16.gmra.mrb[56].mxu1 %v5716_v36  ;;  %v3417_v36 = vcombine.low %v4993_v50, %v5035_v29  ;;  %v3424_v50 = vcombine.high %v5050_v27, %v5085_v12  ;;  %v4270_v29 = vld [vmem:[%s5682_s2 + $0x3c8] sm:$0xff]  }
  0x9f   :  { %1906 = vmatprep.mubr.bf16.mxu1 %v3320_v41  ;;  %v3319_v41 = vcombine.low %v4907_v58, %v4920_v19 }
  0xa3   :  { %1810 = vmatmul.mubr.bf16.gmra.mrb[60].mxu0 %v3317_v7  ;;  %v4269_v7 = vld [vmem:[%s5682_s2 + $0x348] sm:$0xff]  }
  0xa4   :  { %2280 = vmatprep.mubr.bf16.mxu0 %v3418_v0  ;;  %v4272_v0 = vld [vmem:[%s5682_s2 + $0x388] sm:$0xff]  }
  0xa6   :  { %1907 = vmatmul.mubr.bf16.gmra.mrb[60].mxu1 %v3319_v41  ;;  %v3421_v41 = vcombine.low %v5037_v37, %v5071_v17  ;;  %v4277_v37 = vld [vmem:[%s5682_s2 + $0x358] sm:$0xff]   ;;  %v3428_v17 = vcombine.high %v5087_v6, %v5125_v45 }
  0xa7   :  { %2377 = vmatprep.mubr.bf16.mxu1 %v3420_v31  ;;  %v4274_v31 = vld [vmem:[%s5682_s2 + $0x3d0] sm:$0xff]  }
  0xab   :  { %2281 = vmatmul.mubr.bf16.vlgmr.msra.gmra.mrb[64].mxu0 %v3417_v36  ;;  %v3426_v36 = vcombine.high %v5073_v56, %v5111_v28 }
  0xac   :  { %4042 = vmatpush3.bf16.msra.mxu0 %v4267_v53  ;;  %2288 = vmatprep.mubr.bf16.mxu0 %v3422_v51  ;;  %v4275_v53 = vld [vmem:[%s5682_s2 + $0x310] sm:$0xff]   ;;  %v3423_v51 = vcombine.low %v5050_v27, %v5085_v12  ;;  %v4279_v27 = vld [vmem:[%s5682_s2 + $0x318] sm:$0xff]   ;;  %v4281_v12 = vld [vmem:[%s5682_s2 + $0x360] sm:$0xff]  }
  0xad   :  { %4043 = vmatprep.subr.bf16.mxu0 %v4269_v7  ;;  %v4278_v7 = vld [vmem:[%s5682_s2 + $0x3d8] sm:$0xff]  }
  0xae   :  { %2378 = vmatmul.mubr.bf16.vlgmr.msra.gmra.mrb[64].mxu1 %v3419_v61  ;;  %v4276_v61 = vld [vmem:[%s5682_s2 + $0x390] sm:$0xff]  }
  0xaf   :  { %4106 = vmatpush3.bf16.msra.mxu1 %v4268_v5  ;;  %2385 = vmatprep.mubr.bf16.mxu1 %v3424_v50  ;;  %v4280_v5 = vld [vmem:[%s5682_s2 + $0x398] sm:$0xff]   ;;  %v3425_v50 = vcombine.low %v5073_v56, %v5111_v28  ;;  %v4285_v56 = vld [vmem:[%s5682_s2 + $0x368] sm:$0xff]   ;;  %v3432_v28 = vcombine.high %v5127_v33, %v5191_v49 }
  0xb0   :  { %4107 = vmatprep.subr.bf16.mxu1 %v4270_v29  ;;  %4044 = vmatpush3.bf16.msra.mxu0 %v4271_v25  ;;  %v4282_v29 = vld [vmem:[%s5682_s2 + $0x3e0] sm:$0xff]   ;;  %v3430_v25 = vcombine.high %v5113_v2, %v5186_v52 }
  0xb1   :  { %4045 = vmatprep.subr.bf16.mxu0 %v4273_v54  ;;  %v4283_v54 = vld [vmem:[%s5682_s2 + $0x320] sm:$0xff]  }
  0xb3   :  { %4108 = vmatpush3.bf16.msra.mxu1 %v4272_v0  ;;  %2289 = vmatmul.mubr.bf16.gmra.mrb[68].mxu0 %v3421_v41  ;;  %v3427_v0 = vcombine.low %v5087_v6, %v5125_v45  ;;  %v4284_v41 = vld [vmem:[%s5682_s2 + $0x3a0] sm:$0xff]   ;;  %v4287_v45 = vld [vmem:[%s5682_s2 + $0x328] sm:$0xff]   ;;  %v4289_v6 = vld [vmem:[%s5682_s2 + $0x370] sm:$0xff]  }
  0xb4   :  { %4109 = vmatprep.subr.bf16.mxu1 %v4274_v31  ;;  %2296 = vmatprep.mubr.bf16.mxu0 %v3426_v36  ;;  %v4286_v31 = vld [vmem:[%s5682_s2 + $0x3e8] sm:$0xff]  }
  0xb5   :  { %4046 = vmatpush3.bf16.msra.mxu0 %v4275_v53  ;;  %v4288_v36 = vld [vmem:[%s5682_s2 + $0x3a8] sm:$0xff]   ;;  %v3429_v53 = vcombine.low %v5113_v2, %v5186_v52  ;;  %v4292_v2 = vld [vmem:[%s5682_s2 + $0x3b0] sm:$0xff]  }
  0xb6   :  { %2386 = vmatmul.mubr.bf16.gmra.mrb[68].mxu1 %v3423_v51  ;;  %4047 = vmatprep.subr.bf16.mxu0 %v4277_v37  ;;  %v4290_v51 = vld [vmem:[%s5682_s2 + $0x3f0] sm:$0xff]  }
  0xb7   :  { %2393 = vmatprep.mubr.bf16.mxu1 %v3428_v17  ;;  %4110 = vmatpush3.bf16.msra.mxu1 %v4276_v61  ;;  %v4291_v37 = vld [vmem:[%s5682_s2 + $0x330] sm:$0xff]   ;;  %v3431_v17 = vcombine.low %v5127_v33, %v5191_v49  ;;  %v4293_v61 = vld [vmem:[%s5682_s2 + $0x378] sm:$0xff]  }
  0xb8   :  { %4111 = vmatprep.subr.bf16.mxu1 %v4278_v7  ;;  %v4294_v7 = vld [vmem:[%s5682_s2 + $0x3f8] sm:$0xff]  }
  0xb9   :  { %4048 = vmatpush3.bf16.msra.mxu0 %v4279_v27  ;;  %v5717_v27 = vcombine.high %v4662_v62, %v4732_v63  ;;  %v4295_v33 = vld [vmem:[%s5682_s2 + $0x338] sm:$0xff]  }
  0xba   :  { %4049 = vmatprep.subr.bf16.mxu0 %v4281_v12  ;;  %v5718_v12 = vcombine.high %v4680_v15, %v4754_v24 }
  0xbb   :  { %4112 = vmatpush3.bf16.msra.mxu1 %v4280_v5  ;;  %2297 = vmatmul.mubr.bf16.gmra.mrb[72].mxu0 %v3425_v50  ;;  %v4296_v5 = vld [vmem:[%s5682_s2 + $0x3b8] sm:$0xff]   ;;  %v5719_v50 = vcombine.low %v4662_v62, %v4732_v63  ;;  %v5724_v62 = vcombine.high %v4818_v44, %v4886_v18  ;;  %v5725_v63 = vcombine.low %v4762_v32, %v4828_v55 }
  0xbc   :  { %4113 = vmatprep.subr.bf16.mxu1 %v4282_v29  ;;  %2304 = vmatprep.mubr.bf16.mxu0 %v3430_v25  ;;  %v5720_v29 = vcombine.high %v4742_v8, %v4802_v9  ;;  %v5721_v25 = vcombine.low %v4680_v15, %v4754_v24  ;;  %v5726_v15 = vcombine.high %v4840_v1, %v4907_v58 }
  0xbd   :  { %4050 = vmatpush3.bf16.msra.mxu0 %v4283_v54  ;;  %v5722_v54 = vcombine.high %v4762_v32, %v4828_v55  ;;  %v3446_v24 = vcombine.high %v4898_v47, %v5222_v40  ;;  %v3445_v32 = vcombine.low %v4898_v47, %v5222_v40  ;;  %v3546_v55 = vcombine.high %v4491_v35, %v4551_v10 }
  0xbe   :  { %2394 = vmatmul.mubr.bf16.gmra.mrb[72].mxu1 %v3427_v0  ;;  %4051 = vmatprep.subr.bf16.mxu0 %v4285_v56  ;;  %v5723_v0 = vcombine.low %v4742_v8, %v4802_v9  ;;  %v3448_v56 = vcombine.high %v4920_v19, %v5229_v20  ;;  %v5727_v8 = vcombine.low %v4818_v44, %v4886_v18  ;;  %v2459_v44 = vshrl.u32 %v5186_v52, 16 }
  0xbf   :  { %2401 = vmatprep.mubr.bf16.mxu1 %v3432_v28  ;;  %4114 = vmatpush3.bf16.msra.mxu1 %v4284_v41  ;;  %v5728_v9 = vcombine.low %v4840_v1, %v4907_v58  ;;  %v3447_v28 = vcombine.low %v4920_v19, %v5229_v20  ;;  %v3548_v41 = vcombine.high %v4514_v46, %v4555_v11  ;;  %v2462_v1 = vshll.u32 %v5186_v52, 16 }
  0xc0   :  { %4115 = vmatprep.subr.bf16.mxu1 %v4286_v31  ;;  %v3545_v18 = vcombine.low %v4491_v35, %v4551_v10  ;;  %v2473_v47 = vshrl.u32 %v5191_v49, 16  ;;  %v2476_v58 = vshll.u32 %v5191_v49, 16  ;;  %v3550_v19 = vcombine.high %v4571_v38, %v4602_v4 }
  0xc1   :  { %4052 = vmatpush3.bf16.msra.mxu0 %v4287_v45  ;;  %v3547_v31 = vcombine.low %v4514_v46, %v4555_v11  ;;  %v2461_v45 = vrot.slane %v2459_v44, 4  ;;  %v3552_v52 = vcombine.high %v4575_v39, %v4630_v22  ;;  %v3549_v46 = vcombine.low %v4571_v38, %v4602_v4 }
  0xc2   :  { %4053 = vmatprep.subr.bf16.mxu0 %v4289_v6  ;;  %v2464_v6 = vrot.slane %v2462_v1, 5  ;;  %v2478_v35 = vrot.slane %v2476_v58, 5  ;;  %v3556_v38 = vcombine.high %v4639_v26, %v4696_v23 }
  0xc3   :  { %4116 = vmatpush3.bf16.msra.mxu1 %v4288_v36  ;;  %2305 = vmatmul.mubr.bf16.gmra.mrb[76].mxu0 %v3429_v53  ;;  %v269_v36 = vld [vmem:[#allocation3 + $0x10] sm:$0x11] }
  0xc4   :  { %4117 = vmatprep.subr.bf16.mxu1 %v4290_v51  ;;  %2312 = vmatprep.mubr.bf16.mxu0 %v5717_v27  ;;  %v2475_v51 = vrot.slane %v2473_v47, 4 }
  0xc5   :  { %4054 = vmatpush3.bf16.msra.mxu0 %v4291_v37  ;;  %v270_v37 = vld [vmem:[#allocation3 + $0x18] sm:$0x11] }
  0xc6   :  { %2402 = vmatmul.mubr.bf16.gmra.mrb[76].mxu1 %v3431_v17  ;;  %4055 = vmatprep.subr.bf16.mxu0 %v4293_v61 }
  0xc7   :  { %2409 = vmatprep.mubr.bf16.mxu1 %v5718_v12  ;;  %4118 = vmatpush3.bf16.msra.mxu1 %v4292_v2  ;;  %v2465_v2 = vor.u32 %v2464_v6, %v2461_v45 }
  0xc8   :  { %4119 = vmatprep.subr.bf16.mxu1 %v4294_v7  ;;  %v2468_v7 = vshll.u32 %v269_v36, 16  ;;  %v3562_v36 = vcombine.high %v4769_v34, %v4835_v57 }
  0xc9   :  { %4056 = vmatpush3.bf16.msra.mxu0 %v4295_v33 }
  0xcb   :  { %4120 = vmatpush3.bf16.msra.mxu1 %v4296_v5  ;;  %2313 = vmatmul.mubr.bf16.gmra.mrb[80].mxu0 %v5719_v50  ;;  %v2479_v50 = vor.u32 %v2478_v35, %v2475_v51  ;;  %v3564_v35 = vcombine.high %v4785_v48, %v4851_v60 }
  0xcc   :  { %2320 = vmatprep.mubr.bf16.mxu0 %v5720_v29  ;;  %v2482_v29 = vshll.u32 %v270_v37, 16 }
  0xce   :  { %2410 = vmatmul.mubr.bf16.gmra.mrb[80].mxu1 %v5721_v25  ;;  %v3551_v25 = vcombine.low %v4575_v39, %v4630_v22  ;;  %v3553_v22 = vcombine.low %v4615_v13, %v4684_v16 }
  0xcf   :  { %2417 = vmatprep.mubr.bf16.mxu1 %v5722_v54  ;;  %v3554_v54 = vcombine.high %v4615_v13, %v4684_v16 }
  0xd3   :  { %2321 = vmatmul.mubr.bf16.gmra.mrb[84].mxu0 %v5723_v0 }
  0xd4   :  { %2328 = vmatprep.mubr.bf16.mxu0 %v5724_v62 }
  0xd6   :  { %2418 = vmatmul.mubr.bf16.gmra.mrb[84].mxu1 %v5725_v63 }
  0xd7   :  { %2425 = vmatprep.mubr.bf16.mxu1 %v5726_v15  ;;  %v2466_v15 = vrot.slane %v2465_v2, 4 }
  0xdb   :  { %2329 = vmatmul.mubr.bf16.gmra.mrb[88].mxu0 %v5727_v8  ;;  %v2484_v8 = vrot.slane %v2482_v29, 5  ;;  %v3561_v29 = vcombine.low %v4769_v34, %v4835_v57  ;;  %v274_v34 = vld [vmem:[#allocation3 + $0x38] sm:$0x11] }
  0xdc   :  { %2336 = vmatprep.mubr.bf16.mxu0 %v3446_v24  ;;  %v2470_v24 = vrot.slane %v2468_v7, 5 }
  0xde   :  { %2426 = vmatmul.mubr.bf16.gmra.mrb[88].mxu1 %v5728_v9  ;;  %v2471_v39 = vsel %vm4478_vm2, %v2466_v15, %v2470_v24  ;;  %v3568_v15 = vcombine.high %v4872_v42, %v4936_v43  ;;  %v273_v24 = vld [vmem:[#allocation3 + $0x30] sm:$0x11] }
  0xdf   :  { %2433 = vmatprep.mubr.bf16.mxu1 %v3448_v56  ;;  %v2480_v56 = vrot.slane %v2479_v50, 4  ;;  %v2504_v50 = vshll.u32 %v5229_v20, 16 }
  0xe1   :  { %v2485_v9 = vsel %vm4478_vm2, %v2480_v56, %v2484_v8 }
  0xe2   :  { %v3560_v44 = vcombine.high %v4709_v30, %v2485_v9 }
  0xe3   :  { %2337 = vmatmul.mubr.bf16.gmra.mrb[92].mxu0 %v3445_v32  ;;  %v3558_v32 = vcombine.high %v4692_v21, %v2471_v39 }
  0xe4   :  { %2875 = vmatprep.mubr.bf16.mxu0 %v3546_v55  ;;  %v3555_v55 = vcombine.low %v4639_v26, %v4696_v23  ;;  %v3557_v26 = vcombine.low %v4692_v21, %v2471_v39 }
  0xe6   :  { %2434 = vmatmul.mubr.bf16.gmra.mrb[92].mxu1 %v3447_v28 }
  0xe7   :  { %2972 = vmatprep.mubr.bf16.mxu1 %v3548_v41 }
  0xeb   :  { %2876 = vmatmul.mubr.bf16.vlgmr.msra.gmra.mrb[96].mxu0 %v3545_v18 }
  0xec   :  { %2883 = vmatprep.mubr.bf16.mxu0 %v3550_v19 }
  0xee   :  { %2973 = vmatmul.mubr.bf16.vlgmr.msra.gmra.mrb[96].mxu1 %v3547_v31 }
  0xef   :  { %2980 = vmatprep.mubr.bf16.mxu1 %v3552_v52 }
  0xf3   :  { %2884 = vmatmul.mubr.bf16.gmra.mrb[100].mxu0 %v3549_v46  ;;  %v2487_v46 = vshrl.u32 %v5222_v40, 16 }
  0xf4   :  { %2891 = vmatprep.mubr.bf16.mxu0 %v3554_v54  ;;  %v3566_v54 = vcombine.high %v4847_v3, %v4911_v59 }
  0xf6   :  { %2981 = vmatmul.mubr.bf16.gmra.mrb[100].mxu1 %v3551_v25 }
  0xf7   :  { %v3673_v53 = vpop.f32.mrb[0].mxu0  ;;  %2988 = vmatprep.mubr.bf16.mxu1 %v3556_v38 }
  0xf8   :  { %v3674_v10 = vpop.f32.mrb[1].mxu0 }
  0xf9   :  { %v3675_v17 = vadd.f32 %v3674_v10, %v3673_v53  ;;  %v3676_v61 = vpop.f32.mrb[2].mxu0  ;;  %v3559_v53 = vcombine.low %v4709_v30, %v2485_v9 }
  0xfa   :  { %v3737_v49 = vpop.f32.mrb[0].mxu1  ;;  %v3677_v27 = vpop.f32.mrb[3].mxu0 }
  0xfb   :  { %v3738_v11 = vpop.f32.mrb[1].mxu1  ;;  %v3678_v5 = vadd.f32 %v3677_v27, %v3676_v61  ;;  %2892 = vmatmul.mubr.bf16.gmra.mrb[104].mxu0 %v3553_v22  ;;  %v2496_v22 = vshll.u32 %v273_v24, 16 }
  0xfc   :  { %v3739_v33 = vadd.f32 %v3738_v11, %v3737_v49  ;;  %v3740_v12 = vpop.f32.mrb[2].mxu1  ;;  %2899 = vmatprep.mubr.bf16.mxu0 %v3558_v32  ;;  %v2490_v11 = vshll.u32 %v5222_v40, 16  ;;  %v3563_v40 = vcombine.low %v4785_v48, %v4851_v60  ;;  %v3565_v32 = vcombine.low %v4847_v3, %v4911_v59  ;;  %v5732_v3 = vld [vmem:[#allocation5_spill] sm:$0xff] }
  0xfd   :  { %v3741_v0 = vpop.f32.mrb[3].mxu1 }
  0xfe   :  { %v5441_v62 = vadd.f32 %v3739_v33, %v3675_v17  ;;  %v3742_v63 = vadd.f32 %v3741_v0, %v3740_v12  ;;  %2989 = vmatmul.mubr.bf16.gmra.mrb[104].mxu1 %v3555_v55  ;;  %v2489_v0 = vrot.slane %v2487_v46, 4 }
  0xff   :  { %2996 = vmatprep.mubr.bf16.mxu1 %v3560_v44 }
 0x100   :  { %v5445_v4 = vadd.f32 %v3742_v63, %v3678_v5  ;;  %v3679_v28 = vpop.f32.mrb[4].mxu0  ;;  %v2501_v5 = vshrl.u32 %v5229_v20, 16  ;;  %v2492_v63 = vrot.slane %v2490_v11, 5  ;;  %v2506_v20 = vrot.slane %v2504_v50, 5  ;;  %v5734_v50 = vld [vmem:[#allocation9_spill] sm:$0xff] }
 0x101   :  { %v3680_v1 = vpop.f32.mrb[5].mxu0 }
 0x102   :  { %v3743_v41 = vpop.f32.mrb[4].mxu1  ;;  %v3681_v47 = vadd.f32 %v3680_v1, %v3679_v28  ;;  %v3682_v19 = vpop.f32.mrb[6].mxu0  ;;  %v2503_v38 = vrot.slane %v2501_v5, 4  ;;  %v2493_v39 = vor.u32 %v2492_v63, %v2489_v0  ;;  %v2510_v1 = vshll.u32 %v274_v34, 16 }
 0x103   :  { %v3744_v18 = vpop.f32.mrb[5].mxu1  ;;  %v3683_v13 = vpop.f32.mrb[7].mxu0  ;;  %2900 = vmatmul.mubr.bf16.gmra.mrb[108].mxu0 %v3557_v26  ;;  %v2498_v26 = vrot.slane %v2496_v22, 5 }
 0x104   :  { %v3745_v58 = vadd.f32 %v3744_v18, %v3743_v41  ;;  %v3746_v31 = vpop.f32.mrb[6].mxu1  ;;  %v3684_v6 = vadd.f32 %v3683_v13, %v3682_v19  ;;  %2907 = vmatprep.mubr.bf16.mxu0 %v3562_v36  ;;  %v2507_v44 = vor.u32 %v2506_v20, %v2503_v38  ;;  %v3567_v18 = vcombine.low %v4872_v42, %v4936_v43  ;;  %v5729_v19 = vld [vmem:[#allocation6_spill] sm:$0xff]  ;;  %v5731_v36 = vld [vmem:[#allocation8_spill] sm:$0xff] }
 0x105   :  { %v3747_v16 = vpop.f32.mrb[7].mxu1  ;;  %v3572_v59 = vcombine.high %v5732_v3, %v5731_v36  ;;  %v3571_v46 = vcombine.low %v5732_v3, %v5731_v36 }
 0x106   :  { %v5457_v45 = vadd.f32 %v3745_v58, %v3681_v47  ;;  %v3748_v52 = vadd.f32 %v3747_v16, %v3746_v31  ;;  %2997 = vmatmul.mubr.bf16.gmra.mrb[108].mxu1 %v3559_v53  ;;  %v5730_v31 = vld [vmem:[#allocation4_spill] sm:$0xff] }
 0x107   :  { %3004 = vmatprep.mubr.bf16.mxu1 %v3564_v35  ;;  %v3570_v13 = vcombine.high %v5730_v31, %v5729_v19  ;;  %v2512_v35 = vrot.slane %v2510_v1, 5 }
 0x108   :  { %v5460_v23 = vadd.f32 %v3748_v52, %v3684_v6  ;;  %v3685_v51 = vpop.f32.mrb[8].mxu0  ;;  %v2494_v52 = vrot.slane %v2493_v39, 4 }
 0x109   :  { %v3686_v37 = vpop.f32.mrb[9].mxu0 }
 0x10a   :  { %v3749_v10 = vpop.f32.mrb[8].mxu1  ;;  %v3687_v49 = vadd.f32 %v3686_v37, %v3685_v51  ;;  %v3688_v61 = vpop.f32.mrb[10].mxu0  ;;  %v2508_v51 = vrot.slane %v2507_v44, 4  ;;  %v2499_v42 = vsel %vm4478_vm2, %v2494_v52, %v2498_v26 }
 0x10b   :  { %v3750_v17 = vpop.f32.mrb[9].mxu1  ;;  %v3689_v7 = vpop.f32.mrb[11].mxu0  ;;  %2908 = vmatmul.mubr.bf16.gmra.mrb[112].mxu0 %v3561_v29 }
 0x10c   :  { %v3751_v2 = vadd.f32 %v3750_v17, %v3749_v10  ;;  %v3752_v21 = vpop.f32.mrb[10].mxu1  ;;  %v3690_v30 = vadd.f32 %v3689_v7, %v3688_v61  ;;  %2915 = vmatprep.mubr.bf16.mxu0 %v3566_v54  ;;  %v3569_v10 = vcombine.low %v5730_v31, %v5729_v19 }
 0x10d   :  { %v3753_v27 = vpop.f32.mrb[11].mxu1 }
 0x10e   :  { %v5469_v33 = vadd.f32 %v3751_v2, %v3687_v49  ;;  %v3754_v12 = vadd.f32 %v3753_v27, %v3752_v21  ;;  %3005 = vmatmul.mubr.bf16.gmra.mrb[112].mxu1 %v3563_v40  ;;  %v2513_v49 = vsel %vm4478_vm2, %v2508_v51, %v2512_v35  ;;  %v5733_v21 = vld [vmem:[#allocation7_spill] sm:$0xff] }
 0x10f   :  { %3012 = vmatprep.mubr.bf16.mxu1 %v3568_v15  ;;  %v3574_v7 = vcombine.high %v5733_v21, %v2499_v42  ;;  %v3576_v29 = vcombine.high %v5734_v50, %v2513_v49  ;;  %v3573_v63 = vcombine.low %v5733_v21, %v2499_v42  ;;  %v3575_v15 = vcombine.low %v5734_v50, %v2513_v49 }
 0x110   :  { %v5475_v25 = vadd.f32 %v3754_v12, %v3690_v30  ;;  %v3691_v56 = vpop.f32.mrb[12].mxu0 }
 0x111   :  { %v3692_v8 = vpop.f32.mrb[13].mxu0 }
 0x112   :  { %v3755_v57 = vpop.f32.mrb[12].mxu1  ;;  %v3693_v9 = vadd.f32 %v3692_v8, %v3691_v56  ;;  %v3694_v60 = vpop.f32.mrb[14].mxu0 }
 0x113   :  { %v3756_v48 = vpop.f32.mrb[13].mxu1  ;;  %v3695_v41 = vpop.f32.mrb[15].mxu0  ;;  %2916 = vmatmul.mubr.bf16.gmra.mrb[116].mxu0 %v3565_v32 }
 0x114   :  { %v3757_v55 = vadd.f32 %v3756_v48, %v3755_v57  ;;  %v3758_v28 = vpop.f32.mrb[14].mxu1  ;;  %v3696_v47 = vadd.f32 %v3695_v41, %v3694_v60  ;;  %2923 = vmatprep.mubr.bf16.mxu0 %v3570_v13 }
 0x115   :  { %v3759_v58 = vpop.f32.mrb[15].mxu1 }
 0x116   :  { %v5489_v16 = vadd.f32 %v3757_v55, %v3693_v9  ;;  %v3760_v6 = vadd.f32 %v3759_v58, %v3758_v28  ;;  %3013 = vmatmul.mubr.bf16.gmra.mrb[116].mxu1 %v3567_v18 }
 0x117   :  { %3020 = vmatprep.mubr.bf16.mxu1 %v3572_v59 }
 0x118   :  { %v5493_v53 = vadd.f32 %v3760_v6, %v3696_v47  ;;  %v3697_v43 = vpop.f32.mrb[16].mxu0 }
 0x119   :  { %v3698_v37 = vpop.f32.mrb[17].mxu0 }
 0x11a   :  { %v3761_v17 = vpop.f32.mrb[16].mxu1  ;;  %v3699_v61 = vadd.f32 %v3698_v37, %v3697_v43  ;;  %v3700_v2 = vpop.f32.mrb[18].mxu0 }
 0x11b   :  { %v3762_v11 = vpop.f32.mrb[17].mxu1  ;;  %v3701_v30 = vpop.f32.mrb[19].mxu0  ;;  %2924 = vmatmul.mubr.bf16.gmra.mrb[120].mxu0 %v3569_v10 }
 0x11c   :  { %v3763_v27 = vadd.f32 %v3762_v11, %v3761_v17  ;;  %v3764_v12 = vpop.f32.mrb[18].mxu1  ;;  %v3702_v5 = vadd.f32 %v3701_v30, %v3700_v2  ;;  %2931 = vmatprep.mubr.bf16.mxu0 %v3574_v7 }
 0x11d   :  { %v3765_v54 = vpop.f32.mrb[19].mxu1 }
 0x11e   :  { %v5505_v40 = vadd.f32 %v3763_v27, %v3699_v61  ;;  %v3766_v14 = vadd.f32 %v3765_v54, %v3764_v12  ;;  %3021 = vmatmul.mubr.bf16.gmra.mrb[120].mxu1 %v3571_v46 }
 0x11f   :  { %3028 = vmatprep.mubr.bf16.mxu1 %v3576_v29 }
 0x120   :  { %v5507_v0 = vadd.f32 %v3766_v14, %v3702_v5 }
 0x122   :  { %v3703_v24 = vpop.f32.mrb[20].mxu0 }
 0x123   :  { %v3704_v38 = vpop.f32.mrb[21].mxu0  ;;  %2932 = vmatmul.mubr.bf16.gmra.mrb[124].mxu0 %v3573_v63 }
 0x124   :  { %v3705_v20 = vadd.f32 %v3704_v38, %v3703_v24  ;;  %v3706_v56 = vpop.f32.mrb[22].mxu0 }
 0x125   :  { %v3767_v34 = vpop.f32.mrb[20].mxu1  ;;  %v3707_v57 = vpop.f32.mrb[23].mxu0 }
 0x126   :  { %3029 = vmatmul.mubr.bf16.gmra.mrb[124].mxu1 %v3575_v15  ;;  %v3768_v8 = vpop.f32.mrb[21].mxu1  ;;  %v3708_v39 = vadd.f32 %v3707_v57, %v3706_v56 }
 0x127   :  { %v3769_v22 = vadd.f32 %v3768_v8, %v3767_v34  ;;  %v3770_v9 = vpop.f32.mrb[22].mxu1 }
 0x128   :  { %v3771_v48 = vpop.f32.mrb[23].mxu1 }
 0x129   :  { %v5511_v60 = vadd.f32 %v3769_v22, %v3705_v20  ;;  %v3772_v32 = vadd.f32 %v3771_v48, %v3770_v9 }
 0x12b   :  { %v5513_v55 = vadd.f32 %v3772_v32, %v3708_v39 }
 0x12c   :  { %v3709_v28 = vpop.f32.mrb[24].mxu0 }
 0x12d   :  { %v3710_v41 = vpop.f32.mrb[25].mxu0 }
 0x12e   :  { %v3773_v44 = vpop.f32.mrb[24].mxu1  ;;  %v3711_v1 = vadd.f32 %v3710_v41, %v3709_v28  ;;  %v3712_v18 = vpop.f32.mrb[26].mxu0 }
 0x12f   :  { %v3774_v47 = vpop.f32.mrb[25].mxu1  ;;  %v3713_v58 = vpop.f32.mrb[27].mxu0 }
 0x130   :  { %v3775_v19 = vadd.f32 %v3774_v47, %v3773_v44  ;;  %v3776_v31 = vpop.f32.mrb[26].mxu1  ;;  %v3714_v13 = vadd.f32 %v3713_v58, %v3712_v18 }
 0x131   :  { %v3777_v6 = vpop.f32.mrb[27].mxu1 }
 0x132   :  { %v5515_v52 = vadd.f32 %v3775_v19, %v3711_v1  ;;  %v3778_v26 = vadd.f32 %v3777_v6, %v3776_v31 }
 0x134   :  { %v5517_v36 = vadd.f32 %v3778_v26, %v3714_v13 }
 0x136   :  { %v3715_v3 = vpop.f32.mrb[28].mxu0 }
 0x137   :  { %v3716_v59 = vpop.f32.mrb[29].mxu0 }
 0x138   :  { %v3717_v35 = vadd.f32 %v3716_v59, %v3715_v3  ;;  %v3718_v42 = vpop.f32.mrb[30].mxu0 }
 0x139   :  { %v3779_v51 = vpop.f32.mrb[28].mxu1  ;;  %v3719_v10 = vpop.f32.mrb[31].mxu0 }
 0x13a   :  { %v3780_v43 = vpop.f32.mrb[29].mxu1  ;;  %v3720_v17 = vadd.f32 %v3719_v10, %v3718_v42 }
 0x13b   :  { %v3781_v37 = vadd.f32 %v3780_v43, %v3779_v51  ;;  %v3782_v49 = vpop.f32.mrb[30].mxu1 }
 0x13c   :  { %v3783_v61 = vpop.f32.mrb[31].mxu1 }
 0x13d   :  { %v5519_v2 = vadd.f32 %v3781_v37, %v3717_v35  ;;  %v3784_v21 = vadd.f32 %v3783_v61, %v3782_v49 }
 0x13e   :  { %v3801_v46 = vpop.f32.mrb[32].mxu0 }
 0x13f   :  { %v5521_v7 = vadd.f32 %v3784_v21, %v3720_v17  ;;  %v3802_v11 = vpop.f32.mrb[33].mxu0 }
 0x140   :  { %v3803_v27 = vadd.f32 %v3802_v11, %v3801_v46  ;;  %v3804_v12 = vpop.f32.mrb[34].mxu0 }
 0x141   :  { %v3865_v30 = vpop.f32.mrb[32].mxu1  ;;  %v3805_v50 = vpop.f32.mrb[35].mxu0 }
 0x142   :  { %v3866_v5 = vpop.f32.mrb[33].mxu1  ;;  %v1756_v29 = vadd.f32 %v3803_v27, %v5441_v62  ;;  %v3806_v63 = vadd.f32 %v3805_v50, %v3804_v12 }
 0x143   :  { %v3867_v54 = vadd.f32 %v3866_v5, %v3865_v30  ;;  %v3868_v14 = vpop.f32.mrb[34].mxu1 }
 0x144   :  { %v3869_v15 = vpop.f32.mrb[35].mxu1  ;;  %v1759_v38 = vadd.f32 %v3806_v63, %v5445_v4 }
 0x145   :  { %v5524_v24 = vadd.f32 %v3867_v54, %v1756_v29  ;;  %v3870_v20 = vadd.f32 %v3869_v15, %v3868_v14 }
 0x146   :  { %v3807_v34 = vpop.f32.mrb[36].mxu0 }
 0x147   :  { %v5527_v56 = vadd.f32 %v3870_v20, %v1759_v38  ;;  %v3808_v57 = vpop.f32.mrb[37].mxu0 }
 0x148   :  { %v3809_v39 = vadd.f32 %v3808_v57, %v3807_v34  ;;  %v3810_v22 = vpop.f32.mrb[38].mxu0 }
 0x149   :  { %v3871_v8 = vpop.f32.mrb[36].mxu1  ;;  %v3811_v48 = vpop.f32.mrb[39].mxu0 }
 0x14a   :  { %v3872_v9 = vpop.f32.mrb[37].mxu1  ;;  %v1764_v62 = vadd.f32 %v3809_v39, %v5457_v45  ;;  %v3812_v41 = vadd.f32 %v3811_v48, %v3810_v22 }
 0x14b   :  { %v3873_v32 = vadd.f32 %v3872_v9, %v3871_v8  ;;  %v3874_v28 = vpop.f32.mrb[38].mxu1 }
 0x14c   :  { %v3875_v44 = vpop.f32.mrb[39].mxu1  ;;  %v1767_v4 = vadd.f32 %v3812_v41, %v5460_v23 }
 0x14d   :  { %v5530_v1 = vadd.f32 %v3873_v32, %v1764_v62  ;;  %v3876_v18 = vadd.f32 %v3875_v44, %v3874_v28 }
 0x14e   :  { %v3813_v58 = vpop.f32.mrb[40].mxu0 }
 0x14f   :  { %v5533_v47 = vadd.f32 %v3876_v18, %v1767_v4  ;;  %v3814_v19 = vpop.f32.mrb[41].mxu0 }
 0x150   :  { %v3815_v13 = vadd.f32 %v3814_v19, %v3813_v58  ;;  %v3816_v6 = vpop.f32.mrb[42].mxu0 }
 0x151   :  { %v3877_v31 = vpop.f32.mrb[40].mxu1  ;;  %v3817_v3 = vpop.f32.mrb[43].mxu0 }
 0x152   :  { %v3878_v26 = vpop.f32.mrb[41].mxu1  ;;  %v1772_v45 = vadd.f32 %v3815_v13, %v5469_v33  ;;  %v3818_v35 = vadd.f32 %v3817_v3, %v3816_v6 }
 0x153   :  { %v3879_v59 = vadd.f32 %v3878_v26, %v3877_v31  ;;  %v3880_v51 = vpop.f32.mrb[42].mxu1 }
 0x154   :  { %v3881_v42 = vpop.f32.mrb[43].mxu1  ;;  %v1775_v23 = vadd.f32 %v3818_v35, %v5475_v25 }
 0x155   :  { %v5536_v43 = vadd.f32 %v3879_v59, %v1772_v45  ;;  %v3882_v10 = vadd.f32 %v3881_v42, %v3880_v51 }
 0x156   :  { %v3819_v49 = vpop.f32.mrb[44].mxu0 }
 0x157   :  { %v5539_v37 = vadd.f32 %v3882_v10, %v1775_v23  ;;  %v3820_v17 = vpop.f32.mrb[45].mxu0 }
 0x158   :  { %v3821_v21 = vadd.f32 %v3820_v17, %v3819_v49  ;;  %v3822_v46 = vpop.f32.mrb[46].mxu0 }
 0x159   :  { %v3883_v61 = vpop.f32.mrb[44].mxu1  ;;  %v3823_v30 = vpop.f32.mrb[47].mxu0 }
 0x15a   :  { %v3884_v11 = vpop.f32.mrb[45].mxu1  ;;  %v1780_v33 = vadd.f32 %v3821_v21, %v5489_v16  ;;  %v3824_v5 = vadd.f32 %v3823_v30, %v3822_v46 }
 0x15b   :  { %v3885_v27 = vadd.f32 %v3884_v11, %v3883_v61  ;;  %v3886_v12 = vpop.f32.mrb[46].mxu1 }
 0x15c   :  { %v3887_v50 = vpop.f32.mrb[47].mxu1  ;;  %v1783_v25 = vadd.f32 %v3824_v5, %v5493_v53 }
 0x15d   :  { %v5542_v29 = vadd.f32 %v3885_v27, %v1780_v33  ;;  %v3888_v54 = vadd.f32 %v3887_v50, %v3886_v12 }
 0x15e   :  { %v3825_v63 = vpop.f32.mrb[48].mxu0 }
 0x15f   :  { %v5545_v14 = vadd.f32 %v3888_v54, %v1783_v25  ;;  %v3826_v15 = vpop.f32.mrb[49].mxu0 }
 0x160   :  { %v3827_v20 = vadd.f32 %v3826_v15, %v3825_v63  ;;  %v3828_v34 = vpop.f32.mrb[50].mxu0 }
 0x161   :  { %v3889_v38 = vpop.f32.mrb[48].mxu1  ;;  %v3829_v8 = vpop.f32.mrb[51].mxu0 }
 0x162   :  { %v3890_v57 = vpop.f32.mrb[49].mxu1  ;;  %v1788_v16 = vadd.f32 %v3827_v20, %v5505_v40  ;;  %v3830_v9 = vadd.f32 %v3829_v8, %v3828_v34 }
 0x163   :  { %v3891_v39 = vadd.f32 %v3890_v57, %v3889_v38  ;;  %v3892_v22 = vpop.f32.mrb[50].mxu1 }
 0x164   :  { %v3893_v48 = vpop.f32.mrb[51].mxu1  ;;  %v1791_v53 = vadd.f32 %v3830_v9, %v5507_v0 }
 0x165   :  { %v5548_v62 = vadd.f32 %v3891_v39, %v1788_v16  ;;  %v3894_v32 = vadd.f32 %v3893_v48, %v3892_v22 }
 0x166   :  { %v3831_v41 = vpop.f32.mrb[52].mxu0 }
 0x167   :  { %v5551_v28 = vadd.f32 %v3894_v32, %v1791_v53  ;;  %v3832_v44 = vpop.f32.mrb[53].mxu0 }
 0x168   :  { %v3833_v18 = vadd.f32 %v3832_v44, %v3831_v41  ;;  %v3834_v58 = vpop.f32.mrb[54].mxu0 }
 0x169   :  { %v3895_v4 = vpop.f32.mrb[52].mxu1  ;;  %v3835_v31 = vpop.f32.mrb[55].mxu0 }
 0x16a   :  { %v3896_v19 = vpop.f32.mrb[53].mxu1  ;;  %v1796_v40 = vadd.f32 %v3833_v18, %v5511_v60  ;;  %v3836_v26 = vadd.f32 %v3835_v31, %v3834_v58 }
 0x16b   :  { %v3897_v13 = vadd.f32 %v3896_v19, %v3895_v4  ;;  %v3898_v6 = vpop.f32.mrb[54].mxu1 }
 0x16c   :  { %v3899_v3 = vpop.f32.mrb[55].mxu1  ;;  %v1799_v0 = vadd.f32 %v3836_v26, %v5513_v55 }
 0x16d   :  { %v5554_v45 = vadd.f32 %v3897_v13, %v1796_v40  ;;  %v3900_v59 = vadd.f32 %v3899_v3, %v3898_v6 }
 0x16e   :  { %v3837_v35 = vpop.f32.mrb[56].mxu0 }
 0x16f   :  { %v5557_v51 = vadd.f32 %v3900_v59, %v1799_v0  ;;  %v3838_v42 = vpop.f32.mrb[57].mxu0 }
 0x170   :  { %v3839_v10 = vadd.f32 %v3838_v42, %v3837_v35  ;;  %v3840_v49 = vpop.f32.mrb[58].mxu0 }
 0x171   :  { %v3901_v23 = vpop.f32.mrb[56].mxu1  ;;  %v3841_v61 = vpop.f32.mrb[59].mxu0 }
 0x172   :  { %v3902_v17 = vpop.f32.mrb[57].mxu1  ;;  %v1804_v60 = vadd.f32 %v3839_v10, %v5515_v52  ;;  %v3842_v11 = vadd.f32 %v3841_v61, %v3840_v49 }
 0x173   :  { %v3903_v21 = vadd.f32 %v3902_v17, %v3901_v23  ;;  %v3904_v46 = vpop.f32.mrb[58].mxu1 }
 0x174   :  { %v3905_v30 = vpop.f32.mrb[59].mxu1  ;;  %v1807_v55 = vadd.f32 %v3842_v11, %v5517_v36 }
 0x175   :  { %v5560_v33 = vadd.f32 %v3903_v21, %v1804_v60  ;;  %v3906_v27 = vadd.f32 %v3905_v30, %v3904_v46 }
 0x176   :  { %v3843_v5 = vpop.f32.mrb[60].mxu0 }
 0x177   :  { %v5563_v12 = vadd.f32 %v3906_v27, %v1807_v55  ;;  %v3844_v50 = vpop.f32.mrb[61].mxu0 }
 0x178   :  { %v3845_v54 = vadd.f32 %v3844_v50, %v3843_v5  ;;  %v3846_v63 = vpop.f32.mrb[62].mxu0 }
 0x179   :  { %v3907_v25 = vpop.f32.mrb[60].mxu1  ;;  %v3847_v38 = vpop.f32.mrb[63].mxu0 }
 0x17a   :  { %v3908_v15 = vpop.f32.mrb[61].mxu1  ;;  %v1812_v52 = vadd.f32 %v3845_v54, %v5519_v2  ;;  %v3848_v57 = vadd.f32 %v3847_v38, %v3846_v63 }
 0x17b   :  { %v3909_v20 = vadd.f32 %v3908_v15, %v3907_v25  ;;  %v3910_v34 = vpop.f32.mrb[62].mxu1 }
 0x17c   :  { %v3911_v8 = vpop.f32.mrb[63].mxu1  ;;  %v1815_v36 = vadd.f32 %v3848_v57, %v5521_v7 }
 0x17d   :  { %v5566_v16 = vadd.f32 %v3909_v20, %v1812_v52  ;;  %v3912_v39 = vadd.f32 %v3911_v8, %v3910_v34 }
 0x17e   :  { %v3929_v9 = vpop.f32.mrb[64].mxu0 }
 0x17f   :  { %v5569_v22 = vadd.f32 %v3912_v39, %v1815_v36  ;;  %v3930_v48 = vpop.f32.mrb[65].mxu0 }
 0x180   :  { %v3931_v32 = vadd.f32 %v3930_v48, %v3929_v9  ;;  %v3932_v41 = vpop.f32.mrb[66].mxu0 }
 0x181   :  { %v3993_v53 = vpop.f32.mrb[64].mxu1  ;;  %v3933_v4 = vpop.f32.mrb[67].mxu0 }
 0x182   :  { %v3994_v44 = vpop.f32.mrb[65].mxu1  ;;  %v3934_v58 = vadd.f32 %v3933_v4, %v3932_v41 }
 0x183   :  { %v3995_v18 = vadd.f32 %v3994_v44, %v3993_v53  ;;  %v3996_v2 = vpop.f32.mrb[66].mxu1 }
 0x184   :  { %v3997_v19 = vpop.f32.mrb[67].mxu1 }
 0x185   :  { %v2380_v31 = vadd.f32 %v3995_v18, %v3931_v32  ;;  %v3998_v40 = vadd.f32 %v3997_v19, %v3996_v2 }
 0x186   :  { %v3935_v6 = vpop.f32.mrb[68].mxu0 }
 0x187   :  { %v5572_v13 = vadd.f32 %v2380_v31, %v5524_v24  ;;  %v2383_v7 = vadd.f32 %v3998_v40, %v3934_v58  ;;  %v3936_v26 = vpop.f32.mrb[69].mxu0 }
 0x188   :  { %v3937_v59 = vadd.f32 %v3936_v26, %v3935_v6  ;;  %v3938_v35 = vpop.f32.mrb[70].mxu0 }
 0x189   :  { %v5575_v3 = vadd.f32 %v2383_v7, %v5527_v56  ;;  %v3999_v0 = vpop.f32.mrb[68].mxu1  ;;  %v3939_v23 = vpop.f32.mrb[71].mxu0 }
 0x18a   :  { %v4000_v42 = vpop.f32.mrb[69].mxu1  ;;  %v3940_v17 = vadd.f32 %v3939_v23, %v3938_v35 }
 0x18b   :  { %v4001_v10 = vadd.f32 %v4000_v42, %v3999_v0  ;;  %v4002_v49 = vpop.f32.mrb[70].mxu1 }
 0x18c   :  { %v4003_v61 = vpop.f32.mrb[71].mxu1 }
 0x18d   :  { %v2388_v60 = vadd.f32 %v4001_v10, %v3937_v59  ;;  %v4004_v21 = vadd.f32 %v4003_v61, %v4002_v49 }
 0x18e   :  { %v3941_v11 = vpop.f32.mrb[72].mxu0 }
 0x18f   :  { %v5578_v24 = vadd.f32 %v2388_v60, %v5530_v1  ;;  %v2391_v46 = vadd.f32 %v4004_v21, %v3940_v17  ;;  %v3942_v30 = vpop.f32.mrb[73].mxu0 }
 0x190   :  { %v3943_v27 = vadd.f32 %v3942_v30, %v3941_v11  ;;  %v3944_v5 = vpop.f32.mrb[74].mxu0 }
 0x191   :  { %v5581_v56 = vadd.f32 %v2391_v46, %v5533_v47  ;;  %v4005_v55 = vpop.f32.mrb[72].mxu1  ;;  %v3945_v25 = vpop.f32.mrb[75].mxu0 }
 0x192   :  { %v4006_v50 = vpop.f32.mrb[73].mxu1  ;;  %v3946_v15 = vadd.f32 %v3945_v25, %v3944_v5 }
 0x193   :  { %v4007_v54 = vadd.f32 %v4006_v50, %v4005_v55  ;;  %v4008_v63 = vpop.f32.mrb[74].mxu1 }
 0x194   :  { %v4009_v38 = vpop.f32.mrb[75].mxu1 }
 0x195   :  { %v2396_v52 = vadd.f32 %v4007_v54, %v3943_v27  ;;  %v4010_v20 = vadd.f32 %v4009_v38, %v4008_v63 }
 0x196   :  { %v3947_v57 = vpop.f32.mrb[76].mxu0 }
 0x197   :  { %v5584_v1 = vadd.f32 %v2396_v52, %v5536_v43  ;;  %v2399_v34 = vadd.f32 %v4010_v20, %v3946_v15  ;;  %v3948_v8 = vpop.f32.mrb[77].mxu0 }
 0x198   :  { %v3949_v39 = vadd.f32 %v3948_v8, %v3947_v57  ;;  %v3950_v9 = vpop.f32.mrb[78].mxu0 }
 0x199   :  { %v5587_v47 = vadd.f32 %v2399_v34, %v5539_v37  ;;  %v4011_v36 = vpop.f32.mrb[76].mxu1  ;;  %v3951_v53 = vpop.f32.mrb[79].mxu0 }
 0x19a   :  { %v4012_v48 = vpop.f32.mrb[77].mxu1  ;;  %v3952_v44 = vadd.f32 %v3951_v53, %v3950_v9 }
 0x19b   :  { %v4013_v32 = vadd.f32 %v4012_v48, %v4011_v36  ;;  %v4014_v41 = vpop.f32.mrb[78].mxu1 }
 0x19c   :  { %v4015_v4 = vpop.f32.mrb[79].mxu1 }
 0x19d   :  { %v2404_v18 = vadd.f32 %v4013_v32, %v3949_v39  ;;  %v4016_v2 = vadd.f32 %v4015_v4, %v4014_v41 }
 0x19e   :  { %v3953_v19 = vpop.f32.mrb[80].mxu0 }
 0x19f   :  { %v5590_v43 = vadd.f32 %v2404_v18, %v5542_v29  ;;  %v2407_v58 = vadd.f32 %v4016_v2, %v3952_v44  ;;  %v3954_v31 = vpop.f32.mrb[81].mxu0 }
 0x1a0   :  { %v3955_v7 = vadd.f32 %v3954_v31, %v3953_v19  ;;  %v3956_v6 = vpop.f32.mrb[82].mxu0 }
 0x1a1   :  { %v5593_v37 = vadd.f32 %v2407_v58, %v5545_v14  ;;  %v4017_v40 = vpop.f32.mrb[80].mxu1  ;;  %v3957_v0 = vpop.f32.mrb[83].mxu0 }
 0x1a2   :  { %v4018_v26 = vpop.f32.mrb[81].mxu1  ;;  %v3958_v42 = vadd.f32 %v3957_v0, %v3956_v6 }
 0x1a3   :  { %v4019_v59 = vadd.f32 %v4018_v26, %v4017_v40  ;;  %v4020_v35 = vpop.f32.mrb[82].mxu1 }
 0x1a4   :  { %v4021_v23 = vpop.f32.mrb[83].mxu1 }
 0x1a5   :  { %v2412_v10 = vadd.f32 %v4019_v59, %v3955_v7  ;;  %v4022_v49 = vadd.f32 %v4021_v23, %v4020_v35 }
 0x1a6   :  { %v3959_v61 = vpop.f32.mrb[84].mxu0 }
 0x1a7   :  { %v5596_v29 = vadd.f32 %v2412_v10, %v5548_v62  ;;  %v2415_v17 = vadd.f32 %v4022_v49, %v3958_v42  ;;  %v3960_v60 = vpop.f32.mrb[85].mxu0 }
 0x1a8   :  { %v3961_v46 = vadd.f32 %v3960_v60, %v3959_v61  ;;  %v3962_v11 = vpop.f32.mrb[86].mxu0 }
 0x1a9   :  { %v5599_v14 = vadd.f32 %v2415_v17, %v5551_v28  ;;  %v4023_v21 = vpop.f32.mrb[84].mxu1  ;;  %v3963_v55 = vpop.f32.mrb[87].mxu0 }
 0x1aa   :  { %v4024_v30 = vpop.f32.mrb[85].mxu1  ;;  %v3964_v50 = vadd.f32 %v3963_v55, %v3962_v11 }
 0x1ab   :  { %v4025_v27 = vadd.f32 %v4024_v30, %v4023_v21  ;;  %v4026_v5 = vpop.f32.mrb[86].mxu1 }
 0x1ac   :  { %v4027_v25 = vpop.f32.mrb[87].mxu1 }
 0x1ad   :  { %v2420_v54 = vadd.f32 %v4025_v27, %v3961_v46  ;;  %v4028_v63 = vadd.f32 %v4027_v25, %v4026_v5 }
 0x1ae   :  { %v3965_v38 = vpop.f32.mrb[88].mxu0 }
 0x1af   :  { %v5602_v62 = vadd.f32 %v2420_v54, %v5554_v45  ;;  %v2423_v15 = vadd.f32 %v4028_v63, %v3964_v50  ;;  %v3966_v52 = vpop.f32.mrb[89].mxu0 }
 0x1b0   :  { %v3967_v34 = vadd.f32 %v3966_v52, %v3965_v38  ;;  %v3968_v57 = vpop.f32.mrb[90].mxu0 }
 0x1b1   :  { %v5605_v28 = vadd.f32 %v2423_v15, %v5557_v51  ;;  %v4029_v20 = vpop.f32.mrb[88].mxu1  ;;  %v3969_v36 = vpop.f32.mrb[91].mxu0 }
 0x1b2   :  { %v4030_v8 = vpop.f32.mrb[89].mxu1  ;;  %v3970_v48 = vadd.f32 %v3969_v36, %v3968_v57 }
 0x1b3   :  { %v4031_v39 = vadd.f32 %v4030_v8, %v4029_v20  ;;  %v4032_v9 = vpop.f32.mrb[90].mxu1 }
 0x1b4   :  { %v4033_v53 = vpop.f32.mrb[91].mxu1 }
 0x1b5   :  { %v2428_v32 = vadd.f32 %v4031_v39, %v3967_v34  ;;  %v4034_v41 = vadd.f32 %v4033_v53, %v4032_v9 }
 0x1b6   :  { %v3971_v4 = vpop.f32.mrb[92].mxu0 }
 0x1b7   :  { %v5608_v45 = vadd.f32 %v2428_v32, %v5560_v33  ;;  %v2431_v44 = vadd.f32 %v4034_v41, %v3970_v48  ;;  %v3972_v18 = vpop.f32.mrb[93].mxu0 }
 0x1b8   :  { %v3973_v58 = vadd.f32 %v3972_v18, %v3971_v4  ;;  %v3974_v19 = vpop.f32.mrb[94].mxu0 }
 0x1b9   :  { %v5611_v51 = vadd.f32 %v2431_v44, %v5563_v12  ;;  %v4035_v2 = vpop.f32.mrb[92].mxu1  ;;  %v3975_v40 = vpop.f32.mrb[95].mxu0 }
 0x1ba   :  { %v4036_v31 = vpop.f32.mrb[93].mxu1  ;;  %v3976_v26 = vadd.f32 %v3975_v40, %v3974_v19 }
 0x1bb   :  { %v4037_v7 = vadd.f32 %v4036_v31, %v4035_v2  ;;  %v4038_v6 = vpop.f32.mrb[94].mxu1 }
 0x1bc   :  { %v4039_v0 = vpop.f32.mrb[95].mxu1 }
 0x1bd   :  { %v2436_v59 = vadd.f32 %v4037_v7, %v3973_v58  ;;  %v4040_v35 = vadd.f32 %v4039_v0, %v4038_v6 }
 0x1be   :  { %v4057_v23 = vpop.f32.mrb[96].mxu0 }
 0x1bf   :  { %v5614_v33 = vadd.f32 %v2436_v59, %v5566_v16  ;;  %v2439_v42 = vadd.f32 %v4040_v35, %v3976_v26  ;;  %v4058_v10 = vpop.f32.mrb[97].mxu0  ;;  %v5622_v16 = vld [vmem:[%s5683_s3] ss:$0 sm:$0xff] }
 0x1c0   :  { %v4059_v17 = vadd.f32 %v4058_v10, %v4057_v23  ;;  %v4060_v61 = vpop.f32.mrb[98].mxu0 }
 0x1c1   :  { %v5617_v12 = vadd.f32 %v2439_v42, %v5569_v22  ;;  %v4121_v49 = vpop.f32.mrb[96].mxu1  ;;  %v4061_v21 = vpop.f32.mrb[99].mxu0 }
 0x1c2   :  { %v4122_v60 = vpop.f32.mrb[97].mxu1  ;;  %v4062_v30 = vadd.f32 %v4061_v21, %v4060_v61 }
 0x1c3   :  { %v4123_v46 = vadd.f32 %v4122_v60, %v4121_v49  ;;  %v4124_v11 = vpop.f32.mrb[98].mxu1 }
 0x1c4   :  { %v4125_v55 = vpop.f32.mrb[99].mxu1 }
 0x1c5   :  { %v2975_v27 = vadd.f32 %v4123_v46, %v4059_v17  ;;  %v4126_v5 = vadd.f32 %v4125_v55, %v4124_v11 }
 0x1c6   :  { %v4063_v25 = vpop.f32.mrb[100].mxu0 }
 0x1c7   :  { %v3037_v50 = vadd.f32 %v2975_v27, %v5572_v13  ;;  %v2978_v22 = vadd.f32 %v4126_v5, %v4062_v30  ;;  %v4064_v54 = vpop.f32.mrb[101].mxu0 }
 0x1c8   :  { %v4065_v52 = vadd.f32 %v4064_v54, %v4063_v25  ;;  %v4066_v20 = vpop.f32.mrb[102].mxu0 }
 0x1c9   :  { %v3060_v63 = vadd.f32 %v5622_v16, %v3037_v50  ;;  %v3038_v15 = vadd.f32 %v2978_v22, %v5575_v3  ;;  %v4127_v38 = vpop.f32.mrb[100].mxu1  ;;  %v4067_v57 = vpop.f32.mrb[103].mxu0 }
 0x1ca   :  { %v4128_v34 = vpop.f32.mrb[101].mxu1  ;;  %v4068_v48 = vadd.f32 %v4067_v57, %v4066_v20 }
 0x1cb   :  { %v3076_v8 = vmul.f32 0.2, %v3060_v63  ;;  %v3061_v36 = vadd.f32 %v5622_v16, %v3038_v15  ;;  %v4129_v39 = vadd.f32 %v4128_v34, %v4127_v38  ;;  %v4130_v9 = vpop.f32.mrb[102].mxu1 }
 0x1cc   :  { %v4131_v53 = vpop.f32.mrb[103].mxu1 }
 0x1cd   :  { %v3077_v13 = vmul.f32 0.2, %v3061_v36  ;;  %v2983_v32 = vadd.f32 %v4129_v39, %v4065_v52  ;;  %v4132_v41 = vadd.f32 %v4131_v53, %v4130_v9  ;;  %v3092_v44 = vmax.f32 %v3060_v63, %v3076_v8 }
 0x1ce   :  { %v4069_v2 = vpop.f32.mrb[104].mxu0 }
 0x1cf   :  { %v3093_v4 = vmax.f32 %v3061_v36, %v3077_v13  ;;  %v3039_v18 = vadd.f32 %v2983_v32, %v5578_v24  ;;  %v2986_v3 = vadd.f32 %v4132_v41, %v4068_v48  ;;  %v4070_v58 = vpop.f32.mrb[105].mxu0 }
 0x1d0   :  { %v4071_v6 = vadd.f32 %v4070_v58, %v4069_v2  ;;  %v4072_v26 = vpop.f32.mrb[106].mxu0 }
 0x1d1   :  { %v3613_v19 = vpack.c.bf16 %v3093_v4, %v3092_v44  ;;  %v3062_v31 = vadd.f32 %v5622_v16, %v3039_v18  ;;  %v3040_v40 = vadd.f32 %v2986_v3, %v5581_v56  ;;  %v4133_v7 = vpop.f32.mrb[104].mxu1  ;;  %v4073_v59 = vpop.f32.mrb[107].mxu0 }
 0x1d2   :  { %v4134_v0 = vpop.f32.mrb[105].mxu1  ;;  %v4074_v10 = vadd.f32 %v4073_v59, %v4072_v26 }
 0x1d3   :  { %3614 = vst [vmem:[%s5684_s4] sm:$0xff] %v3613_v19   ;;  %v3078_v35 = vmul.f32 0.2, %v3062_v31  ;;  %v3063_v24 = vadd.f32 %v5622_v16, %v3040_v40  ;;  %v4135_v42 = vadd.f32 %v4134_v0, %v4133_v7  ;;  %v4136_v23 = vpop.f32.mrb[106].mxu1 }
 0x1d4   :  { %v4137_v49 = vpop.f32.mrb[107].mxu1 }
 0x1d5   :  { %v3079_v17 = vmul.f32 0.2, %v3063_v24  ;;  %v2991_v61 = vadd.f32 %v4135_v42, %v4071_v6  ;;  %v4138_v60 = vadd.f32 %v4137_v49, %v4136_v23  ;;  %v3094_v56 = vmax.f32 %v3062_v31, %v3078_v35 }
 0x1d6   :  { %v4075_v30 = vpop.f32.mrb[108].mxu0 }
 0x1d7   :  { %v3095_v21 = vmax.f32 %v3063_v24, %v3079_v17  ;;  %v3041_v46 = vadd.f32 %v2991_v61, %v5584_v1  ;;  %v2994_v11 = vadd.f32 %v4138_v60, %v4074_v10  ;;  %v4076_v55 = vpop.f32.mrb[109].mxu0 }
 0x1d8   :  { %v4077_v25 = vadd.f32 %v4076_v55, %v4075_v30  ;;  %v4078_v54 = vpop.f32.mrb[110].mxu0 }
 0x1d9   :  { %v3618_v27 = vpack.c.bf16 %v3095_v21, %v3094_v56  ;;  %v3064_v5 = vadd.f32 %v5622_v16, %v3041_v46  ;;  %v3042_v50 = vadd.f32 %v2994_v11, %v5587_v47  ;;  %v4139_v22 = vpop.f32.mrb[108].mxu1  ;;  %v4079_v15 = vpop.f32.mrb[111].mxu0 }
 0x1da   :  { %v4140_v63 = vpop.f32.mrb[109].mxu1  ;;  %v4080_v34 = vadd.f32 %v4079_v15, %v4078_v54 }
 0x1db   :  { %3650 = vst [vmem:[%s5684_s4 + $0x8] sm:$0xff] %v3618_v27   ;;  %v3080_v38 = vmul.f32 0.2, %v3064_v5  ;;  %v3065_v1 = vadd.f32 %v5622_v16, %v3042_v50  ;;  %v4141_v52 = vadd.f32 %v4140_v63, %v4139_v22  ;;  %v4142_v20 = vpop.f32.mrb[110].mxu1 }
 0x1dc   :  { %v4143_v57 = vpop.f32.mrb[111].mxu1 }
 0x1dd   :  { %v3081_v8 = vmul.f32 0.2, %v3065_v1  ;;  %v2999_v36 = vadd.f32 %v4141_v52, %v4077_v25  ;;  %v4144_v39 = vadd.f32 %v4143_v57, %v4142_v20  ;;  %v3096_v47 = vmax.f32 %v3064_v5, %v3080_v38 }
 0x1de   :  { %v4081_v13 = vpop.f32.mrb[112].mxu0 }
 0x1df   :  { %v3097_v9 = vmax.f32 %v3065_v1, %v3081_v8  ;;  %v3043_v48 = vadd.f32 %v2999_v36, %v5590_v43  ;;  %v3002_v53 = vadd.f32 %v4144_v39, %v4080_v34  ;;  %v4082_v32 = vpop.f32.mrb[113].mxu0 }
 0x1e0   :  { %v4083_v3 = vadd.f32 %v4082_v32, %v4081_v13  ;;  %v4084_v2 = vpop.f32.mrb[114].mxu0 }
 0x1e1   :  { %v3623_v41 = vpack.c.bf16 %v3097_v9, %v3096_v47  ;;  %v3066_v44 = vadd.f32 %v5622_v16, %v3043_v48  ;;  %v3044_v4 = vadd.f32 %v3002_v53, %v5593_v37  ;;  %v4145_v18 = vpop.f32.mrb[112].mxu1  ;;  %v4085_v19 = vpop.f32.mrb[115].mxu0 }
 0x1e2   :  { %v4146_v58 = vpop.f32.mrb[113].mxu1  ;;  %v4086_v6 = vadd.f32 %v4085_v19, %v4084_v2 }
 0x1e3   :  { %3651 = vst [vmem:[%s5684_s4 + $0x10] sm:$0xff] %v3623_v41   ;;  %v3082_v31 = vmul.f32 0.2, %v3066_v44  ;;  %v3067_v43 = vadd.f32 %v5622_v16, %v3044_v4  ;;  %v4147_v40 = vadd.f32 %v4146_v58, %v4145_v18  ;;  %v4148_v7 = vpop.f32.mrb[114].mxu1 }
 0x1e4   :  { %v4149_v26 = vpop.f32.mrb[115].mxu1 }
 0x1e5   :  { %v3083_v0 = vmul.f32 0.2, %v3067_v43  ;;  %v3007_v59 = vadd.f32 %v4147_v40, %v4083_v3  ;;  %v4150_v35 = vadd.f32 %v4149_v26, %v4148_v7  ;;  %v3098_v37 = vmax.f32 %v3066_v44, %v3082_v31 }
 0x1e6   :  { %v4087_v10 = vpop.f32.mrb[116].mxu0 }
 0x1e7   :  { %v3099_v24 = vmax.f32 %v3067_v43, %v3083_v0  ;;  %v3045_v42 = vadd.f32 %v3007_v59, %v5596_v29  ;;  %v3010_v23 = vadd.f32 %v4150_v35, %v4086_v6  ;;  %v4088_v49 = vpop.f32.mrb[117].mxu0 }
 0x1e8   :  { %v4089_v21 = vadd.f32 %v4088_v49, %v4087_v10  ;;  %v4090_v46 = vpop.f32.mrb[118].mxu0 }
 0x1e9   :  { %v3628_v17 = vpack.c.bf16 %v3099_v24, %v3098_v37  ;;  %v3068_v61 = vadd.f32 %v5622_v16, %v3045_v42  ;;  %v3046_v60 = vadd.f32 %v3010_v23, %v5599_v14  ;;  %v4151_v56 = vpop.f32.mrb[116].mxu1  ;;  %v4091_v30 = vpop.f32.mrb[119].mxu0 }
 0x1ea   :  { %v4152_v11 = vpop.f32.mrb[117].mxu1  ;;  %v4092_v50 = vadd.f32 %v4091_v30, %v4090_v46 }
 0x1eb   :  { %3652 = vst [vmem:[%s5684_s4 + $0x18] sm:$0xff] %v3628_v17   ;;  %v3084_v55 = vmul.f32 0.2, %v3068_v61  ;;  %v3069_v29 = vadd.f32 %v5622_v16, %v3046_v60  ;;  %v4153_v27 = vadd.f32 %v4152_v11, %v4151_v56  ;;  %v4154_v5 = vpop.f32.mrb[118].mxu1 }
 0x1ec   :  { %v4155_v22 = vpop.f32.mrb[119].mxu1 }
 0x1ed   :  { %v3085_v25 = vmul.f32 0.2, %v3069_v29  ;;  %v3015_v54 = vadd.f32 %v4153_v27, %v4089_v21  ;;  %v4156_v63 = vadd.f32 %v4155_v22, %v4154_v5  ;;  %v3100_v14 = vmax.f32 %v3068_v61, %v3084_v55 }
 0x1ee   :  { %v4093_v52 = vpop.f32.mrb[120].mxu0 }
 0x1ef   :  { %v3101_v15 = vmax.f32 %v3069_v29, %v3085_v25  ;;  %v3047_v38 = vadd.f32 %v3015_v54, %v5602_v62  ;;  %v3018_v1 = vadd.f32 %v4156_v63, %v4092_v50  ;;  %v4094_v20 = vpop.f32.mrb[121].mxu0 }
 0x1f0   :  { %v4095_v39 = vadd.f32 %v4094_v20, %v4093_v52  ;;  %v4096_v47 = vpop.f32.mrb[122].mxu0 }
 0x1f1   :  { %v3633_v34 = vpack.c.bf16 %v3101_v15, %v3100_v14  ;;  %v3070_v57 = vadd.f32 %v5622_v16, %v3047_v38  ;;  %v3048_v8 = vadd.f32 %v3018_v1, %v5605_v28  ;;  %v4157_v36 = vpop.f32.mrb[120].mxu1  ;;  %v4097_v48 = vpop.f32.mrb[123].mxu0 }
 0x1f2   :  { %v4158_v9 = vpop.f32.mrb[121].mxu1  ;;  %v4098_v41 = vadd.f32 %v4097_v48, %v4096_v47 }
 0x1f3   :  { %3653 = vst [vmem:[%s5684_s4 + $0x20] sm:$0xff] %v3633_v34   ;;  %v3086_v53 = vmul.f32 0.2, %v3070_v57  ;;  %v3071_v62 = vadd.f32 %v5622_v16, %v3048_v8  ;;  %v4159_v13 = vadd.f32 %v4158_v9, %v4157_v36  ;;  %v4160_v32 = vpop.f32.mrb[122].mxu1 }
 0x1f4   :  { %v4161_v44 = vpop.f32.mrb[123].mxu1 }
 0x1f5   :  { %v3087_v4 = vmul.f32 0.2, %v3071_v62  ;;  %v3023_v18 = vadd.f32 %v4159_v13, %v4095_v39  ;;  %v4162_v3 = vadd.f32 %v4161_v44, %v4160_v32  ;;  %v3102_v28 = vmax.f32 %v3070_v57, %v3086_v53 }
 0x1f6   :  { %v4099_v31 = vpop.f32.mrb[124].mxu0 }
 0x1f7   :  { %v3103_v2 = vmax.f32 %v3071_v62, %v3087_v4  ;;  %v3049_v58 = vadd.f32 %v3023_v18, %v5608_v45  ;;  %v3026_v19 = vadd.f32 %v4162_v3, %v4098_v41  ;;  %v4100_v43 = vpop.f32.mrb[125].mxu0 }
 0x1f8   :  { %v4101_v0 = vadd.f32 %v4100_v43, %v4099_v31  ;;  %v4102_v59 = vpop.f32.mrb[126].mxu0 }
 0x1f9   :  { %v3638_v40 = vpack.c.bf16 %v3103_v2, %v3102_v28  ;;  %v3072_v7 = vadd.f32 %v5622_v16, %v3049_v58  ;;  %v3050_v6 = vadd.f32 %v3026_v19, %v5611_v51  ;;  %v4163_v26 = vpop.f32.mrb[124].mxu1  ;;  %v4103_v37 = vpop.f32.mrb[127].mxu0 }
 0x1fa   :  { %v4164_v35 = vpop.f32.mrb[125].mxu1  ;;  %v4104_v10 = vadd.f32 %v4103_v37, %v4102_v59 }
 0x1fb   :  { %3654 = vst [vmem:[%s5684_s4 + $0x28] sm:$0xff] %v3638_v40   ;;  %v3088_v24 = vmul.f32 0.2, %v3072_v7  ;;  %v3073_v45 = vadd.f32 %v5622_v16, %v3050_v6  ;;  %v4165_v42 = vadd.f32 %v4164_v35, %v4163_v26  ;;  %v4166_v23 = vpop.f32.mrb[126].mxu1 }
 0x1fc   :  { %v4167_v49 = vpop.f32.mrb[127].mxu1 }
 0x1fd   :  { %v3089_v17 = vmul.f32 0.2, %v3073_v45  ;;  %v3031_v61 = vadd.f32 %v4165_v42, %v4101_v0  ;;  %v4168_v60 = vadd.f32 %v4167_v49, %v4166_v23  ;;  %v3104_v51 = vmax.f32 %v3072_v7, %v3088_v24 }
 0x1ff   :  { %v3105_v56 = vmax.f32 %v3073_v45, %v3089_v17  ;;  %v3051_v21 = vadd.f32 %v3031_v61, %v5614_v33  ;;  %v3034_v46 = vadd.f32 %v4168_v60, %v4104_v10 }
 0x201   :  { %v3643_v11 = vpack.c.bf16 %v3105_v56, %v3104_v51  ;;  %v3074_v30 = vadd.f32 %v5622_v16, %v3051_v21  ;;  %v3052_v55 = vadd.f32 %v3034_v46, %v5617_v12 }
 0x203   :  { %3655 = vst [vmem:[%s5684_s4 + $0x30] sm:$0xff] %v3643_v11   ;;  %v3090_v29 = vmul.f32 0.2, %v3074_v30  ;;  %v3075_v27 = vadd.f32 %v5622_v16, %v3052_v55 }
 0x205   :  { %v3091_v5 = vmul.f32 0.2, %v3075_v27  ;;  %v3106_v50 = vmax.f32 %v3074_v30, %v3090_v29 }
 0x207   :  { %v3107_v22 = vmax.f32 %v3075_v27, %v3091_v5 }
 0x209   :  { %v3648_v25 = vpack.c.bf16 %v3107_v22, %v3106_v50 }
 0x20b   :  { %3656 = vst [vmem:[%s5684_s4 + $0x38] sm:$0xff] %v3648_v25  }

// kernel: fc_discriminator_forward.7
= control target key start
LH: loop header
LB: loop body
LE: loop exit
PB: predicated region body
PF: predicated region fallthrough
CT: control target
= control target key end

     0   :  { %vm327_vm0 = vsmask.f32 1280  ;;  %vm328_vm1 = vsmask.f32 3336  ;;  %vm330_vm2 = vsmask.f32 5392  ;;  %v518_v44 = vlaneseq  ;;  %s3694_s0 = inlined_call_operand.vmem [shape: bf16[2,5,5,512], index: 0, kind: input, shape index: {}, may-alias: {0,1}]   ;;  %s3695_s1 = inlined_call_operand.vmem [shape: bf16[2,5,5,512], index: 1, kind: input, shape index: {}, may-alias: {0,1}]   ;;  %s3696_s2 = inlined_call_operand.vmem [shape: bf16[2,2,512,128], index: 2, kind: input, shape index: {}]   ;;  %s3697_s3 = inlined_call_operand.vmem [shape: f32[1,128], index: 3, kind: input, shape index: {}]   ;;  %s3698_s4 = inlined_call_operand.vmem [shape: bf16[2,4,4,128], index: 4, kind: output, shape index: {}]  }
   0x1   :  { %v2839_v0 = vld [vmem:[%s3696_s2 + $0x140] sm:$0xff]   ;;  %v2843_v4 = vld [vmem:[%s3696_s2 + $0x148] sm:$0xff]   ;;  %v2847_v8 = vld [vmem:[%s3696_s2 + $0x150] sm:$0xff]   ;;  %vm332_vm3 = vsmask.f32 7448 }
   0x2   :  { %v2840_v1 = vld [vmem:[%s3696_s2 + $0x1c0] sm:$0xff]   ;;  %2614 = vmatprep.subr.bf16.mxu0 %v2839_v0  ;;  %v2844_v5 = vld [vmem:[%s3696_s2 + $0x1c8] sm:$0xff]   ;;  %v2848_v9 = vld [vmem:[%s3696_s2 + $0x1d0] sm:$0xff]   ;;  %v519_v57 = vshrl.u32 %v518_v44, 7 }
   0x3   :  { %v2841_v2 = vld [vmem:[%s3696_s2 + $0x100] sm:$0xff]   ;;  %2642 = vmatprep.subr.bf16.mxu1 %v2840_v1  ;;  %v2845_v6 = vld [vmem:[%s3696_s2 + $0x108] sm:$0xff]   ;;  %v2849_v10 = vld [vmem:[%s3696_s2 + $0x110] sm:$0xff]  }
   0x4   :  { %v2842_v3 = vld [vmem:[%s3696_s2 + $0x180] sm:$0xff]   ;;  %2615 = vmatpush3.bf16.msra.mxu0 %v2841_v2  ;;  %v2846_v7 = vld [vmem:[%s3696_s2 + $0x188] sm:$0xff]   ;;  %v2850_v11 = vld [vmem:[%s3696_s2 + $0x190] sm:$0xff]  }
   0x5   :  { %2643 = vmatpush3.bf16.msra.mxu1 %v2842_v3  ;;  %2616 = vmatprep.subr.bf16.mxu0 %v2843_v4  ;;  %v2851_v12 = vld [vmem:[%s3696_s2 + $0x158] sm:$0xff]   ;;  %v2855_v16 = vld [vmem:[%s3696_s2 + $0x160] sm:$0xff]   ;;  %v2859_v20 = vld [vmem:[%s3696_s2 + $0x168] sm:$0xff]   ;;  %v2967_v3 = vmov 1983009808  }
   0x6   :  { %2644 = vmatprep.subr.bf16.mxu1 %v2844_v5  ;;  %v2852_v13 = vld [vmem:[%s3696_s2 + $0x1d8] sm:$0xff]   ;;  %v2856_v17 = vld [vmem:[%s3696_s2 + $0x1e0] sm:$0xff]   ;;  %v2860_v21 = vld [vmem:[%s3696_s2 + $0x1e8] sm:$0xff]   ;;  %v516_v4 = vunpack.c.l.s4 %v2967_v3 }
   0x7   :  { %v2853_v14 = vld [vmem:[%s3696_s2 + $0x118] sm:$0xff]   ;;  %v2857_v18 = vld [vmem:[%s3696_s2 + $0x120] sm:$0xff]   ;;  %v2861_v22 = vld [vmem:[%s3696_s2 + $0x128] sm:$0xff]  }
   0x8   :  { %2617 = vmatpush3.bf16.msra.mxu0 %v2845_v6  ;;  %v2854_v15 = vld [vmem:[%s3696_s2 + $0x198] sm:$0xff]   ;;  %v2858_v19 = vld [vmem:[%s3696_s2 + $0x1a0] sm:$0xff]   ;;  %v2862_v23 = vld [vmem:[%s3696_s2 + $0x1a8] sm:$0xff]  }
   0x9   :  { %2645 = vmatpush3.bf16.msra.mxu1 %v2846_v7  ;;  %2618 = vmatprep.subr.bf16.mxu0 %v2847_v8  ;;  %v2863_v24 = vld [vmem:[%s3696_s2 + $0x170] sm:$0xff]   ;;  %v2867_v28 = vld [vmem:[%s3696_s2 + $0x178] sm:$0xff]   ;;  %v23_v32 = vld [vmem:[%s3694_s0] sm:$0xff] }
   0xa   :  { %2646 = vmatprep.subr.bf16.mxu1 %v2848_v9  ;;  %v2864_v25 = vld [vmem:[%s3696_s2 + $0x1f0] sm:$0xff]   ;;  %v2868_v29 = vld [vmem:[%s3696_s2 + $0x1f8] sm:$0xff]   ;;  %v25_v33 = vld [vmem:[%s3694_s0 + $0x8] sm:$0xff]  ;;  %24 = vst [vmem:[#allocation2] sm:$0xff] %v23_v32 }
   0xb   :  { %v2865_v26 = vld [vmem:[%s3696_s2 + $0x130] sm:$0xff]   ;;  %v2869_v30 = vld [vmem:[%s3696_s2 + $0x138] sm:$0xff]   ;;  %26 = vst [vmem:[#allocation2 + $0x8] sm:$0xff] %v25_v33  ;;  %v31_v36 = vld [vmem:[%s3694_s0 + $0x20] sm:$0xff] }
   0xc   :  { %2619 = vmatpush3.bf16.msra.mxu0 %v2849_v10  ;;  %v2866_v27 = vld [vmem:[%s3696_s2 + $0x1b0] sm:$0xff]   ;;  %v2870_v31 = vld [vmem:[%s3696_s2 + $0x1b8] sm:$0xff]   ;;  %v33_v37 = vld [vmem:[%s3694_s0 + $0x28] sm:$0xff]  ;;  %32 = vst [vmem:[#allocation2 + $0x20] sm:$0xff] %v31_v36 }
   0xd   :  { %2647 = vmatpush3.bf16.msra.mxu1 %v2850_v11  ;;  %2620 = vmatprep.subr.bf16.mxu0 %v2851_v12  ;;  %v27_v34 = vld [vmem:[%s3694_s0 + $0x10] sm:$0xff]  ;;  %v29_v35 = vld [vmem:[%s3694_s0 + $0x18] sm:$0xff]  ;;  %34 = vst [vmem:[#allocation2 + $0x28] sm:$0xff] %v33_v37  ;;  %v2871_v40 = vld [vmem:[%s3696_s2 + $0x40] sm:$0xff]  }
   0xe   :  { %2648 = vmatprep.subr.bf16.mxu1 %v2852_v13  ;;  %28 = vst [vmem:[#allocation2 + $0x10] sm:$0xff] %v27_v34  ;;  %30 = vst [vmem:[#allocation2 + $0x18] sm:$0xff] %v29_v35  ;;  %v35_v38 = vld [vmem:[%s3694_s0 + $0x30] sm:$0xff]  ;;  %v37_v39 = vld [vmem:[%s3694_s0 + $0x38] sm:$0xff] }
   0xf   :  { %36 = vst [vmem:[#allocation2 + $0x30] sm:$0xff] %v35_v38  ;;  %38 = vst [vmem:[#allocation2 + $0x38] sm:$0xff] %v37_v39  ;;  %v2872_v41 = vld [vmem:[%s3696_s2 + $0xc0] sm:$0xff]   ;;  %v2877_v3 = vld [vmem:[%s3696_s2 + $0x8] sm:$0xff]  }
  0x10   :  { %2621 = vmatpush3.bf16.msra.mxu0 %v2853_v14  ;;  %vm3141_vm4 = vmor %vm327_vm0, %vm328_vm1 }
  0x11   :  { %2649 = vmatpush3.bf16.msra.mxu1 %v2854_v15  ;;  %2622 = vmatprep.subr.bf16.mxu0 %v2855_v16  ;;  %v3119_v42 = vld.sshfl [vmem:[#allocation2] sm:$0x5f pattern:$0x76325410]  ;;  %vm331_vm5 = vmor %vm3141_vm4, %vm330_vm2 }
  0x12   :  { %2650 = vmatprep.subr.bf16.mxu1 %v2856_v17  ;;  %v3121_v43 = vld.sshfl [vmem:[#allocation2 + $0x8] sm:$0x5f pattern:$0x76325410]  ;;  %vm3163_vm6 = vmor %vm331_vm5, %vm332_vm3 }
  0x13   :  { %v149_v46 = vcombine.low %v3119_v42, %v3121_v43  ;;  %v319_v47 = vcombine.high %v3119_v42, %v3121_v43  ;;  %v3131_v49 = vld.sshfl [vmem:[#allocation2 + $0x20] sm:$0x5f pattern:$0x76325410] }
  0x14   :  { %2623 = vmatpush3.bf16.msra.mxu0 %v2857_v18  ;;  %v3135_v53 = vld.sshfl [vmem:[#allocation2 + $0x28] sm:$0x5f pattern:$0x76325410] }
  0x15   :  { %2651 = vmatpush3.bf16.msra.mxu1 %v2858_v19  ;;  %2624 = vmatprep.subr.bf16.mxu0 %v2859_v20  ;;  %v3123_v45 = vld.sshfl [vmem:[#allocation2 + $0x10] sm:$0x5f pattern:$0x76325410]  ;;  %v335_v51 = vshrl.u32 %v149_v46, 16  ;;  %v338_v52 = vshll.u32 %v149_v46, 16  ;;  %v179_v60 = vcombine.low %v3131_v49, %v3135_v53  ;;  %v321_v61 = vcombine.high %v3131_v49, %v3135_v53 }
  0x16   :  { %2652 = vmatprep.subr.bf16.mxu1 %v2860_v21  ;;  %v3129_v48 = vld.sshfl [vmem:[#allocation2 + $0x18] sm:$0x5f pattern:$0x76325410]  ;;  %v344_v56 = vshll.u32 %v319_v47, 16  ;;  %v2477_v58 = vcombine.low %v3123_v45, %v3131_v49  ;;  %v517_v21 = vunpack.c.0.s8 %v516_v4  ;;  %v2878_v4 = vld [vmem:[%s3696_s2 + $0x88] sm:$0xff]  }
  0x17   :  { %v164_v50 = vcombine.low %v3123_v45, %v3129_v48  ;;  %v320_v54 = vcombine.high %v3123_v45, %v3129_v48  ;;  %v3147_v59 = vld.sshfl [vmem:[#allocation2 + $0x30] sm:$0x5f pattern:$0x76325410]  ;;  %v337_v62 = vrot.slane %v335_v51, 6  ;;  %v340_v63 = vrot.slane %v338_v52, 7 }
  0x18   :  { %2625 = vmatpush3.bf16.msra.mxu0 %v2861_v22  ;;  %v3153_v0 = vld.sshfl [vmem:[#allocation2 + $0x38] sm:$0x5f pattern:$0x76325410]  ;;  %v346_v1 = vrot.slane %v344_v56, 7  ;;  %v363_v11 = vshrl.u32 %v179_v60, 16  ;;  %v3175_v36 = vsub.s32 %v517_v21, %v519_v57 }
  0x19   :  { %2653 = vmatpush3.bf16.msra.mxu1 %v2862_v23  ;;  %2626 = vmatprep.subr.bf16.mxu0 %v2863_v24  ;;  %v349_v2 = vshrl.u32 %v164_v50, 16  ;;  %v194_v5 = vcombine.low %v3147_v59, %v3153_v0  ;;  %v322_v6 = vcombine.high %v3147_v59, %v3153_v0  ;;  %v341_v7 = vor.u32 %v340_v63, %v337_v62  ;;  %v2873_v56 = vld [vmem:[%s3696_s2] sm:$0xff]   ;;  %v2886_v21 = vld [vmem:[%s3696_s2 + $0x98] sm:$0xff]  }
  0x1a   :  { %2654 = vmatprep.subr.bf16.mxu1 %v2864_v25  ;;  %v352_v8 = vshll.u32 %v164_v50, 16  ;;  %v358_v10 = vshll.u32 %v320_v54, 16  ;;  %v366_v12 = vshll.u32 %v179_v60, 16  ;;  %v372_v15 = vshll.u32 %v321_v61, 16  ;;  %v2874_v57 = vld [vmem:[%s3696_s2 + $0x80] sm:$0xff]  }
  0x1b   :  { %v351_v9 = vrot.slane %v349_v2, 6  ;;  %v342_v13 = vrot.slane %v341_v7, 2  ;;  %v377_v16 = vshrl.u32 %v194_v5, 16  ;;  %v365_v18 = vrot.slane %v363_v11, 6  ;;  %v2876_v2 = vld [vmem:[%s3696_s2 + $0xc8] sm:$0xff]   ;;  %v2879_v7 = vld [vmem:[%s3696_s2 + $0x50] sm:$0xff]  }
  0x1c   :  { %2627 = vmatpush3.bf16.msra.mxu0 %v2865_v26  ;;  %v354_v14 = vrot.slane %v352_v8, 7  ;;  %v368_v19 = vrot.slane %v366_v12, 7  ;;  %v380_v20 = vshll.u32 %v194_v5, 16  ;;  %v360_v23 = vrot.slane %v358_v10, 7  ;;  %v39_v5 = vld [vmem:[%s3694_s0 + $0x50] sm:$0xff]  ;;  %v43_v8 = vld [vmem:[%s3694_s0 + $0x60] sm:$0xff] }
  0x1d   :  { %2655 = vmatpush3.bf16.msra.mxu1 %v2866_v27  ;;  %2628 = vmatprep.subr.bf16.mxu0 %v2867_v28  ;;  %v374_v24 = vrot.slane %v372_v15, 7  ;;  %v379_v25 = vrot.slane %v377_v16, 6  ;;  %v386_v28 = vshll.u32 %v322_v6, 16  ;;  %v41_v6 = vld [vmem:[%s3694_s0 + $0x58] sm:$0xff]  ;;  %40 = vst [vmem:[#allocation2 + $0x40] sm:$0xff] %v39_v5  ;;  %v47_v10 = vld [vmem:[%s3694_s0 + $0x70] sm:$0xff] }
  0x1e   :  { %2656 = vmatprep.subr.bf16.mxu1 %v2868_v29  ;;  %v355_v22 = vor.u32 %v354_v14, %v351_v9  ;;  %v369_v26 = vor.u32 %v368_v19, %v365_v18  ;;  %v382_v27 = vrot.slane %v380_v20, 7  ;;  %v347_v29 = vsel %vm3163_vm6, %v342_v13, %v346_v1  ;;  %v2875_v1 = vld [vmem:[%s3696_s2 + $0x48] sm:$0xff]   ;;  %42 = vst [vmem:[#allocation2 + $0x48] sm:$0xff] %v41_v6  ;;  %v49_v11 = vld [vmem:[%s3694_s0 + $0x78] sm:$0xff]  ;;  %v51_v12 = vld [vmem:[%s3694_s0 + $0x80] sm:$0xff] }
  0x1f   :  { %v388_v34 = vrot.slane %v386_v28, 7  ;;  %v45_v9 = vld [vmem:[%s3694_s0 + $0x68] sm:$0xff]  ;;  %44 = vst [vmem:[#allocation2 + $0x50] sm:$0xff] %v43_v8  ;;  %48 = vst [vmem:[#allocation2 + $0x60] sm:$0xff] %v47_v10  ;;  %v2880_v14 = vld [vmem:[%s3696_s2 + $0xd0] sm:$0xff]  }
  0x20   :  { %2629 = vmatpush3.bf16.msra.mxu0 %v2869_v30  ;;  %v356_v30 = vrot.slane %v355_v22, 2  ;;  %v370_v32 = vrot.slane %v369_v26, 2  ;;  %v383_v33 = vor.u32 %v382_v27, %v379_v25  ;;  %46 = vst [vmem:[#allocation2 + $0x58] sm:$0xff] %v45_v9  ;;  %v53_v13 = vld [vmem:[%s3694_s0 + $0x88] sm:$0xff]  ;;  %50 = vst [vmem:[#allocation2 + $0x68] sm:$0xff] %v49_v11  ;;  %v2881_v15 = vld [vmem:[%s3696_s2 + $0x10] sm:$0xff]  }
  0x21   :  { %2657 = vmatpush3.bf16.msra.mxu1 %v2870_v31  ;;  %2670 = vmatprep.subr.bf16.mxu0 %v2871_v40  ;;  %v2478_v31 = vcombine.low %v3129_v48, %v3135_v53  ;;  %52 = vst [vmem:[#allocation2 + $0x70] sm:$0xff] %v51_v12  ;;  %54 = vst [vmem:[#allocation2 + $0x78] sm:$0xff] %v53_v13  ;;  %v2882_v16 = vld [vmem:[%s3696_s2 + $0x90] sm:$0xff]   ;;  %v2883_v18 = vld [vmem:[%s3696_s2 + $0x58] sm:$0xff]  }
  0x22   :  { %2698 = vmatprep.subr.bf16.mxu1 %v2872_v41  ;;  %v3173_v35 = vsel %vm3163_vm6, %v356_v30, %v360_v23  ;;  %v3179_v37 = vsel %vm3163_vm6, %v370_v32, %v374_v24  ;;  %v384_v38 = vrot.slane %v383_v33, 2  ;;  %v2884_v19 = vld [vmem:[%s3696_s2 + $0xd8] sm:$0xff]   ;;  %v2887_v24 = vld [vmem:[%s3696_s2 + $0x60] sm:$0xff]   ;;  %v2893_v5 = vld [vmem:[%s3696_s2 + $0x28] sm:$0xff]  }
  0x23   :  { %v511_v39 = vcombine.low %v347_v29, %v3173_v35  ;;  %v512_v40 = vcombine.high %v347_v29, %v3173_v35  ;;  %v1819_v41 = vcombine.low %v3173_v35, %v3179_v37  ;;  %v1820_v44 = vcombine.high %v3173_v35, %v3179_v37  ;;  %v2885_v20 = vld [vmem:[%s3696_s2 + $0x18] sm:$0xff]   ;;  %v2888_v25 = vld [vmem:[%s3696_s2 + $0xe0] sm:$0xff]   ;;  %v2894_v6 = vld [vmem:[%s3696_s2 + $0xa8] sm:$0xff]  }
  0x24   :  { %v3189_v46 = vsel %vm3163_vm6, %v384_v38, %v388_v34  ;;  %v3265_v22 = vld.sshfl [vmem:[#allocation2 + $0x40] sm:$0x5f pattern:$0x76325410]  ;;  %v2895_v11 = vld [vmem:[%s3696_s2 + $0x70] sm:$0xff]  }
  0x25   :  { %v513_v47 = vcombine.low %v3179_v37, %v3189_v46  ;;  %v521_v50 = vrot.slane %v511_v39, %v3175_v36  ;;  %v514_v51 = vcombine.high %v3179_v37, %v3189_v46  ;;  %v528_v52 = vrot.slane %v512_v40, %v3175_v36  ;;  %v3267_v23 = vld.sshfl [vmem:[#allocation2 + $0x48] sm:$0x5f pattern:$0x76325410]  ;;  %v2889_v30 = vld [vmem:[%s3696_s2 + $0x20] sm:$0xff]   ;;  %v2948_v37 = vld [vmem:[%s3696_s2 + $0x3d8] sm:$0xff]  }
  0x26   :  { %v3275_v26 = vld.sshfl [vmem:[#allocation2 + $0x50] sm:$0x5f pattern:$0x76325410]  ;;  %v209_v27 = vcombine.low %v3265_v22, %v3267_v23  ;;  %v323_v28 = vcombine.high %v3265_v22, %v3267_v23  ;;  %v2890_v32 = vld [vmem:[%s3696_s2 + $0xa0] sm:$0xff]   ;;  %v2891_v40 = vld [vmem:[%s3696_s2 + $0x68] sm:$0xff]  }
  0x27   :  { %v535_v54 = vrot.slane %v513_v47, %v3175_v36  ;;  %v542_v55 = vrot.slane %v514_v51, %v3175_v36  ;;  %v3281_v29 = vld.sshfl [vmem:[#allocation2 + $0x58] sm:$0x5f pattern:$0x76325410]  ;;  %v2892_v47 = vld [vmem:[%s3696_s2 + $0xe8] sm:$0xff]  }
  0x28   :  { %v3289_v33 = vld.sshfl [vmem:[#allocation2 + $0x60] sm:$0x5f pattern:$0x76325410]  ;;  %v224_v34 = vcombine.low %v3275_v26, %v3281_v29  ;;  %v391_v38 = vshrl.u32 %v209_v27, 16  ;;  %v394_v39 = vshll.u32 %v209_v27, 16  ;;  %v324_v51 = vcombine.high %v3275_v26, %v3281_v29 }
  0x29   :  { %v544_v60 = vcombine.high %v521_v50, %v535_v54  ;;  %v546_v61 = vcombine.high %v528_v52, %v542_v55  ;;  %v543_v62 = vcombine.low %v521_v50, %v535_v54  ;;  %v545_v63 = vcombine.low %v528_v52, %v542_v55  ;;  %v3299_v50 = vld.sshfl [vmem:[#allocation2 + $0x68] sm:$0x5f pattern:$0x76325410]  ;;  %v2897_v27 = vld [vmem:[%s3696_s2 + $0x30] sm:$0xff]  }
  0x2a   :  { %v400_v52 = vshll.u32 %v323_v28, 16  ;;  %v3303_v54 = vld.sshfl [vmem:[#allocation2 + $0x70] sm:$0x5f pattern:$0x76325410]  ;;  %v239_v55 = vcombine.low %v3289_v33, %v3299_v50  ;;  %v414_v8 = vshll.u32 %v324_v51, 16 }
  0x2b   :  { %815 = vmatprep.mubr.bf16.mxu0 %v544_v60  ;;  %864 = vmatprep.mubr.bf16.mxu1 %v546_v61  ;;  %v396_v60 = vrot.slane %v394_v39, 7  ;;  %v3309_v61 = vld.sshfl [vmem:[#allocation2 + $0x78] sm:$0x5f pattern:$0x76325410]  ;;  %v2898_v28 = vld [vmem:[%s3696_s2 + $0xb0] sm:$0xff]  }
  0x2c   :  { %816 = vmatmul.mubr.bf16.vlgmr.msra.gmra.mrb[0].mxu0 %v543_v62  ;;  %865 = vmatmul.mubr.bf16.vlgmr.msra.gmra.mrb[0].mxu1 %v545_v63  ;;  %v402_v62 = vrot.slane %v400_v52, 7  ;;  %v405_v63 = vshrl.u32 %v224_v34, 16  ;;  %v419_v9 = vshrl.u32 %v239_v55, 16  ;;  %v422_v10 = vshll.u32 %v239_v55, 16  ;;  %v2900_v52 = vld [vmem:[%s3696_s2 + $0xf8] sm:$0xff]  }
  0x2d   :  { %2671 = vmatpush3.bf16.msra.mxu0 %v2873_v56  ;;  %2699 = vmatpush3.bf16.msra.mxu1 %v2874_v57  ;;  %v325_v56 = vcombine.high %v3289_v33, %v3299_v50  ;;  %v393_v57 = vrot.slane %v391_v38, 6  ;;  %v2370_v55 = vcombine.low %v3121_v43, %v3129_v48  ;;  %v2931_v48 = vld [vmem:[%s3696_s2 + $0x278] sm:$0xff]  }
  0x2e   :  { %2672 = vmatprep.subr.bf16.mxu0 %v2875_v1  ;;  %2700 = vmatprep.subr.bf16.mxu1 %v2876_v2  ;;  %v254_v1 = vcombine.low %v3303_v54, %v3309_v61  ;;  %v326_v2 = vcombine.high %v3303_v54, %v3309_v61 }
  0x30   :  { %v442_v39 = vshll.u32 %v326_v2, 16 }
  0x31   :  { %2673 = vmatpush3.bf16.msra.mxu0 %v2877_v3  ;;  %2701 = vmatpush3.bf16.msra.mxu1 %v2878_v4  ;;  %v397_v3 = vor.u32 %v396_v60, %v393_v57  ;;  %v408_v4 = vshll.u32 %v224_v34, 16 }
  0x32   :  { %2674 = vmatprep.subr.bf16.mxu0 %v2879_v7  ;;  %2702 = vmatprep.subr.bf16.mxu1 %v2880_v14  ;;  %v407_v7 = vrot.slane %v405_v63, 6  ;;  %v428_v14 = vshll.u32 %v325_v56, 16  ;;  %v444_v60 = vrot.slane %v442_v39, 7  ;;  %v2374_v39 = vcombine.low %v3267_v23, %v3281_v29 }
  0x33   :  { %v398_v12 = vrot.slane %v397_v3, 2  ;;  %v410_v13 = vrot.slane %v408_v4, 7 }
  0x34   :  { %v430_v34 = vrot.slane %v428_v14, 7  ;;  %v2904_v14 = vld [vmem:[%s3696_s2 + $0x2c0] sm:$0xff]  }
  0x35   :  { %2675 = vmatpush3.bf16.msra.mxu0 %v2881_v15  ;;  %2703 = vmatpush3.bf16.msra.mxu1 %v2882_v16  ;;  %v433_v15 = vshrl.u32 %v254_v1, 16  ;;  %v421_v16 = vrot.slane %v419_v9, 6  ;;  %v2903_v9 = vld [vmem:[%s3696_s2 + $0x240] sm:$0xff]  }
  0x36   :  { %2676 = vmatprep.subr.bf16.mxu0 %v2883_v18  ;;  %2704 = vmatprep.subr.bf16.mxu1 %v2884_v19  ;;  %v424_v18 = vrot.slane %v422_v10, 7  ;;  %v436_v19 = vshll.u32 %v254_v1, 16  ;;  %v2901_v1 = vld [vmem:[%s3696_s2 + $0x38] sm:$0xff]  }
  0x38   :  { %v438_v38 = vrot.slane %v436_v19, 7 }
  0x39   :  { %2677 = vmatpush3.bf16.msra.mxu0 %v2885_v20  ;;  %2705 = vmatpush3.bf16.msra.mxu1 %v2886_v21  ;;  %v2896_v20 = vld [vmem:[%s3696_s2 + $0xf0] sm:$0xff]   ;;  %v411_v21 = vor.u32 %v410_v13, %v407_v7 }
  0x3a   :  { %2678 = vmatprep.subr.bf16.mxu0 %v2887_v24  ;;  %2706 = vmatprep.subr.bf16.mxu1 %v2888_v25  ;;  %v416_v24 = vrot.slane %v414_v8, 7  ;;  %v435_v25 = vrot.slane %v433_v15, 6  ;;  %v898_v8 = vrot.slane %v2370_v55, %v3175_v36 }
  0x3b   :  { %v412_v51 = vrot.slane %v411_v21, 2 }
  0x3c   :  { %v439_v57 = vor.u32 %v438_v38, %v435_v25  ;;  %v2375_v38 = vcombine.low %v3289_v33, %v3303_v54 }
  0x3d   :  { %2679 = vmatpush3.bf16.msra.mxu0 %v2889_v30  ;;  %2707 = vmatpush3.bf16.msra.mxu1 %v2890_v32  ;;  %v2369_v30 = vcombine.low %v3119_v42, %v3123_v45  ;;  %v425_v32 = vor.u32 %v424_v18, %v421_v16  ;;  %v2371_v42 = vcombine.low %v3131_v49, %v3147_v59  ;;  %v2930_v45 = vld [vmem:[%s3696_s2 + $0x2b0] sm:$0xff]  }
  0x3e   :  { %2680 = vmatprep.subr.bf16.mxu0 %v2891_v40  ;;  %2708 = vmatprep.subr.bf16.mxu1 %v2892_v47  ;;  %v2899_v40 = vld [vmem:[%s3696_s2 + $0x78] sm:$0xff]   ;;  %v403_v47 = vsel %vm3163_vm6, %v398_v12, %v402_v62  ;;  %v2372_v62 = vcombine.low %v3135_v53, %v3153_v0  ;;  %v3351_v63 = vsel %vm3163_vm6, %v412_v51, %v416_v24  ;;  %v440_v3 = vrot.slane %v439_v57, 2  ;;  %v2907_v57 = vld [vmem:[%s3696_s2 + $0x248] sm:$0xff]  }
  0x3f   :  { %v426_v56 = vrot.slane %v425_v32, 2  ;;  %v891_v2 = vrot.slane %v2369_v30, %v3175_v36  ;;  %v547_v4 = vcombine.low %v403_v47, %v3351_v63  ;;  %v905_v7 = vrot.slane %v2371_v42, %v3175_v36  ;;  %v2932_v53 = vld [vmem:[%s3696_s2 + $0x2f8] sm:$0xff]  }
  0x40   :  { %v912_v13 = vrot.slane %v2372_v62, %v3175_v36  ;;  %v941_v51 = vrot.slane %v2375_v38, %v3175_v36  ;;  %v2909_v62 = vld [vmem:[%s3696_s2 + $0x208] sm:$0xff]   ;;  %v2928_v38 = vld [vmem:[%s3696_s2 + $0x2f0] sm:$0xff]  }
  0x41   :  { %2681 = vmatpush3.bf16.msra.mxu0 %v2893_v5  ;;  %2709 = vmatpush3.bf16.msra.mxu1 %v2894_v6  ;;  %v3359_v43 = vsel %vm3163_vm6, %v426_v56, %v430_v34  ;;  %v548_v5 = vcombine.high %v403_v47, %v3351_v63  ;;  %v2902_v6 = vld [vmem:[%s3696_s2 + $0xb8] sm:$0xff]   ;;  %v557_v12 = vrot.slane %v547_v4, %v3175_v36  ;;  %v2905_v47 = vld [vmem:[%s3696_s2 + $0x200] sm:$0xff]   ;;  %v2911_v4 = vld [vmem:[%s3696_s2 + $0x250] sm:$0xff]  }
  0x42   :  { %2682 = vmatprep.subr.bf16.mxu0 %v2895_v11  ;;  %2710 = vmatprep.subr.bf16.mxu1 %v2896_v20  ;;  %v1855_v10 = vcombine.low %v3351_v63, %v3359_v43  ;;  %v3375_v11 = vsel %vm3163_vm6, %v440_v3, %v444_v60  ;;  %v1856_v19 = vcombine.high %v3351_v63, %v3359_v43  ;;  %v2906_v56 = vld [vmem:[%s3696_s2 + $0x280] sm:$0xff]   ;;  %v2908_v60 = vld [vmem:[%s3696_s2 + $0x2c8] sm:$0xff]  }
  0x43   :  { %v549_v15 = vcombine.low %v3359_v43, %v3375_v11  ;;  %v550_v16 = vcombine.high %v3359_v43, %v3375_v11  ;;  %v564_v18 = vrot.slane %v548_v5, %v3175_v36  ;;  %v914_v24 = vcombine.high %v891_v2, %v905_v7  ;;  %v2912_v5 = vld [vmem:[%s3696_s2 + $0x2d0] sm:$0xff]   ;;  %v2954_v63 = vld [vmem:[%s3696_s2 + $0x3a0] sm:$0xff]  }
  0x44   :  { %v916_v25 = vcombine.high %v898_v8, %v912_v13  ;;  %v2373_v34 = vcombine.low %v3265_v22, %v3275_v26  ;;  %v913_v23 = vcombine.low %v891_v2, %v905_v7  ;;  %v915_v55 = vcombine.low %v898_v8, %v912_v13  ;;  %v2910_v2 = vld [vmem:[%s3696_s2 + $0x288] sm:$0xff]   ;;  %v2914_v8 = vld [vmem:[%s3696_s2 + $0x290] sm:$0xff]   ;;  %v2916_v13 = vld [vmem:[%s3696_s2 + $0x2d8] sm:$0xff]  }
  0x45   :  { %2683 = vmatpush3.bf16.msra.mxu0 %v2897_v27  ;;  %2711 = vmatpush3.bf16.msra.mxu1 %v2898_v28  ;;  %v571_v20 = vrot.slane %v549_v15, %v3175_v36  ;;  %v578_v21 = vrot.slane %v550_v16, %v3175_v36  ;;  %v2918_v15 = vld [vmem:[%s3696_s2 + $0x298] sm:$0xff]   ;;  %v2919_v16 = vld [vmem:[%s3696_s2 + $0x260] sm:$0xff]   ;;  %v1872_v17 = vrot.slane %v1856_v19, %v3175_v36 }
  0x46   :  { %2684 = vmatprep.subr.bf16.mxu0 %v2899_v40  ;;  %2712 = vmatprep.subr.bf16.mxu1 %v2900_v52  ;;  %v2376_v40 = vcombine.low %v3299_v50, %v3309_v61  ;;  %v927_v22 = vrot.slane %v2373_v34, %v3175_v36  ;;  %v934_v52 = vrot.slane %v2374_v39, %v3175_v36  ;;  %v2927_v34 = vld [vmem:[%s3696_s2 + $0x270] sm:$0xff]  }
  0x47   :  { %v580_v27 = vcombine.high %v557_v12, %v571_v20  ;;  %v582_v28 = vcombine.high %v564_v18, %v578_v21  ;;  %v579_v30 = vcombine.low %v557_v12, %v571_v20  ;;  %v581_v32 = vcombine.low %v564_v18, %v578_v21  ;;  %v2915_v12 = vld [vmem:[%s3696_s2 + $0x258] sm:$0xff]   ;;  %v2920_v18 = vld [vmem:[%s3696_s2 + $0x2e0] sm:$0xff]  }
  0x48   :  { %v948_v42 = vrot.slane %v2376_v40, %v3175_v36  ;;  %v949_v7 = vcombine.low %v927_v22, %v941_v51  ;;  %v2253_v20 = vld [vmem:[%s3695_s1 + $0x40] sm:$0xff]  ;;  %v2929_v40 = vld [vmem:[%s3696_s2 + $0x230] sm:$0xff]  }
  0x49   :  { %2685 = vmatpush3.bf16.msra.mxu0 %v2901_v1  ;;  %2713 = vmatpush3.bf16.msra.mxu1 %v2902_v6  ;;  %v950_v1 = vcombine.high %v927_v22, %v941_v51  ;;  %v2913_v6 = vld [vmem:[%s3696_s2 + $0x210] sm:$0xff]   ;;  %v2921_v21 = vld [vmem:[%s3696_s2 + $0x220] sm:$0xff]   ;;  %78 = vst [vmem:[#allocation3] sm:$0xff] %v2253_v20  ;;  %v1360_v22 = vrot.slane %v2477_v58, %v3175_v36 }
  0x4a   :  { %2726 = vmatprep.subr.bf16.mxu0 %v2903_v9  ;;  %2754 = vmatprep.subr.bf16.mxu1 %v2904_v14  ;;  %v952_v3 = vcombine.high %v934_v52, %v948_v42  ;;  %v951_v9 = vcombine.low %v934_v52, %v948_v42  ;;  %v2917_v14 = vld [vmem:[%s3696_s2 + $0x218] sm:$0xff]  }
  0x4b   :  { %823 = vmatprep.mubr.bf16.mxu0 %v580_v27  ;;  %872 = vmatprep.mubr.bf16.mxu1 %v582_v28  ;;  %v2923_v27 = vld [vmem:[%s3696_s2 + $0x268] sm:$0xff]  }
  0x4c   :  { %824 = vmatmul.mubr.bf16.gmra.mrb[4].mxu0 %v579_v30  ;;  %873 = vmatmul.mubr.bf16.gmra.mrb[4].mxu1 %v581_v32  ;;  %v2924_v28 = vld [vmem:[%s3696_s2 + $0x2e8] sm:$0xff]  }
  0x4d   :  { %1185 = vmatprep.mubr.bf16.mxu0 %v914_v24  ;;  %1234 = vmatprep.mubr.bf16.mxu1 %v916_v25  ;;  %v2254_v24 = vld [vmem:[%s3695_s1 + $0x48] sm:$0xff]  ;;  %v2922_v25 = vld [vmem:[%s3696_s2 + $0x2a0] sm:$0xff]  }
  0x4e   :  { %80 = vst [vmem:[#allocation3 + $0x8] sm:$0xff] %v2254_v24  ;;  %v2925_v30 = vld [vmem:[%s3696_s2 + $0x228] sm:$0xff]  }
  0x4f   :  { %v2926_v32 = vld [vmem:[%s3696_s2 + $0x2a8] sm:$0xff]  }
  0x50   :  { %v2409_v39 = vld.sshfl [vmem:[#allocation3] sm:$0x5f pattern:$0x76325410] }
  0x54   :  { %1186 = vmatmul.mubr.bf16.vlgmr.msra.gmra.mrb[8].mxu0 %v913_v23  ;;  %1235 = vmatmul.mubr.bf16.vlgmr.msra.gmra.mrb[8].mxu1 %v915_v55  ;;  %v1367_v23 = vrot.slane %v2478_v31, %v3175_v36 }
  0x55   :  { %2727 = vmatpush3.bf16.msra.mxu0 %v2905_v47  ;;  %2755 = vmatpush3.bf16.msra.mxu1 %v2906_v56  ;;  %v2479_v47 = vcombine.low %v3147_v59, %v2409_v39  ;;  %v2410_v51 = vld.sshfl [vmem:[#allocation3 + $0x8] sm:$0x5f pattern:$0x76325410]  ;;  %v2255_v56 = vld [vmem:[%s3695_s1 + $0x90] sm:$0xff]  ;;  %v2256_v59 = vld [vmem:[%s3695_s1 + $0x98] sm:$0xff] }
  0x56   :  { %2728 = vmatprep.subr.bf16.mxu0 %v2907_v57  ;;  %2756 = vmatprep.subr.bf16.mxu1 %v2908_v60  ;;  %v1269_v52 = vcombine.low %v2409_v39, %v2410_v51  ;;  %v2480_v42 = vcombine.low %v3153_v0, %v2410_v51  ;;  %v1724_v55 = vcombine.high %v2409_v39, %v2410_v51  ;;  %v2933_v57 = vld [vmem:[%s3696_s2 + $0x238] sm:$0xff]  }
  0x57   :  { %1193 = vmatprep.mubr.bf16.mxu0 %v950_v1  ;;  %1242 = vmatprep.mubr.bf16.mxu1 %v952_v3  ;;  %v1374_v49 = vrot.slane %v2479_v47, %v3175_v36  ;;  %82 = vst [vmem:[#allocation3 + $0x10] sm:$0xff] %v2255_v56  ;;  %84 = vst [vmem:[#allocation3 + $0x18] sm:$0xff] %v2256_v59  ;;  %v2934_v60 = vld [vmem:[%s3696_s2 + $0x2b8] sm:$0xff]   ;;  %v3567_v59 = vrot.slane %v1819_v41, %v3175_v36 }
  0x58   :  { %v1381_v58 = vrot.slane %v2480_v42, %v3175_v36  ;;  %v1727_v0 = vshrl.u32 %v1269_v52, 16  ;;  %v1730_v31 = vshll.u32 %v1269_v52, 16  ;;  %v2943_v42 = vld [vmem:[%s3696_s2 + $0x350] sm:$0xff]   ;;  %v2947_v41 = vld [vmem:[%s3696_s2 + $0x358] sm:$0xff]  }
  0x59   :  { %2729 = vmatpush3.bf16.msra.mxu0 %v2909_v62  ;;  %2757 = vmatpush3.bf16.msra.mxu1 %v2910_v2  ;;  %v1383_v62 = vcombine.high %v1360_v22, %v1374_v49 }
  0x5a   :  { %2730 = vmatprep.subr.bf16.mxu0 %v2911_v4  ;;  %2758 = vmatprep.subr.bf16.mxu1 %v2912_v5  ;;  %v1385_v1 = vcombine.high %v1367_v23, %v1381_v58  ;;  %v1729_v3 = vrot.slane %v1727_v0, 6  ;;  %v1732_v2 = vrot.slane %v1730_v31, 7  ;;  %v1736_v4 = vshll.u32 %v1724_v55, 16  ;;  %v2935_v5 = vld [vmem:[%s3696_s2 + $0x340] sm:$0xff]   ;;  %v2945_v55 = vld [vmem:[%s3696_s2 + $0x310] sm:$0xff]  }
  0x5c   :  { %1194 = vmatmul.mubr.bf16.gmra.mrb[12].mxu0 %v949_v7  ;;  %1243 = vmatmul.mubr.bf16.gmra.mrb[12].mxu1 %v951_v9  ;;  %v2482_v7 = vcombine.low %v3281_v29, %v3299_v50  ;;  %v2937_v9 = vld [vmem:[%s3696_s2 + $0x300] sm:$0xff]   ;;  %v2939_v29 = vld [vmem:[%s3696_s2 + $0x348] sm:$0xff]  }
  0x5d   :  { %2731 = vmatpush3.bf16.msra.mxu0 %v2913_v6  ;;  %2759 = vmatpush3.bf16.msra.mxu1 %v2914_v8  ;;  %v2481_v6 = vcombine.low %v3275_v26, %v3289_v33  ;;  %v2936_v8 = vld [vmem:[%s3696_s2 + $0x3c0] sm:$0xff]   ;;  %v1733_v26 = vor.u32 %v1732_v2, %v1729_v3  ;;  %v1382_v33 = vcombine.low %v1360_v22, %v1374_v49  ;;  %v2940_v50 = vld [vmem:[%s3696_s2 + $0x3c8] sm:$0xff]  }
  0x5e   :  { %2732 = vmatprep.subr.bf16.mxu0 %v2915_v12  ;;  %2760 = vmatprep.subr.bf16.mxu1 %v2916_v13  ;;  %v2938_v12 = vld [vmem:[%s3696_s2 + $0x380] sm:$0xff]   ;;  %v1384_v13 = vcombine.low %v1367_v23, %v1381_v58  ;;  %v2412_v20 = vld.sshfl [vmem:[#allocation3 + $0x18] sm:$0x5f pattern:$0x76325410]  ;;  %v2944_v23 = vld [vmem:[%s3696_s2 + $0x3d0] sm:$0xff]   ;;  %v3574_v49 = vrot.slane %v1820_v44, %v3175_v36  ;;  %v1865_v2 = vrot.slane %v1855_v10, %v3175_v36 }
  0x5f   :  { %1654 = vmatprep.mubr.bf16.mxu0 %v1383_v62  ;;  %1703 = vmatprep.mubr.bf16.mxu1 %v1385_v1  ;;  %v2946_v58 = vld [vmem:[%s3696_s2 + $0x390] sm:$0xff]   ;;  %v2950_v1 = vld [vmem:[%s3696_s2 + $0x398] sm:$0xff]   ;;  %v2952_v10 = vld [vmem:[%s3696_s2 + $0x3e0] sm:$0xff]  }
  0x61   :  { %2733 = vmatpush3.bf16.msra.mxu0 %v2917_v14  ;;  %2761 = vmatpush3.bf16.msra.mxu1 %v2918_v15  ;;  %v2411_v14 = vld.sshfl [vmem:[#allocation3 + $0x10] sm:$0x5f pattern:$0x76325410]  ;;  %v1738_v15 = vrot.slane %v1736_v4, 7  ;;  %v2951_v4 = vld [vmem:[%s3696_s2 + $0x360] sm:$0xff]  }
  0x62   :  { %2734 = vmatprep.subr.bf16.mxu0 %v2919_v16  ;;  %2762 = vmatprep.subr.bf16.mxu1 %v2920_v18  ;;  %v2483_v16 = vcombine.low %v3303_v54, %v2411_v14  ;;  %v1396_v18 = vrot.slane %v2481_v6, %v3175_v36  ;;  %v1284_v24 = vcombine.low %v2411_v14, %v2412_v20  ;;  %v2941_v54 = vld [vmem:[%s3696_s2 + $0x308] sm:$0xff]  }
  0x65   :  { %2735 = vmatpush3.bf16.msra.mxu0 %v2921_v21  ;;  %2763 = vmatpush3.bf16.msra.mxu1 %v2922_v25  ;;  %v1403_v21 = vrot.slane %v2482_v7, %v3175_v36  ;;  %v2484_v25 = vcombine.low %v3309_v61, %v2412_v20  ;;  %v2942_v61 = vld [vmem:[%s3696_s2 + $0x388] sm:$0xff]  }
  0x66   :  { %2736 = vmatprep.subr.bf16.mxu0 %v2923_v27  ;;  %2764 = vmatprep.subr.bf16.mxu1 %v2924_v28  ;;  %v1725_v27 = vcombine.high %v2411_v14, %v2412_v20  ;;  %v1410_v28 = vrot.slane %v2483_v16, %v3175_v36  ;;  %v2961_v14 = vld [vmem:[%s3696_s2 + $0x330] sm:$0xff]   ;;  %v2963_v16 = vld [vmem:[%s3696_s2 + $0x378] sm:$0xff]  }
  0x67   :  { %v2965_v20 = vld [vmem:[%s3696_s2 + $0x338] sm:$0xff]  }
  0x68   :  { %v1750_v39 = vshll.u32 %v1725_v27, 16 }
  0x69   :  { %2737 = vmatpush3.bf16.msra.mxu0 %v2925_v30  ;;  %2765 = vmatpush3.bf16.msra.mxu1 %v2926_v32  ;;  %v1734_v30 = vrot.slane %v1733_v26, 2  ;;  %v1417_v32 = vrot.slane %v2484_v25, %v3175_v36 }
  0x6a   :  { %2738 = vmatprep.subr.bf16.mxu0 %v2927_v34  ;;  %2766 = vmatprep.subr.bf16.mxu1 %v2928_v38  ;;  %v1741_v34 = vshrl.u32 %v1284_v24, 16  ;;  %v1744_v38 = vshll.u32 %v1284_v24, 16  ;;  %v1752_v31 = vrot.slane %v1750_v39, 7 }
  0x6b   :  { %v1739_v47 = vsel %vm3163_vm6, %v1734_v30, %v1738_v15  ;;  %v1421_v22 = vcombine.high %v1403_v21, %v1417_v32  ;;  %v2962_v15 = vld [vmem:[%s3696_s2 + $0x3b0] sm:$0xff]  }
  0x6c   :  { %v1743_v51 = vrot.slane %v1741_v34, 6  ;;  %v1746_v52 = vrot.slane %v1744_v38, 7  ;;  %v1821_v56 = vcombine.low %v3189_v46, %v1739_v47 }
  0x6d   :  { %2739 = vmatpush3.bf16.msra.mxu0 %v2929_v40  ;;  %2767 = vmatpush3.bf16.msra.mxu1 %v2930_v45  ;;  %v1419_v40 = vcombine.high %v1396_v18, %v1410_v28  ;;  %v1822_v45 = vcombine.high %v3189_v46, %v1739_v47 }
  0x6e   :  { %2740 = vmatprep.subr.bf16.mxu0 %v2931_v48  ;;  %2768 = vmatprep.subr.bf16.mxu1 %v2932_v53  ;;  %v1418_v48 = vcombine.low %v1396_v18, %v1410_v28  ;;  %v1420_v53 = vcombine.low %v1403_v21, %v1417_v32  ;;  %v1747_v0 = vor.u32 %v1746_v52, %v1743_v51  ;;  %v2964_v18 = vld [vmem:[%s3696_s2 + $0x3f8] sm:$0xff]  }
  0x6f   :  { %v3583_v46 = vrot.slane %v1821_v56, %v3175_v36  ;;  %v3586_v35 = vrot.slane %v1822_v45, %v3175_v36  ;;  %v2966_v21 = vld [vmem:[%s3696_s2 + $0x3b8] sm:$0xff]  }
  0x70   :  { %v1748_v44 = vrot.slane %v1747_v0, 2 }
  0x71   :  { %2741 = vmatpush3.bf16.msra.mxu0 %v2933_v57  ;;  %2769 = vmatpush3.bf16.msra.mxu1 %v2934_v60  ;;  %v2949_v57 = vld [vmem:[%s3696_s2 + $0x318] sm:$0xff]   ;;  %v1852_v60 = vcombine.high %v3567_v59, %v3583_v46  ;;  %v1854_v62 = vcombine.high %v3574_v49, %v3586_v35  ;;  %v1851_v24 = vcombine.low %v3567_v59, %v3583_v46 }
  0x72   :  { %2782 = vmatprep.subr.bf16.mxu0 %v2935_v5  ;;  %2810 = vmatprep.subr.bf16.mxu1 %v2936_v8  ;;  %v1753_v3 = vsel %vm3163_vm6, %v1748_v44, %v1752_v31  ;;  %v1853_v25 = vcombine.low %v3574_v49, %v3586_v35 }
  0x73   :  { %v1857_v5 = vcombine.low %v3375_v11, %v1753_v3  ;;  %v1858_v6 = vcombine.high %v3375_v11, %v1753_v3  ;;  %v2953_v11 = vld [vmem:[%s3696_s2 + $0x320] sm:$0xff]  }
  0x74   :  { %1655 = vmatmul.mubr.bf16.vlgmr.msra.gmra.mrb[16].mxu0 %v1382_v33  ;;  %1704 = vmatmul.mubr.bf16.vlgmr.msra.gmra.mrb[16].mxu1 %v1384_v13  ;;  %v2957_v33 = vld [vmem:[%s3696_s2 + $0x328] sm:$0xff]  }
  0x75   :  { %2783 = vmatpush3.bf16.msra.mxu0 %v2937_v9  ;;  %2811 = vmatpush3.bf16.msra.mxu1 %v2938_v12  ;;  %v1879_v7 = vrot.slane %v1857_v5, %v3175_v36  ;;  %v1886_v8 = vrot.slane %v1858_v6, %v3175_v36  ;;  %v2955_v12 = vld [vmem:[%s3696_s2 + $0x368] sm:$0xff]  }
  0x76   :  { %2784 = vmatprep.subr.bf16.mxu0 %v2939_v29  ;;  %2812 = vmatprep.subr.bf16.mxu1 %v2940_v50  ;;  %v2956_v36 = vld [vmem:[%s3696_s2 + $0x3e8] sm:$0xff]   ;;  %v2959_v29 = vld [vmem:[%s3696_s2 + $0x370] sm:$0xff]  }
  0x77   :  { %1662 = vmatprep.mubr.bf16.mxu0 %v1419_v40  ;;  %1711 = vmatprep.mubr.bf16.mxu1 %v1421_v22  ;;  %v1888_v43 = vcombine.high %v1865_v2, %v1879_v7  ;;  %v1890_v19 = vcombine.high %v1872_v17, %v1886_v8  ;;  %v1887_v9 = vcombine.low %v1865_v2, %v1879_v7  ;;  %v2958_v13 = vld [vmem:[%s3696_s2 + $0x3a8] sm:$0xff]   ;;  %v2960_v50 = vld [vmem:[%s3696_s2 + $0x3f0] sm:$0xff]  }
  0x78   :  { %v1889_v26 = vcombine.low %v1872_v17, %v1886_v8 }
  0x79   :  { %2785 = vmatpush3.bf16.msra.mxu0 %v2941_v54  ;;  %2813 = vmatpush3.bf16.msra.mxu1 %v2942_v61 }
  0x7a   :  { %2786 = vmatprep.subr.bf16.mxu0 %v2943_v42  ;;  %2814 = vmatprep.subr.bf16.mxu1 %v2944_v23 }
  0x7c   :  { %1663 = vmatmul.mubr.bf16.gmra.mrb[20].mxu0 %v1418_v48  ;;  %1712 = vmatmul.mubr.bf16.gmra.mrb[20].mxu1 %v1420_v53 }
  0x7d   :  { %2787 = vmatpush3.bf16.msra.mxu0 %v2945_v55  ;;  %2815 = vmatpush3.bf16.msra.mxu1 %v2946_v58 }
  0x7e   :  { %2788 = vmatprep.subr.bf16.mxu0 %v2947_v41  ;;  %2816 = vmatprep.subr.bf16.mxu1 %v2948_v37 }
  0x7f   :  { %2123 = vmatprep.mubr.bf16.mxu0 %v1852_v60  ;;  %2172 = vmatprep.mubr.bf16.mxu1 %v1854_v62 }
  0x81   :  { %2789 = vmatpush3.bf16.msra.mxu0 %v2949_v57  ;;  %2817 = vmatpush3.bf16.msra.mxu1 %v2950_v1 }
  0x82   :  { %2790 = vmatprep.subr.bf16.mxu0 %v2951_v4  ;;  %2818 = vmatprep.subr.bf16.mxu1 %v2952_v10 }
  0x85   :  { %2791 = vmatpush3.bf16.msra.mxu0 %v2953_v11  ;;  %2819 = vmatpush3.bf16.msra.mxu1 %v2954_v63 }
  0x86   :  { %2792 = vmatprep.subr.bf16.mxu0 %v2955_v12  ;;  %2820 = vmatprep.subr.bf16.mxu1 %v2956_v36 }
  0x89   :  { %2793 = vmatpush3.bf16.msra.mxu0 %v2957_v33  ;;  %2821 = vmatpush3.bf16.msra.mxu1 %v2958_v13 }
  0x8a   :  { %2794 = vmatprep.subr.bf16.mxu0 %v2959_v29  ;;  %2822 = vmatprep.subr.bf16.mxu1 %v2960_v50 }
  0x8d   :  { %2795 = vmatpush3.bf16.msra.mxu0 %v2961_v14  ;;  %2823 = vmatpush3.bf16.msra.mxu1 %v2962_v15 }
  0x8e   :  { %2796 = vmatprep.subr.bf16.mxu0 %v2963_v16  ;;  %2824 = vmatprep.subr.bf16.mxu1 %v2964_v18 }
  0x91   :  { %2797 = vmatpush3.bf16.msra.mxu0 %v2965_v20  ;;  %2825 = vmatpush3.bf16.msra.mxu1 %v2966_v21 }
  0x94   :  { %2124 = vmatmul.mubr.bf16.vlgmr.msra.gmra.mrb[24].mxu0 %v1851_v24  ;;  %2173 = vmatmul.mubr.bf16.vlgmr.msra.gmra.mrb[24].mxu1 %v1853_v25 }
  0x95   :  { %2131 = vmatprep.mubr.bf16.mxu0 %v1888_v43  ;;  %2180 = vmatprep.mubr.bf16.mxu1 %v1890_v19 }
  0x9c   :  { %2132 = vmatmul.mubr.bf16.gmra.mrb[28].mxu0 %v1887_v9  ;;  %2181 = vmatmul.mubr.bf16.gmra.mrb[28].mxu1 %v1889_v26 }
  0xff   :  { %v2630_v27 = vpop.f32.mrb[0].mxu0  ;;  %v2658_v28 = vpop.f32.mrb[0].mxu1 }
 0x100   :  { %v2631_v30 = vpop.f32.mrb[1].mxu0  ;;  %v2659_v54 = vpop.f32.mrb[1].mxu1 }
 0x101   :  { %v2632_v32 = vadd.f32 %v2631_v30, %v2630_v27  ;;  %v2660_v34 = vadd.f32 %v2659_v54, %v2658_v28  ;;  %v2633_v38 = vpop.f32.mrb[2].mxu0  ;;  %v2661_v39 = vpop.f32.mrb[2].mxu1 }
 0x102   :  { %v2634_v61 = vpop.f32.mrb[3].mxu0  ;;  %v2662_v40 = vpop.f32.mrb[3].mxu1 }
 0x103   :  { %v867_v47 = vadd.f32 %v2660_v34, %v2632_v32  ;;  %v2635_v22 = vadd.f32 %v2634_v61, %v2633_v38  ;;  %v2663_v51 = vadd.f32 %v2662_v40, %v2661_v39 }
 0x105   :  { %v870_v52 = vadd.f32 %v2663_v51, %v2635_v22 }
 0x11f   :  { %v2636_v42 = vpop.f32.mrb[4].mxu0  ;;  %v2664_v23 = vpop.f32.mrb[4].mxu1 }
 0x120   :  { %v2637_v55 = vpop.f32.mrb[5].mxu0  ;;  %v2665_v56 = vpop.f32.mrb[5].mxu1 }
 0x121   :  { %v2638_v59 = vadd.f32 %v2637_v55, %v2636_v42  ;;  %v2666_v45 = vadd.f32 %v2665_v56, %v2664_v23  ;;  %v2639_v49 = vpop.f32.mrb[6].mxu0  ;;  %v2667_v48 = vpop.f32.mrb[6].mxu1 }
 0x122   :  { %v2640_v53 = vpop.f32.mrb[7].mxu0  ;;  %v2668_v58 = vpop.f32.mrb[7].mxu1 }
 0x123   :  { %v875_v0 = vadd.f32 %v2666_v45, %v2638_v59  ;;  %v2641_v31 = vadd.f32 %v2640_v53, %v2639_v49  ;;  %v2669_v41 = vadd.f32 %v2668_v58, %v2667_v48 }
 0x125   :  { %v878_v46 = vadd.f32 %v2669_v41, %v2641_v31 }
 0x127   :  { %v2686_v35 = vpop.f32.mrb[8].mxu0  ;;  %v2714_v37 = vpop.f32.mrb[8].mxu1 }
 0x128   :  { %v2687_v44 = vpop.f32.mrb[9].mxu0  ;;  %v2715_v57 = vpop.f32.mrb[9].mxu1 }
 0x129   :  { %v2688_v60 = vadd.f32 %v2687_v44, %v2686_v35  ;;  %v2716_v62 = vadd.f32 %v2715_v57, %v2714_v37  ;;  %v2689_v1 = vpop.f32.mrb[10].mxu0  ;;  %v2717_v3 = vpop.f32.mrb[10].mxu1 }
 0x12a   :  { %v2690_v2 = vpop.f32.mrb[11].mxu0  ;;  %v2718_v4 = vpop.f32.mrb[11].mxu1 }
 0x12b   :  { %v1188_v5 = vadd.f32 %v2688_v60, %v867_v47  ;;  %v2691_v6 = vadd.f32 %v2690_v2, %v2689_v1  ;;  %v2719_v17 = vadd.f32 %v2718_v4, %v2717_v3 }
 0x12d   :  { %v1237_v10 = vadd.f32 %v2716_v62, %v1188_v5  ;;  %v1191_v7 = vadd.f32 %v2691_v6, %v870_v52 }
 0x12f   :  { %v1240_v8 = vadd.f32 %v2719_v17, %v1191_v7  ;;  %v2692_v11 = vpop.f32.mrb[12].mxu0  ;;  %v2720_v63 = vpop.f32.mrb[12].mxu1 }
 0x130   :  { %v2693_v43 = vpop.f32.mrb[13].mxu0  ;;  %v2721_v19 = vpop.f32.mrb[13].mxu1 }
 0x131   :  { %v2694_v9 = vadd.f32 %v2693_v43, %v2692_v11  ;;  %v2695_v12 = vpop.f32.mrb[14].mxu0  ;;  %v2722_v36 = vadd.f32 %v2721_v19, %v2720_v63  ;;  %v2723_v26 = vpop.f32.mrb[14].mxu1 }
 0x132   :  { %v2696_v33 = vpop.f32.mrb[15].mxu0  ;;  %v2724_v13 = vpop.f32.mrb[15].mxu1 }
 0x133   :  { %v1196_v29 = vadd.f32 %v2694_v9, %v875_v0  ;;  %v2697_v50 = vadd.f32 %v2696_v33, %v2695_v12  ;;  %v2725_v14 = vadd.f32 %v2724_v13, %v2723_v26 }
 0x135   :  { %v1199_v15 = vadd.f32 %v2697_v50, %v878_v46  ;;  %v1245_v16 = vadd.f32 %v2722_v36, %v1196_v29 }
 0x137   :  { %v1248_v18 = vadd.f32 %v2725_v14, %v1199_v15 }
 0x147   :  { %v2742_v20 = vpop.f32.mrb[16].mxu0  ;;  %v2770_v21 = vpop.f32.mrb[16].mxu1 }
 0x148   :  { %v2743_v24 = vpop.f32.mrb[17].mxu0  ;;  %v2771_v25 = vpop.f32.mrb[17].mxu1 }
 0x149   :  { %v2744_v27 = vadd.f32 %v2743_v24, %v2742_v20  ;;  %v2772_v28 = vadd.f32 %v2771_v25, %v2770_v21  ;;  %v2745_v30 = vpop.f32.mrb[18].mxu0  ;;  %v2773_v54 = vpop.f32.mrb[18].mxu1 }
 0x14a   :  { %v2746_v32 = vpop.f32.mrb[19].mxu0  ;;  %v2774_v34 = vpop.f32.mrb[19].mxu1 }
 0x14b   :  { %v1706_v38 = vadd.f32 %v2772_v28, %v2744_v27  ;;  %v2747_v39 = vadd.f32 %v2746_v32, %v2745_v30  ;;  %v2775_v61 = vadd.f32 %v2774_v34, %v2773_v54 }
 0x14d   :  { %v1720_v40 = vadd.f32 %v1706_v38, %v1237_v10  ;;  %v1709_v47 = vadd.f32 %v2775_v61, %v2747_v39  ;;  %v2613_v10 = vld [vmem:[%s3697_s3] ss:$0 sm:$0xff] }
 0x14f   :  { %v1721_v22 = vadd.f32 %v1709_v47, %v1240_v8  ;;  %v2748_v51 = vpop.f32.mrb[20].mxu0  ;;  %v2776_v52 = vpop.f32.mrb[20].mxu1 }
 0x150   :  { %v2749_v42 = vpop.f32.mrb[21].mxu0  ;;  %v2777_v23 = vpop.f32.mrb[21].mxu1 }
 0x151   :  { %v2750_v55 = vadd.f32 %v2749_v42, %v2748_v51  ;;  %v2778_v56 = vadd.f32 %v2777_v23, %v2776_v52  ;;  %v2751_v59 = vpop.f32.mrb[22].mxu0  ;;  %v2779_v45 = vpop.f32.mrb[22].mxu1 }
 0x152   :  { %v2752_v49 = vpop.f32.mrb[23].mxu0  ;;  %v2780_v48 = vpop.f32.mrb[23].mxu1 }
 0x153   :  { %v1714_v53 = vadd.f32 %v2778_v56, %v2750_v55  ;;  %v2753_v58 = vadd.f32 %v2752_v49, %v2751_v59  ;;  %v2781_v0 = vadd.f32 %v2780_v48, %v2779_v45 }
 0x155   :  { %v1722_v31 = vadd.f32 %v1714_v53, %v1245_v16  ;;  %v1717_v41 = vadd.f32 %v2781_v0, %v2753_v58 }
 0x157   :  { %v1723_v46 = vadd.f32 %v1717_v41, %v1248_v18 }
 0x167   :  { %v2798_v35 = vpop.f32.mrb[24].mxu0  ;;  %v2826_v37 = vpop.f32.mrb[24].mxu1 }
 0x168   :  { %v2799_v44 = vpop.f32.mrb[25].mxu0  ;;  %v2827_v57 = vpop.f32.mrb[25].mxu1 }
 0x169   :  { %v2800_v60 = vadd.f32 %v2799_v44, %v2798_v35  ;;  %v2828_v62 = vadd.f32 %v2827_v57, %v2826_v37  ;;  %v2801_v1 = vpop.f32.mrb[26].mxu0  ;;  %v2829_v3 = vpop.f32.mrb[26].mxu1 }
 0x16a   :  { %v2802_v2 = vpop.f32.mrb[27].mxu0  ;;  %v2830_v4 = vpop.f32.mrb[27].mxu1 }
 0x16b   :  { %v2175_v5 = vadd.f32 %v2828_v62, %v2800_v60  ;;  %v2803_v6 = vadd.f32 %v2802_v2, %v2801_v1  ;;  %v2831_v17 = vadd.f32 %v2830_v4, %v2829_v3 }
 0x16d   :  { %v2189_v7 = vadd.f32 %v2175_v5, %v1720_v40  ;;  %v2178_v8 = vadd.f32 %v2831_v17, %v2803_v6 }
 0x16f   :  { %v2200_v11 = vadd.f32 %v2613_v10, %v2189_v7  ;;  %v2190_v63 = vadd.f32 %v2178_v8, %v1721_v22  ;;  %v2804_v43 = vpop.f32.mrb[28].mxu0  ;;  %v2832_v19 = vpop.f32.mrb[28].mxu1 }
 0x170   :  { %v2805_v9 = vpop.f32.mrb[29].mxu0  ;;  %v2833_v12 = vpop.f32.mrb[29].mxu1 }
 0x171   :  { %v2204_v36 = vmul.f32 0.2, %v2200_v11  ;;  %v2201_v26 = vadd.f32 %v2613_v10, %v2190_v63  ;;  %v2806_v33 = vadd.f32 %v2805_v9, %v2804_v43  ;;  %v2834_v13 = vadd.f32 %v2833_v12, %v2832_v19  ;;  %v2807_v29 = vpop.f32.mrb[30].mxu0  ;;  %v2835_v50 = vpop.f32.mrb[30].mxu1 }
 0x172   :  { %v2808_v14 = vpop.f32.mrb[31].mxu0  ;;  %v2836_v15 = vpop.f32.mrb[31].mxu1 }
 0x173   :  { %v2208_v16 = vmax.f32 %v2200_v11, %v2204_v36  ;;  %v2205_v18 = vmul.f32 0.2, %v2201_v26  ;;  %v2183_v20 = vadd.f32 %v2834_v13, %v2806_v33  ;;  %v2809_v21 = vadd.f32 %v2808_v14, %v2807_v29 }
 0x174   :  { %v2837_v24 = vadd.f32 %v2836_v15, %v2835_v50 }
 0x175   :  { %v2216_v25 = vcombine.high %v2208_v16, %v2208_v16  ;;  %v2224_v27 = vpack.c.bf16 %v2208_v16, %v2208_v16  ;;  %v2209_v28 = vmax.f32 %v2201_v26, %v2205_v18  ;;  %v2191_v30 = vadd.f32 %v2183_v20, %v1722_v31 }
 0x176   :  { %v2186_v54 = vadd.f32 %v2837_v24, %v2809_v21 }
 0x177   :  { %v2225_v32 = vpack.c.bf16 %v2216_v25, %v2216_v25  ;;  %2232 = vst [vmem:[%s3698_s4] sm:$0x3] %v2224_v27  ;;  %v2217_v34 = vcombine.high %v2209_v28, %v2209_v28  ;;  %v2226_v38 = vpack.c.bf16 %v2209_v28, %v2209_v28  ;;  %v2202_v39 = vadd.f32 %v2613_v10, %v2191_v30 }
 0x178   :  { %v2192_v61 = vadd.f32 %v2186_v54, %v1723_v46 }
 0x179   :  { %2233 = vst [vmem:[%s3698_s4 + $0x2] sm:$0x3] %v2225_v32  ;;  %v2227_v40 = vpack.c.bf16 %v2217_v34, %v2217_v34  ;;  %2234 = vst [vmem:[%s3698_s4 + $0x4] sm:$0x3] %v2226_v38  ;;  %v2206_v47 = vmul.f32 0.2, %v2202_v39 }
 0x17a   :  { %v2203_v22 = vadd.f32 %v2613_v10, %v2192_v61 }
 0x17b   :  { %2235 = vst [vmem:[%s3698_s4 + $0x6] sm:$0x3] %v2227_v40  ;;  %v2210_v51 = vmax.f32 %v2202_v39, %v2206_v47 }
 0x17c   :  { %v2207_v52 = vmul.f32 0.2, %v2203_v22 }
 0x17d   :  { %v2218_v42 = vcombine.high %v2210_v51, %v2210_v51  ;;  %v2228_v23 = vpack.c.bf16 %v2210_v51, %v2210_v51 }
 0x17e   :  { %v2211_v55 = vmax.f32 %v2203_v22, %v2207_v52 }
 0x17f   :  { %v2229_v56 = vpack.c.bf16 %v2218_v42, %v2218_v42  ;;  %2236 = vst [vmem:[%s3698_s4 + $0x8] sm:$0x3] %v2228_v23 }
 0x180   :  { %v2219_v59 = vcombine.high %v2211_v55, %v2211_v55  ;;  %v2230_v45 = vpack.c.bf16 %v2211_v55, %v2211_v55 }
 0x181   :  { %2237 = vst [vmem:[%s3698_s4 + $0xa] sm:$0x3] %v2229_v56 }
 0x182   :  { %v2231_v49 = vpack.c.bf16 %v2219_v59, %v2219_v59  ;;  %2238 = vst [vmem:[%s3698_s4 + $0xc] sm:$0x3] %v2230_v45 }
 0x184   :  { %2239 = vst [vmem:[%s3698_s4 + $0xe] sm:$0x3] %v2231_v49 }

// kernel: fc_discriminator_forward.8
= control target key start
LH: loop header
LB: loop body
LE: loop exit
PB: predicated region body
PF: predicated region fallthrough
CT: control target
= control target key end

     0   :  { %vm215_vm0 = vsmask.f32 256  ;;  %vm216_vm1 = vsmask.f32 1284  ;;  %v336_v38 = vlaneseq  ;;  %vm218_vm3 = vsmask.f32 2312  ;;  %s2974_s0 = inlined_call_operand.vmem [shape: bf16[2,3,3,512], index: 0, kind: input, shape index: {}, may-alias: {0,1}]   ;;  %s2975_s1 = inlined_call_operand.vmem [shape: bf16[2,3,3,512], index: 1, kind: input, shape index: {}, may-alias: {0,1}]   ;;  %s2976_s2 = inlined_call_operand.vmem [shape: bf16[2,2,512,128], index: 2, kind: input, shape index: {}]   ;;  %s2977_s3 = inlined_call_operand.vmem [shape: f32[1,128], index: 3, kind: input, shape index: {}]   ;;  %s2978_s4 = inlined_call_operand.vmem [shape: bf16[2,2,2,128], index: 4, kind: output, shape index: {}]  }
   0x1   :  { %v2305_v0 = vld [vmem:[%s2976_s2 + $0x140] sm:$0xff]   ;;  %v2309_v4 = vld [vmem:[%s2976_s2 + $0x148] sm:$0xff]   ;;  %v2313_v8 = vld [vmem:[%s2976_s2 + $0x150] sm:$0xff]   ;;  %vm220_vm4 = vsmask.f32 3340 }
   0x2   :  { %v2306_v1 = vld [vmem:[%s2976_s2 + $0x1c0] sm:$0xff]   ;;  %2127 = vmatprep.subr.bf16.mxu0 %v2305_v0  ;;  %v2310_v5 = vld [vmem:[%s2976_s2 + $0x1c8] sm:$0xff]   ;;  %v2314_v9 = vld [vmem:[%s2976_s2 + $0x1d0] sm:$0xff]   ;;  %vm222_vm5 = vsmask.f32 4368  ;;  %v2574_v41 = vshrl.u32 %v336_v38, 7 }
   0x3   :  { %v2307_v2 = vld [vmem:[%s2976_s2 + $0x100] sm:$0xff]   ;;  %2149 = vmatprep.subr.bf16.mxu1 %v2306_v1  ;;  %v2311_v6 = vld [vmem:[%s2976_s2 + $0x108] sm:$0xff]   ;;  %v2315_v10 = vld [vmem:[%s2976_s2 + $0x110] sm:$0xff]   ;;  %vm224_vm7 = vsmask.f32 5396 }
   0x4   :  { %v2308_v3 = vld [vmem:[%s2976_s2 + $0x180] sm:$0xff]   ;;  %2128 = vmatpush3.bf16.msra.mxu0 %v2307_v2  ;;  %v2312_v7 = vld [vmem:[%s2976_s2 + $0x188] sm:$0xff]   ;;  %v2316_v11 = vld [vmem:[%s2976_s2 + $0x190] sm:$0xff]   ;;  %vm226_vm8 = vsmask.f32 6424 }
   0x5   :  { %2150 = vmatpush3.bf16.msra.mxu1 %v2308_v3  ;;  %2129 = vmatprep.subr.bf16.mxu0 %v2309_v4  ;;  %v2317_v12 = vld [vmem:[%s2976_s2 + $0x158] sm:$0xff]   ;;  %v2321_v16 = vld [vmem:[%s2976_s2 + $0x160] sm:$0xff]   ;;  %v2325_v20 = vld [vmem:[%s2976_s2 + $0x168] sm:$0xff]   ;;  %v2433_v39 = vmov 1966171168  }
   0x6   :  { %2151 = vmatprep.subr.bf16.mxu1 %v2310_v5  ;;  %v2318_v13 = vld [vmem:[%s2976_s2 + $0x1d8] sm:$0xff]   ;;  %v2322_v17 = vld [vmem:[%s2976_s2 + $0x1e0] sm:$0xff]   ;;  %v2326_v21 = vld [vmem:[%s2976_s2 + $0x1e8] sm:$0xff]   ;;  %v334_v40 = vunpack.c.l.s4 %v2433_v39  ;;  %vm228_vm13 = vsmask.f32 7452 }
   0x7   :  { %v2319_v14 = vld [vmem:[%s2976_s2 + $0x118] sm:$0xff]   ;;  %v2323_v18 = vld [vmem:[%s2976_s2 + $0x120] sm:$0xff]   ;;  %v2327_v22 = vld [vmem:[%s2976_s2 + $0x128] sm:$0xff]  }
   0x8   :  { %2130 = vmatpush3.bf16.msra.mxu0 %v2311_v6  ;;  %v2320_v15 = vld [vmem:[%s2976_s2 + $0x198] sm:$0xff]   ;;  %v2324_v19 = vld [vmem:[%s2976_s2 + $0x1a0] sm:$0xff]   ;;  %v2328_v23 = vld [vmem:[%s2976_s2 + $0x1a8] sm:$0xff]   ;;  %v335_v45 = vunpack.c.0.s8 %v334_v40 }
   0x9   :  { %2152 = vmatpush3.bf16.msra.mxu1 %v2312_v7  ;;  %2131 = vmatprep.subr.bf16.mxu0 %v2313_v8  ;;  %v2329_v24 = vld [vmem:[%s2976_s2 + $0x170] sm:$0xff]   ;;  %v2333_v28 = vld [vmem:[%s2976_s2 + $0x178] sm:$0xff]   ;;  %v44_v32 = vld [vmem:[%s2974_s0] sm:$0xff] }
   0xa   :  { %2153 = vmatprep.subr.bf16.mxu1 %v2314_v9  ;;  %v2330_v25 = vld [vmem:[%s2976_s2 + $0x1f0] sm:$0xff]   ;;  %v2334_v29 = vld [vmem:[%s2976_s2 + $0x1f8] sm:$0xff]   ;;  %v46_v33 = vld [vmem:[%s2974_s0 + $0x8] sm:$0xff]  ;;  %45 = vst [vmem:[#allocation2] sm:$0xff] %v44_v32  ;;  %v2593_v52 = vsub.s32 %v335_v45, %v2574_v41 }
   0xb   :  { %v2331_v26 = vld [vmem:[%s2976_s2 + $0x130] sm:$0xff]   ;;  %v2335_v30 = vld [vmem:[%s2976_s2 + $0x138] sm:$0xff]   ;;  %47 = vst [vmem:[#allocation2 + $0x8] sm:$0xff] %v46_v33  ;;  %v50_v35 = vld [vmem:[%s2974_s0 + $0x20] sm:$0xff] }
   0xc   :  { %2132 = vmatpush3.bf16.msra.mxu0 %v2315_v10  ;;  %v2332_v27 = vld [vmem:[%s2976_s2 + $0x1b0] sm:$0xff]   ;;  %v2336_v31 = vld [vmem:[%s2976_s2 + $0x1b8] sm:$0xff]   ;;  %v1793_v37 = vld [vmem:[%s2975_s1 + $0x28] sm:$0xff]  ;;  %51 = vst [vmem:[#allocation2 + $0x18] sm:$0xff] %v50_v35 }
   0xd   :  { %2154 = vmatpush3.bf16.msra.mxu1 %v2316_v11  ;;  %2133 = vmatprep.subr.bf16.mxu0 %v2317_v12  ;;  %v48_v34 = vld [vmem:[%s2974_s0 + $0x18] sm:$0xff]  ;;  %v1792_v36 = vld [vmem:[%s2975_s1 + $0x10] sm:$0xff]  ;;  %94 = vst [vmem:[#allocation3 + $0x8] sm:$0xff] %v1793_v37  ;;  %vm217_vm2 = vmor %vm215_vm0, %vm216_vm1 }
   0xe   :  { %2155 = vmatprep.subr.bf16.mxu1 %v2318_v13  ;;  %49 = vst [vmem:[#allocation2 + $0x10] sm:$0xff] %v48_v34  ;;  %92 = vst [vmem:[#allocation3] sm:$0xff] %v1792_v36  ;;  %v2337_v42 = vld [vmem:[%s2976_s2 + $0x40] sm:$0xff]   ;;  %v2341_v33 = vld [vmem:[%s2976_s2 + $0x48] sm:$0xff]  }
   0xf   :  { %vm219_vm6 = vmor %vm217_vm2, %vm218_vm3  ;;  %v2338_v43 = vld [vmem:[%s2976_s2 + $0xc0] sm:$0xff]   ;;  %v2342_v39 = vld [vmem:[%s2976_s2 + $0xc8] sm:$0xff]  }
  0x10   :  { %2134 = vmatpush3.bf16.msra.mxu0 %v2319_v14  ;;  %vm221_vm9 = vmor %vm219_vm6, %vm220_vm4  ;;  %v2339_v32 = vld [vmem:[%s2976_s2] sm:$0xff]   ;;  %v2343_v44 = vld [vmem:[%s2976_s2 + $0x8] sm:$0xff]  }
  0x11   :  { %2156 = vmatpush3.bf16.msra.mxu1 %v2320_v15  ;;  %2135 = vmatprep.subr.bf16.mxu0 %v2321_v16  ;;  %vm223_vm10 = vmor %vm221_vm9, %vm222_vm5  ;;  %v1794_v46 = vld.sshfl [vmem:[#allocation2] sm:$0xff pattern:$0x75316420]  ;;  %v2345_v45 = vld [vmem:[%s2976_s2 + $0x50] sm:$0xff]  }
  0x12   :  { %2157 = vmatprep.subr.bf16.mxu1 %v2322_v17  ;;  %vm225_vm11 = vmor %vm223_vm10, %vm224_vm7  ;;  %v2586_v47 = vld.sshfl [vmem:[#allocation2 + $0x8] sm:$0xff pattern:$0x75316420]  ;;  %v211_v50 = vcombine.high %v1794_v46, %v1794_v46  ;;  %v231_v60 = vshrl.u32 %v1794_v46, 16  ;;  %v2340_v38 = vld [vmem:[%s2976_s2 + $0x80] sm:$0xff]  }
  0x13   :  { %vm2582_vm12 = vmor %vm225_vm11, %vm226_vm8  ;;  %v2588_v49 = vld.sshfl [vmem:[#allocation2 + $0x18] sm:$0xff pattern:$0x75316420]  ;;  %v212_v51 = vcombine.high %v2586_v47, %v2586_v47  ;;  %v641_v58 = vcombine.low %v1794_v46, %v2586_v47  ;;  %v240_v62 = vshrl.u32 %v2586_v47, 16  ;;  %v2344_v46 = vld [vmem:[%s2976_s2 + $0x88] sm:$0xff]  }
  0x14   :  { %2136 = vmatpush3.bf16.msra.mxu0 %v2323_v18  ;;  %v2597_v54 = vld.sshfl [vmem:[#allocation3 + $0x8] sm:$0xff pattern:$0x75316420]  ;;  %v214_v56 = vcombine.high %v2588_v49, %v2588_v49  ;;  %vm2604_vm14 = vmor %vm2582_vm12, %vm228_vm13  ;;  %v236_v61 = vshll.u32 %v211_v50, 16  ;;  %v258_v2 = vshrl.u32 %v2588_v49, 16  ;;  %v2347_v50 = vld [vmem:[%s2976_s2 + $0x10] sm:$0xff]  }
  0x15   :  { %2158 = vmatpush3.bf16.msra.mxu1 %v2324_v19  ;;  %2137 = vmatprep.subr.bf16.mxu0 %v2325_v20  ;;  %v1796_v48 = vld.sshfl [vmem:[#allocation2 + $0x10] sm:$0xff pattern:$0x75316420]  ;;  %v2595_v53 = vld.sshfl [vmem:[#allocation3] sm:$0xff pattern:$0x75316420]  ;;  %v1344_v7 = vcombine.high %v2597_v54, %v2597_v54  ;;  %v2628_v17 = vrot.slane %v641_v58, %v2593_v52 }
  0x16   :  { %2159 = vmatprep.subr.bf16.mxu1 %v2326_v21  ;;  %v213_v55 = vcombine.high %v1796_v48, %v1796_v48  ;;  %v642_v59 = vcombine.low %v1796_v48, %v2588_v49  ;;  %v245_v63 = vshll.u32 %v212_v51, 16  ;;  %v249_v0 = vshrl.u32 %v1796_v48, 16  ;;  %v2346_v48 = vld [vmem:[%s2976_s2 + $0xd0] sm:$0xff]   ;;  %v2349_v51 = vld [vmem:[%s2976_s2 + $0x58] sm:$0xff]   ;;  %v2353_v58 = vld [vmem:[%s2976_s2 + $0x60] sm:$0xff]  }
  0x17   :  { %v263_v3 = vshll.u32 %v214_v56, 16  ;;  %v238_v4 = vsel %vm2604_vm14, %v231_v60, %v236_v61  ;;  %v1343_v6 = vcombine.high %v2595_v53, %v2595_v53  ;;  %v1346_v11 = vshrl.u32 %v2595_v53, 16  ;;  %v2350_v56 = vld [vmem:[%s2976_s2 + $0xd8] sm:$0xff]   ;;  %v2354_v60 = vld [vmem:[%s2976_s2 + $0xe0] sm:$0xff]  }
  0x18   :  { %2138 = vmatpush3.bf16.msra.mxu0 %v2327_v22  ;;  %v254_v1 = vshll.u32 %v213_v55, 16  ;;  %v247_v5 = vsel %vm2604_vm14, %v240_v62, %v245_v63  ;;  %v1355_v14 = vshrl.u32 %v2597_v54, 16  ;;  %v1360_v15 = vshll.u32 %v1344_v7, 16  ;;  %v2348_v55 = vld [vmem:[%s2976_s2 + $0x90] sm:$0xff]   ;;  %v2351_v57 = vld [vmem:[%s2976_s2 + $0x18] sm:$0xff]   ;;  %v2355_v61 = vld [vmem:[%s2976_s2 + $0x20] sm:$0xff]  }
  0x19   :  { %2160 = vmatpush3.bf16.msra.mxu1 %v2328_v23  ;;  %2139 = vmatprep.subr.bf16.mxu0 %v2329_v24  ;;  %v265_v9 = vsel %vm2604_vm14, %v258_v2, %v263_v3  ;;  %v331_v10 = vcombine.low %v238_v4, %v247_v5  ;;  %v1351_v13 = vshll.u32 %v1343_v6, 16  ;;  %v2631_v18 = vrot.slane %v642_v59, %v2593_v52  ;;  %v2352_v59 = vld [vmem:[%s2976_s2 + $0x98] sm:$0xff]   ;;  %v2357_v62 = vld [vmem:[%s2976_s2 + $0x68] sm:$0xff]   ;;  %v2356_v63 = vld [vmem:[%s2976_s2 + $0xa0] sm:$0xff]  }
  0x1a   :  { %2161 = vmatprep.subr.bf16.mxu1 %v2330_v25  ;;  %v256_v8 = vsel %vm2604_vm14, %v249_v0, %v254_v1  ;;  %v1362_v21 = vsel %vm2604_vm14, %v1355_v14, %v1360_v15  ;;  %v1032_v0 = vcombine.low %v2586_v47, %v2595_v53  ;;  %v1033_v1 = vcombine.low %v2588_v49, %v2597_v54  ;;  %v2358_v2 = vld [vmem:[%s2976_s2 + $0xe8] sm:$0xff]   ;;  %v2361_v4 = vld [vmem:[%s2976_s2 + $0x70] sm:$0xff]   ;;  %v2365_v6 = vld [vmem:[%s2976_s2 + $0x78] sm:$0xff]  }
  0x1b   :  { %v332_v12 = vcombine.low %v256_v8, %v265_v9  ;;  %v339_v16 = vrot.slane %v331_v10, %v2593_v52  ;;  %v1353_v20 = vsel %vm2604_vm14, %v1346_v11, %v1351_v13  ;;  %v1429_v23 = vcombine.low %v265_v9, %v1362_v21  ;;  %v2359_v3 = vld [vmem:[%s2976_s2 + $0x28] sm:$0xff]   ;;  %v2362_v54 = vld [vmem:[%s2976_s2 + $0xf0] sm:$0xff]   ;;  %v2366_v10 = vld [vmem:[%s2976_s2 + $0xf8] sm:$0xff]  }
  0x1c   :  { %2140 = vmatpush3.bf16.msra.mxu0 %v2331_v26  ;;  %v1428_v22 = vcombine.low %v247_v5, %v1353_v20  ;;  %v658_v24 = vcombine.high %v2628_v17, %v2631_v18  ;;  %v2360_v47 = vld [vmem:[%s2976_s2 + $0xa8] sm:$0xff]   ;;  %v2725_v49 = vrot.slane %v1032_v0, %v2593_v52  ;;  %v2728_v53 = vrot.slane %v1033_v1, %v2593_v52  ;;  %v2363_v5 = vld [vmem:[%s2976_s2 + $0x30] sm:$0xff]   ;;  %v2367_v11 = vld [vmem:[%s2976_s2 + $0x38] sm:$0xff]  }
  0x1d   :  { %2162 = vmatpush3.bf16.msra.mxu1 %v2332_v27  ;;  %2141 = vmatprep.subr.bf16.mxu0 %v2333_v28  ;;  %v346_v19 = vrot.slane %v332_v12, %v2593_v52  ;;  %v657_v7 = vcombine.low %v2628_v17, %v2631_v18  ;;  %v2364_v8 = vld [vmem:[%s2976_s2 + $0xb0] sm:$0xff]   ;;  %v2369_v13 = vld [vmem:[%s2976_s2 + $0x240] sm:$0xff]   ;;  %v2368_v14 = vld [vmem:[%s2976_s2 + $0xb8] sm:$0xff]  }
  0x1e   :  { %2163 = vmatprep.subr.bf16.mxu1 %v2334_v29  ;;  %v672_v27 = vrot.slane %v658_v24, %v2593_v52  ;;  %v1436_v28 = vrot.slane %v1428_v22, %v2593_v52  ;;  %v1443_v29 = vrot.slane %v1429_v23, %v2593_v52  ;;  %v1049_v9 = vcombine.high %v2725_v49, %v2728_v53  ;;  %v2371_v17 = vld [vmem:[%s2976_s2 + $0x200] sm:$0xff]   ;;  %v2374_v22 = vld [vmem:[%s2976_s2 + $0x2c8] sm:$0xff]   ;;  %v2377_v24 = vld [vmem:[%s2976_s2 + $0x250] sm:$0xff]  }
  0x1f   :  { %v348_v25 = vcombine.high %v339_v16, %v346_v19  ;;  %v347_v26 = vcombine.low %v339_v16, %v346_v19  ;;  %v665_v12 = vrot.slane %v657_v7, %v2593_v52  ;;  %v2370_v16 = vld [vmem:[%s2976_s2 + $0x2c0] sm:$0xff]   ;;  %v2373_v19 = vld [vmem:[%s2976_s2 + $0x248] sm:$0xff]   ;;  %v2416_v7 = vld [vmem:[%s2976_s2 + $0x398] sm:$0xff]  }
  0x20   :  { %2142 = vmatpush3.bf16.msra.mxu0 %v2335_v30  ;;  %v1445_v34 = vcombine.high %v1436_v28, %v1443_v29  ;;  %v1444_v35 = vcombine.low %v1436_v28, %v1443_v29  ;;  %v674_v40 = vcombine.high %v672_v27, %v672_v27  ;;  %v1063_v15 = vrot.slane %v1049_v9, %v2593_v52  ;;  %v2372_v20 = vld [vmem:[%s2976_s2 + $0x280] sm:$0xff]   ;;  %v2375_v23 = vld [vmem:[%s2976_s2 + $0x208] sm:$0xff]   ;;  %v2381_v28 = vld [vmem:[%s2976_s2 + $0x258] sm:$0xff]  }
  0x21   :  { %2164 = vmatpush3.bf16.msra.mxu1 %v2336_v31  ;;  %2171 = vmatprep.subr.bf16.mxu0 %v2337_v42  ;;  %v362_v30 = vrot.slane %v348_v25, %v2593_v52  ;;  %v355_v31 = vrot.slane %v347_v26, %v2593_v52  ;;  %v673_v18 = vcombine.high %v665_v12, %v665_v12  ;;  %v2376_v25 = vld [vmem:[%s2976_s2 + $0x288] sm:$0xff]   ;;  %v2378_v26 = vld [vmem:[%s2976_s2 + $0x2d0] sm:$0xff]   ;;  %v2419_v9 = vld [vmem:[%s2976_s2 + $0x320] sm:$0xff]  }
  0x22   :  { %2193 = vmatprep.subr.bf16.mxu1 %v2338_v43  ;;  %v2658_v42 = vrot.slane %v1445_v34, %v2593_v52  ;;  %v2661_v43 = vrot.slane %v1444_v35, %v2593_v52  ;;  %v1065_v21 = vcombine.high %v1063_v15, %v1063_v15  ;;  %v2380_v29 = vld [vmem:[%s2976_s2 + $0x290] sm:$0xff]   ;;  %v2386_v34 = vld [vmem:[%s2976_s2 + $0x2e0] sm:$0xff]   ;;  %v2406_v1 = vld [vmem:[%s2976_s2 + $0x3c8] sm:$0xff]  }
  0x23   :  { %593 = vmatprep.mubr.bf16.mxu0 %v362_v30  ;;  %v364_v36 = vcombine.high %v362_v30, %v362_v30  ;;  %v363_v37 = vcombine.high %v355_v31, %v355_v31  ;;  %v2382_v30 = vld [vmem:[%s2976_s2 + $0x2d8] sm:$0xff]   ;;  %v2387_v35 = vld [vmem:[%s2976_s2 + $0x220] sm:$0xff]  }
  0x24   :  { %594 = vmatmul.mubr.bf16.vlgmr.msra.gmra.mrb[0].mxu0 %v355_v31  ;;  %v2383_v31 = vld [vmem:[%s2976_s2 + $0x218] sm:$0xff]   ;;  %v1461_v0 = vcombine.high %v2658_v42, %v2658_v42 }
  0x25   :  { %633 = vmatprep.mubr.bf16.mxu1 %v364_v36  ;;  %2172 = vmatpush3.bf16.msra.mxu0 %v2339_v32  ;;  %v2385_v32 = vld [vmem:[%s2976_s2 + $0x260] sm:$0xff]   ;;  %v2389_v36 = vld [vmem:[%s2976_s2 + $0x268] sm:$0xff]  }
  0x26   :  { %634 = vmatmul.mubr.bf16.vlgmr.msra.gmra.mrb[0].mxu1 %v363_v37  ;;  %2173 = vmatprep.subr.bf16.mxu0 %v2341_v33  ;;  %v2384_v33 = vld [vmem:[%s2976_s2 + $0x298] sm:$0xff]   ;;  %v2388_v37 = vld [vmem:[%s2976_s2 + $0x2a0] sm:$0xff]  }
  0x27   :  { %2194 = vmatpush3.bf16.msra.mxu1 %v2340_v38  ;;  %903 = vmatprep.mubr.bf16.mxu0 %v672_v27  ;;  %v2379_v27 = vld [vmem:[%s2976_s2 + $0x210] sm:$0xff]   ;;  %v2390_v38 = vld [vmem:[%s2976_s2 + $0x2e8] sm:$0xff]  }
  0x28   :  { %2195 = vmatprep.subr.bf16.mxu1 %v2342_v39  ;;  %943 = vmatprep.mubr.bf16.mxu1 %v674_v40  ;;  %v2391_v39 = vld [vmem:[%s2976_s2 + $0x228] sm:$0xff]   ;;  %v2393_v40 = vld [vmem:[%s2976_s2 + $0x270] sm:$0xff]  }
  0x29   :  { %2174 = vmatpush3.bf16.msra.mxu0 %v2343_v44  ;;  %v2392_v44 = vld [vmem:[%s2976_s2 + $0x2a8] sm:$0xff]  }
  0x2a   :  { %2175 = vmatprep.subr.bf16.mxu0 %v2345_v45  ;;  %v2394_v45 = vld [vmem:[%s2976_s2 + $0x2f0] sm:$0xff]  }
  0x2b   :  { %2196 = vmatpush3.bf16.msra.mxu1 %v2344_v46  ;;  %v2395_v46 = vld [vmem:[%s2976_s2 + $0x230] sm:$0xff]  }
  0x2c   :  { %2197 = vmatprep.subr.bf16.mxu1 %v2346_v48  ;;  %v2397_v48 = vld [vmem:[%s2976_s2 + $0x278] sm:$0xff]  }
  0x2d   :  { %2176 = vmatpush3.bf16.msra.mxu0 %v2347_v50  ;;  %v1048_v50 = vcombine.low %v2725_v49, %v2728_v53  ;;  %v2413_v49 = vld [vmem:[%s2976_s2 + $0x358] sm:$0xff]   ;;  %v2412_v53 = vld [vmem:[%s2976_s2 + $0x390] sm:$0xff]  }
  0x2e   :  { %2177 = vmatprep.subr.bf16.mxu0 %v2349_v51  ;;  %v2396_v51 = vld [vmem:[%s2976_s2 + $0x2b0] sm:$0xff]  }
  0x2f   :  { %2198 = vmatpush3.bf16.msra.mxu1 %v2348_v55  ;;  %v2398_v55 = vld [vmem:[%s2976_s2 + $0x2f8] sm:$0xff]  }
  0x30   :  { %2199 = vmatprep.subr.bf16.mxu1 %v2350_v56  ;;  %v2399_v56 = vld [vmem:[%s2976_s2 + $0x238] sm:$0xff]  }
  0x31   :  { %2178 = vmatpush3.bf16.msra.mxu0 %v2351_v57  ;;  %v1056_v57 = vrot.slane %v1048_v50, %v2593_v52 }
  0x32   :  { %2179 = vmatprep.subr.bf16.mxu0 %v2353_v58  ;;  %v2401_v58 = vld [vmem:[%s2976_s2 + $0x340] sm:$0xff]  }
  0x33   :  { %2200 = vmatpush3.bf16.msra.mxu1 %v2352_v59  ;;  %v2400_v59 = vld [vmem:[%s2976_s2 + $0x2b8] sm:$0xff]   ;;  %v1064_v52 = vcombine.high %v1056_v57, %v1056_v57 }
  0x34   :  { %2201 = vmatprep.subr.bf16.mxu1 %v2354_v60  ;;  %v2402_v60 = vld [vmem:[%s2976_s2 + $0x3c0] sm:$0xff]  }
  0x35   :  { %2180 = vmatpush3.bf16.msra.mxu0 %v2355_v61  ;;  %v2403_v61 = vld [vmem:[%s2976_s2 + $0x300] sm:$0xff]  }
  0x36   :  { %2181 = vmatprep.subr.bf16.mxu0 %v2357_v62  ;;  %v2405_v62 = vld [vmem:[%s2976_s2 + $0x348] sm:$0xff]  }
  0x37   :  { %2202 = vmatpush3.bf16.msra.mxu1 %v2356_v63  ;;  %v2404_v63 = vld [vmem:[%s2976_s2 + $0x380] sm:$0xff]  }
  0x38   :  { %2203 = vmatprep.subr.bf16.mxu1 %v2358_v2  ;;  %v2407_v2 = vld [vmem:[%s2976_s2 + $0x308] sm:$0xff]  }
  0x39   :  { %2182 = vmatpush3.bf16.msra.mxu0 %v2359_v3  ;;  %v2409_v3 = vld [vmem:[%s2976_s2 + $0x350] sm:$0xff]  }
  0x3a   :  { %2183 = vmatprep.subr.bf16.mxu0 %v2361_v4  ;;  %v2408_v4 = vld [vmem:[%s2976_s2 + $0x388] sm:$0xff]  }
  0x3b   :  { %2204 = vmatpush3.bf16.msra.mxu1 %v2360_v47  ;;  %v2410_v47 = vld [vmem:[%s2976_s2 + $0x3d0] sm:$0xff]  }
  0x3c   :  { %2205 = vmatprep.subr.bf16.mxu1 %v2362_v54  ;;  %v2414_v54 = vld [vmem:[%s2976_s2 + $0x3d8] sm:$0xff]  }
  0x3d   :  { %2184 = vmatpush3.bf16.msra.mxu0 %v2363_v5  ;;  %v2415_v5 = vld [vmem:[%s2976_s2 + $0x318] sm:$0xff]  }
  0x3e   :  { %2185 = vmatprep.subr.bf16.mxu0 %v2365_v6  ;;  %v2417_v6 = vld [vmem:[%s2976_s2 + $0x360] sm:$0xff]  }
  0x3f   :  { %2206 = vmatpush3.bf16.msra.mxu1 %v2364_v8  ;;  %v2418_v8 = vld [vmem:[%s2976_s2 + $0x3e0] sm:$0xff]  }
  0x40   :  { %2207 = vmatprep.subr.bf16.mxu1 %v2366_v10  ;;  %v2421_v10 = vld [vmem:[%s2976_s2 + $0x368] sm:$0xff]  }
  0x41   :  { %2186 = vmatpush3.bf16.msra.mxu0 %v2367_v11  ;;  %v2420_v11 = vld [vmem:[%s2976_s2 + $0x3a0] sm:$0xff]  }
  0x42   :  { %2215 = vmatprep.subr.bf16.mxu0 %v2369_v13  ;;  %v2423_v13 = vld [vmem:[%s2976_s2 + $0x328] sm:$0xff]  }
  0x43   :  { %2208 = vmatpush3.bf16.msra.mxu1 %v2368_v14  ;;  %v2425_v14 = vld [vmem:[%s2976_s2 + $0x370] sm:$0xff]  }
  0x44   :  { %904 = vmatmul.mubr.bf16.vlgmr.msra.gmra.mrb[4].mxu0 %v665_v12  ;;  %2237 = vmatprep.subr.bf16.mxu1 %v2370_v16  ;;  %v2422_v12 = vld [vmem:[%s2976_s2 + $0x3e8] sm:$0xff]   ;;  %v2426_v16 = vld [vmem:[%s2976_s2 + $0x3f0] sm:$0xff]  }
  0x45   :  { %2216 = vmatpush3.bf16.msra.mxu0 %v2371_v17  ;;  %1294 = vmatprep.mubr.bf16.mxu0 %v1063_v15  ;;  %v2424_v15 = vld [vmem:[%s2976_s2 + $0x3a8] sm:$0xff]   ;;  %v2427_v17 = vld [vmem:[%s2976_s2 + $0x330] sm:$0xff]  }
  0x46   :  { %944 = vmatmul.mubr.bf16.vlgmr.msra.gmra.mrb[4].mxu1 %v673_v18  ;;  %2217 = vmatprep.subr.bf16.mxu0 %v2373_v19  ;;  %v2429_v18 = vld [vmem:[%s2976_s2 + $0x378] sm:$0xff]   ;;  %v2428_v19 = vld [vmem:[%s2976_s2 + $0x3b0] sm:$0xff]  }
  0x47   :  { %2238 = vmatpush3.bf16.msra.mxu1 %v2372_v20  ;;  %1334 = vmatprep.mubr.bf16.mxu1 %v1065_v21  ;;  %v2430_v20 = vld [vmem:[%s2976_s2 + $0x3f8] sm:$0xff]  }
  0x48   :  { %2239 = vmatprep.subr.bf16.mxu1 %v2374_v22  ;;  %v2431_v21 = vld [vmem:[%s2976_s2 + $0x338] sm:$0xff]  }
  0x49   :  { %2218 = vmatpush3.bf16.msra.mxu0 %v2375_v23  ;;  %v2432_v22 = vld [vmem:[%s2976_s2 + $0x3b8] sm:$0xff]   ;;  %v1460_v23 = vcombine.high %v2661_v43, %v2661_v43 }
  0x4a   :  { %2219 = vmatprep.subr.bf16.mxu0 %v2377_v24 }
  0x4b   :  { %2240 = vmatpush3.bf16.msra.mxu1 %v2376_v25 }
  0x4c   :  { %2241 = vmatprep.subr.bf16.mxu1 %v2378_v26 }
  0x4d   :  { %2220 = vmatpush3.bf16.msra.mxu0 %v2379_v27 }
  0x4e   :  { %2221 = vmatprep.subr.bf16.mxu0 %v2381_v28 }
  0x4f   :  { %2242 = vmatpush3.bf16.msra.mxu1 %v2380_v29 }
  0x50   :  { %2243 = vmatprep.subr.bf16.mxu1 %v2382_v30 }
  0x51   :  { %2222 = vmatpush3.bf16.msra.mxu0 %v2383_v31 }
  0x52   :  { %2223 = vmatprep.subr.bf16.mxu0 %v2385_v32 }
  0x53   :  { %2244 = vmatpush3.bf16.msra.mxu1 %v2384_v33 }
  0x54   :  { %2245 = vmatprep.subr.bf16.mxu1 %v2386_v34 }
  0x55   :  { %2224 = vmatpush3.bf16.msra.mxu0 %v2387_v35 }
  0x56   :  { %2225 = vmatprep.subr.bf16.mxu0 %v2389_v36 }
  0x57   :  { %2246 = vmatpush3.bf16.msra.mxu1 %v2388_v37 }
  0x58   :  { %2247 = vmatprep.subr.bf16.mxu1 %v2390_v38 }
  0x59   :  { %2226 = vmatpush3.bf16.msra.mxu0 %v2391_v39 }
  0x5a   :  { %2227 = vmatprep.subr.bf16.mxu0 %v2393_v40 }
  0x5b   :  { %2248 = vmatpush3.bf16.msra.mxu1 %v2392_v44 }
  0x5c   :  { %2249 = vmatprep.subr.bf16.mxu1 %v2394_v45 }
  0x5d   :  { %2228 = vmatpush3.bf16.msra.mxu0 %v2395_v46 }
  0x5e   :  { %2229 = vmatprep.subr.bf16.mxu0 %v2397_v48 }
  0x5f   :  { %2250 = vmatpush3.bf16.msra.mxu1 %v2396_v51 }
  0x60   :  { %2251 = vmatprep.subr.bf16.mxu1 %v2398_v55 }
  0x61   :  { %2230 = vmatpush3.bf16.msra.mxu0 %v2399_v56 }
  0x62   :  { %2259 = vmatprep.subr.bf16.mxu0 %v2401_v58 }
  0x63   :  { %2252 = vmatpush3.bf16.msra.mxu1 %v2400_v59 }
  0x64   :  { %1295 = vmatmul.mubr.bf16.vlgmr.msra.gmra.mrb[8].mxu0 %v1056_v57  ;;  %2281 = vmatprep.subr.bf16.mxu1 %v2402_v60 }
  0x65   :  { %2260 = vmatpush3.bf16.msra.mxu0 %v2403_v61  ;;  %1690 = vmatprep.mubr.bf16.mxu0 %v2658_v42  ;;  %v2411_v42 = vld [vmem:[%s2976_s2 + $0x310] sm:$0xff]  }
  0x66   :  { %1335 = vmatmul.mubr.bf16.vlgmr.msra.gmra.mrb[8].mxu1 %v1064_v52  ;;  %2261 = vmatprep.subr.bf16.mxu0 %v2405_v62 }
  0x67   :  { %2282 = vmatpush3.bf16.msra.mxu1 %v2404_v63  ;;  %1730 = vmatprep.mubr.bf16.mxu1 %v1461_v0 }
  0x68   :  { %2283 = vmatprep.subr.bf16.mxu1 %v2406_v1 }
  0x69   :  { %2262 = vmatpush3.bf16.msra.mxu0 %v2407_v2 }
  0x6a   :  { %2263 = vmatprep.subr.bf16.mxu0 %v2409_v3 }
  0x6b   :  { %2284 = vmatpush3.bf16.msra.mxu1 %v2408_v4 }
  0x6c   :  { %2285 = vmatprep.subr.bf16.mxu1 %v2410_v47 }
  0x6d   :  { %2264 = vmatpush3.bf16.msra.mxu0 %v2411_v42 }
  0x6e   :  { %2265 = vmatprep.subr.bf16.mxu0 %v2413_v49 }
  0x6f   :  { %2286 = vmatpush3.bf16.msra.mxu1 %v2412_v53 }
  0x70   :  { %2287 = vmatprep.subr.bf16.mxu1 %v2414_v54  ;;  %v2434_v54 = vmov 1983009808  }
  0x71   :  { %2266 = vmatpush3.bf16.msra.mxu0 %v2415_v5  ;;  %v1752_v5 = vunpack.c.l.s4 %v2434_v54 }
  0x72   :  { %2267 = vmatprep.subr.bf16.mxu0 %v2417_v6 }
  0x73   :  { %2288 = vmatpush3.bf16.msra.mxu1 %v2416_v7 }
  0x74   :  { %2289 = vmatprep.subr.bf16.mxu1 %v2418_v8 }
  0x75   :  { %2268 = vmatpush3.bf16.msra.mxu0 %v2419_v9  ;;  %v2126_v9 = vld [vmem:[%s2977_s3] ss:$0 sm:$0xff] }
  0x76   :  { %2269 = vmatprep.subr.bf16.mxu0 %v2421_v10 }
  0x77   :  { %2290 = vmatpush3.bf16.msra.mxu1 %v2420_v11  ;;  %v1753_v11 = vunpack.c.0.s8 %v1752_v5 }
  0x78   :  { %2291 = vmatprep.subr.bf16.mxu1 %v2422_v12 }
  0x79   :  { %2270 = vmatpush3.bf16.msra.mxu0 %v2423_v13 }
  0x7a   :  { %2271 = vmatprep.subr.bf16.mxu0 %v2425_v14  ;;  %v1756_v14 = vsub.s32 %v1753_v11, %v2574_v41 }
  0x7b   :  { %2292 = vmatpush3.bf16.msra.mxu1 %v2424_v15 }
  0x7c   :  { %2293 = vmatprep.subr.bf16.mxu1 %v2426_v16 }
  0x7d   :  { %2272 = vmatpush3.bf16.msra.mxu0 %v2427_v17 }
  0x7e   :  { %2273 = vmatprep.subr.bf16.mxu0 %v2429_v18 }
  0x7f   :  { %2294 = vmatpush3.bf16.msra.mxu1 %v2428_v19 }
  0x80   :  { %2295 = vmatprep.subr.bf16.mxu1 %v2430_v20 }
  0x81   :  { %2274 = vmatpush3.bf16.msra.mxu0 %v2431_v21 }
  0x83   :  { %2296 = vmatpush3.bf16.msra.mxu1 %v2432_v22 }
  0x84   :  { %1691 = vmatmul.mubr.bf16.vlgmr.msra.gmra.mrb[12].mxu0 %v2661_v43 }
  0x86   :  { %1731 = vmatmul.mubr.bf16.vlgmr.msra.gmra.mrb[12].mxu1 %v1460_v23 }
  0xf7   :  { %v2143_v24 = vpop.f32.mrb[0].mxu0 }
  0xf8   :  { %v2144_v25 = vpop.f32.mrb[1].mxu0 }
  0xf9   :  { %v2165_v26 = vpop.f32.mrb[0].mxu1  ;;  %v2145_v27 = vadd.f32 %v2144_v25, %v2143_v24  ;;  %v2146_v28 = vpop.f32.mrb[2].mxu0 }
  0xfa   :  { %v2166_v29 = vpop.f32.mrb[1].mxu1  ;;  %v2147_v30 = vpop.f32.mrb[3].mxu0 }
  0xfb   :  { %v2167_v31 = vadd.f32 %v2166_v29, %v2165_v26  ;;  %v2168_v32 = vpop.f32.mrb[2].mxu1 }
  0xfc   :  { %v2169_v33 = vpop.f32.mrb[3].mxu1 }
  0xfd   :  { %v636_v34 = vadd.f32 %v2167_v31, %v2145_v27 }
 0x117   :  { %v2187_v35 = vpop.f32.mrb[4].mxu0 }
 0x118   :  { %v2188_v36 = vpop.f32.mrb[5].mxu0 }
 0x119   :  { %v2209_v37 = vpop.f32.mrb[4].mxu1  ;;  %v2189_v38 = vadd.f32 %v2188_v36, %v2187_v35  ;;  %v2190_v39 = vpop.f32.mrb[6].mxu0 }
 0x11a   :  { %v2210_v40 = vpop.f32.mrb[5].mxu1  ;;  %v2191_v44 = vpop.f32.mrb[7].mxu0 }
 0x11b   :  { %v906_v43 = vadd.f32 %v2189_v38, %v636_v34  ;;  %v2211_v45 = vadd.f32 %v2210_v40, %v2209_v37  ;;  %v2212_v46 = vpop.f32.mrb[6].mxu1 }
 0x11c   :  { %v2213_v48 = vpop.f32.mrb[7].mxu1 }
 0x11d   :  { %v946_v50 = vadd.f32 %v2211_v45, %v906_v43 }
 0x137   :  { %v2231_v51 = vpop.f32.mrb[8].mxu0 }
 0x138   :  { %v2232_v55 = vpop.f32.mrb[9].mxu0 }
 0x139   :  { %v2253_v56 = vpop.f32.mrb[8].mxu1  ;;  %v2233_v57 = vadd.f32 %v2232_v55, %v2231_v51  ;;  %v2234_v58 = vpop.f32.mrb[10].mxu0 }
 0x13a   :  { %v2254_v59 = vpop.f32.mrb[9].mxu1  ;;  %v2235_v60 = vpop.f32.mrb[11].mxu0 }
 0x13b   :  { %v2255_v61 = vadd.f32 %v2254_v59, %v2253_v56  ;;  %v2256_v52 = vpop.f32.mrb[10].mxu1 }
 0x13c   :  { %v2257_v62 = vpop.f32.mrb[11].mxu1 }
 0x13d   :  { %v1337_v63 = vadd.f32 %v2255_v61, %v2233_v57 }
 0x13f   :  { %v1342_v0 = vadd.f32 %v1337_v63, %v946_v50 }
 0x157   :  { %v2275_v1 = vpop.f32.mrb[12].mxu0 }
 0x158   :  { %v2276_v2 = vpop.f32.mrb[13].mxu0 }
 0x159   :  { %v2297_v3 = vpop.f32.mrb[12].mxu1  ;;  %v2277_v4 = vadd.f32 %v2276_v2, %v2275_v1  ;;  %v2278_v47 = vpop.f32.mrb[14].mxu0 }
 0x15a   :  { %v2298_v42 = vpop.f32.mrb[13].mxu1  ;;  %v2279_v49 = vpop.f32.mrb[15].mxu0 }
 0x15b   :  { %v2299_v53 = vadd.f32 %v2298_v42, %v2297_v3  ;;  %v2300_v6 = vpop.f32.mrb[14].mxu1 }
 0x15c   :  { %v2301_v7 = vpop.f32.mrb[15].mxu1 }
 0x15d   :  { %v1733_v8 = vadd.f32 %v2299_v53, %v2277_v4 }
 0x15f   :  { %v1738_v10 = vadd.f32 %v1733_v8, %v1342_v0 }
 0x161   :  { %v1746_v12 = vadd.f32 %v2126_v9, %v1738_v10 }
 0x163   :  { %v1747_v13 = vmul.f32 0.2, %v1746_v12 }
 0x165   :  { %v1748_v15 = vmax.f32 %v1746_v12, %v1747_v13 }
 0x167   :  { %v1750_v16 = vcombine.high %v1748_v15, %v1748_v15  ;;  %v1757_v17 = vrot.slane %v1748_v15, %v1756_v14 }
 0x169   :  { %v1764_v18 = vrot.slane %v1750_v16, %v1756_v14  ;;  %v1765_v19 = vcombine.high %v1757_v17, %v1757_v17  ;;  %v1771_v20 = vpack.c.bf16 %v1757_v17, %v1757_v17 }
 0x16b   :  { %v1766_v21 = vcombine.high %v1764_v18, %v1764_v18  ;;  %v1772_v22 = vpack.c.bf16 %v1765_v19, %v1765_v19  ;;  %v1773_v23 = vpack.c.bf16 %v1764_v18, %v1764_v18  ;;  %1775 = vst [vmem:[%s2978_s4] sm:$0x1] %v1771_v20 }
 0x16d   :  { %v1774_v24 = vpack.c.bf16 %v1766_v21, %v1766_v21  ;;  %1776 = vst [vmem:[%s2978_s4 + $0x1] sm:$0x1] %v1772_v22  ;;  %1777 = vst [vmem:[%s2978_s4 + $0x2] sm:$0x1] %v1773_v23 }
 0x16f   :  { %1778 = vst [vmem:[%s2978_s4 + $0x3] sm:$0x1] %v1774_v24 }

// kernel: fc_discriminator_forward.9
= control target key start
LH: loop header
LB: loop body
LE: loop exit
PB: predicated region body
PF: predicated region fallthrough
CT: control target
= control target key end

     0   :  { %v258_v30 = vlaneseq  ;;  %v2328_v35 = vmov 1966171168   ;;  %vm304_vm0 = vcmask 1041409   ;;  %s2838_s0 = inlined_call_operand.vmem [shape: bf16[2,2,2,512], index: 0, kind: input, shape index: {}, may-alias: {0,1}]   ;;  %s2839_s1 = inlined_call_operand.vmem [shape: bf16[2,2,2,512], index: 1, kind: input, shape index: {}, may-alias: {0,1}]   ;;  %s2840_s2 = inlined_call_operand.vmem [shape: bf16[2,2,512,128], index: 2, kind: input, shape index: {}]   ;;  %s2841_s3 = inlined_call_operand.vmem [shape: f32[1,128], index: 3, kind: input, shape index: {}]   ;;  %s2842_s4 = inlined_call_operand.vmem [shape: f32[2,1,1,128], index: 4, kind: output, shape index: {}]  }
   0x1   :  { %v2200_v0 = vld [vmem:[%s2840_s2 + $0x140] sm:$0xff]   ;;  %v2204_v4 = vld [vmem:[%s2840_s2 + $0x148] sm:$0xff]   ;;  %v2208_v8 = vld [vmem:[%s2840_s2 + $0x150] sm:$0xff]   ;;  %v256_v36 = vunpack.c.l.s4 %v2328_v35 }
   0x2   :  { %v2201_v1 = vld [vmem:[%s2840_s2 + $0x1c0] sm:$0xff]   ;;  %2023 = vmatprep.subr.bf16.mxu0 %v2200_v0  ;;  %v2205_v5 = vld [vmem:[%s2840_s2 + $0x1c8] sm:$0xff]   ;;  %v2209_v9 = vld [vmem:[%s2840_s2 + $0x1d0] sm:$0xff]   ;;  %v259_v37 = vshrl.u32 %v258_v30, 7 }
   0x3   :  { %v2202_v2 = vld [vmem:[%s2840_s2 + $0x100] sm:$0xff]   ;;  %2045 = vmatprep.subr.bf16.mxu1 %v2201_v1  ;;  %v2206_v6 = vld [vmem:[%s2840_s2 + $0x108] sm:$0xff]   ;;  %v2210_v10 = vld [vmem:[%s2840_s2 + $0x110] sm:$0xff]   ;;  %v257_v40 = vunpack.c.0.s8 %v256_v36 }
   0x4   :  { %v2203_v3 = vld [vmem:[%s2840_s2 + $0x180] sm:$0xff]   ;;  %2024 = vmatpush3.bf16.msra.mxu0 %v2202_v2  ;;  %v2207_v7 = vld [vmem:[%s2840_s2 + $0x188] sm:$0xff]   ;;  %v2211_v11 = vld [vmem:[%s2840_s2 + $0x190] sm:$0xff]  }
   0x5   :  { %2046 = vmatpush3.bf16.msra.mxu1 %v2203_v3  ;;  %2025 = vmatprep.subr.bf16.mxu0 %v2204_v4  ;;  %v2212_v12 = vld [vmem:[%s2840_s2 + $0x158] sm:$0xff]   ;;  %v2216_v16 = vld [vmem:[%s2840_s2 + $0x160] sm:$0xff]   ;;  %v2220_v20 = vld [vmem:[%s2840_s2 + $0x168] sm:$0xff]   ;;  %v2462_v41 = vsub.s32 %v257_v40, %v259_v37 }
   0x6   :  { %2047 = vmatprep.subr.bf16.mxu1 %v2205_v5  ;;  %v2213_v13 = vld [vmem:[%s2840_s2 + $0x1d8] sm:$0xff]   ;;  %v2217_v17 = vld [vmem:[%s2840_s2 + $0x1e0] sm:$0xff]   ;;  %v2221_v21 = vld [vmem:[%s2840_s2 + $0x1e8] sm:$0xff]  }
   0x7   :  { %v2214_v14 = vld [vmem:[%s2840_s2 + $0x118] sm:$0xff]   ;;  %v2218_v18 = vld [vmem:[%s2840_s2 + $0x120] sm:$0xff]   ;;  %v2222_v22 = vld [vmem:[%s2840_s2 + $0x128] sm:$0xff]  }
   0x8   :  { %2026 = vmatpush3.bf16.msra.mxu0 %v2206_v6  ;;  %v2215_v15 = vld [vmem:[%s2840_s2 + $0x198] sm:$0xff]   ;;  %v2219_v19 = vld [vmem:[%s2840_s2 + $0x1a0] sm:$0xff]   ;;  %v2223_v23 = vld [vmem:[%s2840_s2 + $0x1a8] sm:$0xff]  }
   0x9   :  { %2048 = vmatpush3.bf16.msra.mxu1 %v2207_v7  ;;  %2027 = vmatprep.subr.bf16.mxu0 %v2208_v8  ;;  %v2224_v24 = vld [vmem:[%s2840_s2 + $0x170] sm:$0xff]   ;;  %v2228_v28 = vld [vmem:[%s2840_s2 + $0x178] sm:$0xff]   ;;  %v26_v33 = vld [vmem:[%s2838_s0] sm:$0xf] }
   0xa   :  { %2049 = vmatprep.subr.bf16.mxu1 %v2209_v9  ;;  %v2225_v25 = vld [vmem:[%s2840_s2 + $0x1f0] sm:$0xff]   ;;  %v2229_v29 = vld [vmem:[%s2840_s2 + $0x1f8] sm:$0xff]   ;;  %v28_v34 = vld [vmem:[%s2838_s0 + $0x8] sm:$0xf]  ;;  %27 = vst [vmem:[#allocation2] sm:$0xf] %v26_v33 }
   0xb   :  { %v2226_v26 = vld [vmem:[%s2840_s2 + $0x130] sm:$0xff]   ;;  %v2230_v31 = vld [vmem:[%s2840_s2 + $0x138] sm:$0xff]   ;;  %29 = vst [vmem:[#allocation2 + $0x4] sm:$0xf] %v28_v34  ;;  %v2232_v38 = vld [vmem:[%s2840_s2 + $0x40] sm:$0xff]  }
   0xc   :  { %2028 = vmatpush3.bf16.msra.mxu0 %v2210_v10  ;;  %v2227_v27 = vld [vmem:[%s2840_s2 + $0x1b0] sm:$0xff]   ;;  %v2231_v32 = vld [vmem:[%s2840_s2 + $0x1b8] sm:$0xff]   ;;  %v2233_v39 = vld [vmem:[%s2840_s2 + $0xc0] sm:$0xff]  }
   0xd   :  { %2050 = vmatpush3.bf16.msra.mxu1 %v2211_v11  ;;  %2029 = vmatprep.subr.bf16.mxu0 %v2212_v12  ;;  %v2234_v7 = vld [vmem:[%s2840_s2] sm:$0xff]   ;;  %v2252_v34 = vld [vmem:[%s2840_s2 + $0x68] sm:$0xff]   ;;  %v2258_v40 = vld [vmem:[%s2840_s2 + $0x30] sm:$0xff]  }
   0xe   :  { %2051 = vmatprep.subr.bf16.mxu1 %v2213_v13  ;;  %v2235_v10 = vld [vmem:[%s2840_s2 + $0x80] sm:$0xff]   ;;  %v2253_v35 = vld [vmem:[%s2840_s2 + $0xe8] sm:$0xff]  }
   0xf   :  { %v2248_v30 = vld [vmem:[%s2840_s2 + $0x60] sm:$0xff]   ;;  %v2254_v36 = vld [vmem:[%s2840_s2 + $0x28] sm:$0xff]  }
  0x10   :  { %2030 = vmatpush3.bf16.msra.mxu0 %v2214_v14  ;;  %v2236_v14 = vld [vmem:[%s2840_s2 + $0x48] sm:$0xff]   ;;  %v2251_v33 = vld [vmem:[%s2840_s2 + $0xa0] sm:$0xff]  }
  0x11   :  { %2052 = vmatpush3.bf16.msra.mxu1 %v2215_v15  ;;  %2031 = vmatprep.subr.bf16.mxu0 %v2216_v16  ;;  %v1760_v42 = vld.sshfl [vmem:[#allocation2] sm:$0x33 pattern:$0x75316420]  ;;  %v2237_v16 = vld [vmem:[%s2840_s2 + $0xc8] sm:$0xff]  }
  0x12   :  { %2053 = vmatprep.subr.bf16.mxu1 %v2217_v17  ;;  %v1761_v43 = vld.sshfl [vmem:[#allocation2 + $0x4] sm:$0x33 pattern:$0x75316420]  ;;  %v254_v44 = vcombine.high %v1760_v42, %v1760_v42  ;;  %v2465_v45 = vrot.slane %v1760_v42, %v2462_v41  ;;  %v2255_v37 = vld [vmem:[%s2840_s2 + $0xa8] sm:$0xff]  }
  0x13   :  { %v278_v46 = vcombine.high %v1761_v43, %v1761_v43  ;;  %v2468_v47 = vrot.slane %v1761_v43, %v2462_v41  ;;  %v2259_v43 = vld [vmem:[%s2840_s2 + $0xb0] sm:$0xff]  }
  0x14   :  { %2032 = vmatpush3.bf16.msra.mxu0 %v2218_v18  ;;  %v268_v48 = vrot.slane %v254_v44, %v2462_v41  ;;  %v295_v49 = vunpack.c.l.b16 %v2465_v45  ;;  %v269_v50 = vcombine.high %v2465_v45, %v2465_v45  ;;  %v2260_v44 = vld [vmem:[%s2840_s2 + $0x78] sm:$0xff]   ;;  %v2266_v45 = vld [vmem:[%s2840_s2 + $0x200] sm:$0xff]  }
  0x15   :  { %2054 = vmatpush3.bf16.msra.mxu1 %v2219_v19  ;;  %2033 = vmatprep.subr.bf16.mxu0 %v2220_v20  ;;  %v292_v51 = vrot.slane %v278_v46, %v2462_v41  ;;  %v299_v52 = vunpack.c.l.b16 %v2468_v47  ;;  %v293_v53 = vcombine.high %v2468_v47, %v2468_v47  ;;  %v2238_v19 = vld [vmem:[%s2840_s2 + $0x8] sm:$0xff]   ;;  %v2262_v47 = vld [vmem:[%s2840_s2 + $0x38] sm:$0xff]  }
  0x16   :  { %2055 = vmatprep.subr.bf16.mxu1 %v2221_v21  ;;  %v296_v54 = vunpack.c.l.b16 %v268_v48  ;;  %v270_v55 = vcombine.high %v268_v48, %v268_v48  ;;  %v303_v56 = vrot.slane %v295_v49, 1  ;;  %v2480_v57 = vunpack.c.l.b16 %v269_v50  ;;  %v2239_v21 = vld [vmem:[%s2840_s2 + $0x88] sm:$0xff]   ;;  %v2261_v48 = vld [vmem:[%s2840_s2 + $0xf8] sm:$0xff]  }
  0x17   :  { %v300_v58 = vunpack.c.l.b16 %v292_v51  ;;  %v294_v59 = vcombine.high %v292_v51, %v292_v51  ;;  %v2482_v60 = vunpack.c.l.b16 %v293_v53  ;;  %v592_v42 = vrot.slane %v299_v52, 7  ;;  %v2263_v50 = vld [vmem:[%s2840_s2 + $0xb8] sm:$0xff]  }
  0x18   :  { %2034 = vmatpush3.bf16.msra.mxu0 %v2222_v22  ;;  %v306_v61 = vrot.slane %v296_v54, 1  ;;  %v298_v62 = vunpack.c.l.b16 %v270_v55  ;;  %v305_v63 = vsel %vm304_vm0, %v299_v52, %v303_v56  ;;  %v308_v0 = vrot.slane %v2480_v57, 1  ;;  %v2240_v22 = vld [vmem:[%s2840_s2 + $0x50] sm:$0xff]   ;;  %v2264_v52 = vld [vmem:[%s2840_s2 + $0x240] sm:$0xff]  }
  0x19   :  { %2056 = vmatpush3.bf16.msra.mxu1 %v2223_v23  ;;  %2035 = vmatprep.subr.bf16.mxu0 %v2224_v24  ;;  %v594_v1 = vrot.slane %v300_v58, 7  ;;  %v302_v2 = vunpack.c.l.b16 %v294_v59  ;;  %v312_v5 = vpack.c.b16 %v305_v63, %v305_v63  ;;  %v2241_v23 = vld [vmem:[%s2840_s2 + $0xd0] sm:$0xff]   ;;  %v596_v46 = vrot.slane %v2482_v60, 7  ;;  %v2270_v59 = vld [vmem:[%s2840_s2 + $0x208] sm:$0xff]  }
  0x1a   :  { %2057 = vmatprep.subr.bf16.mxu1 %v2225_v25  ;;  %v307_v3 = vsel %vm304_vm0, %v300_v58, %v306_v61  ;;  %v310_v4 = vrot.slane %v298_v62, 1  ;;  %v309_v6 = vsel %vm304_vm0, %v2482_v60, %v308_v0  ;;  %v2242_v24 = vld [vmem:[%s2840_s2 + $0x10] sm:$0xff]   ;;  %v593_v51 = vsel %vm304_vm0, %v592_v42, %v295_v49  ;;  %v2267_v49 = vld [vmem:[%s2840_s2 + $0x280] sm:$0xff]   ;;  %v2269_v58 = vld [vmem:[%s2840_s2 + $0x2c8] sm:$0xff]  }
  0x1b   :  { %v313_v8 = vpack.c.b16 %v307_v3, %v307_v3  ;;  %v598_v9 = vrot.slane %v302_v2, 7  ;;  %v595_v11 = vsel %vm304_vm0, %v594_v1, %v296_v54  ;;  %v314_v13 = vpack.c.b16 %v309_v6, %v309_v6  ;;  %v2243_v25 = vld [vmem:[%s2840_s2 + $0x90] sm:$0xff]   ;;  %v2265_v54 = vld [vmem:[%s2840_s2 + $0x2c0] sm:$0xff]   ;;  %v2271_v60 = vld [vmem:[%s2840_s2 + $0x288] sm:$0xff]  }
  0x1c   :  { %2036 = vmatpush3.bf16.msra.mxu0 %v2226_v26  ;;  %v311_v12 = vsel %vm304_vm0, %v302_v2, %v310_v4  ;;  %v601_v17 = vpack.c.b16 %v595_v11, %v595_v11  ;;  %v2244_v26 = vld [vmem:[%s2840_s2 + $0x58] sm:$0xff]   ;;  %v597_v53 = vsel %vm304_vm0, %v596_v46, %v2480_v57  ;;  %v600_v55 = vpack.c.b16 %v593_v51, %v593_v51  ;;  %v2268_v57 = vld [vmem:[%s2840_s2 + $0x248] sm:$0xff]   ;;  %v2272_v61 = vld [vmem:[%s2840_s2 + $0x250] sm:$0xff]  }
  0x1d   :  { %2058 = vmatpush3.bf16.msra.mxu1 %v2227_v27  ;;  %2037 = vmatprep.subr.bf16.mxu0 %v2228_v28  ;;  %v315_v15 = vpack.c.b16 %v311_v12, %v311_v12  ;;  %v599_v18 = vsel %vm304_vm0, %v598_v9, %v298_v62  ;;  %v2245_v27 = vld [vmem:[%s2840_s2 + $0xd8] sm:$0xff]   ;;  %v602_v56 = vpack.c.b16 %v597_v53, %v597_v53  ;;  %v2273_v62 = vld [vmem:[%s2840_s2 + $0x2d0] sm:$0xff]   ;;  %v2281_v6 = vld [vmem:[%s2840_s2 + $0x2e0] sm:$0xff]  }
  0x1e   :  { %2059 = vmatprep.subr.bf16.mxu1 %v2229_v29  ;;  %544 = vmatprep.mubr.bf16.mxu0 %v313_v8  ;;  %v603_v20 = vpack.c.b16 %v599_v18, %v599_v18  ;;  %v2246_v28 = vld [vmem:[%s2840_s2 + $0x18] sm:$0xff]   ;;  %v2274_v63 = vld [vmem:[%s2840_s2 + $0x210] sm:$0xff]   ;;  %v2283_v8 = vld [vmem:[%s2840_s2 + $0x2a0] sm:$0xff]  }
  0x1f   :  { %584 = vmatprep.mubr.bf16.mxu1 %v315_v15  ;;  %v2247_v29 = vld [vmem:[%s2840_s2 + $0x98] sm:$0xff]   ;;  %v2275_v0 = vld [vmem:[%s2840_s2 + $0x290] sm:$0xff]   ;;  %v2284_v9 = vld [vmem:[%s2840_s2 + $0x268] sm:$0xff]  }
  0x20   :  { %2038 = vmatpush3.bf16.msra.mxu0 %v2230_v31  ;;  %v2249_v31 = vld [vmem:[%s2840_s2 + $0xe0] sm:$0xff]   ;;  %v2276_v1 = vld [vmem:[%s2840_s2 + $0x258] sm:$0xff]   ;;  %v1695_v11 = vld [vmem:[%s2839_s1 + $0xc] sm:$0xf] }
  0x21   :  { %2060 = vmatpush3.bf16.msra.mxu1 %v2231_v32  ;;  %2067 = vmatprep.subr.bf16.mxu0 %v2232_v38  ;;  %v2250_v32 = vld [vmem:[%s2840_s2 + $0x20] sm:$0xff]   ;;  %v2256_v38 = vld [vmem:[%s2840_s2 + $0x70] sm:$0xff]   ;;  %v2277_v2 = vld [vmem:[%s2840_s2 + $0x2d8] sm:$0xff]   ;;  %77 = vst [vmem:[#allocation3 + $0x4] sm:$0xf] %v1695_v11 }
  0x22   :  { %2089 = vmatprep.subr.bf16.mxu1 %v2233_v39  ;;  %v2257_v39 = vld [vmem:[%s2840_s2 + $0xf0] sm:$0xff]   ;;  %v2278_v3 = vld [vmem:[%s2840_s2 + $0x218] sm:$0xff]   ;;  %v2285_v12 = vld [vmem:[%s2840_s2 + $0x2e8] sm:$0xff]  }
  0x23   :  { %545 = vmatmul.mubr.bf16.vlgmr.msra.gmra.mrb[0].mxu0 %v312_v5  ;;  %v2279_v4 = vld [vmem:[%s2840_s2 + $0x298] sm:$0xff]   ;;  %v2280_v5 = vld [vmem:[%s2840_s2 + $0x260] sm:$0xff]   ;;  %v2288_v15 = vld [vmem:[%s2840_s2 + $0x270] sm:$0xff]  }
  0x24   :  { %2068 = vmatpush3.bf16.msra.mxu0 %v2234_v7  ;;  %585 = vmatmul.mubr.bf16.vlgmr.msra.gmra.mrb[0].mxu1 %v314_v13  ;;  %v2282_v7 = vld [vmem:[%s2840_s2 + $0x220] sm:$0xff]   ;;  %v2286_v13 = vld [vmem:[%s2840_s2 + $0x228] sm:$0xff]   ;;  %v2291_v18 = vld [vmem:[%s2840_s2 + $0x2b0] sm:$0xff]  }
  0x25   :  { %2069 = vmatprep.subr.bf16.mxu0 %v2236_v14  ;;  %2090 = vmatpush3.bf16.msra.mxu1 %v2235_v10  ;;  %v1694_v10 = vld [vmem:[%s2839_s1 + $0x4] sm:$0xf]  ;;  %v2287_v14 = vld [vmem:[%s2840_s2 + $0x2a8] sm:$0xff]   ;;  %v2309_v11 = vld [vmem:[%s2840_s2 + $0x3d8] sm:$0xff]  }
  0x26   :  { %832 = vmatprep.mubr.bf16.mxu0 %v601_v17  ;;  %2091 = vmatprep.subr.bf16.mxu1 %v2237_v16  ;;  %75 = vst [vmem:[#allocation3] sm:$0xf] %v1694_v10  ;;  %v2289_v16 = vld [vmem:[%s2840_s2 + $0x2f0] sm:$0xff]   ;;  %v2297_v46 = vld [vmem:[%s2840_s2 + $0x3c0] sm:$0xff]  }
  0x27   :  { %872 = vmatprep.mubr.bf16.mxu1 %v603_v20  ;;  %v2290_v17 = vld [vmem:[%s2840_s2 + $0x230] sm:$0xff]  }
  0x28   :  { %2070 = vmatpush3.bf16.msra.mxu0 %v2238_v19  ;;  %v2292_v19 = vld [vmem:[%s2840_s2 + $0x278] sm:$0xff]   ;;  %v2307_v10 = vld [vmem:[%s2840_s2 + $0x390] sm:$0xff]  }
  0x29   :  { %2071 = vmatprep.subr.bf16.mxu0 %v2240_v22  ;;  %2092 = vmatpush3.bf16.msra.mxu1 %v2239_v21  ;;  %v1891_v21 = vld.sshfl [vmem:[#allocation3 + $0x4] sm:$0x33 pattern:$0x75316420] }
  0x2a   :  { %2093 = vmatprep.subr.bf16.mxu1 %v2241_v23 }
  0x2c   :  { %2072 = vmatpush3.bf16.msra.mxu0 %v2242_v24  ;;  %v978_v24 = vcombine.high %v1891_v21, %v1891_v21 }
  0x2d   :  { %2073 = vmatprep.subr.bf16.mxu0 %v2244_v26  ;;  %2094 = vmatpush3.bf16.msra.mxu1 %v2243_v25  ;;  %v1890_v20 = vld.sshfl [vmem:[#allocation3] sm:$0x33 pattern:$0x75316420]  ;;  %v2689_v25 = vrot.slane %v1891_v21, %v2462_v41  ;;  %v2293_v26 = vld [vmem:[%s2840_s2 + $0x2f8] sm:$0xff]   ;;  %v2320_v21 = vld [vmem:[%s2840_s2 + $0x370] sm:$0xff]  }
  0x2e   :  { %2095 = vmatprep.subr.bf16.mxu1 %v2245_v27  ;;  %v954_v22 = vcombine.high %v1890_v20, %v1890_v20  ;;  %v2686_v23 = vrot.slane %v1890_v20, %v2462_v41  ;;  %v2318_v20 = vld [vmem:[%s2840_s2 + $0x328] sm:$0xff]  }
  0x30   :  { %2074 = vmatpush3.bf16.msra.mxu0 %v2246_v28  ;;  %v968_v27 = vrot.slane %v954_v22, %v2462_v41  ;;  %v969_v28 = vcombine.high %v2686_v23, %v2686_v23  ;;  %v2319_v22 = vld [vmem:[%s2840_s2 + $0x3a8] sm:$0xff]  }
  0x31   :  { %2075 = vmatprep.subr.bf16.mxu0 %v2248_v30  ;;  %2096 = vmatpush3.bf16.msra.mxu1 %v2247_v29  ;;  %v2294_v29 = vld [vmem:[%s2840_s2 + $0x238] sm:$0xff]   ;;  %v992_v30 = vrot.slane %v978_v24, %v2462_v41  ;;  %v2321_v24 = vld [vmem:[%s2840_s2 + $0x3f0] sm:$0xff]  }
  0x32   :  { %2097 = vmatprep.subr.bf16.mxu1 %v2249_v31  ;;  %v995_v31 = vunpack.c.l.b16 %v2686_v23  ;;  %v2326_v23 = vld [vmem:[%s2840_s2 + $0x338] sm:$0xff]  }
  0x34   :  { %2076 = vmatpush3.bf16.msra.mxu0 %v2250_v32  ;;  %v999_v32 = vunpack.c.l.b16 %v2689_v25 }
  0x35   :  { %2077 = vmatprep.subr.bf16.mxu0 %v2252_v34  ;;  %2098 = vmatpush3.bf16.msra.mxu1 %v2251_v33  ;;  %v993_v33 = vcombine.high %v2689_v25, %v2689_v25  ;;  %v996_v34 = vunpack.c.l.b16 %v968_v27 }
  0x36   :  { %2099 = vmatprep.subr.bf16.mxu1 %v2253_v35  ;;  %v970_v35 = vcombine.high %v968_v27, %v968_v27  ;;  %v1003_v42 = vrot.slane %v999_v32, 7  ;;  %v1357_v27 = vrot.slane %v995_v31, 1 }
  0x38   :  { %2078 = vmatpush3.bf16.msra.mxu0 %v2254_v36  ;;  %v2705_v36 = vunpack.c.l.b16 %v969_v28  ;;  %v1004_v51 = vsel %vm304_vm0, %v1003_v42, %v995_v31  ;;  %v2324_v28 = vld [vmem:[%s2840_s2 + $0x378] sm:$0xff]   ;;  %v1358_v31 = vsel %vm304_vm0, %v999_v32, %v1357_v27 }
  0x39   :  { %2079 = vmatprep.subr.bf16.mxu0 %v2256_v38  ;;  %2100 = vmatpush3.bf16.msra.mxu1 %v2255_v37  ;;  %v2296_v37 = vld [vmem:[%s2840_s2 + $0x340] sm:$0xff]   ;;  %v2295_v38 = vld [vmem:[%s2840_s2 + $0x2b8] sm:$0xff]   ;;  %v1011_v53 = vpack.c.b16 %v1004_v51, %v1004_v51 }
  0x3a   :  { %2101 = vmatprep.subr.bf16.mxu1 %v2257_v39  ;;  %v1000_v39 = vunpack.c.l.b16 %v992_v30 }
  0x3c   :  { %2080 = vmatpush3.bf16.msra.mxu0 %v2258_v40  ;;  %v994_v40 = vcombine.high %v992_v30, %v992_v30  ;;  %v1361_v30 = vrot.slane %v2705_v36, 1 }
  0x3d   :  { %2081 = vmatprep.subr.bf16.mxu0 %v2260_v44  ;;  %2102 = vmatpush3.bf16.msra.mxu1 %v2259_v43  ;;  %v2715_v43 = vunpack.c.l.b16 %v993_v33  ;;  %v998_v44 = vunpack.c.l.b16 %v970_v35  ;;  %v2325_v33 = vld [vmem:[%s2840_s2 + $0x3f8] sm:$0xff]  }
  0x3e   :  { %2103 = vmatprep.subr.bf16.mxu1 %v2261_v48  ;;  %v1359_v48 = vrot.slane %v996_v34, 1 }
  0x3f   :  { %v1362_v35 = vsel %vm304_vm0, %v2715_v43, %v1361_v30 }
  0x40   :  { %2082 = vmatpush3.bf16.msra.mxu0 %v2262_v47  ;;  %v1005_v47 = vrot.slane %v1000_v39, 7 }
  0x41   :  { %2111 = vmatprep.subr.bf16.mxu0 %v2264_v52  ;;  %2104 = vmatpush3.bf16.msra.mxu1 %v2263_v50  ;;  %v1002_v50 = vunpack.c.l.b16 %v994_v40  ;;  %v1007_v52 = vrot.slane %v2715_v43, 7 }
  0x42   :  { %2133 = vmatprep.subr.bf16.mxu1 %v2265_v54  ;;  %v1006_v54 = vsel %vm304_vm0, %v1005_v47, %v996_v34  ;;  %v2327_v34 = vld [vmem:[%s2840_s2 + $0x3b8] sm:$0xff]  }
  0x43   :  { %833 = vmatmul.mubr.bf16.vlgmr.msra.gmra.mrb[4].mxu0 %v600_v55  ;;  %v1009_v55 = vrot.slane %v1002_v50, 7 }
  0x44   :  { %2112 = vmatpush3.bf16.msra.mxu0 %v2266_v45  ;;  %873 = vmatmul.mubr.bf16.vlgmr.msra.gmra.mrb[4].mxu1 %v602_v56  ;;  %v1008_v45 = vsel %vm304_vm0, %v1007_v52, %v2705_v36  ;;  %v1012_v56 = vpack.c.b16 %v1006_v54, %v1006_v54  ;;  %v1365_v36 = vpack.c.b16 %v1358_v31, %v1358_v31 }
  0x45   :  { %2113 = vmatprep.subr.bf16.mxu0 %v2268_v57  ;;  %2134 = vmatpush3.bf16.msra.mxu1 %v2267_v49  ;;  %v1360_v49 = vsel %vm304_vm0, %v1000_v39, %v1359_v48  ;;  %v2298_v57 = vld [vmem:[%s2840_s2 + $0x300] sm:$0xff]  }
  0x46   :  { %2135 = vmatprep.subr.bf16.mxu1 %v2269_v58  ;;  %v1363_v58 = vrot.slane %v998_v44, 1  ;;  %1243 = vmatprep.mubr.bf16.mxu0 %v1012_v56 }
  0x48   :  { %2114 = vmatpush3.bf16.msra.mxu0 %v2270_v59  ;;  %v1010_v59 = vsel %vm304_vm0, %v1009_v55, %v998_v44 }
  0x49   :  { %2115 = vmatprep.subr.bf16.mxu0 %v2272_v61  ;;  %2136 = vmatpush3.bf16.msra.mxu1 %v2271_v60  ;;  %v1013_v60 = vpack.c.b16 %v1008_v45, %v1008_v45  ;;  %v2300_v61 = vld [vmem:[%s2840_s2 + $0x348] sm:$0xff]  }
  0x4a   :  { %2137 = vmatprep.subr.bf16.mxu1 %v2273_v62  ;;  %v1014_v62 = vpack.c.b16 %v1010_v59, %v1010_v59 }
  0x4c   :  { %2116 = vmatpush3.bf16.msra.mxu0 %v2274_v63  ;;  %v2299_v63 = vld [vmem:[%s2840_s2 + $0x380] sm:$0xff]   ;;  %1283 = vmatprep.mubr.bf16.mxu1 %v1014_v62 }
  0x4d   :  { %2117 = vmatprep.subr.bf16.mxu0 %v2276_v1  ;;  %2138 = vmatpush3.bf16.msra.mxu1 %v2275_v0  ;;  %v1366_v0 = vpack.c.b16 %v1360_v49, %v1360_v49  ;;  %v1364_v1 = vsel %vm304_vm0, %v1002_v50, %v1363_v58 }
  0x4e   :  { %2139 = vmatprep.subr.bf16.mxu1 %v2277_v2  ;;  %v2301_v2 = vld [vmem:[%s2840_s2 + $0x3c8] sm:$0xff]  }
  0x50   :  { %2118 = vmatpush3.bf16.msra.mxu0 %v2278_v3  ;;  %v1368_v3 = vpack.c.b16 %v1364_v1, %v1364_v1 }
  0x51   :  { %2119 = vmatprep.subr.bf16.mxu0 %v2280_v5  ;;  %2140 = vmatpush3.bf16.msra.mxu1 %v2279_v4  ;;  %v2302_v4 = vld [vmem:[%s2840_s2 + $0x308] sm:$0xff]   ;;  %v2304_v5 = vld [vmem:[%s2840_s2 + $0x350] sm:$0xff]  }
  0x52   :  { %2141 = vmatprep.subr.bf16.mxu1 %v2281_v6  ;;  %v2303_v6 = vld [vmem:[%s2840_s2 + $0x388] sm:$0xff]  }
  0x54   :  { %2120 = vmatpush3.bf16.msra.mxu0 %v2282_v7  ;;  %v2305_v7 = vld [vmem:[%s2840_s2 + $0x3d0] sm:$0xff]  }
  0x55   :  { %2121 = vmatprep.subr.bf16.mxu0 %v2284_v9  ;;  %2142 = vmatpush3.bf16.msra.mxu1 %v2283_v8  ;;  %v2306_v8 = vld [vmem:[%s2840_s2 + $0x310] sm:$0xff]   ;;  %v2308_v9 = vld [vmem:[%s2840_s2 + $0x358] sm:$0xff]  }
  0x56   :  { %2143 = vmatprep.subr.bf16.mxu1 %v2285_v12  ;;  %v2310_v12 = vld [vmem:[%s2840_s2 + $0x318] sm:$0xff]  }
  0x58   :  { %2122 = vmatpush3.bf16.msra.mxu0 %v2286_v13  ;;  %v2312_v13 = vld [vmem:[%s2840_s2 + $0x360] sm:$0xff]  }
  0x59   :  { %2123 = vmatprep.subr.bf16.mxu0 %v2288_v15  ;;  %2144 = vmatpush3.bf16.msra.mxu1 %v2287_v14  ;;  %v2311_v14 = vld [vmem:[%s2840_s2 + $0x398] sm:$0xff]   ;;  %v2313_v15 = vld [vmem:[%s2840_s2 + $0x3e0] sm:$0xff]  }
  0x5a   :  { %2145 = vmatprep.subr.bf16.mxu1 %v2289_v16  ;;  %v2314_v16 = vld [vmem:[%s2840_s2 + $0x320] sm:$0xff]  }
  0x5c   :  { %2124 = vmatpush3.bf16.msra.mxu0 %v2290_v17  ;;  %v2316_v17 = vld [vmem:[%s2840_s2 + $0x368] sm:$0xff]  }
  0x5d   :  { %2125 = vmatprep.subr.bf16.mxu0 %v2292_v19  ;;  %2146 = vmatpush3.bf16.msra.mxu1 %v2291_v18  ;;  %v2315_v18 = vld [vmem:[%s2840_s2 + $0x3a0] sm:$0xff]   ;;  %v2317_v19 = vld [vmem:[%s2840_s2 + $0x3e8] sm:$0xff]  }
  0x5e   :  { %2147 = vmatprep.subr.bf16.mxu1 %v2293_v26  ;;  %v2322_v26 = vld [vmem:[%s2840_s2 + $0x330] sm:$0xff]  }
  0x60   :  { %2126 = vmatpush3.bf16.msra.mxu0 %v2294_v29  ;;  %v2323_v29 = vld [vmem:[%s2840_s2 + $0x3b0] sm:$0xff]  }
  0x61   :  { %2155 = vmatprep.subr.bf16.mxu0 %v2296_v37  ;;  %2148 = vmatpush3.bf16.msra.mxu1 %v2295_v38  ;;  %v1367_v37 = vpack.c.b16 %v1362_v35, %v1362_v35 }
  0x62   :  { %2177 = vmatprep.subr.bf16.mxu1 %v2297_v46 }
  0x63   :  { %1244 = vmatmul.mubr.bf16.vlgmr.msra.gmra.mrb[8].mxu0 %v1011_v53 }
  0x64   :  { %2156 = vmatpush3.bf16.msra.mxu0 %v2298_v57  ;;  %1284 = vmatmul.mubr.bf16.vlgmr.msra.gmra.mrb[8].mxu1 %v1013_v60 }
  0x65   :  { %2157 = vmatprep.subr.bf16.mxu0 %v2300_v61  ;;  %2178 = vmatpush3.bf16.msra.mxu1 %v2299_v63 }
  0x66   :  { %1597 = vmatprep.mubr.bf16.mxu0 %v1366_v0  ;;  %2179 = vmatprep.subr.bf16.mxu1 %v2301_v2 }
  0x67   :  { %1637 = vmatprep.mubr.bf16.mxu1 %v1368_v3 }
  0x68   :  { %2158 = vmatpush3.bf16.msra.mxu0 %v2302_v4 }
  0x69   :  { %2159 = vmatprep.subr.bf16.mxu0 %v2304_v5  ;;  %2180 = vmatpush3.bf16.msra.mxu1 %v2303_v6 }
  0x6a   :  { %2181 = vmatprep.subr.bf16.mxu1 %v2305_v7 }
  0x6c   :  { %2160 = vmatpush3.bf16.msra.mxu0 %v2306_v8 }
  0x6d   :  { %2161 = vmatprep.subr.bf16.mxu0 %v2308_v9  ;;  %2182 = vmatpush3.bf16.msra.mxu1 %v2307_v10 }
  0x6e   :  { %2183 = vmatprep.subr.bf16.mxu1 %v2309_v11 }
  0x70   :  { %2162 = vmatpush3.bf16.msra.mxu0 %v2310_v12 }
  0x71   :  { %2163 = vmatprep.subr.bf16.mxu0 %v2312_v13  ;;  %2184 = vmatpush3.bf16.msra.mxu1 %v2311_v14 }
  0x72   :  { %2185 = vmatprep.subr.bf16.mxu1 %v2313_v15 }
  0x74   :  { %2164 = vmatpush3.bf16.msra.mxu0 %v2314_v16 }
  0x75   :  { %2165 = vmatprep.subr.bf16.mxu0 %v2316_v17  ;;  %2186 = vmatpush3.bf16.msra.mxu1 %v2315_v18 }
  0x76   :  { %2187 = vmatprep.subr.bf16.mxu1 %v2317_v19  ;;  %v2020_v19 = vld [vmem:[%s2841_s3] ss:$0 sm:$0xff] }
  0x78   :  { %2166 = vmatpush3.bf16.msra.mxu0 %v2318_v20 }
  0x79   :  { %2167 = vmatprep.subr.bf16.mxu0 %v2320_v21  ;;  %2188 = vmatpush3.bf16.msra.mxu1 %v2319_v22 }
  0x7a   :  { %2189 = vmatprep.subr.bf16.mxu1 %v2321_v24 }
  0x7c   :  { %2168 = vmatpush3.bf16.msra.mxu0 %v2322_v26 }
  0x7d   :  { %2169 = vmatprep.subr.bf16.mxu0 %v2324_v28  ;;  %2190 = vmatpush3.bf16.msra.mxu1 %v2323_v29 }
  0x7e   :  { %2191 = vmatprep.subr.bf16.mxu1 %v2325_v33 }
  0x80   :  { %2170 = vmatpush3.bf16.msra.mxu0 %v2326_v23 }
  0x81   :  { %2192 = vmatpush3.bf16.msra.mxu1 %v2327_v34 }
  0x83   :  { %1598 = vmatmul.mubr.bf16.vlgmr.msra.gmra.mrb[12].mxu0 %v1365_v36 }
  0x84   :  { %1638 = vmatmul.mubr.bf16.vlgmr.msra.gmra.mrb[12].mxu1 %v1367_v37 }
  0xf6   :  { %v2039_v38 = vpop.f32.mrb[0].mxu0 }
  0xf7   :  { %v2040_v25 = vpop.f32.mrb[1].mxu0  ;;  %v2061_v39 = vpop.f32.mrb[0].mxu1 }
  0xf8   :  { %v2041_v32 = vadd.f32 %v2040_v25, %v2039_v38  ;;  %v2042_v40 = vpop.f32.mrb[2].mxu0  ;;  %v2062_v42 = vpop.f32.mrb[1].mxu1 }
  0xf9   :  { %v2043_v44 = vpop.f32.mrb[3].mxu0  ;;  %v2063_v46 = vadd.f32 %v2062_v42, %v2061_v39  ;;  %v2064_v48 = vpop.f32.mrb[2].mxu1 }
  0xfa   :  { %v2065_v47 = vpop.f32.mrb[3].mxu1 }
  0xfb   :  { %v587_v50 = vadd.f32 %v2063_v46, %v2041_v32 }
 0x116   :  { %v2083_v51 = vpop.f32.mrb[4].mxu0 }
 0x117   :  { %v2084_v43 = vpop.f32.mrb[5].mxu0  ;;  %v2105_v52 = vpop.f32.mrb[4].mxu1 }
 0x118   :  { %v2085_v53 = vadd.f32 %v2084_v43, %v2083_v51  ;;  %v2086_v54 = vpop.f32.mrb[6].mxu0  ;;  %v2106_v55 = vpop.f32.mrb[5].mxu1 }
 0x119   :  { %v2087_v45 = vpop.f32.mrb[7].mxu0  ;;  %v2107_v56 = vadd.f32 %v2106_v55, %v2105_v52  ;;  %v2108_v57 = vpop.f32.mrb[6].mxu1 }
 0x11a   :  { %v835_v49 = vadd.f32 %v2085_v53, %v587_v50  ;;  %v2109_v58 = vpop.f32.mrb[7].mxu1 }
 0x11c   :  { %v875_v59 = vadd.f32 %v2107_v56, %v835_v49 }
 0x136   :  { %v2127_v60 = vpop.f32.mrb[8].mxu0 }
 0x137   :  { %v2128_v61 = vpop.f32.mrb[9].mxu0  ;;  %v2149_v62 = vpop.f32.mrb[8].mxu1 }
 0x138   :  { %v2129_v63 = vadd.f32 %v2128_v61, %v2127_v60  ;;  %v2130_v0 = vpop.f32.mrb[10].mxu0  ;;  %v2150_v1 = vpop.f32.mrb[9].mxu1 }
 0x139   :  { %v2131_v2 = vpop.f32.mrb[11].mxu0  ;;  %v2151_v3 = vadd.f32 %v2150_v1, %v2149_v62  ;;  %v2152_v4 = vpop.f32.mrb[10].mxu1 }
 0x13a   :  { %v2153_v5 = vpop.f32.mrb[11].mxu1 }
 0x13b   :  { %v1286_v6 = vadd.f32 %v2151_v3, %v2129_v63 }
 0x13d   :  { %v1291_v7 = vadd.f32 %v1286_v6, %v875_v59 }
 0x156   :  { %v2171_v8 = vpop.f32.mrb[12].mxu0 }
 0x157   :  { %v2172_v9 = vpop.f32.mrb[13].mxu0  ;;  %v2193_v10 = vpop.f32.mrb[12].mxu1 }
 0x158   :  { %v2173_v11 = vadd.f32 %v2172_v9, %v2171_v8  ;;  %v2174_v12 = vpop.f32.mrb[14].mxu0  ;;  %v2194_v13 = vpop.f32.mrb[13].mxu1 }
 0x159   :  { %v2175_v14 = vpop.f32.mrb[15].mxu0  ;;  %v2195_v15 = vadd.f32 %v2194_v13, %v2193_v10  ;;  %v2196_v16 = vpop.f32.mrb[14].mxu1 }
 0x15a   :  { %v2197_v17 = vpop.f32.mrb[15].mxu1 }
 0x15b   :  { %v1640_v18 = vadd.f32 %v2195_v15, %v2173_v11 }
 0x15d   :  { %v1645_v20 = vadd.f32 %v1640_v18, %v1291_v7 }
 0x15f   :  { %v1653_v21 = vadd.f32 %v2020_v19, %v1645_v20 }
 0x161   :  { %v1661_v22 = vrot.slane %v1653_v21, %v2462_v41 }
 0x163   :  { %v1662_v24 = vcombine.high %v1661_v22, %v1661_v22  ;;  %2021 = vst.sshfl [vmem:[%s2842_s4] sm:$0x1 pattern:$0x73625140] %v1661_v22 }
 0x165   :  { %2022 = vst.sshfl [vmem:[%s2842_s4 + $0x1] sm:$0x1 pattern:$0x73625140] %v1662_v24 }

</bundles_post_ra>
